<compile_context>
chip_gen: v5e
topology: v5e:2x2
jax: 0.10.0
libtpu: 0.0.40
codegen_flags: <defaults>
</compile_context>

<pallas_src>
import functools

import jax
import jax.numpy as jnp
from jax import lax
from jax.experimental import pallas as pl
from jax.experimental.pallas import tpu as pltpu


# ----------------------------------------------------------------------------
# Pallas kernel: one LSTM layer over one time chunk (grid streams the chunks).
# Gate order (columns of the pre-transposed weights / bias): [i, f, o, g].
# ----------------------------------------------------------------------------
def _lstm_layer_kernel(x_ref, w_ih_ref, w_hh_ref, b_ref,      # inputs
                       y_ref, h_ref, c_ref,                   # outputs
                       gx_ref, ystage_ref,                    # VMEM scratch
                       *, hid_dim, t_real, lookahead, write_y):
    H = hid_dim
    Tc, B, D = x_ref.shape
    L = lookahead

    # h/c output blocks are resident across the whole grid (constant index
    # map); initialize them on the first chunk only.
    @pl.when(pl.program_id(0) == 0)
    def _init():
        h_ref[...] = jnp.zeros(h_ref.shape, h_ref.dtype)
        c_ref[...] = jnp.zeros(c_ref.shape, c_ref.dtype)

    # Hoisted bias broadcast (avoid re-emitting broadcast_in_dim per step).
    bias = jnp.broadcast_to(b_ref[...], (B, 4 * H)).astype(jnp.float32)

    # Prologue: batched x-projection for the first L timesteps of the chunk.
    xL = x_ref[0:L].reshape(L * B, D)                          # bf16
    gx0 = jnp.dot(xL, w_ih_ref[...],
                  preferred_element_type=jnp.float32) + b_ref[...]
    gx_ref[0:L] = gx0.reshape(L, B, 4 * H)

    base = pl.program_id(0) * Tc                               # global t offset

    def step(t, carry):
        h, c = carry                                           # f32 (B, H)

        # Read this step's x-projection first (anti-dep only vs the lookahead
        # store below), then issue the recurrence matmul (on the serial
        # chain), then push the independent lookahead projection so it drains
        # on the MXU while the EUP works on the gates.
        gx_t = gx_ref[t]
        rec = jnp.dot(h.astype(jnp.bfloat16), w_hh_ref[...],
                      preferred_element_type=jnp.float32)

        @pl.when(t + L < Tc)
        def _lookahead_proj():
            x_t = x_ref[t + L]                                 # (B, D) bf16
            gx_ref[t + L] = jnp.dot(
                x_t, w_ih_ref[...],
                preferred_element_type=jnp.float32) + bias

        gates = gx_t + rec
        sig = jax.nn.sigmoid(gates[:, : 3 * H])                # one EUP slab
        g = jnp.tanh(gates[:, 3 * H:])                         # one EUP slab
        i = sig[:, 0 * H:1 * H]
        f = sig[:, 1 * H:2 * H]
        o = sig[:, 2 * H:3 * H]
        c_new = f * c + i * g                                  # f32
        h_new = o * jnp.tanh(c_new)                            # f32

        if t_real is not None:                                 # padded tail
            valid = (base + t) < t_real
            h_new = jnp.where(valid, h_new, h)
            c_new = jnp.where(valid, c_new, c)

        if write_y:
            ystage_ref[t] = h_new                              # full-vreg f32
        return h_new, c_new

    h0 = h_ref[...]
    c0 = c_ref[...]
    h_fin, c_fin = lax.fori_loop(0, Tc, step, (h0, c0),
                                 unroll=min(int(Tc), 8))
    h_ref[...] = h_fin
    c_ref[...] = c_fin
    if write_y:
        # One lane-dense cast+store per chunk instead of per-step bf16 stores.
        y_ref[...] = ystage_ref[...].astype(y_ref.dtype)


# ----------------------------------------------------------------------------
# VMEM budgeting (generation-aware) and chunk selection.
# ----------------------------------------------------------------------------
def _vmem_capacity_bytes():
    try:
        cap = int(pltpu.get_tpu_info().vmem_capacity_bytes)
        if cap <= 0:
            raise ValueError
    except Exception:
        cap = 64 << 20          # conservative fallback (v7x physical VMEM)
    return cap


def _vmem_need_bytes(Tc, B, D, H):
    bf16, f32 = 2, 4
    return (2 * Tc * B * D * bf16            # x chunk, double-buffered
            + 2 * Tc * B * H * bf16          # y chunk, double-buffered
            + 2 * (D + H) * 4 * H * bf16     # weights (x2 safety)
            + 2 * 4 * H * f32                # bias
            + 2 * 2 * B * H * f32            # h, c carried blocks
            + Tc * B * 4 * H * f32           # gx scratch
            + Tc * B * H * f32)              # y staging scratch


def _select_chunk(T, B, D, H, budget, max_chunk=None):
    bf16, f32 = 2, 4
    fixed = (2 * (D + H) * 4 * H * bf16 + 2 * 4 * H * f32
             + 2 * 2 * B * H * f32)
    per_t = (2 * B * D * bf16 + 2 * B * H * bf16
             + B * 4 * H * f32 + B * H * f32)
    tc_cap = max(1, (budget - fixed) // per_t)
    tc_cap = min(tc_cap, 512)                       # diminishing returns past this
    if max_chunk is not None:
        tc_cap = min(tc_cap, max_chunk)
    tc_cap = max(int(tc_cap), 1)
    if T <= tc_cap:
        return T                                    # single chunk, no padding
    n_chunks = -(-T // tc_cap)
    return -(-T // n_chunks)                        # balanced -> padding < 1 chunk


# ----------------------------------------------------------------------------
# One LSTM layer via pallas_call.
# ----------------------------------------------------------------------------
def lstm_layer_pallas(x_seq, w_ih_t, w_hh_t, b_row, *, hid_dim,
                      max_chunk=None, need_y=True):
    """One LSTM layer.

    x_seq:  (T, B, D) bf16 activations
    w_ih_t: (D, 4H) bf16, gate order [i,f,o,g]
    w_hh_t: (H, 4H) bf16, gate order [i,f,o,g]
    b_row:  (1, 4H) f32 (b_ih + b_hh, reordered)
    returns y (T,B,H) bf16 (or None if need_y=False), h (B,H) f32, c (B,H) f32
    """
    T, B, D = x_seq.shape
    H = hid_dim

    cap = _vmem_capacity_bytes()
    budget = (cap * 3) // 4                     # ~48 MiB on v7x, ~96 MiB v5e/v6e
    Tc = _select_chunk(T, B, D, H, budget, max_chunk)
    n_chunks = -(-T // Tc)
    T_pad = n_chunks * Tc

    if T_pad != T:
        x_in = jnp.concatenate(
            [x_seq, jnp.zeros((T_pad - T, B, D), x_seq.dtype)], axis=0)
        t_real = T
    else:
        x_in = x_seq
        t_real = None

    need = _vmem_need_bytes(Tc, B, D, H)
    vmem_limit = max(need + (8 << 20), 32 << 20)    # headroom, never below need
    vmem_limit = min(vmem_limit, cap)
    vmem_limit = max(vmem_limit, need)

    lookahead = max(1, min(4, Tc))
    kernel = functools.partial(_lstm_layer_kernel, hid_dim=H, t_real=t_real,
                               lookahead=lookahead, write_y=need_y)

    if need_y:
        y_shape = (T_pad, B, H)
        y_spec = pl.BlockSpec((Tc, B, H), lambda t: (t, 0, 0))
    else:
        # Last layer: y is never consumed; keep a single resident dummy block.
        y_shape = (Tc, B, H)
        y_spec = pl.BlockSpec((Tc, B, H), lambda t: (0, 0, 0))

    grid_spec = pltpu.PrefetchScalarGridSpec(
        num_scalar_prefetch=0,
        grid=(n_chunks,),
        in_specs=[
            pl.BlockSpec((Tc, B, D), lambda t: (t, 0, 0)),     # x chunk
            pl.BlockSpec((D, 4 * H), lambda t: (0, 0)),        # W_ih^T (resident)
            pl.BlockSpec((H, 4 * H), lambda t: (0, 0)),        # W_hh^T (resident)
            pl.BlockSpec((1, 4 * H), lambda t: (0, 0)),        # bias
        ],
        out_specs=(
            y_spec,                                            # y chunk
            pl.BlockSpec((B, H), lambda t: (0, 0)),            # h (carried)
            pl.BlockSpec((B, H), lambda t: (0, 0)),            # c (carried)
        ),
        scratch_shapes=[
            pltpu.VMEM((Tc, B, 4 * H), jnp.float32),           # gx
            pltpu.VMEM((Tc, B, H), jnp.float32),               # y staging
        ],
    )
    y, h, c = pl.pallas_call(
        kernel,
        grid_spec=grid_spec,
        out_shape=(
            jax.ShapeDtypeStruct(y_shape, jnp.bfloat16),
            jax.ShapeDtypeStruct((B, H), jnp.float32),
            jax.ShapeDtypeStruct((B, H), jnp.float32),
        ),
        compiler_params=pltpu.CompilerParams(
            dimension_semantics=("arbitrary",),
            vmem_limit_bytes=int(vmem_limit)),
    )(x_in, w_ih_t, w_hh_t, b_row)

    if not need_y:
        return None, h, c
    if T_pad != T:
        y = y[:T]
    return y, h, c


# ----------------------------------------------------------------------------
# One-time parameter preparation (hoisted out of the jitted forward):
# PyTorch layout [i,f,g,o]/(4H, D_in) -> transposed (D_in, 4H) bf16 with gate
# columns reordered to [i,f,o,g]; biases pre-summed; embedding cast to bf16.
# ----------------------------------------------------------------------------
def prepare_encoder_params(params):
    layers = []
    for layer in params["lstm"]:
        H = layer["w_hh"].shape[1]

        def reorder(w, H=H):   # rows [i,f,g,o] -> [i,f,o,g]
            return jnp.concatenate(
                [w[:2 * H], w[3 * H:4 * H], w[2 * H:3 * H]], axis=0)

        w_ih_t = reorder(layer["w_ih"]).T.astype(jnp.bfloat16)      # (D, 4H)
        w_hh_t = reorder(layer["w_hh"]).T.astype(jnp.bfloat16)      # (H, 4H)
        b_row = reorder(layer["b_ih"] + layer["b_hh"]).reshape(1, -1)
        layers.append((w_ih_t, w_hh_t, b_row.astype(jnp.float32)))
    return {"embedding": params["embedding"].astype(jnp.bfloat16),
            "layers": tuple(layers)}


# ----------------------------------------------------------------------------
# Encoder forward: embedding lookup (plain JAX gather glue) + stacked Pallas
# LSTM layers.  Returns (hidden, cell), each (n_layers, B, H), f32.
# Dropout (after embedding / between layers) is identity in eval mode.
# ----------------------------------------------------------------------------
def encoder_forward(prepared, src, *, max_chunk=None):
    x = prepared["embedding"][src]                      # (T, B, E) bf16 gather
    n_layers = len(prepared["layers"])
    hs, cs = [], []
    for li, (w_ih_t, w_hh_t, b_row) in enumerate(prepared["layers"]):
        H = w_hh_t.shape[0]
        need_y = li < n_layers - 1
        y, h, c = lstm_layer_pallas(x, w_ih_t, w_hh_t, b_row, hid_dim=H,
                                    max_chunk=max_chunk, need_y=need_y)
        if need_y:
            x = y
        hs.append(h)
        cs.append(c)
    return jnp.stack(hs, axis=0), jnp.stack(cs, axis=0)


# ----------------------------------------------------------------------------
# Pure-JAX references.
#   mxu_dtype=jnp.bfloat16 mirrors the kernel's bf16 matmul operands (tight
#   check); mxu_dtype=jnp.float32 is the full-precision PyTorch-equivalent
#   forward (loose sanity check).
# ----------------------------------------------------------------------------
def encoder_forward_ref(params, src, mxu_dtype=jnp.float32):
    x = params["embedding"][src]
    hs, cs = [], []
    for layer in params["lstm"]:
        T, B, _ = x.shape
        H = layer["w_hh"].shape[1]
        w_ih_t = layer["w_ih"].T.astype(mxu_dtype)
        w_hh_t = layer["w_hh"].T.astype(mxu_dtype)
        b = (layer["b_ih"] + layer["b_hh"]).astype(jnp.float32)
        h = jnp.zeros((B, H), jnp.float32)
        c = jnp.zeros((B, H), jnp.float32)
        ys = []
        for t in range(T):
            gx = jnp.dot(x[t].astype(mxu_dtype), w_ih_t,
                         preferred_element_type=jnp.float32) + b
            gates = gx + jnp.dot(h.astype(mxu_dtype), w_hh_t,
                                 preferred_element_type=jnp.float32)
            i = jax.nn.sigmoid(gates[:, 0 * H:1 * H])
            f = jax.nn.sigmoid(gates[:, 1 * H:2 * H])
            g = jnp.tanh(gates[:, 2 * H:3 * H])
            o = jax.nn.sigmoid(gates[:, 3 * H:4 * H])
            c = f * c + i * g
            h = o * jnp.tanh(c)
            ys.append(h)
        x = jnp.stack(ys, axis=0)
        hs.append(h)
        cs.append(c)
    return jnp.stack(hs, axis=0), jnp.stack(cs, axis=0)


def init_params(key, input_dim, emb_dim, hid_dim, n_layers):
    keys = jax.random.split(key, 1 + 4 * n_layers)
    params = {"embedding": jax.random.normal(keys[0], (input_dim, emb_dim),
                                             jnp.float32) * 0.1,
              "lstm": []}
    k = 1
    bound = 1.0 / (hid_dim ** 0.5)
    for layer in range(n_layers):
        d_in = emb_dim if layer == 0 else hid_dim
        params["lstm"].append({
            "w_ih": jax.random.uniform(keys[k + 0], (4 * hid_dim, d_in),
                                       jnp.float32, -bound, bound),
            "w_hh": jax.random.uniform(keys[k + 1], (4 * hid_dim, hid_dim),
                                       jnp.float32, -bound, bound),
            "b_ih": jax.random.uniform(keys[k + 2], (4 * hid_dim,),
                                       jnp.float32, -bound, bound),
            "b_hh": jax.random.uniform(keys[k + 3], (4 * hid_dim,),
                                       jnp.float32, -bound, bound),
        })
        k += 4
    return params


if __name__ == "__main__":
    # Small but lane-aligned configuration (H = 128 -> lane-dense gates/out).
    input_dim, emb_dim, hid_dim, n_layers = 50, 128, 128, 2
    T, B = 20, 8

    key = jax.random.PRNGKey(0)
    pkey, skey = jax.random.split(key)
    params = init_params(pkey, input_dim, emb_dim, hid_dim, n_layers)
    src = jax.random.randint(skey, (T, B), 0, input_dim, dtype=jnp.int32)

    prepared = prepare_encoder_params(params)

    # Path 1: forced small chunk (Tc=7 -> 3 chunks, 1 padded timestep) to
    # exercise carried h/c state, tail masking, and the lookahead pipeline.
    fwd_chunked = jax.jit(functools.partial(encoder_forward, max_chunk=7))
    hidden, cell = jax.block_until_ready(fwd_chunked(prepared, src))

    # Path 2: default VMEM-budgeted chunk (single chunk at this tiny T).
    fwd_default = jax.jit(encoder_forward)
    hidden2, cell2 = jax.block_until_ready(fwd_default(prepared, src))

    assert hidden.shape == (n_layers, B, hid_dim)
    assert cell.shape == (n_layers, B, hid_dim)
    assert hidden2.shape == (n_layers, B, hid_dim)
    assert cell2.shape == (n_layers, B, hid_dim)

    # Tight check vs a reference that uses the same bf16 matmul operands.
    h_bf, c_bf = encoder_forward_ref(params, src, mxu_dtype=jnp.bfloat16)
    for name, (h_out, c_out) in (("chunked", (hidden, cell)),
                                 ("default", (hidden2, cell2))):
        assert jnp.allclose(h_out, h_bf, atol=2e-3), f"hidden mismatch ({name})"
        assert jnp.allclose(c_out, c_bf, atol=2e-3), f"cell mismatch ({name})"

    # Loose sanity check vs the full-f32 (PyTorch-equivalent) forward.
    h_f32, c_f32 = encoder_forward_ref(params, src, mxu_dtype=jnp.float32)
    assert jnp.allclose(hidden, h_f32, atol=5e-2), "hidden mismatch (f32 ref)"
    assert jnp.allclose(cell, c_f32, atol=5e-2), "cell mismatch (f32 ref)"

    print("KERNEL_OK")
</pallas_src>

<mosaic_0001>
module attributes {stable_mosaic.version = 11 : i64} {
  func.func @_lstm_layer_kernel(%arg0: i32, %arg1: memref<7x8x128xbf16, #tpu.memory_space<vmem>>, %arg2: memref<128x512xbf16, #tpu.memory_space<vmem>>, %arg3: memref<128x512xbf16, #tpu.memory_space<vmem>>, %arg4: memref<1x512xf32, #tpu.memory_space<vmem>>, %arg5: memref<7x8x128xbf16, #tpu.memory_space<vmem>>, %arg6: memref<8x128xf32, #tpu.memory_space<vmem>>, %arg7: memref<8x128xf32, #tpu.memory_space<vmem>>, %arg8: memref<7x8x512xf32, #tpu.memory_space<vmem>>, %arg9: memref<7x8x128xf32, #tpu.memory_space<vmem>>) attributes {dimension_semantics = [#tpu.dimension_semantics<arbitrary>], iteration_bounds = array<i64: 3>, scalar_prefetch = 0 : i64, scratch_operands = 2 : i64, tpu.core_type = #tpu.core_type<tc>, window_params = [{transform_indices = @transform_0, window_bounds = array<i64: 7, 8, 128>}, {pipeline_mode = #tpu.pipeline_mode<synchronous>, transform_indices = @transform_1, window_bounds = array<i64: 128, 512>}, {pipeline_mode = #tpu.pipeline_mode<synchronous>, transform_indices = @transform_2, window_bounds = array<i64: 128, 512>}, {pipeline_mode = #tpu.pipeline_mode<synchronous>, transform_indices = @transform_3, window_bounds = array<i64: 1, 512>}, {pipeline_mode = #tpu.pipeline_mode<synchronous>, transform_indices = @transform_4, window_bounds = array<i64: 7, 8, 128>}, {pipeline_mode = #tpu.pipeline_mode<synchronous>, transform_indices = @transform_5, window_bounds = array<i64: 8, 128>}, {pipeline_mode = #tpu.pipeline_mode<synchronous>, transform_indices = @transform_6, window_bounds = array<i64: 8, 128>}]} {
    %c0_i32 = arith.constant 0 : i32
    %0 = arith.cmpi eq, %arg0, %c0_i32 : i32
    %1 = arith.extui %0 : i1 to i32
    %c0_i32_0 = arith.constant 0 : i32
    %2 = arith.cmpi ne, %1, %c0_i32_0 : i32
    scf.if %2 {
      %cst_91 = arith.constant 0.000000e+00 : f32
      %237 = vector.broadcast %cst_91 : f32 to vector<8x128xf32>
      %c0_92 = arith.constant 0 : index
      %c0_93 = arith.constant 0 : index
      %238 = vector.load %arg6[%c0_92, %c0_93] : memref<8x128xf32, #tpu.memory_space<vmem>>, vector<8x128xf32>
      tpu.vector_store %arg6[%c0_92, %c0_93], %237 {strides = array<i32>} : memref<8x128xf32, #tpu.memory_space<vmem>>, vector<8x128xf32>,
      %cst_94 = arith.constant 0.000000e+00 : f32
      %239 = vector.broadcast %cst_94 : f32 to vector<8x128xf32>
      %c0_95 = arith.constant 0 : index
      %c0_96 = arith.constant 0 : index
      %240 = vector.load %arg7[%c0_95, %c0_96] : memref<8x128xf32, #tpu.memory_space<vmem>>, vector<8x128xf32>
      tpu.vector_store %arg7[%c0_95, %c0_96], %239 {strides = array<i32>} : memref<8x128xf32, #tpu.memory_space<vmem>>, vector<8x128xf32>,
    } else {
    }
    %c0 = arith.constant 0 : index
    %c0_1 = arith.constant 0 : index
    %3 = vector.load %arg4[%c0, %c0_1] : memref<1x512xf32, #tpu.memory_space<vmem>>, vector<1x512xf32>
    %4 = vector.shape_cast %3 : vector<1x512xf32> to vector<1x512xf32>
    %5 = vector.broadcast %4 : vector<1x512xf32> to vector<8x512xf32>
    %c0_2 = arith.constant 0 : index
    %c0_3 = arith.constant 0 : index
    %c0_4 = arith.constant 0 : index
    %6 = vector.load %arg1[%c0_2, %c0_3, %c0_4] : memref<7x8x128xbf16, #tpu.memory_space<vmem>>, vector<4x8x128xbf16>
    %7 = vector.shape_cast %6 : vector<4x8x128xbf16> to vector<32x128xbf16>
    %c0_5 = arith.constant 0 : index
    %c0_6 = arith.constant 0 : index
    %8 = vector.load %arg2[%c0_5, %c0_6] : memref<128x512xbf16, #tpu.memory_space<vmem>>, vector<128x512xbf16>
    %cst = arith.constant dense<0.000000e+00> : vector<32x512xf32>
    %9 = tpu.matmul %7, %8, %cst {dimension_numbers = #tpu.dot_dimension_numbers<[1], [0], [0], [1], [0, 0, 1, 1], [], []>} : vector<32x128xbf16>, vector<128x512xbf16>, vector<32x512xf32> -> vector<32x512xf32>
    %c0_7 = arith.constant 0 : index
    %c0_8 = arith.constant 0 : index
    %10 = vector.load %arg4[%c0_7, %c0_8] : memref<1x512xf32, #tpu.memory_space<vmem>>, vector<1x512xf32>
    %11 = vector.broadcast %10 : vector<1x512xf32> to vector<32x512xf32>
    %12 = arith.addf %9, %11 : vector<32x512xf32>
    %13 = vector.shape_cast %12 : vector<32x512xf32> to vector<4x8x512xf32>
    %c0_9 = arith.constant 0 : index
    %c0_10 = arith.constant 0 : index
    %c0_11 = arith.constant 0 : index
    %14 = vector.load %arg8[%c0_9, %c0_10, %c0_11] : memref<7x8x512xf32, #tpu.memory_space<vmem>>, vector<4x8x512xf32>
    tpu.vector_store %arg8[%c0_9, %c0_10, %c0_11], %13 {strides = array<i32>} : memref<7x8x512xf32, #tpu.memory_space<vmem>>, vector<4x8x512xf32>,
    %c7_i32 = arith.constant 7 : i32
    %15 = arith.muli %arg0, %c7_i32 : i32
    %c0_12 = arith.constant 0 : index
    %c0_13 = arith.constant 0 : index
    %16 = vector.load %arg6[%c0_12, %c0_13] : memref<8x128xf32, #tpu.memory_space<vmem>>, vector<8x128xf32>
    %c0_14 = arith.constant 0 : index
    %c0_15 = arith.constant 0 : index
    %17 = vector.load %arg7[%c0_14, %c0_15] : memref<8x128xf32, #tpu.memory_space<vmem>>, vector<8x128xf32>
    %c0_i32_16 = arith.constant 0 : i32
    %18 = arith.index_cast %c0_i32_16 : i32 to index
    %c0_17 = arith.constant 0 : index
    %c0_18 = arith.constant 0 : index
    %19 = vector.load %arg8[%18, %c0_17, %c0_18] : memref<7x8x512xf32, #tpu.memory_space<vmem>>, vector<1x8x512xf32>
    %20 = vector.shape_cast %19 : vector<1x8x512xf32> to vector<8x512xf32>
    %21 = arith.truncf %16 : vector<8x128xf32> to vector<8x128xbf16>
    %c0_19 = arith.constant 0 : index
    %c0_20 = arith.constant 0 : index
    %22 = vector.load %arg3[%c0_19, %c0_20] : memref<128x512xbf16, #tpu.memory_space<vmem>>, vector<128x512xbf16>
    %cst_21 = arith.constant dense<0.000000e+00> : vector<8x512xf32>
    %23 = tpu.matmul %21, %22, %cst_21 {dimension_numbers = #tpu.dot_dimension_numbers<[1], [0], [0], [1], [0, 0, 1, 1], [], []>} : vector<8x128xbf16>, vector<128x512xbf16>, vector<8x512xf32> -> vector<8x512xf32>
    %c4_i32 = arith.constant 4 : i32
    %24 = arith.addi %c0_i32_16, %c4_i32 : i32
    %c7_i32_22 = arith.constant 7 : i32
    %25 = arith.cmpi slt, %24, %c7_i32_22 : i32
    %26 = arith.extui %25 : i1 to i32
    %c0_i32_23 = arith.constant 0 : i32
    %27 = arith.cmpi ne, %26, %c0_i32_23 : i32
    scf.if %27 {
      %c4_i32_91 = arith.constant 4 : i32
      %237 = arith.addi %c0_i32_16, %c4_i32_91 : i32
      %238 = arith.index_cast %237 : i32 to index
      %c0_92 = arith.constant 0 : index
      %c0_93 = arith.constant 0 : index
      %239 = vector.load %arg1[%238, %c0_92, %c0_93] : memref<7x8x128xbf16, #tpu.memory_space<vmem>>, vector<1x8x128xbf16>
      %240 = vector.shape_cast %239 : vector<1x8x128xbf16> to vector<8x128xbf16>
      %c0_94 = arith.constant 0 : index
      %c0_95 = arith.constant 0 : index
      %241 = vector.load %arg2[%c0_94, %c0_95] : memref<128x512xbf16, #tpu.memory_space<vmem>>, vector<128x512xbf16>
      %cst_96 = arith.constant dense<0.000000e+00> : vector<8x512xf32>
      %242 = tpu.matmul %240, %241, %cst_96 {dimension_numbers = #tpu.dot_dimension_numbers<[1], [0], [0], [1], [0, 0, 1, 1], [], []>} : vector<8x128xbf16>, vector<128x512xbf16>, vector<8x512xf32> -> vector<8x512xf32>
      %243 = arith.addf %242, %5 : vector<8x512xf32>
      %c4_i32_97 = arith.constant 4 : i32
      %244 = arith.addi %c0_i32_16, %c4_i32_97 : i32
      %245 = arith.index_cast %244 : i32 to index
      %c0_98 = arith.constant 0 : index
      %c0_99 = arith.constant 0 : index
      %246 = vector.load %arg8[%245, %c0_98, %c0_99] : memref<7x8x512xf32, #tpu.memory_space<vmem>>, vector<1x8x512xf32>
      %247 = vector.shape_cast %246 : vector<1x8x512xf32> to vector<8x512xf32>
      %248 = vector.shape_cast %243 : vector<8x512xf32> to vector<1x8x512xf32>
      tpu.vector_store %arg8[%245, %c0_98, %c0_99], %248 {strides = array<i32>} : memref<7x8x512xf32, #tpu.memory_space<vmem>>, vector<1x8x512xf32>,
    } else {
    }
    %28 = arith.addf %20, %23 : vector<8x512xf32>
    %29 = vector.extract_strided_slice %28 {offsets = [0, 0], sizes = [8, 384], strides = [1, 1]} : vector<8x512xf32> to vector<8x384xf32>
    %30 = arith.negf %29 : vector<8x384xf32>
    %31 = math.exp %30 : vector<8x384xf32>
    %cst_24 = arith.constant 1.000000e+00 : f32
    %32 = vector.broadcast %cst_24 : f32 to vector<8x384xf32>
    %33 = arith.addf %32, %31 : vector<8x384xf32>
    %34 = arith.divf %32, %33 : vector<8x384xf32>
    %35 = vector.extract_strided_slice %28 {offsets = [0, 384], sizes = [8, 128], strides = [1, 1]} : vector<8x512xf32> to vector<8x128xf32>
    %36 = math.tanh %35 : vector<8x128xf32>
    %37 = vector.extract_strided_slice %34 {offsets = [0, 0], sizes = [8, 128], strides = [1, 1]} : vector<8x384xf32> to vector<8x128xf32>
    %38 = vector.extract_strided_slice %34 {offsets = [0, 128], sizes = [8, 128], strides = [1, 1]} : vector<8x384xf32> to vector<8x128xf32>
    %39 = vector.extract_strided_slice %34 {offsets = [0, 256], sizes = [8, 128], strides = [1, 1]} : vector<8x384xf32> to vector<8x128xf32>
    %40 = arith.mulf %38, %17 : vector<8x128xf32>
    %41 = arith.mulf %37, %36 : vector<8x128xf32>
    %42 = arith.addf %40, %41 : vector<8x128xf32>
    %43 = math.tanh %42 : vector<8x128xf32>
    %44 = arith.mulf %39, %43 : vector<8x128xf32>
    %45 = arith.addi %15, %c0_i32_16 : i32
    %c20_i32 = arith.constant 20 : i32
    %46 = arith.cmpi slt, %45, %c20_i32 : i32
    %47 = arith.select %46, %44, %16 : vector<8x128xf32>
    %48 = arith.select %46, %42, %17 : vector<8x128xf32>
    %c1_i32 = arith.constant 1 : i32
    %49 = arith.index_cast %c1_i32 : i32 to index
    %c0_25 = arith.constant 0 : index
    %c0_26 = arith.constant 0 : index
    %50 = vector.load %arg8[%49, %c0_25, %c0_26] : memref<7x8x512xf32, #tpu.memory_space<vmem>>, vector<1x8x512xf32>
    %51 = vector.shape_cast %50 : vector<1x8x512xf32> to vector<8x512xf32>
    %52 = arith.truncf %47 : vector<8x128xf32> to vector<8x128xbf16>
    %c0_27 = arith.constant 0 : index
    %c0_28 = arith.constant 0 : index
    %53 = vector.load %arg3[%c0_27, %c0_28] : memref<128x512xbf16, #tpu.memory_space<vmem>>, vector<128x512xbf16>
    %cst_29 = arith.constant dense<0.000000e+00> : vector<8x512xf32>
    %54 = tpu.matmul %52, %53, %cst_29 {dimension_numbers = #tpu.dot_dimension_numbers<[1], [0], [0], [1], [0, 0, 1, 1], [], []>} : vector<8x128xbf16>, vector<128x512xbf16>, vector<8x512xf32> -> vector<8x512xf32>
    %c4_i32_30 = arith.constant 4 : i32
    %55 = arith.addi %c1_i32, %c4_i32_30 : i32
    %c7_i32_31 = arith.constant 7 : i32
    %56 = arith.cmpi slt, %55, %c7_i32_31 : i32
    %57 = arith.extui %56 : i1 to i32
    %c0_i32_32 = arith.constant 0 : i32
    %58 = arith.cmpi ne, %57, %c0_i32_32 : i32
    scf.if %58 {
      %c4_i32_91 = arith.constant 4 : i32
      %237 = arith.addi %c1_i32, %c4_i32_91 : i32
      %238 = arith.index_cast %237 : i32 to index
      %c0_92 = arith.constant 0 : index
      %c0_93 = arith.constant 0 : index
      %239 = vector.load %arg1[%238, %c0_92, %c0_93] : memref<7x8x128xbf16, #tpu.memory_space<vmem>>, vector<1x8x128xbf16>
      %240 = vector.shape_cast %239 : vector<1x8x128xbf16> to vector<8x128xbf16>
      %c0_94 = arith.constant 0 : index
      %c0_95 = arith.constant 0 : index
      %241 = vector.load %arg2[%c0_94, %c0_95] : memref<128x512xbf16, #tpu.memory_space<vmem>>, vector<128x512xbf16>
      %cst_96 = arith.constant dense<0.000000e+00> : vector<8x512xf32>
      %242 = tpu.matmul %240, %241, %cst_96 {dimension_numbers = #tpu.dot_dimension_numbers<[1], [0], [0], [1], [0, 0, 1, 1], [], []>} : vector<8x128xbf16>, vector<128x512xbf16>, vector<8x512xf32> -> vector<8x512xf32>
      %243 = arith.addf %242, %5 : vector<8x512xf32>
      %c4_i32_97 = arith.constant 4 : i32
      %244 = arith.addi %c1_i32, %c4_i32_97 : i32
      %245 = arith.index_cast %244 : i32 to index
      %c0_98 = arith.constant 0 : index
      %c0_99 = arith.constant 0 : index
      %246 = vector.load %arg8[%245, %c0_98, %c0_99] : memref<7x8x512xf32, #tpu.memory_space<vmem>>, vector<1x8x512xf32>
      %247 = vector.shape_cast %246 : vector<1x8x512xf32> to vector<8x512xf32>
      %248 = vector.shape_cast %243 : vector<8x512xf32> to vector<1x8x512xf32>
      tpu.vector_store %arg8[%245, %c0_98, %c0_99], %248 {strides = array<i32>} : memref<7x8x512xf32, #tpu.memory_space<vmem>>, vector<1x8x512xf32>,
    } else {
    }
    %59 = arith.addf %51, %54 : vector<8x512xf32>
    %60 = vector.extract_strided_slice %59 {offsets = [0, 0], sizes = [8, 384], strides = [1, 1]} : vector<8x512xf32> to vector<8x384xf32>
    %61 = arith.negf %60 : vector<8x384xf32>
    %62 = math.exp %61 : vector<8x384xf32>
    %cst_33 = arith.constant 1.000000e+00 : f32
    %63 = vector.broadcast %cst_33 : f32 to vector<8x384xf32>
    %64 = arith.addf %63, %62 : vector<8x384xf32>
    %65 = arith.divf %63, %64 : vector<8x384xf32>
    %66 = vector.extract_strided_slice %59 {offsets = [0, 384], sizes = [8, 128], strides = [1, 1]} : vector<8x512xf32> to vector<8x128xf32>
    %67 = math.tanh %66 : vector<8x128xf32>
    %68 = vector.extract_strided_slice %65 {offsets = [0, 0], sizes = [8, 128], strides = [1, 1]} : vector<8x384xf32> to vector<8x128xf32>
    %69 = vector.extract_strided_slice %65 {offsets = [0, 128], sizes = [8, 128], strides = [1, 1]} : vector<8x384xf32> to vector<8x128xf32>
    %70 = vector.extract_strided_slice %65 {offsets = [0, 256], sizes = [8, 128], strides = [1, 1]} : vector<8x384xf32> to vector<8x128xf32>
    %71 = arith.mulf %69, %48 : vector<8x128xf32>
    %72 = arith.mulf %68, %67 : vector<8x128xf32>
    %73 = arith.addf %71, %72 : vector<8x128xf32>
    %74 = math.tanh %73 : vector<8x128xf32>
    %75 = arith.mulf %70, %74 : vector<8x128xf32>
    %76 = arith.addi %15, %c1_i32 : i32
    %c20_i32_34 = arith.constant 20 : i32
    %77 = arith.cmpi slt, %76, %c20_i32_34 : i32
    %78 = arith.select %77, %75, %47 : vector<8x128xf32>
    %79 = arith.select %77, %73, %48 : vector<8x128xf32>
    %c2_i32 = arith.constant 2 : i32
    %80 = arith.index_cast %c2_i32 : i32 to index
    %c0_35 = arith.constant 0 : index
    %c0_36 = arith.constant 0 : index
    %81 = vector.load %arg8[%80, %c0_35, %c0_36] : memref<7x8x512xf32, #tpu.memory_space<vmem>>, vector<1x8x512xf32>
    %82 = vector.shape_cast %81 : vector<1x8x512xf32> to vector<8x512xf32>
    %83 = arith.truncf %78 : vector<8x128xf32> to vector<8x128xbf16>
    %c0_37 = arith.constant 0 : index
    %c0_38 = arith.constant 0 : index
    %84 = vector.load %arg3[%c0_37, %c0_38] : memref<128x512xbf16, #tpu.memory_space<vmem>>, vector<128x512xbf16>
    %cst_39 = arith.constant dense<0.000000e+00> : vector<8x512xf32>
    %85 = tpu.matmul %83, %84, %cst_39 {dimension_numbers = #tpu.dot_dimension_numbers<[1], [0], [0], [1], [0, 0, 1, 1], [], []>} : vector<8x128xbf16>, vector<128x512xbf16>, vector<8x512xf32> -> vector<8x512xf32>
    %c4_i32_40 = arith.constant 4 : i32
    %86 = arith.addi %c2_i32, %c4_i32_40 : i32
    %c7_i32_41 = arith.constant 7 : i32
    %87 = arith.cmpi slt, %86, %c7_i32_41 : i32
    %88 = arith.extui %87 : i1 to i32
    %c0_i32_42 = arith.constant 0 : i32
    %89 = arith.cmpi ne, %88, %c0_i32_42 : i32
    scf.if %89 {
      %c4_i32_91 = arith.constant 4 : i32
      %237 = arith.addi %c2_i32, %c4_i32_91 : i32
      %238 = arith.index_cast %237 : i32 to index
      %c0_92 = arith.constant 0 : index
      %c0_93 = arith.constant 0 : index
      %239 = vector.load %arg1[%238, %c0_92, %c0_93] : memref<7x8x128xbf16, #tpu.memory_space<vmem>>, vector<1x8x128xbf16>
      %240 = vector.shape_cast %239 : vector<1x8x128xbf16> to vector<8x128xbf16>
      %c0_94 = arith.constant 0 : index
      %c0_95 = arith.constant 0 : index
      %241 = vector.load %arg2[%c0_94, %c0_95] : memref<128x512xbf16, #tpu.memory_space<vmem>>, vector<128x512xbf16>
      %cst_96 = arith.constant dense<0.000000e+00> : vector<8x512xf32>
      %242 = tpu.matmul %240, %241, %cst_96 {dimension_numbers = #tpu.dot_dimension_numbers<[1], [0], [0], [1], [0, 0, 1, 1], [], []>} : vector<8x128xbf16>, vector<128x512xbf16>, vector<8x512xf32> -> vector<8x512xf32>
      %243 = arith.addf %242, %5 : vector<8x512xf32>
      %c4_i32_97 = arith.constant 4 : i32
      %244 = arith.addi %c2_i32, %c4_i32_97 : i32
      %245 = arith.index_cast %244 : i32 to index
      %c0_98 = arith.constant 0 : index
      %c0_99 = arith.constant 0 : index
      %246 = vector.load %arg8[%245, %c0_98, %c0_99] : memref<7x8x512xf32, #tpu.memory_space<vmem>>, vector<1x8x512xf32>
      %247 = vector.shape_cast %246 : vector<1x8x512xf32> to vector<8x512xf32>
      %248 = vector.shape_cast %243 : vector<8x512xf32> to vector<1x8x512xf32>
      tpu.vector_store %arg8[%245, %c0_98, %c0_99], %248 {strides = array<i32>} : memref<7x8x512xf32, #tpu.memory_space<vmem>>, vector<1x8x512xf32>,
    } else {
    }
    %90 = arith.addf %82, %85 : vector<8x512xf32>
    %91 = vector.extract_strided_slice %90 {offsets = [0, 0], sizes = [8, 384], strides = [1, 1]} : vector<8x512xf32> to vector<8x384xf32>
    %92 = arith.negf %91 : vector<8x384xf32>
    %93 = math.exp %92 : vector<8x384xf32>
    %cst_43 = arith.constant 1.000000e+00 : f32
    %94 = vector.broadcast %cst_43 : f32 to vector<8x384xf32>
    %95 = arith.addf %94, %93 : vector<8x384xf32>
    %96 = arith.divf %94, %95 : vector<8x384xf32>
    %97 = vector.extract_strided_slice %90 {offsets = [0, 384], sizes = [8, 128], strides = [1, 1]} : vector<8x512xf32> to vector<8x128xf32>
    %98 = math.tanh %97 : vector<8x128xf32>
    %99 = vector.extract_strided_slice %96 {offsets = [0, 0], sizes = [8, 128], strides = [1, 1]} : vector<8x384xf32> to vector<8x128xf32>
    %100 = vector.extract_strided_slice %96 {offsets = [0, 128], sizes = [8, 128], strides = [1, 1]} : vector<8x384xf32> to vector<8x128xf32>
    %101 = vector.extract_strided_slice %96 {offsets = [0, 256], sizes = [8, 128], strides = [1, 1]} : vector<8x384xf32> to vector<8x128xf32>
    %102 = arith.mulf %100, %79 : vector<8x128xf32>
    %103 = arith.mulf %99, %98 : vector<8x128xf32>
    %104 = arith.addf %102, %103 : vector<8x128xf32>
    %105 = math.tanh %104 : vector<8x128xf32>
    %106 = arith.mulf %101, %105 : vector<8x128xf32>
    %107 = arith.addi %15, %c2_i32 : i32
    %c20_i32_44 = arith.constant 20 : i32
    %108 = arith.cmpi slt, %107, %c20_i32_44 : i32
    %109 = arith.select %108, %106, %78 : vector<8x128xf32>
    %110 = arith.select %108, %104, %79 : vector<8x128xf32>
    %c3_i32 = arith.constant 3 : i32
    %111 = arith.index_cast %c3_i32 : i32 to index
    %c0_45 = arith.constant 0 : index
    %c0_46 = arith.constant 0 : index
    %112 = vector.load %arg8[%111, %c0_45, %c0_46] : memref<7x8x512xf32, #tpu.memory_space<vmem>>, vector<1x8x512xf32>
    %113 = vector.shape_cast %112 : vector<1x8x512xf32> to vector<8x512xf32>
    %114 = arith.truncf %109 : vector<8x128xf32> to vector<8x128xbf16>
    %c0_47 = arith.constant 0 : index
    %c0_48 = arith.constant 0 : index
    %115 = vector.load %arg3[%c0_47, %c0_48] : memref<128x512xbf16, #tpu.memory_space<vmem>>, vector<128x512xbf16>
    %cst_49 = arith.constant dense<0.000000e+00> : vector<8x512xf32>
    %116 = tpu.matmul %114, %115, %cst_49 {dimension_numbers = #tpu.dot_dimension_numbers<[1], [0], [0], [1], [0, 0, 1, 1], [], []>} : vector<8x128xbf16>, vector<128x512xbf16>, vector<8x512xf32> -> vector<8x512xf32>
    %c4_i32_50 = arith.constant 4 : i32
    %117 = arith.addi %c3_i32, %c4_i32_50 : i32
    %c7_i32_51 = arith.constant 7 : i32
    %118 = arith.cmpi slt, %117, %c7_i32_51 : i32
    %119 = arith.extui %118 : i1 to i32
    %c0_i32_52 = arith.constant 0 : i32
    %120 = arith.cmpi ne, %119, %c0_i32_52 : i32
    scf.if %120 {
      %c4_i32_91 = arith.constant 4 : i32
      %237 = arith.addi %c3_i32, %c4_i32_91 : i32
      %238 = arith.index_cast %237 : i32 to index
      %c0_92 = arith.constant 0 : index
      %c0_93 = arith.constant 0 : index
      %239 = vector.load %arg1[%238, %c0_92, %c0_93] : memref<7x8x128xbf16, #tpu.memory_space<vmem>>, vector<1x8x128xbf16>
      %240 = vector.shape_cast %239 : vector<1x8x128xbf16> to vector<8x128xbf16>
      %c0_94 = arith.constant 0 : index
      %c0_95 = arith.constant 0 : index
      %241 = vector.load %arg2[%c0_94, %c0_95] : memref<128x512xbf16, #tpu.memory_space<vmem>>, vector<128x512xbf16>
      %cst_96 = arith.constant dense<0.000000e+00> : vector<8x512xf32>
      %242 = tpu.matmul %240, %241, %cst_96 {dimension_numbers = #tpu.dot_dimension_numbers<[1], [0], [0], [1], [0, 0, 1, 1], [], []>} : vector<8x128xbf16>, vector<128x512xbf16>, vector<8x512xf32> -> vector<8x512xf32>
      %243 = arith.addf %242, %5 : vector<8x512xf32>
      %c4_i32_97 = arith.constant 4 : i32
      %244 = arith.addi %c3_i32, %c4_i32_97 : i32
      %245 = arith.index_cast %244 : i32 to index
      %c0_98 = arith.constant 0 : index
      %c0_99 = arith.constant 0 : index
      %246 = vector.load %arg8[%245, %c0_98, %c0_99] : memref<7x8x512xf32, #tpu.memory_space<vmem>>, vector<1x8x512xf32>
      %247 = vector.shape_cast %246 : vector<1x8x512xf32> to vector<8x512xf32>
      %248 = vector.shape_cast %243 : vector<8x512xf32> to vector<1x8x512xf32>
      tpu.vector_store %arg8[%245, %c0_98, %c0_99], %248 {strides = array<i32>} : memref<7x8x512xf32, #tpu.memory_space<vmem>>, vector<1x8x512xf32>,
    } else {
    }
    %121 = arith.addf %113, %116 : vector<8x512xf32>
    %122 = vector.extract_strided_slice %121 {offsets = [0, 0], sizes = [8, 384], strides = [1, 1]} : vector<8x512xf32> to vector<8x384xf32>
    %123 = arith.negf %122 : vector<8x384xf32>
    %124 = math.exp %123 : vector<8x384xf32>
    %cst_53 = arith.constant 1.000000e+00 : f32
    %125 = vector.broadcast %cst_53 : f32 to vector<8x384xf32>
    %126 = arith.addf %125, %124 : vector<8x384xf32>
    %127 = arith.divf %125, %126 : vector<8x384xf32>
    %128 = vector.extract_strided_slice %121 {offsets = [0, 384], sizes = [8, 128], strides = [1, 1]} : vector<8x512xf32> to vector<8x128xf32>
    %129 = math.tanh %128 : vector<8x128xf32>
    %130 = vector.extract_strided_slice %127 {offsets = [0, 0], sizes = [8, 128], strides = [1, 1]} : vector<8x384xf32> to vector<8x128xf32>
    %131 = vector.extract_strided_slice %127 {offsets = [0, 128], sizes = [8, 128], strides = [1, 1]} : vector<8x384xf32> to vector<8x128xf32>
    %132 = vector.extract_strided_slice %127 {offsets = [0, 256], sizes = [8, 128], strides = [1, 1]} : vector<8x384xf32> to vector<8x128xf32>
    %133 = arith.mulf %131, %110 : vector<8x128xf32>
    %134 = arith.mulf %130, %129 : vector<8x128xf32>
    %135 = arith.addf %133, %134 : vector<8x128xf32>
    %136 = math.tanh %135 : vector<8x128xf32>
    %137 = arith.mulf %132, %136 : vector<8x128xf32>
    %138 = arith.addi %15, %c3_i32 : i32
    %c20_i32_54 = arith.constant 20 : i32
    %139 = arith.cmpi slt, %138, %c20_i32_54 : i32
    %140 = arith.select %139, %137, %109 : vector<8x128xf32>
    %141 = arith.select %139, %135, %110 : vector<8x128xf32>
    %c4_i32_55 = arith.constant 4 : i32
    %142 = arith.index_cast %c4_i32_55 : i32 to index
    %c0_56 = arith.constant 0 : index
    %c0_57 = arith.constant 0 : index
    %143 = vector.load %arg8[%142, %c0_56, %c0_57] : memref<7x8x512xf32, #tpu.memory_space<vmem>>, vector<1x8x512xf32>
    %144 = vector.shape_cast %143 : vector<1x8x512xf32> to vector<8x512xf32>
    %145 = arith.truncf %140 : vector<8x128xf32> to vector<8x128xbf16>
    %c0_58 = arith.constant 0 : index
    %c0_59 = arith.constant 0 : index
    %146 = vector.load %arg3[%c0_58, %c0_59] : memref<128x512xbf16, #tpu.memory_space<vmem>>, vector<128x512xbf16>
    %cst_60 = arith.constant dense<0.000000e+00> : vector<8x512xf32>
    %147 = tpu.matmul %145, %146, %cst_60 {dimension_numbers = #tpu.dot_dimension_numbers<[1], [0], [0], [1], [0, 0, 1, 1], [], []>} : vector<8x128xbf16>, vector<128x512xbf16>, vector<8x512xf32> -> vector<8x512xf32>
    %c4_i32_61 = arith.constant 4 : i32
    %148 = arith.addi %c4_i32_55, %c4_i32_61 : i32
    %c7_i32_62 = arith.constant 7 : i32
    %149 = arith.cmpi slt, %148, %c7_i32_62 : i32
    %150 = arith.extui %149 : i1 to i32
    %c0_i32_63 = arith.constant 0 : i32
    %151 = arith.cmpi ne, %150, %c0_i32_63 : i32
    scf.if %151 {
      %c4_i32_91 = arith.constant 4 : i32
      %237 = arith.addi %c4_i32_55, %c4_i32_91 : i32
      %238 = arith.index_cast %237 : i32 to index
      %c0_92 = arith.constant 0 : index
      %c0_93 = arith.constant 0 : index
      %239 = vector.load %arg1[%238, %c0_92, %c0_93] : memref<7x8x128xbf16, #tpu.memory_space<vmem>>, vector<1x8x128xbf16>
      %240 = vector.shape_cast %239 : vector<1x8x128xbf16> to vector<8x128xbf16>
      %c0_94 = arith.constant 0 : index
      %c0_95 = arith.constant 0 : index
      %241 = vector.load %arg2[%c0_94, %c0_95] : memref<128x512xbf16, #tpu.memory_space<vmem>>, vector<128x512xbf16>
      %cst_96 = arith.constant dense<0.000000e+00> : vector<8x512xf32>
      %242 = tpu.matmul %240, %241, %cst_96 {dimension_numbers = #tpu.dot_dimension_numbers<[1], [0], [0], [1], [0, 0, 1, 1], [], []>} : vector<8x128xbf16>, vector<128x512xbf16>, vector<8x512xf32> -> vector<8x512xf32>
      %243 = arith.addf %242, %5 : vector<8x512xf32>
      %c4_i32_97 = arith.constant 4 : i32
      %244 = arith.addi %c4_i32_55, %c4_i32_97 : i32
      %245 = arith.index_cast %244 : i32 to index
      %c0_98 = arith.constant 0 : index
      %c0_99 = arith.constant 0 : index
      %246 = vector.load %arg8[%245, %c0_98, %c0_99] : memref<7x8x512xf32, #tpu.memory_space<vmem>>, vector<1x8x512xf32>
      %247 = vector.shape_cast %246 : vector<1x8x512xf32> to vector<8x512xf32>
      %248 = vector.shape_cast %243 : vector<8x512xf32> to vector<1x8x512xf32>
      tpu.vector_store %arg8[%245, %c0_98, %c0_99], %248 {strides = array<i32>} : memref<7x8x512xf32, #tpu.memory_space<vmem>>, vector<1x8x512xf32>,
    } else {
    }
    %152 = arith.addf %144, %147 : vector<8x512xf32>
    %153 = vector.extract_strided_slice %152 {offsets = [0, 0], sizes = [8, 384], strides = [1, 1]} : vector<8x512xf32> to vector<8x384xf32>
    %154 = arith.negf %153 : vector<8x384xf32>
    %155 = math.exp %154 : vector<8x384xf32>
    %cst_64 = arith.constant 1.000000e+00 : f32
    %156 = vector.broadcast %cst_64 : f32 to vector<8x384xf32>
    %157 = arith.addf %156, %155 : vector<8x384xf32>
    %158 = arith.divf %156, %157 : vector<8x384xf32>
    %159 = vector.extract_strided_slice %152 {offsets = [0, 384], sizes = [8, 128], strides = [1, 1]} : vector<8x512xf32> to vector<8x128xf32>
    %160 = math.tanh %159 : vector<8x128xf32>
    %161 = vector.extract_strided_slice %158 {offsets = [0, 0], sizes = [8, 128], strides = [1, 1]} : vector<8x384xf32> to vector<8x128xf32>
    %162 = vector.extract_strided_slice %158 {offsets = [0, 128], sizes = [8, 128], strides = [1, 1]} : vector<8x384xf32> to vector<8x128xf32>
    %163 = vector.extract_strided_slice %158 {offsets = [0, 256], sizes = [8, 128], strides = [1, 1]} : vector<8x384xf32> to vector<8x128xf32>
    %164 = arith.mulf %162, %141 : vector<8x128xf32>
    %165 = arith.mulf %161, %160 : vector<8x128xf32>
    %166 = arith.addf %164, %165 : vector<8x128xf32>
    %167 = math.tanh %166 : vector<8x128xf32>
    %168 = arith.mulf %163, %167 : vector<8x128xf32>
    %169 = arith.addi %15, %c4_i32_55 : i32
    %c20_i32_65 = arith.constant 20 : i32
    %170 = arith.cmpi slt, %169, %c20_i32_65 : i32
    %171 = arith.select %170, %168, %140 : vector<8x128xf32>
    %172 = arith.select %170, %166, %141 : vector<8x128xf32>
    %c5_i32 = arith.constant 5 : i32
    %173 = arith.index_cast %c5_i32 : i32 to index
    %c0_66 = arith.constant 0 : index
    %c0_67 = arith.constant 0 : index
    %174 = vector.load %arg8[%173, %c0_66, %c0_67] : memref<7x8x512xf32, #tpu.memory_space<vmem>>, vector<1x8x512xf32>
    %175 = vector.shape_cast %174 : vector<1x8x512xf32> to vector<8x512xf32>
    %176 = arith.truncf %171 : vector<8x128xf32> to vector<8x128xbf16>
    %c0_68 = arith.constant 0 : index
    %c0_69 = arith.constant 0 : index
    %177 = vector.load %arg3[%c0_68, %c0_69] : memref<128x512xbf16, #tpu.memory_space<vmem>>, vector<128x512xbf16>
    %cst_70 = arith.constant dense<0.000000e+00> : vector<8x512xf32>
    %178 = tpu.matmul %176, %177, %cst_70 {dimension_numbers = #tpu.dot_dimension_numbers<[1], [0], [0], [1], [0, 0, 1, 1], [], []>} : vector<8x128xbf16>, vector<128x512xbf16>, vector<8x512xf32> -> vector<8x512xf32>
    %c4_i32_71 = arith.constant 4 : i32
    %179 = arith.addi %c5_i32, %c4_i32_71 : i32
    %c7_i32_72 = arith.constant 7 : i32
    %180 = arith.cmpi slt, %179, %c7_i32_72 : i32
    %181 = arith.extui %180 : i1 to i32
    %c0_i32_73 = arith.constant 0 : i32
    %182 = arith.cmpi ne, %181, %c0_i32_73 : i32
    scf.if %182 {
      %c4_i32_91 = arith.constant 4 : i32
      %237 = arith.addi %c5_i32, %c4_i32_91 : i32
      %238 = arith.index_cast %237 : i32 to index
      %c0_92 = arith.constant 0 : index
      %c0_93 = arith.constant 0 : index
      %239 = vector.load %arg1[%238, %c0_92, %c0_93] : memref<7x8x128xbf16, #tpu.memory_space<vmem>>, vector<1x8x128xbf16>
      %240 = vector.shape_cast %239 : vector<1x8x128xbf16> to vector<8x128xbf16>
      %c0_94 = arith.constant 0 : index
      %c0_95 = arith.constant 0 : index
      %241 = vector.load %arg2[%c0_94, %c0_95] : memref<128x512xbf16, #tpu.memory_space<vmem>>, vector<128x512xbf16>
      %cst_96 = arith.constant dense<0.000000e+00> : vector<8x512xf32>
      %242 = tpu.matmul %240, %241, %cst_96 {dimension_numbers = #tpu.dot_dimension_numbers<[1], [0], [0], [1], [0, 0, 1, 1], [], []>} : vector<8x128xbf16>, vector<128x512xbf16>, vector<8x512xf32> -> vector<8x512xf32>
      %243 = arith.addf %242, %5 : vector<8x512xf32>
      %c4_i32_97 = arith.constant 4 : i32
      %244 = arith.addi %c5_i32, %c4_i32_97 : i32
      %245 = arith.index_cast %244 : i32 to index
      %c0_98 = arith.constant 0 : index
      %c0_99 = arith.constant 0 : index
      %246 = vector.load %arg8[%245, %c0_98, %c0_99] : memref<7x8x512xf32, #tpu.memory_space<vmem>>, vector<1x8x512xf32>
      %247 = vector.shape_cast %246 : vector<1x8x512xf32> to vector<8x512xf32>
      %248 = vector.shape_cast %243 : vector<8x512xf32> to vector<1x8x512xf32>
      tpu.vector_store %arg8[%245, %c0_98, %c0_99], %248 {strides = array<i32>} : memref<7x8x512xf32, #tpu.memory_space<vmem>>, vector<1x8x512xf32>,
    } else {
    }
    %183 = arith.addf %175, %178 : vector<8x512xf32>
    %184 = vector.extract_strided_slice %183 {offsets = [0, 0], sizes = [8, 384], strides = [1, 1]} : vector<8x512xf32> to vector<8x384xf32>
    %185 = arith.negf %184 : vector<8x384xf32>
    %186 = math.exp %185 : vector<8x384xf32>
    %cst_74 = arith.constant 1.000000e+00 : f32
    %187 = vector.broadcast %cst_74 : f32 to vector<8x384xf32>
    %188 = arith.addf %187, %186 : vector<8x384xf32>
    %189 = arith.divf %187, %188 : vector<8x384xf32>
    %190 = vector.extract_strided_slice %183 {offsets = [0, 384], sizes = [8, 128], strides = [1, 1]} : vector<8x512xf32> to vector<8x128xf32>
    %191 = math.tanh %190 : vector<8x128xf32>
    %192 = vector.extract_strided_slice %189 {offsets = [0, 0], sizes = [8, 128], strides = [1, 1]} : vector<8x384xf32> to vector<8x128xf32>
    %193 = vector.extract_strided_slice %189 {offsets = [0, 128], sizes = [8, 128], strides = [1, 1]} : vector<8x384xf32> to vector<8x128xf32>
    %194 = vector.extract_strided_slice %189 {offsets = [0, 256], sizes = [8, 128], strides = [1, 1]} : vector<8x384xf32> to vector<8x128xf32>
    %195 = arith.mulf %193, %172 : vector<8x128xf32>
    %196 = arith.mulf %192, %191 : vector<8x128xf32>
    %197 = arith.addf %195, %196 : vector<8x128xf32>
    %198 = math.tanh %197 : vector<8x128xf32>
    %199 = arith.mulf %194, %198 : vector<8x128xf32>
    %200 = arith.addi %15, %c5_i32 : i32
    %c20_i32_75 = arith.constant 20 : i32
    %201 = arith.cmpi slt, %200, %c20_i32_75 : i32
    %202 = arith.select %201, %199, %171 : vector<8x128xf32>
    %203 = arith.select %201, %197, %172 : vector<8x128xf32>
    %c6_i32 = arith.constant 6 : i32
    %204 = arith.index_cast %c6_i32 : i32 to index
    %c0_76 = arith.constant 0 : index
    %c0_77 = arith.constant 0 : index
    %205 = vector.load %arg8[%204, %c0_76, %c0_77] : memref<7x8x512xf32, #tpu.memory_space<vmem>>, vector<1x8x512xf32>
    %206 = vector.shape_cast %205 : vector<1x8x512xf32> to vector<8x512xf32>
    %207 = arith.truncf %202 : vector<8x128xf32> to vector<8x128xbf16>
    %c0_78 = arith.constant 0 : index
    %c0_79 = arith.constant 0 : index
    %208 = vector.load %arg3[%c0_78, %c0_79] : memref<128x512xbf16, #tpu.memory_space<vmem>>, vector<128x512xbf16>
    %cst_80 = arith.constant dense<0.000000e+00> : vector<8x512xf32>
    %209 = tpu.matmul %207, %208, %cst_80 {dimension_numbers = #tpu.dot_dimension_numbers<[1], [0], [0], [1], [0, 0, 1, 1], [], []>} : vector<8x128xbf16>, vector<128x512xbf16>, vector<8x512xf32> -> vector<8x512xf32>
    %c4_i32_81 = arith.constant 4 : i32
    %210 = arith.addi %c6_i32, %c4_i32_81 : i32
    %c7_i32_82 = arith.constant 7 : i32
    %211 = arith.cmpi slt, %210, %c7_i32_82 : i32
    %212 = arith.extui %211 : i1 to i32
    %c0_i32_83 = arith.constant 0 : i32
    %213 = arith.cmpi ne, %212, %c0_i32_83 : i32
    scf.if %213 {
      %c4_i32_91 = arith.constant 4 : i32
      %237 = arith.addi %c6_i32, %c4_i32_91 : i32
      %238 = arith.index_cast %237 : i32 to index
      %c0_92 = arith.constant 0 : index
      %c0_93 = arith.constant 0 : index
      %239 = vector.load %arg1[%238, %c0_92, %c0_93] : memref<7x8x128xbf16, #tpu.memory_space<vmem>>, vector<1x8x128xbf16>
      %240 = vector.shape_cast %239 : vector<1x8x128xbf16> to vector<8x128xbf16>
      %c0_94 = arith.constant 0 : index
      %c0_95 = arith.constant 0 : index
      %241 = vector.load %arg2[%c0_94, %c0_95] : memref<128x512xbf16, #tpu.memory_space<vmem>>, vector<128x512xbf16>
      %cst_96 = arith.constant dense<0.000000e+00> : vector<8x512xf32>
      %242 = tpu.matmul %240, %241, %cst_96 {dimension_numbers = #tpu.dot_dimension_numbers<[1], [0], [0], [1], [0, 0, 1, 1], [], []>} : vector<8x128xbf16>, vector<128x512xbf16>, vector<8x512xf32> -> vector<8x512xf32>
      %243 = arith.addf %242, %5 : vector<8x512xf32>
      %c4_i32_97 = arith.constant 4 : i32
      %244 = arith.addi %c6_i32, %c4_i32_97 : i32
      %245 = arith.index_cast %244 : i32 to index
      %c0_98 = arith.constant 0 : index
      %c0_99 = arith.constant 0 : index
      %246 = vector.load %arg8[%245, %c0_98, %c0_99] : memref<7x8x512xf32, #tpu.memory_space<vmem>>, vector<1x8x512xf32>
      %247 = vector.shape_cast %246 : vector<1x8x512xf32> to vector<8x512xf32>
      %248 = vector.shape_cast %243 : vector<8x512xf32> to vector<1x8x512xf32>
      tpu.vector_store %arg8[%245, %c0_98, %c0_99], %248 {strides = array<i32>} : memref<7x8x512xf32, #tpu.memory_space<vmem>>, vector<1x8x512xf32>,
    } else {
    }
    %214 = arith.addf %206, %209 : vector<8x512xf32>
    %215 = vector.extract_strided_slice %214 {offsets = [0, 0], sizes = [8, 384], strides = [1, 1]} : vector<8x512xf32> to vector<8x384xf32>
    %216 = arith.negf %215 : vector<8x384xf32>
    %217 = math.exp %216 : vector<8x384xf32>
    %cst_84 = arith.constant 1.000000e+00 : f32
    %218 = vector.broadcast %cst_84 : f32 to vector<8x384xf32>
    %219 = arith.addf %218, %217 : vector<8x384xf32>
    %220 = arith.divf %218, %219 : vector<8x384xf32>
    %221 = vector.extract_strided_slice %214 {offsets = [0, 384], sizes = [8, 128], strides = [1, 1]} : vector<8x512xf32> to vector<8x128xf32>
    %222 = math.tanh %221 : vector<8x128xf32>
    %223 = vector.extract_strided_slice %220 {offsets = [0, 0], sizes = [8, 128], strides = [1, 1]} : vector<8x384xf32> to vector<8x128xf32>
    %224 = vector.extract_strided_slice %220 {offsets = [0, 128], sizes = [8, 128], strides = [1, 1]} : vector<8x384xf32> to vector<8x128xf32>
    %225 = vector.extract_strided_slice %220 {offsets = [0, 256], sizes = [8, 128], strides = [1, 1]} : vector<8x384xf32> to vector<8x128xf32>
    %226 = arith.mulf %224, %203 : vector<8x128xf32>
    %227 = arith.mulf %223, %222 : vector<8x128xf32>
    %228 = arith.addf %226, %227 : vector<8x128xf32>
    %229 = math.tanh %228 : vector<8x128xf32>
    %230 = arith.mulf %225, %229 : vector<8x128xf32>
    %231 = arith.addi %15, %c6_i32 : i32
    %c20_i32_85 = arith.constant 20 : i32
    %232 = arith.cmpi slt, %231, %c20_i32_85 : i32
    %233 = arith.select %232, %230, %202 : vector<8x128xf32>
    %234 = arith.select %232, %228, %203 : vector<8x128xf32>
    %c7_i32_86 = arith.constant 7 : i32
    %c0_87 = arith.constant 0 : index
    %c0_88 = arith.constant 0 : index
    %235 = vector.load %arg6[%c0_87, %c0_88] : memref<8x128xf32, #tpu.memory_space<vmem>>, vector<8x128xf32>
    tpu.vector_store %arg6[%c0_87, %c0_88], %233 {strides = array<i32>} : memref<8x128xf32, #tpu.memory_space<vmem>>, vector<8x128xf32>,
    %c0_89 = arith.constant 0 : index
    %c0_90 = arith.constant 0 : index
    %236 = vector.load %arg7[%c0_89, %c0_90] : memref<8x128xf32, #tpu.memory_space<vmem>>, vector<8x128xf32>
    tpu.vector_store %arg7[%c0_89, %c0_90], %234 {strides = array<i32>} : memref<8x128xf32, #tpu.memory_space<vmem>>, vector<8x128xf32>,
    return
  }
  func.func @transform_0(%arg0: i32) -> (i32, i32, i32) {
    %c0_i32 = arith.constant 0 : i32
    %c0_i32_0 = arith.constant 0 : i32
    %c0_i32_1 = arith.constant 0 : i32
    return %arg0, %c0_i32, %c0_i32_0 : i32, i32, i32
  }
  func.func @transform_1(%arg0: i32) -> (i32, i32) {
    %c0_i32 = arith.constant 0 : i32
    %c0_i32_0 = arith.constant 0 : i32
    %c0_i32_1 = arith.constant 0 : i32
    return %c0_i32, %c0_i32_0 : i32, i32
  }
  func.func @transform_2(%arg0: i32) -> (i32, i32) {
    %c0_i32 = arith.constant 0 : i32
    %c0_i32_0 = arith.constant 0 : i32
    %c0_i32_1 = arith.constant 0 : i32
    return %c0_i32, %c0_i32_0 : i32, i32
  }
  func.func @transform_3(%arg0: i32) -> (i32, i32) {
    %c0_i32 = arith.constant 0 : i32
    %c0_i32_0 = arith.constant 0 : i32
    %c0_i32_1 = arith.constant 0 : i32
    return %c0_i32, %c0_i32_0 : i32, i32
  }
  func.func @transform_4(%arg0: i32) -> (i32, i32, i32) {
    %c0_i32 = arith.constant 0 : i32
    %c0_i32_0 = arith.constant 0 : i32
    %c0_i32_1 = arith.constant 0 : i32
    %c0_i32_2 = arith.constant 0 : i32
    return %c0_i32, %c0_i32_0, %c0_i32_1 : i32, i32, i32
  }
  func.func @transform_5(%arg0: i32) -> (i32, i32) {
    %c0_i32 = arith.constant 0 : i32
    %c0_i32_0 = arith.constant 0 : i32
    %c0_i32_1 = arith.constant 0 : i32
    return %c0_i32, %c0_i32_0 : i32, i32
  }
  func.func @transform_6(%arg0: i32) -> (i32, i32) {
    %c0_i32 = arith.constant 0 : i32
    %c0_i32_0 = arith.constant 0 : i32
    %c0_i32_1 = arith.constant 0 : i32
    return %c0_i32, %c0_i32_0 : i32, i32
  }
}

module attributes {stable_mosaic.version = 11 : i64} {
  func.func @_lstm_layer_kernel(%arg0: i32, %arg1: memref<7x8x128xbf16, #tpu.memory_space<vmem>>, %arg2: memref<128x512xbf16, #tpu.memory_space<vmem>>, %arg3: memref<128x512xbf16, #tpu.memory_space<vmem>>, %arg4: memref<1x512xf32, #tpu.memory_space<vmem>>, %arg5: memref<7x8x128xbf16, #tpu.memory_space<vmem>>, %arg6: memref<8x128xf32, #tpu.memory_space<vmem>>, %arg7: memref<8x128xf32, #tpu.memory_space<vmem>>, %arg8: memref<7x8x512xf32, #tpu.memory_space<vmem>>, %arg9: memref<7x8x128xf32, #tpu.memory_space<vmem>>) attributes {dimension_semantics = [#tpu.dimension_semantics<arbitrary>], iteration_bounds = array<i64: 3>, scalar_prefetch = 0 : i64, scratch_operands = 2 : i64, tpu.core_type = #tpu.core_type<tc>, window_params = [{transform_indices = @transform_0, window_bounds = array<i64: 7, 8, 128>}, {pipeline_mode = #tpu.pipeline_mode<synchronous>, transform_indices = @transform_1, window_bounds = array<i64: 128, 512>}, {pipeline_mode = #tpu.pipeline_mode<synchronous>, transform_indices = @transform_2, window_bounds = array<i64: 128, 512>}, {pipeline_mode = #tpu.pipeline_mode<synchronous>, transform_indices = @transform_3, window_bounds = array<i64: 1, 512>}, {transform_indices = @transform_4, window_bounds = array<i64: 7, 8, 128>}, {pipeline_mode = #tpu.pipeline_mode<synchronous>, transform_indices = @transform_5, window_bounds = array<i64: 8, 128>}, {pipeline_mode = #tpu.pipeline_mode<synchronous>, transform_indices = @transform_6, window_bounds = array<i64: 8, 128>}]} {
    %c0_i32 = arith.constant 0 : i32
    %0 = arith.cmpi eq, %arg0, %c0_i32 : i32
    %1 = arith.extui %0 : i1 to i32
    %c0_i32_0 = arith.constant 0 : i32
    %2 = arith.cmpi ne, %1, %c0_i32_0 : i32
    scf.if %2 {
      %cst_111 = arith.constant 0.000000e+00 : f32
      %268 = vector.broadcast %cst_111 : f32 to vector<8x128xf32>
      %c0_112 = arith.constant 0 : index
      %c0_113 = arith.constant 0 : index
      %269 = vector.load %arg6[%c0_112, %c0_113] : memref<8x128xf32, #tpu.memory_space<vmem>>, vector<8x128xf32>
      tpu.vector_store %arg6[%c0_112, %c0_113], %268 {strides = array<i32>} : memref<8x128xf32, #tpu.memory_space<vmem>>, vector<8x128xf32>,
      %cst_114 = arith.constant 0.000000e+00 : f32
      %270 = vector.broadcast %cst_114 : f32 to vector<8x128xf32>
      %c0_115 = arith.constant 0 : index
      %c0_116 = arith.constant 0 : index
      %271 = vector.load %arg7[%c0_115, %c0_116] : memref<8x128xf32, #tpu.memory_space<vmem>>, vector<8x128xf32>
      tpu.vector_store %arg7[%c0_115, %c0_116], %270 {strides = array<i32>} : memref<8x128xf32, #tpu.memory_space<vmem>>, vector<8x128xf32>,
    } else {
    }
    %c0 = arith.constant 0 : index
    %c0_1 = arith.constant 0 : index
    %3 = vector.load %arg4[%c0, %c0_1] : memref<1x512xf32, #tpu.memory_space<vmem>>, vector<1x512xf32>
    %4 = vector.shape_cast %3 : vector<1x512xf32> to vector<1x512xf32>
    %5 = vector.broadcast %4 : vector<1x512xf32> to vector<8x512xf32>
    %c0_2 = arith.constant 0 : index
    %c0_3 = arith.constant 0 : index
    %c0_4 = arith.constant 0 : index
    %6 = vector.load %arg1[%c0_2, %c0_3, %c0_4] : memref<7x8x128xbf16, #tpu.memory_space<vmem>>, vector<4x8x128xbf16>
    %7 = vector.shape_cast %6 : vector<4x8x128xbf16> to vector<32x128xbf16>
    %c0_5 = arith.constant 0 : index
    %c0_6 = arith.constant 0 : index
    %8 = vector.load %arg2[%c0_5, %c0_6] : memref<128x512xbf16, #tpu.memory_space<vmem>>, vector<128x512xbf16>
    %cst = arith.constant dense<0.000000e+00> : vector<32x512xf32>
    %9 = tpu.matmul %7, %8, %cst {dimension_numbers = #tpu.dot_dimension_numbers<[1], [0], [0], [1], [0, 0, 1, 1], [], []>} : vector<32x128xbf16>, vector<128x512xbf16>, vector<32x512xf32> -> vector<32x512xf32>
    %c0_7 = arith.constant 0 : index
    %c0_8 = arith.constant 0 : index
    %10 = vector.load %arg4[%c0_7, %c0_8] : memref<1x512xf32, #tpu.memory_space<vmem>>, vector<1x512xf32>
    %11 = vector.broadcast %10 : vector<1x512xf32> to vector<32x512xf32>
    %12 = arith.addf %9, %11 : vector<32x512xf32>
    %13 = vector.shape_cast %12 : vector<32x512xf32> to vector<4x8x512xf32>
    %c0_9 = arith.constant 0 : index
    %c0_10 = arith.constant 0 : index
    %c0_11 = arith.constant 0 : index
    %14 = vector.load %arg8[%c0_9, %c0_10, %c0_11] : memref<7x8x512xf32, #tpu.memory_space<vmem>>, vector<4x8x512xf32>
    tpu.vector_store %arg8[%c0_9, %c0_10, %c0_11], %13 {strides = array<i32>} : memref<7x8x512xf32, #tpu.memory_space<vmem>>, vector<4x8x512xf32>,
    %c7_i32 = arith.constant 7 : i32
    %15 = arith.muli %arg0, %c7_i32 : i32
    %c0_12 = arith.constant 0 : index
    %c0_13 = arith.constant 0 : index
    %16 = vector.load %arg6[%c0_12, %c0_13] : memref<8x128xf32, #tpu.memory_space<vmem>>, vector<8x128xf32>
    %c0_14 = arith.constant 0 : index
    %c0_15 = arith.constant 0 : index
    %17 = vector.load %arg7[%c0_14, %c0_15] : memref<8x128xf32, #tpu.memory_space<vmem>>, vector<8x128xf32>
    %c0_i32_16 = arith.constant 0 : i32
    %18 = arith.index_cast %c0_i32_16 : i32 to index
    %c0_17 = arith.constant 0 : index
    %c0_18 = arith.constant 0 : index
    %19 = vector.load %arg8[%18, %c0_17, %c0_18] : memref<7x8x512xf32, #tpu.memory_space<vmem>>, vector<1x8x512xf32>
    %20 = vector.shape_cast %19 : vector<1x8x512xf32> to vector<8x512xf32>
    %21 = arith.truncf %16 : vector<8x128xf32> to vector<8x128xbf16>
    %c0_19 = arith.constant 0 : index
    %c0_20 = arith.constant 0 : index
    %22 = vector.load %arg3[%c0_19, %c0_20] : memref<128x512xbf16, #tpu.memory_space<vmem>>, vector<128x512xbf16>
    %cst_21 = arith.constant dense<0.000000e+00> : vector<8x512xf32>
    %23 = tpu.matmul %21, %22, %cst_21 {dimension_numbers = #tpu.dot_dimension_numbers<[1], [0], [0], [1], [0, 0, 1, 1], [], []>} : vector<8x128xbf16>, vector<128x512xbf16>, vector<8x512xf32> -> vector<8x512xf32>
    %c4_i32 = arith.constant 4 : i32
    %24 = arith.addi %c0_i32_16, %c4_i32 : i32
    %c7_i32_22 = arith.constant 7 : i32
    %25 = arith.cmpi slt, %24, %c7_i32_22 : i32
    %26 = arith.extui %25 : i1 to i32
    %c0_i32_23 = arith.constant 0 : i32
    %27 = arith.cmpi ne, %26, %c0_i32_23 : i32
    scf.if %27 {
      %c4_i32_111 = arith.constant 4 : i32
      %268 = arith.addi %c0_i32_16, %c4_i32_111 : i32
      %269 = arith.index_cast %268 : i32 to index
      %c0_112 = arith.constant 0 : index
      %c0_113 = arith.constant 0 : index
      %270 = vector.load %arg1[%269, %c0_112, %c0_113] : memref<7x8x128xbf16, #tpu.memory_space<vmem>>, vector<1x8x128xbf16>
      %271 = vector.shape_cast %270 : vector<1x8x128xbf16> to vector<8x128xbf16>
      %c0_114 = arith.constant 0 : index
      %c0_115 = arith.constant 0 : index
      %272 = vector.load %arg2[%c0_114, %c0_115] : memref<128x512xbf16, #tpu.memory_space<vmem>>, vector<128x512xbf16>
      %cst_116 = arith.constant dense<0.000000e+00> : vector<8x512xf32>
      %273 = tpu.matmul %271, %272, %cst_116 {dimension_numbers = #tpu.dot_dimension_numbers<[1], [0], [0], [1], [0, 0, 1, 1], [], []>} : vector<8x128xbf16>, vector<128x512xbf16>, vector<8x512xf32> -> vector<8x512xf32>
      %274 = arith.addf %273, %5 : vector<8x512xf32>
      %c4_i32_117 = arith.constant 4 : i32
      %275 = arith.addi %c0_i32_16, %c4_i32_117 : i32
      %276 = arith.index_cast %275 : i32 to index
      %c0_118 = arith.constant 0 : index
      %c0_119 = arith.constant 0 : index
      %277 = vector.load %arg8[%276, %c0_118, %c0_119] : memref<7x8x512xf32, #tpu.memory_space<vmem>>, vector<1x8x512xf32>
      %278 = vector.shape_cast %277 : vector<1x8x512xf32> to vector<8x512xf32>
      %279 = vector.shape_cast %274 : vector<8x512xf32> to vector<1x8x512xf32>
      tpu.vector_store %arg8[%276, %c0_118, %c0_119], %279 {strides = array<i32>} : memref<7x8x512xf32, #tpu.memory_space<vmem>>, vector<1x8x512xf32>,
    } else {
    }
    %28 = arith.addf %20, %23 : vector<8x512xf32>
    %29 = vector.extract_strided_slice %28 {offsets = [0, 0], sizes = [8, 384], strides = [1, 1]} : vector<8x512xf32> to vector<8x384xf32>
    %30 = arith.negf %29 : vector<8x384xf32>
    %31 = math.exp %30 : vector<8x384xf32>
    %cst_24 = arith.constant 1.000000e+00 : f32
    %32 = vector.broadcast %cst_24 : f32 to vector<8x384xf32>
    %33 = arith.addf %32, %31 : vector<8x384xf32>
    %34 = arith.divf %32, %33 : vector<8x384xf32>
    %35 = vector.extract_strided_slice %28 {offsets = [0, 384], sizes = [8, 128], strides = [1, 1]} : vector<8x512xf32> to vector<8x128xf32>
    %36 = math.tanh %35 : vector<8x128xf32>
    %37 = vector.extract_strided_slice %34 {offsets = [0, 0], sizes = [8, 128], strides = [1, 1]} : vector<8x384xf32> to vector<8x128xf32>
    %38 = vector.extract_strided_slice %34 {offsets = [0, 128], sizes = [8, 128], strides = [1, 1]} : vector<8x384xf32> to vector<8x128xf32>
    %39 = vector.extract_strided_slice %34 {offsets = [0, 256], sizes = [8, 128], strides = [1, 1]} : vector<8x384xf32> to vector<8x128xf32>
    %40 = arith.mulf %38, %17 : vector<8x128xf32>
    %41 = arith.mulf %37, %36 : vector<8x128xf32>
    %42 = arith.addf %40, %41 : vector<8x128xf32>
    %43 = math.tanh %42 : vector<8x128xf32>
    %44 = arith.mulf %39, %43 : vector<8x128xf32>
    %45 = arith.addi %15, %c0_i32_16 : i32
    %c20_i32 = arith.constant 20 : i32
    %46 = arith.cmpi slt, %45, %c20_i32 : i32
    %47 = arith.select %46, %44, %16 : vector<8x128xf32>
    %48 = arith.select %46, %42, %17 : vector<8x128xf32>
    %49 = arith.index_cast %c0_i32_16 : i32 to index
    %c0_25 = arith.constant 0 : index
    %c0_26 = arith.constant 0 : index
    %50 = vector.load %arg9[%49, %c0_25, %c0_26] : memref<7x8x128xf32, #tpu.memory_space<vmem>>, vector<1x8x128xf32>
    %51 = vector.shape_cast %50 : vector<1x8x128xf32> to vector<8x128xf32>
    %52 = vector.shape_cast %47 : vector<8x128xf32> to vector<1x8x128xf32>
    tpu.vector_store %arg9[%49, %c0_25, %c0_26], %52 {strides = array<i32>} : memref<7x8x128xf32, #tpu.memory_space<vmem>>, vector<1x8x128xf32>,
    %c1_i32 = arith.constant 1 : i32
    %53 = arith.index_cast %c1_i32 : i32 to index
    %c0_27 = arith.constant 0 : index
    %c0_28 = arith.constant 0 : index
    %54 = vector.load %arg8[%53, %c0_27, %c0_28] : memref<7x8x512xf32, #tpu.memory_space<vmem>>, vector<1x8x512xf32>
    %55 = vector.shape_cast %54 : vector<1x8x512xf32> to vector<8x512xf32>
    %56 = arith.truncf %47 : vector<8x128xf32> to vector<8x128xbf16>
    %c0_29 = arith.constant 0 : index
    %c0_30 = arith.constant 0 : index
    %57 = vector.load %arg3[%c0_29, %c0_30] : memref<128x512xbf16, #tpu.memory_space<vmem>>, vector<128x512xbf16>
    %cst_31 = arith.constant dense<0.000000e+00> : vector<8x512xf32>
    %58 = tpu.matmul %56, %57, %cst_31 {dimension_numbers = #tpu.dot_dimension_numbers<[1], [0], [0], [1], [0, 0, 1, 1], [], []>} : vector<8x128xbf16>, vector<128x512xbf16>, vector<8x512xf32> -> vector<8x512xf32>
    %c4_i32_32 = arith.constant 4 : i32
    %59 = arith.addi %c1_i32, %c4_i32_32 : i32
    %c7_i32_33 = arith.constant 7 : i32
    %60 = arith.cmpi slt, %59, %c7_i32_33 : i32
    %61 = arith.extui %60 : i1 to i32
    %c0_i32_34 = arith.constant 0 : i32
    %62 = arith.cmpi ne, %61, %c0_i32_34 : i32
    scf.if %62 {
      %c4_i32_111 = arith.constant 4 : i32
      %268 = arith.addi %c1_i32, %c4_i32_111 : i32
      %269 = arith.index_cast %268 : i32 to index
      %c0_112 = arith.constant 0 : index
      %c0_113 = arith.constant 0 : index
      %270 = vector.load %arg1[%269, %c0_112, %c0_113] : memref<7x8x128xbf16, #tpu.memory_space<vmem>>, vector<1x8x128xbf16>
      %271 = vector.shape_cast %270 : vector<1x8x128xbf16> to vector<8x128xbf16>
      %c0_114 = arith.constant 0 : index
      %c0_115 = arith.constant 0 : index
      %272 = vector.load %arg2[%c0_114, %c0_115] : memref<128x512xbf16, #tpu.memory_space<vmem>>, vector<128x512xbf16>
      %cst_116 = arith.constant dense<0.000000e+00> : vector<8x512xf32>
      %273 = tpu.matmul %271, %272, %cst_116 {dimension_numbers = #tpu.dot_dimension_numbers<[1], [0], [0], [1], [0, 0, 1, 1], [], []>} : vector<8x128xbf16>, vector<128x512xbf16>, vector<8x512xf32> -> vector<8x512xf32>
      %274 = arith.addf %273, %5 : vector<8x512xf32>
      %c4_i32_117 = arith.constant 4 : i32
      %275 = arith.addi %c1_i32, %c4_i32_117 : i32
      %276 = arith.index_cast %275 : i32 to index
      %c0_118 = arith.constant 0 : index
      %c0_119 = arith.constant 0 : index
      %277 = vector.load %arg8[%276, %c0_118, %c0_119] : memref<7x8x512xf32, #tpu.memory_space<vmem>>, vector<1x8x512xf32>
      %278 = vector.shape_cast %277 : vector<1x8x512xf32> to vector<8x512xf32>
      %279 = vector.shape_cast %274 : vector<8x512xf32> to vector<1x8x512xf32>
      tpu.vector_store %arg8[%276, %c0_118, %c0_119], %279 {strides = array<i32>} : memref<7x8x512xf32, #tpu.memory_space<vmem>>, vector<1x8x512xf32>,
    } else {
    }
    %63 = arith.addf %55, %58 : vector<8x512xf32>
    %64 = vector.extract_strided_slice %63 {offsets = [0, 0], sizes = [8, 384], strides = [1, 1]} : vector<8x512xf32> to vector<8x384xf32>
    %65 = arith.negf %64 : vector<8x384xf32>
    %66 = math.exp %65 : vector<8x384xf32>
    %cst_35 = arith.constant 1.000000e+00 : f32
    %67 = vector.broadcast %cst_35 : f32 to vector<8x384xf32>
    %68 = arith.addf %67, %66 : vector<8x384xf32>
    %69 = arith.divf %67, %68 : vector<8x384xf32>
    %70 = vector.extract_strided_slice %63 {offsets = [0, 384], sizes = [8, 128], strides = [1, 1]} : vector<8x512xf32> to vector<8x128xf32>
    %71 = math.tanh %70 : vector<8x128xf32>
    %72 = vector.extract_strided_slice %69 {offsets = [0, 0], sizes = [8, 128], strides = [1, 1]} : vector<8x384xf32> to vector<8x128xf32>
    %73 = vector.extract_strided_slice %69 {offsets = [0, 128], sizes = [8, 128], strides = [1, 1]} : vector<8x384xf32> to vector<8x128xf32>
    %74 = vector.extract_strided_slice %69 {offsets = [0, 256], sizes = [8, 128], strides = [1, 1]} : vector<8x384xf32> to vector<8x128xf32>
    %75 = arith.mulf %73, %48 : vector<8x128xf32>
    %76 = arith.mulf %72, %71 : vector<8x128xf32>
    %77 = arith.addf %75, %76 : vector<8x128xf32>
    %78 = math.tanh %77 : vector<8x128xf32>
    %79 = arith.mulf %74, %78 : vector<8x128xf32>
    %80 = arith.addi %15, %c1_i32 : i32
    %c20_i32_36 = arith.constant 20 : i32
    %81 = arith.cmpi slt, %80, %c20_i32_36 : i32
    %82 = arith.select %81, %79, %47 : vector<8x128xf32>
    %83 = arith.select %81, %77, %48 : vector<8x128xf32>
    %84 = arith.index_cast %c1_i32 : i32 to index
    %c0_37 = arith.constant 0 : index
    %c0_38 = arith.constant 0 : index
    %85 = vector.load %arg9[%84, %c0_37, %c0_38] : memref<7x8x128xf32, #tpu.memory_space<vmem>>, vector<1x8x128xf32>
    %86 = vector.shape_cast %85 : vector<1x8x128xf32> to vector<8x128xf32>
    %87 = vector.shape_cast %82 : vector<8x128xf32> to vector<1x8x128xf32>
    tpu.vector_store %arg9[%84, %c0_37, %c0_38], %87 {strides = array<i32>} : memref<7x8x128xf32, #tpu.memory_space<vmem>>, vector<1x8x128xf32>,
    %c2_i32 = arith.constant 2 : i32
    %88 = arith.index_cast %c2_i32 : i32 to index
    %c0_39 = arith.constant 0 : index
    %c0_40 = arith.constant 0 : index
    %89 = vector.load %arg8[%88, %c0_39, %c0_40] : memref<7x8x512xf32, #tpu.memory_space<vmem>>, vector<1x8x512xf32>
    %90 = vector.shape_cast %89 : vector<1x8x512xf32> to vector<8x512xf32>
    %91 = arith.truncf %82 : vector<8x128xf32> to vector<8x128xbf16>
    %c0_41 = arith.constant 0 : index
    %c0_42 = arith.constant 0 : index
    %92 = vector.load %arg3[%c0_41, %c0_42] : memref<128x512xbf16, #tpu.memory_space<vmem>>, vector<128x512xbf16>
    %cst_43 = arith.constant dense<0.000000e+00> : vector<8x512xf32>
    %93 = tpu.matmul %91, %92, %cst_43 {dimension_numbers = #tpu.dot_dimension_numbers<[1], [0], [0], [1], [0, 0, 1, 1], [], []>} : vector<8x128xbf16>, vector<128x512xbf16>, vector<8x512xf32> -> vector<8x512xf32>
    %c4_i32_44 = arith.constant 4 : i32
    %94 = arith.addi %c2_i32, %c4_i32_44 : i32
    %c7_i32_45 = arith.constant 7 : i32
    %95 = arith.cmpi slt, %94, %c7_i32_45 : i32
    %96 = arith.extui %95 : i1 to i32
    %c0_i32_46 = arith.constant 0 : i32
    %97 = arith.cmpi ne, %96, %c0_i32_46 : i32
    scf.if %97 {
      %c4_i32_111 = arith.constant 4 : i32
      %268 = arith.addi %c2_i32, %c4_i32_111 : i32
      %269 = arith.index_cast %268 : i32 to index
      %c0_112 = arith.constant 0 : index
      %c0_113 = arith.constant 0 : index
      %270 = vector.load %arg1[%269, %c0_112, %c0_113] : memref<7x8x128xbf16, #tpu.memory_space<vmem>>, vector<1x8x128xbf16>
      %271 = vector.shape_cast %270 : vector<1x8x128xbf16> to vector<8x128xbf16>
      %c0_114 = arith.constant 0 : index
      %c0_115 = arith.constant 0 : index
      %272 = vector.load %arg2[%c0_114, %c0_115] : memref<128x512xbf16, #tpu.memory_space<vmem>>, vector<128x512xbf16>
      %cst_116 = arith.constant dense<0.000000e+00> : vector<8x512xf32>
      %273 = tpu.matmul %271, %272, %cst_116 {dimension_numbers = #tpu.dot_dimension_numbers<[1], [0], [0], [1], [0, 0, 1, 1], [], []>} : vector<8x128xbf16>, vector<128x512xbf16>, vector<8x512xf32> -> vector<8x512xf32>
      %274 = arith.addf %273, %5 : vector<8x512xf32>
      %c4_i32_117 = arith.constant 4 : i32
      %275 = arith.addi %c2_i32, %c4_i32_117 : i32
      %276 = arith.index_cast %275 : i32 to index
      %c0_118 = arith.constant 0 : index
      %c0_119 = arith.constant 0 : index
      %277 = vector.load %arg8[%276, %c0_118, %c0_119] : memref<7x8x512xf32, #tpu.memory_space<vmem>>, vector<1x8x512xf32>
      %278 = vector.shape_cast %277 : vector<1x8x512xf32> to vector<8x512xf32>
      %279 = vector.shape_cast %274 : vector<8x512xf32> to vector<1x8x512xf32>
      tpu.vector_store %arg8[%276, %c0_118, %c0_119], %279 {strides = array<i32>} : memref<7x8x512xf32, #tpu.memory_space<vmem>>, vector<1x8x512xf32>,
    } else {
    }
    %98 = arith.addf %90, %93 : vector<8x512xf32>
    %99 = vector.extract_strided_slice %98 {offsets = [0, 0], sizes = [8, 384], strides = [1, 1]} : vector<8x512xf32> to vector<8x384xf32>
    %100 = arith.negf %99 : vector<8x384xf32>
    %101 = math.exp %100 : vector<8x384xf32>
    %cst_47 = arith.constant 1.000000e+00 : f32
    %102 = vector.broadcast %cst_47 : f32 to vector<8x384xf32>
    %103 = arith.addf %102, %101 : vector<8x384xf32>
    %104 = arith.divf %102, %103 : vector<8x384xf32>
    %105 = vector.extract_strided_slice %98 {offsets = [0, 384], sizes = [8, 128], strides = [1, 1]} : vector<8x512xf32> to vector<8x128xf32>
    %106 = math.tanh %105 : vector<8x128xf32>
    %107 = vector.extract_strided_slice %104 {offsets = [0, 0], sizes = [8, 128], strides = [1, 1]} : vector<8x384xf32> to vector<8x128xf32>
    %108 = vector.extract_strided_slice %104 {offsets = [0, 128], sizes = [8, 128], strides = [1, 1]} : vector<8x384xf32> to vector<8x128xf32>
    %109 = vector.extract_strided_slice %104 {offsets = [0, 256], sizes = [8, 128], strides = [1, 1]} : vector<8x384xf32> to vector<8x128xf32>
    %110 = arith.mulf %108, %83 : vector<8x128xf32>
    %111 = arith.mulf %107, %106 : vector<8x128xf32>
    %112 = arith.addf %110, %111 : vector<8x128xf32>
    %113 = math.tanh %112 : vector<8x128xf32>
    %114 = arith.mulf %109, %113 : vector<8x128xf32>
    %115 = arith.addi %15, %c2_i32 : i32
    %c20_i32_48 = arith.constant 20 : i32
    %116 = arith.cmpi slt, %115, %c20_i32_48 : i32
    %117 = arith.select %116, %114, %82 : vector<8x128xf32>
    %118 = arith.select %116, %112, %83 : vector<8x128xf32>
    %119 = arith.index_cast %c2_i32 : i32 to index
    %c0_49 = arith.constant 0 : index
    %c0_50 = arith.constant 0 : index
    %120 = vector.load %arg9[%119, %c0_49, %c0_50] : memref<7x8x128xf32, #tpu.memory_space<vmem>>, vector<1x8x128xf32>
    %121 = vector.shape_cast %120 : vector<1x8x128xf32> to vector<8x128xf32>
    %122 = vector.shape_cast %117 : vector<8x128xf32> to vector<1x8x128xf32>
    tpu.vector_store %arg9[%119, %c0_49, %c0_50], %122 {strides = array<i32>} : memref<7x8x128xf32, #tpu.memory_space<vmem>>, vector<1x8x128xf32>,
    %c3_i32 = arith.constant 3 : i32
    %123 = arith.index_cast %c3_i32 : i32 to index
    %c0_51 = arith.constant 0 : index
    %c0_52 = arith.constant 0 : index
    %124 = vector.load %arg8[%123, %c0_51, %c0_52] : memref<7x8x512xf32, #tpu.memory_space<vmem>>, vector<1x8x512xf32>
    %125 = vector.shape_cast %124 : vector<1x8x512xf32> to vector<8x512xf32>
    %126 = arith.truncf %117 : vector<8x128xf32> to vector<8x128xbf16>
    %c0_53 = arith.constant 0 : index
    %c0_54 = arith.constant 0 : index
    %127 = vector.load %arg3[%c0_53, %c0_54] : memref<128x512xbf16, #tpu.memory_space<vmem>>, vector<128x512xbf16>
    %cst_55 = arith.constant dense<0.000000e+00> : vector<8x512xf32>
    %128 = tpu.matmul %126, %127, %cst_55 {dimension_numbers = #tpu.dot_dimension_numbers<[1], [0], [0], [1], [0, 0, 1, 1], [], []>} : vector<8x128xbf16>, vector<128x512xbf16>, vector<8x512xf32> -> vector<8x512xf32>
    %c4_i32_56 = arith.constant 4 : i32
    %129 = arith.addi %c3_i32, %c4_i32_56 : i32
    %c7_i32_57 = arith.constant 7 : i32
    %130 = arith.cmpi slt, %129, %c7_i32_57 : i32
    %131 = arith.extui %130 : i1 to i32
    %c0_i32_58 = arith.constant 0 : i32
    %132 = arith.cmpi ne, %131, %c0_i32_58 : i32
    scf.if %132 {
      %c4_i32_111 = arith.constant 4 : i32
      %268 = arith.addi %c3_i32, %c4_i32_111 : i32
      %269 = arith.index_cast %268 : i32 to index
      %c0_112 = arith.constant 0 : index
      %c0_113 = arith.constant 0 : index
      %270 = vector.load %arg1[%269, %c0_112, %c0_113] : memref<7x8x128xbf16, #tpu.memory_space<vmem>>, vector<1x8x128xbf16>
      %271 = vector.shape_cast %270 : vector<1x8x128xbf16> to vector<8x128xbf16>
      %c0_114 = arith.constant 0 : index
      %c0_115 = arith.constant 0 : index
      %272 = vector.load %arg2[%c0_114, %c0_115] : memref<128x512xbf16, #tpu.memory_space<vmem>>, vector<128x512xbf16>
      %cst_116 = arith.constant dense<0.000000e+00> : vector<8x512xf32>
      %273 = tpu.matmul %271, %272, %cst_116 {dimension_numbers = #tpu.dot_dimension_numbers<[1], [0], [0], [1], [0, 0, 1, 1], [], []>} : vector<8x128xbf16>, vector<128x512xbf16>, vector<8x512xf32> -> vector<8x512xf32>
      %274 = arith.addf %273, %5 : vector<8x512xf32>
      %c4_i32_117 = arith.constant 4 : i32
      %275 = arith.addi %c3_i32, %c4_i32_117 : i32
      %276 = arith.index_cast %275 : i32 to index
      %c0_118 = arith.constant 0 : index
      %c0_119 = arith.constant 0 : index
      %277 = vector.load %arg8[%276, %c0_118, %c0_119] : memref<7x8x512xf32, #tpu.memory_space<vmem>>, vector<1x8x512xf32>
      %278 = vector.shape_cast %277 : vector<1x8x512xf32> to vector<8x512xf32>
      %279 = vector.shape_cast %274 : vector<8x512xf32> to vector<1x8x512xf32>
      tpu.vector_store %arg8[%276, %c0_118, %c0_119], %279 {strides = array<i32>} : memref<7x8x512xf32, #tpu.memory_space<vmem>>, vector<1x8x512xf32>,
    } else {
    }
    %133 = arith.addf %125, %128 : vector<8x512xf32>
    %134 = vector.extract_strided_slice %133 {offsets = [0, 0], sizes = [8, 384], strides = [1, 1]} : vector<8x512xf32> to vector<8x384xf32>
    %135 = arith.negf %134 : vector<8x384xf32>
    %136 = math.exp %135 : vector<8x384xf32>
    %cst_59 = arith.constant 1.000000e+00 : f32
    %137 = vector.broadcast %cst_59 : f32 to vector<8x384xf32>
    %138 = arith.addf %137, %136 : vector<8x384xf32>
    %139 = arith.divf %137, %138 : vector<8x384xf32>
    %140 = vector.extract_strided_slice %133 {offsets = [0, 384], sizes = [8, 128], strides = [1, 1]} : vector<8x512xf32> to vector<8x128xf32>
    %141 = math.tanh %140 : vector<8x128xf32>
    %142 = vector.extract_strided_slice %139 {offsets = [0, 0], sizes = [8, 128], strides = [1, 1]} : vector<8x384xf32> to vector<8x128xf32>
    %143 = vector.extract_strided_slice %139 {offsets = [0, 128], sizes = [8, 128], strides = [1, 1]} : vector<8x384xf32> to vector<8x128xf32>
    %144 = vector.extract_strided_slice %139 {offsets = [0, 256], sizes = [8, 128], strides = [1, 1]} : vector<8x384xf32> to vector<8x128xf32>
    %145 = arith.mulf %143, %118 : vector<8x128xf32>
    %146 = arith.mulf %142, %141 : vector<8x128xf32>
    %147 = arith.addf %145, %146 : vector<8x128xf32>
    %148 = math.tanh %147 : vector<8x128xf32>
    %149 = arith.mulf %144, %148 : vector<8x128xf32>
    %150 = arith.addi %15, %c3_i32 : i32
    %c20_i32_60 = arith.constant 20 : i32
    %151 = arith.cmpi slt, %150, %c20_i32_60 : i32
    %152 = arith.select %151, %149, %117 : vector<8x128xf32>
    %153 = arith.select %151, %147, %118 : vector<8x128xf32>
    %154 = arith.index_cast %c3_i32 : i32 to index
    %c0_61 = arith.constant 0 : index
    %c0_62 = arith.constant 0 : index
    %155 = vector.load %arg9[%154, %c0_61, %c0_62] : memref<7x8x128xf32, #tpu.memory_space<vmem>>, vector<1x8x128xf32>
    %156 = vector.shape_cast %155 : vector<1x8x128xf32> to vector<8x128xf32>
    %157 = vector.shape_cast %152 : vector<8x128xf32> to vector<1x8x128xf32>
    tpu.vector_store %arg9[%154, %c0_61, %c0_62], %157 {strides = array<i32>} : memref<7x8x128xf32, #tpu.memory_space<vmem>>, vector<1x8x128xf32>,
    %c4_i32_63 = arith.constant 4 : i32
    %158 = arith.index_cast %c4_i32_63 : i32 to index
    %c0_64 = arith.constant 0 : index
    %c0_65 = arith.constant 0 : index
    %159 = vector.load %arg8[%158, %c0_64, %c0_65] : memref<7x8x512xf32, #tpu.memory_space<vmem>>, vector<1x8x512xf32>
    %160 = vector.shape_cast %159 : vector<1x8x512xf32> to vector<8x512xf32>
    %161 = arith.truncf %152 : vector<8x128xf32> to vector<8x128xbf16>
    %c0_66 = arith.constant 0 : index
    %c0_67 = arith.constant 0 : index
    %162 = vector.load %arg3[%c0_66, %c0_67] : memref<128x512xbf16, #tpu.memory_space<vmem>>, vector<128x512xbf16>
    %cst_68 = arith.constant dense<0.000000e+00> : vector<8x512xf32>
    %163 = tpu.matmul %161, %162, %cst_68 {dimension_numbers = #tpu.dot_dimension_numbers<[1], [0], [0], [1], [0, 0, 1, 1], [], []>} : vector<8x128xbf16>, vector<128x512xbf16>, vector<8x512xf32> -> vector<8x512xf32>
    %c4_i32_69 = arith.constant 4 : i32
    %164 = arith.addi %c4_i32_63, %c4_i32_69 : i32
    %c7_i32_70 = arith.constant 7 : i32
    %165 = arith.cmpi slt, %164, %c7_i32_70 : i32
    %166 = arith.extui %165 : i1 to i32
    %c0_i32_71 = arith.constant 0 : i32
    %167 = arith.cmpi ne, %166, %c0_i32_71 : i32
    scf.if %167 {
      %c4_i32_111 = arith.constant 4 : i32
      %268 = arith.addi %c4_i32_63, %c4_i32_111 : i32
      %269 = arith.index_cast %268 : i32 to index
      %c0_112 = arith.constant 0 : index
      %c0_113 = arith.constant 0 : index
      %270 = vector.load %arg1[%269, %c0_112, %c0_113] : memref<7x8x128xbf16, #tpu.memory_space<vmem>>, vector<1x8x128xbf16>
      %271 = vector.shape_cast %270 : vector<1x8x128xbf16> to vector<8x128xbf16>
      %c0_114 = arith.constant 0 : index
      %c0_115 = arith.constant 0 : index
      %272 = vector.load %arg2[%c0_114, %c0_115] : memref<128x512xbf16, #tpu.memory_space<vmem>>, vector<128x512xbf16>
      %cst_116 = arith.constant dense<0.000000e+00> : vector<8x512xf32>
      %273 = tpu.matmul %271, %272, %cst_116 {dimension_numbers = #tpu.dot_dimension_numbers<[1], [0], [0], [1], [0, 0, 1, 1], [], []>} : vector<8x128xbf16>, vector<128x512xbf16>, vector<8x512xf32> -> vector<8x512xf32>
      %274 = arith.addf %273, %5 : vector<8x512xf32>
      %c4_i32_117 = arith.constant 4 : i32
      %275 = arith.addi %c4_i32_63, %c4_i32_117 : i32
      %276 = arith.index_cast %275 : i32 to index
      %c0_118 = arith.constant 0 : index
      %c0_119 = arith.constant 0 : index
      %277 = vector.load %arg8[%276, %c0_118, %c0_119] : memref<7x8x512xf32, #tpu.memory_space<vmem>>, vector<1x8x512xf32>
      %278 = vector.shape_cast %277 : vector<1x8x512xf32> to vector<8x512xf32>
      %279 = vector.shape_cast %274 : vector<8x512xf32> to vector<1x8x512xf32>
      tpu.vector_store %arg8[%276, %c0_118, %c0_119], %279 {strides = array<i32>} : memref<7x8x512xf32, #tpu.memory_space<vmem>>, vector<1x8x512xf32>,
    } else {
    }
    %168 = arith.addf %160, %163 : vector<8x512xf32>
    %169 = vector.extract_strided_slice %168 {offsets = [0, 0], sizes = [8, 384], strides = [1, 1]} : vector<8x512xf32> to vector<8x384xf32>
    %170 = arith.negf %169 : vector<8x384xf32>
    %171 = math.exp %170 : vector<8x384xf32>
    %cst_72 = arith.constant 1.000000e+00 : f32
    %172 = vector.broadcast %cst_72 : f32 to vector<8x384xf32>
    %173 = arith.addf %172, %171 : vector<8x384xf32>
    %174 = arith.divf %172, %173 : vector<8x384xf32>
    %175 = vector.extract_strided_slice %168 {offsets = [0, 384], sizes = [8, 128], strides = [1, 1]} : vector<8x512xf32> to vector<8x128xf32>
    %176 = math.tanh %175 : vector<8x128xf32>
    %177 = vector.extract_strided_slice %174 {offsets = [0, 0], sizes = [8, 128], strides = [1, 1]} : vector<8x384xf32> to vector<8x128xf32>
    %178 = vector.extract_strided_slice %174 {offsets = [0, 128], sizes = [8, 128], strides = [1, 1]} : vector<8x384xf32> to vector<8x128xf32>
    %179 = vector.extract_strided_slice %174 {offsets = [0, 256], sizes = [8, 128], strides = [1, 1]} : vector<8x384xf32> to vector<8x128xf32>
    %180 = arith.mulf %178, %153 : vector<8x128xf32>
    %181 = arith.mulf %177, %176 : vector<8x128xf32>
    %182 = arith.addf %180, %181 : vector<8x128xf32>
    %183 = math.tanh %182 : vector<8x128xf32>
    %184 = arith.mulf %179, %183 : vector<8x128xf32>
    %185 = arith.addi %15, %c4_i32_63 : i32
    %c20_i32_73 = arith.constant 20 : i32
    %186 = arith.cmpi slt, %185, %c20_i32_73 : i32
    %187 = arith.select %186, %184, %152 : vector<8x128xf32>
    %188 = arith.select %186, %182, %153 : vector<8x128xf32>
    %189 = arith.index_cast %c4_i32_63 : i32 to index
    %c0_74 = arith.constant 0 : index
    %c0_75 = arith.constant 0 : index
    %190 = vector.load %arg9[%189, %c0_74, %c0_75] : memref<7x8x128xf32, #tpu.memory_space<vmem>>, vector<1x8x128xf32>
    %191 = vector.shape_cast %190 : vector<1x8x128xf32> to vector<8x128xf32>
    %192 = vector.shape_cast %187 : vector<8x128xf32> to vector<1x8x128xf32>
    tpu.vector_store %arg9[%189, %c0_74, %c0_75], %192 {strides = array<i32>} : memref<7x8x128xf32, #tpu.memory_space<vmem>>, vector<1x8x128xf32>,
    %c5_i32 = arith.constant 5 : i32
    %193 = arith.index_cast %c5_i32 : i32 to index
    %c0_76 = arith.constant 0 : index
    %c0_77 = arith.constant 0 : index
    %194 = vector.load %arg8[%193, %c0_76, %c0_77] : memref<7x8x512xf32, #tpu.memory_space<vmem>>, vector<1x8x512xf32>
    %195 = vector.shape_cast %194 : vector<1x8x512xf32> to vector<8x512xf32>
    %196 = arith.truncf %187 : vector<8x128xf32> to vector<8x128xbf16>
    %c0_78 = arith.constant 0 : index
    %c0_79 = arith.constant 0 : index
    %197 = vector.load %arg3[%c0_78, %c0_79] : memref<128x512xbf16, #tpu.memory_space<vmem>>, vector<128x512xbf16>
    %cst_80 = arith.constant dense<0.000000e+00> : vector<8x512xf32>
    %198 = tpu.matmul %196, %197, %cst_80 {dimension_numbers = #tpu.dot_dimension_numbers<[1], [0], [0], [1], [0, 0, 1, 1], [], []>} : vector<8x128xbf16>, vector<128x512xbf16>, vector<8x512xf32> -> vector<8x512xf32>
    %c4_i32_81 = arith.constant 4 : i32
    %199 = arith.addi %c5_i32, %c4_i32_81 : i32
    %c7_i32_82 = arith.constant 7 : i32
    %200 = arith.cmpi slt, %199, %c7_i32_82 : i32
    %201 = arith.extui %200 : i1 to i32
    %c0_i32_83 = arith.constant 0 : i32
    %202 = arith.cmpi ne, %201, %c0_i32_83 : i32
    scf.if %202 {
      %c4_i32_111 = arith.constant 4 : i32
      %268 = arith.addi %c5_i32, %c4_i32_111 : i32
      %269 = arith.index_cast %268 : i32 to index
      %c0_112 = arith.constant 0 : index
      %c0_113 = arith.constant 0 : index
      %270 = vector.load %arg1[%269, %c0_112, %c0_113] : memref<7x8x128xbf16, #tpu.memory_space<vmem>>, vector<1x8x128xbf16>
      %271 = vector.shape_cast %270 : vector<1x8x128xbf16> to vector<8x128xbf16>
      %c0_114 = arith.constant 0 : index
      %c0_115 = arith.constant 0 : index
      %272 = vector.load %arg2[%c0_114, %c0_115] : memref<128x512xbf16, #tpu.memory_space<vmem>>, vector<128x512xbf16>
      %cst_116 = arith.constant dense<0.000000e+00> : vector<8x512xf32>
      %273 = tpu.matmul %271, %272, %cst_116 {dimension_numbers = #tpu.dot_dimension_numbers<[1], [0], [0], [1], [0, 0, 1, 1], [], []>} : vector<8x128xbf16>, vector<128x512xbf16>, vector<8x512xf32> -> vector<8x512xf32>
      %274 = arith.addf %273, %5 : vector<8x512xf32>
      %c4_i32_117 = arith.constant 4 : i32
      %275 = arith.addi %c5_i32, %c4_i32_117 : i32
      %276 = arith.index_cast %275 : i32 to index
      %c0_118 = arith.constant 0 : index
      %c0_119 = arith.constant 0 : index
      %277 = vector.load %arg8[%276, %c0_118, %c0_119] : memref<7x8x512xf32, #tpu.memory_space<vmem>>, vector<1x8x512xf32>
      %278 = vector.shape_cast %277 : vector<1x8x512xf32> to vector<8x512xf32>
      %279 = vector.shape_cast %274 : vector<8x512xf32> to vector<1x8x512xf32>
      tpu.vector_store %arg8[%276, %c0_118, %c0_119], %279 {strides = array<i32>} : memref<7x8x512xf32, #tpu.memory_space<vmem>>, vector<1x8x512xf32>,
    } else {
    }
    %203 = arith.addf %195, %198 : vector<8x512xf32>
    %204 = vector.extract_strided_slice %203 {offsets = [0, 0], sizes = [8, 384], strides = [1, 1]} : vector<8x512xf32> to vector<8x384xf32>
    %205 = arith.negf %204 : vector<8x384xf32>
    %206 = math.exp %205 : vector<8x384xf32>
    %cst_84 = arith.constant 1.000000e+00 : f32
    %207 = vector.broadcast %cst_84 : f32 to vector<8x384xf32>
    %208 = arith.addf %207, %206 : vector<8x384xf32>
    %209 = arith.divf %207, %208 : vector<8x384xf32>
    %210 = vector.extract_strided_slice %203 {offsets = [0, 384], sizes = [8, 128], strides = [1, 1]} : vector<8x512xf32> to vector<8x128xf32>
    %211 = math.tanh %210 : vector<8x128xf32>
    %212 = vector.extract_strided_slice %209 {offsets = [0, 0], sizes = [8, 128], strides = [1, 1]} : vector<8x384xf32> to vector<8x128xf32>
    %213 = vector.extract_strided_slice %209 {offsets = [0, 128], sizes = [8, 128], strides = [1, 1]} : vector<8x384xf32> to vector<8x128xf32>
    %214 = vector.extract_strided_slice %209 {offsets = [0, 256], sizes = [8, 128], strides = [1, 1]} : vector<8x384xf32> to vector<8x128xf32>
    %215 = arith.mulf %213, %188 : vector<8x128xf32>
    %216 = arith.mulf %212, %211 : vector<8x128xf32>
    %217 = arith.addf %215, %216 : vector<8x128xf32>
    %218 = math.tanh %217 : vector<8x128xf32>
    %219 = arith.mulf %214, %218 : vector<8x128xf32>
    %220 = arith.addi %15, %c5_i32 : i32
    %c20_i32_85 = arith.constant 20 : i32
    %221 = arith.cmpi slt, %220, %c20_i32_85 : i32
    %222 = arith.select %221, %219, %187 : vector<8x128xf32>
    %223 = arith.select %221, %217, %188 : vector<8x128xf32>
    %224 = arith.index_cast %c5_i32 : i32 to index
    %c0_86 = arith.constant 0 : index
    %c0_87 = arith.constant 0 : index
    %225 = vector.load %arg9[%224, %c0_86, %c0_87] : memref<7x8x128xf32, #tpu.memory_space<vmem>>, vector<1x8x128xf32>
    %226 = vector.shape_cast %225 : vector<1x8x128xf32> to vector<8x128xf32>
    %227 = vector.shape_cast %222 : vector<8x128xf32> to vector<1x8x128xf32>
    tpu.vector_store %arg9[%224, %c0_86, %c0_87], %227 {strides = array<i32>} : memref<7x8x128xf32, #tpu.memory_space<vmem>>, vector<1x8x128xf32>,
    %c6_i32 = arith.constant 6 : i32
    %228 = arith.index_cast %c6_i32 : i32 to index
    %c0_88 = arith.constant 0 : index
    %c0_89 = arith.constant 0 : index
    %229 = vector.load %arg8[%228, %c0_88, %c0_89] : memref<7x8x512xf32, #tpu.memory_space<vmem>>, vector<1x8x512xf32>
    %230 = vector.shape_cast %229 : vector<1x8x512xf32> to vector<8x512xf32>
    %231 = arith.truncf %222 : vector<8x128xf32> to vector<8x128xbf16>
    %c0_90 = arith.constant 0 : index
    %c0_91 = arith.constant 0 : index
    %232 = vector.load %arg3[%c0_90, %c0_91] : memref<128x512xbf16, #tpu.memory_space<vmem>>, vector<128x512xbf16>
    %cst_92 = arith.constant dense<0.000000e+00> : vector<8x512xf32>
    %233 = tpu.matmul %231, %232, %cst_92 {dimension_numbers = #tpu.dot_dimension_numbers<[1], [0], [0], [1], [0, 0, 1, 1], [], []>} : vector<8x128xbf16>, vector<128x512xbf16>, vector<8x512xf32> -> vector<8x512xf32>
    %c4_i32_93 = arith.constant 4 : i32
    %234 = arith.addi %c6_i32, %c4_i32_93 : i32
    %c7_i32_94 = arith.constant 7 : i32
    %235 = arith.cmpi slt, %234, %c7_i32_94 : i32
    %236 = arith.extui %235 : i1 to i32
    %c0_i32_95 = arith.constant 0 : i32
    %237 = arith.cmpi ne, %236, %c0_i32_95 : i32
    scf.if %237 {
      %c4_i32_111 = arith.constant 4 : i32
      %268 = arith.addi %c6_i32, %c4_i32_111 : i32
      %269 = arith.index_cast %268 : i32 to index
      %c0_112 = arith.constant 0 : index
      %c0_113 = arith.constant 0 : index
      %270 = vector.load %arg1[%269, %c0_112, %c0_113] : memref<7x8x128xbf16, #tpu.memory_space<vmem>>, vector<1x8x128xbf16>
      %271 = vector.shape_cast %270 : vector<1x8x128xbf16> to vector<8x128xbf16>
      %c0_114 = arith.constant 0 : index
      %c0_115 = arith.constant 0 : index
      %272 = vector.load %arg2[%c0_114, %c0_115] : memref<128x512xbf16, #tpu.memory_space<vmem>>, vector<128x512xbf16>
      %cst_116 = arith.constant dense<0.000000e+00> : vector<8x512xf32>
      %273 = tpu.matmul %271, %272, %cst_116 {dimension_numbers = #tpu.dot_dimension_numbers<[1], [0], [0], [1], [0, 0, 1, 1], [], []>} : vector<8x128xbf16>, vector<128x512xbf16>, vector<8x512xf32> -> vector<8x512xf32>
      %274 = arith.addf %273, %5 : vector<8x512xf32>
      %c4_i32_117 = arith.constant 4 : i32
      %275 = arith.addi %c6_i32, %c4_i32_117 : i32
      %276 = arith.index_cast %275 : i32 to index
      %c0_118 = arith.constant 0 : index
      %c0_119 = arith.constant 0 : index
      %277 = vector.load %arg8[%276, %c0_118, %c0_119] : memref<7x8x512xf32, #tpu.memory_space<vmem>>, vector<1x8x512xf32>
      %278 = vector.shape_cast %277 : vector<1x8x512xf32> to vector<8x512xf32>
      %279 = vector.shape_cast %274 : vector<8x512xf32> to vector<1x8x512xf32>
      tpu.vector_store %arg8[%276, %c0_118, %c0_119], %279 {strides = array<i32>} : memref<7x8x512xf32, #tpu.memory_space<vmem>>, vector<1x8x512xf32>,
    } else {
    }
    %238 = arith.addf %230, %233 : vector<8x512xf32>
    %239 = vector.extract_strided_slice %238 {offsets = [0, 0], sizes = [8, 384], strides = [1, 1]} : vector<8x512xf32> to vector<8x384xf32>
    %240 = arith.negf %239 : vector<8x384xf32>
    %241 = math.exp %240 : vector<8x384xf32>
    %cst_96 = arith.constant 1.000000e+00 : f32
    %242 = vector.broadcast %cst_96 : f32 to vector<8x384xf32>
    %243 = arith.addf %242, %241 : vector<8x384xf32>
    %244 = arith.divf %242, %243 : vector<8x384xf32>
    %245 = vector.extract_strided_slice %238 {offsets = [0, 384], sizes = [8, 128], strides = [1, 1]} : vector<8x512xf32> to vector<8x128xf32>
    %246 = math.tanh %245 : vector<8x128xf32>
    %247 = vector.extract_strided_slice %244 {offsets = [0, 0], sizes = [8, 128], strides = [1, 1]} : vector<8x384xf32> to vector<8x128xf32>
    %248 = vector.extract_strided_slice %244 {offsets = [0, 128], sizes = [8, 128], strides = [1, 1]} : vector<8x384xf32> to vector<8x128xf32>
    %249 = vector.extract_strided_slice %244 {offsets = [0, 256], sizes = [8, 128], strides = [1, 1]} : vector<8x384xf32> to vector<8x128xf32>
    %250 = arith.mulf %248, %223 : vector<8x128xf32>
    %251 = arith.mulf %247, %246 : vector<8x128xf32>
    %252 = arith.addf %250, %251 : vector<8x128xf32>
    %253 = math.tanh %252 : vector<8x128xf32>
    %254 = arith.mulf %249, %253 : vector<8x128xf32>
    %255 = arith.addi %15, %c6_i32 : i32
    %c20_i32_97 = arith.constant 20 : i32
    %256 = arith.cmpi slt, %255, %c20_i32_97 : i32
    %257 = arith.select %256, %254, %222 : vector<8x128xf32>
    %258 = arith.select %256, %252, %223 : vector<8x128xf32>
    %259 = arith.index_cast %c6_i32 : i32 to index
    %c0_98 = arith.constant 0 : index
    %c0_99 = arith.constant 0 : index
    %260 = vector.load %arg9[%259, %c0_98, %c0_99] : memref<7x8x128xf32, #tpu.memory_space<vmem>>, vector<1x8x128xf32>
    %261 = vector.shape_cast %260 : vector<1x8x128xf32> to vector<8x128xf32>
    %262 = vector.shape_cast %257 : vector<8x128xf32> to vector<1x8x128xf32>
    tpu.vector_store %arg9[%259, %c0_98, %c0_99], %262 {strides = array<i32>} : memref<7x8x128xf32, #tpu.memory_space<vmem>>, vector<1x8x128xf32>,
    %c7_i32_100 = arith.constant 7 : i32
    %c0_101 = arith.constant 0 : index
    %c0_102 = arith.constant 0 : index
    %263 = vector.load %arg6[%c0_101, %c0_102] : memref<8x128xf32, #tpu.memory_space<vmem>>, vector<8x128xf32>
    tpu.vector_store %arg6[%c0_101, %c0_102], %257 {strides = array<i32>} : memref<8x128xf32, #tpu.memory_space<vmem>>, vector<8x128xf32>,
    %c0_103 = arith.constant 0 : index
    %c0_104 = arith.constant 0 : index
    %264 = vector.load %arg7[%c0_103, %c0_104] : memref<8x128xf32, #tpu.memory_space<vmem>>, vector<8x128xf32>
    tpu.vector_store %arg7[%c0_103, %c0_104], %258 {strides = array<i32>} : memref<8x128xf32, #tpu.memory_space<vmem>>, vector<8x128xf32>,
    %c0_105 = arith.constant 0 : index
    %c0_106 = arith.constant 0 : index
    %c0_107 = arith.constant 0 : index
    %265 = vector.load %arg9[%c0_105, %c0_106, %c0_107] : memref<7x8x128xf32, #tpu.memory_space<vmem>>, vector<7x8x128xf32>
    %266 = arith.truncf %265 : vector<7x8x128xf32> to vector<7x8x128xbf16>
    %c0_108 = arith.constant 0 : index
    %c0_109 = arith.constant 0 : index
    %c0_110 = arith.constant 0 : index
    %267 = vector.load %arg5[%c0_108, %c0_109, %c0_110] : memref<7x8x128xbf16, #tpu.memory_space<vmem>>, vector<7x8x128xbf16>
    tpu.vector_store %arg5[%c0_108, %c0_109, %c0_110], %266 {strides = array<i32>} : memref<7x8x128xbf16, #tpu.memory_space<vmem>>, vector<7x8x128xbf16>,
    return
  }
  func.func @transform_0(%arg0: i32) -> (i32, i32, i32) {
    %c0_i32 = arith.constant 0 : i32
    %c0_i32_0 = arith.constant 0 : i32
    %c0_i32_1 = arith.constant 0 : i32
    return %arg0, %c0_i32, %c0_i32_0 : i32, i32, i32
  }
  func.func @transform_1(%arg0: i32) -> (i32, i32) {
    %c0_i32 = arith.constant 0 : i32
    %c0_i32_0 = arith.constant 0 : i32
    %c0_i32_1 = arith.constant 0 : i32
    return %c0_i32, %c0_i32_0 : i32, i32
  }
  func.func @transform_2(%arg0: i32) -> (i32, i32) {
    %c0_i32 = arith.constant 0 : i32
    %c0_i32_0 = arith.constant 0 : i32
    %c0_i32_1 = arith.constant 0 : i32
    return %c0_i32, %c0_i32_0 : i32, i32
  }
  func.func @transform_3(%arg0: i32) -> (i32, i32) {
    %c0_i32 = arith.constant 0 : i32
    %c0_i32_0 = arith.constant 0 : i32
    %c0_i32_1 = arith.constant 0 : i32
    return %c0_i32, %c0_i32_0 : i32, i32
  }
  func.func @transform_4(%arg0: i32) -> (i32, i32, i32) {
    %c0_i32 = arith.constant 0 : i32
    %c0_i32_0 = arith.constant 0 : i32
    %c0_i32_1 = arith.constant 0 : i32
    return %arg0, %c0_i32, %c0_i32_0 : i32, i32, i32
  }
  func.func @transform_5(%arg0: i32) -> (i32, i32) {
    %c0_i32 = arith.constant 0 : i32
    %c0_i32_0 = arith.constant 0 : i32
    %c0_i32_1 = arith.constant 0 : i32
    return %c0_i32, %c0_i32_0 : i32, i32
  }
  func.func @transform_6(%arg0: i32) -> (i32, i32) {
    %c0_i32 = arith.constant 0 : i32
    %c0_i32_0 = arith.constant 0 : i32
    %c0_i32_1 = arith.constant 0 : i32
    return %c0_i32, %c0_i32_0 : i32, i32
  }
}

</mosaic_0001>

<bundles_post_ra>
// kernel: encoder_forward.3
= control target key start
LH: loop header
LB: loop body
LE: loop exit
PB: predicated region body
PF: predicated region fallthrough
CT: control target
= control target key end

     0   :  { %12 = vsyncpa [#allocation5], 0  ;;  %s5971_s0 = inlined_call_operand.vmem [shape: bf16[21,8,128], index: 0, kind: input, shape index: {}]   ;;  %s5972_s1 = inlined_call_operand.vmem [shape: bf16[128,512], index: 1, kind: input, shape index: {}]   ;;  %s5973_s2 = inlined_call_operand.hbm [shape: bf16[128,512], index: 2, kind: input, shape index: {}]   ;;  %s5974_s3 = inlined_call_operand.vmem [shape: f32[1,512], index: 3, kind: input, shape index: {}]   ;;  %s5975_s4 = inlined_call_operand.hbm [shape: bf16[7,8,128], index: 4, kind: output, shape index: {0}]   ;;  %s5976_s5 = inlined_call_operand.vmem [shape: f32[8,128], index: 5, kind: output, shape index: {1}]   ;;  %s5977_s6 = inlined_call_operand.vmem [shape: f32[8,128], index: 6, kind: output, shape index: {2}]  }
   0x1   :  { %13 = vsyncpa [#allocation6], 0  ;;  %s4672_s21 = smov 0  }
   0x2 LB: > { %s190_s24 = sshll.u32 %s5973_s2, 4  ;;  %s4681_s25 = sadd.s32 4294967295, %s4628_s21   ;;  %s4628_s21 = sphi %s4672_s21, %s19_s21   ;;  %s191_s24 = int_to_ptr.hbm [resolvable:$true] %s190_s24 }
   0x3   : > { %p3088_p0 = scmp.ge.s32.totalorder %s4628_s21, 1  ;;  %p176_p1 = scmp.lt.s32.totalorder %s4628_s21, 4 }
   0x4   : > { %p3089_p2 = scmp.ne.s32.totalorder %s4681_s25, 0  ;;  %p4425_p3 = scmp.eq.s32.totalorder %s4681_s25, 0 }
   0x5   : > { %p177_p4 = pnand %p3088_p0, %p176_p1  ;;  %s4630_s26 = smov [#allocation4]  }
   0x6   : > { %s192_s27 = sshll.u32 %s4630_s26, 4  ;;  %s4631_s28 = smov 256   ;;  %s193_s27 = int_to_ptr.vmem [resolvable:$true] %s192_s27 }
   0x7   : > { %p4421_p5 = pneg %p177_p4  ;;  %s4632_s29 = smov 16  }
   0x8   : > { %220 = sbr.rel (%p177_p4) target bundleno = 1303 (0x517), region = 36 }
   0x9   : > { %p4422_p6 = pnand %p4425_p3, %p4421_p5 }
   0xb   : > { %4424 = dma.hbm_to_vmem [thread:$0]  (!%p4422_p6), %s191_s24, 4096, %s193_s27, [#allocation5], %s4631_s28, %s4631_s28, %s4632_s29  }
   0xd   : > { %4619 = dma.done.wait (%p4425_p3), [#allocation5], 4096  }
   0xe   : > { %4621 = vsyncadd (%p4425_p3), [#allocation5], 4294963200  ;;  %s4688_s30 = smul.u32 7, %s4681_s25 }
  0x10   : > { %p247_p7 = scmp.lt.s32.totalorder %s4688_s30, 20 }
  0x11   : > { %255 = sbr.rel (%p3089_p2) target bundleno = 25 (0x19), region = 44 }
  0x12   : > { %s248_s7 = scalar_select %p247_p7, %s4688_s30, 20 }
  0x14   : > { %s3093_s8 = sshll.u32 %s248_s7, 2 }
  0x15   : > { %s4697_s11 = scalar_lea.vmem %s5971_s0, %s3093_s8 }
  0x16   : > { %v4633_v0 = vmov 0.0  }
  0x17   : > { %256 = vst [vmem:[%s5976_s5] sm:$0xff] %v4633_v0 }
  0x18   : > { %257 = vst [vmem:[%s5977_s6] sm:$0xff] %v4633_v0 }
  0x19 PF: > { %v3217_v1 = vld [vmem:[%s5972_s1 + $0xe0] sm:$0xf]  ;;  %v4187_v2 = vld [vmem:[%s5972_s1 + $0xec] sm:$0xf0]  ;;  %v4185_v3 = vld [vmem:[%s5972_s1 + $0xe4] sm:$0xf] }
  0x1a   : > { %v3218_v4 = vor.u32 %v4187_v2, %v3217_v1  ;;  %v3219_v5 = vld [vmem:[%s5972_s1 + $0xf0] sm:$0xf0]  ;;  %v3225_v6 = vld [vmem:[%s5972_s1 + $0xe8] sm:$0xf]  ;;  %v4188_v7 = vld [vmem:[%s5972_s1 + $0xf4] sm:$0xf0] }
  0x1b   : > { %v3222_v8 = vor.u32 %v4185_v3, %v3219_v5  ;;  %v3226_v9 = vor.u32 %v4188_v7, %v3225_v6  ;;  %v4186_v10 = vld [vmem:[%s5972_s1 + $0xec] sm:$0xf]  ;;  %v3227_v11 = vld [vmem:[%s5972_s1 + $0xf8] sm:$0xf0]  ;;  %v3201_v12 = vld [vmem:[%s5972_s1 + $0xc0] sm:$0xf] }
  0x1c   : > { %476 = vmatpush.bf16.msra.mxu0 %v3218_v4  ;;  %v3230_v13 = vor.u32 %v4186_v10, %v3227_v11  ;;  %v4183_v14 = vld [vmem:[%s5972_s1 + $0xcc] sm:$0xf0]  ;;  %v4181_v15 = vld [vmem:[%s5972_s1 + $0xc4] sm:$0xf]  ;;  %v3203_v16 = vld [vmem:[%s5972_s1 + $0xd0] sm:$0xf0] }
  0x1d   : > { %495 = vmatpush.bf16.msra.mxu1 %v3222_v8  ;;  %514 = vmatpush.bf16.msra.mxu2 %v3226_v9  ;;  %v3202_v17 = vor.u32 %v4183_v14, %v3201_v12  ;;  %v3206_v18 = vor.u32 %v4181_v15, %v3203_v16  ;;  %v3209_v19 = vld [vmem:[%s5972_s1 + $0xc8] sm:$0xf]  ;;  %v4184_v20 = vld [vmem:[%s5972_s1 + $0xd4] sm:$0xf0]  ;;  %v4182_v21 = vld [vmem:[%s5972_s1 + $0xcc] sm:$0xf] }
  0x1e   : > { %533 = vmatpush.bf16.msra.mxu3 %v3230_v13  ;;  %v3210_v22 = vor.u32 %v4184_v20, %v3209_v19  ;;  %v3211_v23 = vld [vmem:[%s5972_s1 + $0xd8] sm:$0xf0]  ;;  %v3185_v24 = vld [vmem:[%s5972_s1 + $0xa0] sm:$0xf]  ;;  %v4179_v25 = vld [vmem:[%s5972_s1 + $0xac] sm:$0xf0] }
  0x1f   : > { %v3214_v26 = vor.u32 %v4182_v21, %v3211_v23  ;;  %v4177_v27 = vld [vmem:[%s5972_s1 + $0xa4] sm:$0xf]  ;;  %v3187_v28 = vld [vmem:[%s5972_s1 + $0xb0] sm:$0xf0]  ;;  %v3193_v29 = vld [vmem:[%s5972_s1 + $0xa8] sm:$0xf]  ;;  %v3186_v30 = vor.u32 %v4179_v25, %v3185_v24 }
  0x20   : > { %477 = vmatpush.bf16.msra.mxu0 %v3202_v17  ;;  %v4180_v31 = vld [vmem:[%s5972_s1 + $0xb4] sm:$0xf0]  ;;  %v4178_v32 = vld [vmem:[%s5972_s1 + $0xac] sm:$0xf]  ;;  %v3195_v33 = vld [vmem:[%s5972_s1 + $0xb8] sm:$0xf0]  ;;  %v3190_v34 = vor.u32 %v4177_v27, %v3187_v28 }
  0x21   : > { %496 = vmatpush.bf16.msra.mxu1 %v3206_v18  ;;  %515 = vmatpush.bf16.msra.mxu2 %v3210_v22  ;;  %v3194_v35 = vor.u32 %v4180_v31, %v3193_v29  ;;  %v3169_v36 = vld [vmem:[%s5972_s1 + $0x80] sm:$0xf]  ;;  %v4175_v37 = vld [vmem:[%s5972_s1 + $0x8c] sm:$0xf0]  ;;  %v4173_v38 = vld [vmem:[%s5972_s1 + $0x84] sm:$0xf]  ;;  %v3198_v39 = vor.u32 %v4178_v32, %v3195_v33 }
  0x22   : > { %534 = vmatpush.bf16.msra.mxu3 %v3214_v26  ;;  %v3171_v40 = vld [vmem:[%s5972_s1 + $0x90] sm:$0xf0]  ;;  %v3177_v41 = vld [vmem:[%s5972_s1 + $0x88] sm:$0xf]  ;;  %v4176_v42 = vld [vmem:[%s5972_s1 + $0x94] sm:$0xf0]  ;;  %v3170_v45 = vor.u32 %v4175_v37, %v3169_v36 }
  0x23   : > { %v4174_v43 = vld [vmem:[%s5972_s1 + $0x8c] sm:$0xf]  ;;  %v3179_v44 = vld [vmem:[%s5972_s1 + $0x98] sm:$0xf0]  ;;  %v3174_v46 = vor.u32 %v4173_v38, %v3171_v40  ;;  %v3178_v47 = vor.u32 %v4176_v42, %v3177_v41  ;;  %v3153_v48 = vld [vmem:[%s5972_s1 + $0x60] sm:$0xf] }
  0x24   : > { %478 = vmatpush.bf16.msra.mxu0 %v3186_v30  ;;  %v4171_v49 = vld [vmem:[%s5972_s1 + $0x6c] sm:$0xf0]  ;;  %v4169_v50 = vld [vmem:[%s5972_s1 + $0x64] sm:$0xf]  ;;  %v3182_v51 = vor.u32 %v4174_v43, %v3179_v44  ;;  %v3155_v52 = vld [vmem:[%s5972_s1 + $0x70] sm:$0xf0] }
  0x25   : > { %497 = vmatpush.bf16.msra.mxu1 %v3190_v34  ;;  %516 = vmatpush.bf16.msra.mxu2 %v3194_v35  ;;  %v3161_v53 = vld [vmem:[%s5972_s1 + $0x68] sm:$0xf]  ;;  %v4172_v54 = vld [vmem:[%s5972_s1 + $0x74] sm:$0xf0]  ;;  %v4170_v55 = vld [vmem:[%s5972_s1 + $0x6c] sm:$0xf]  ;;  %v3154_v57 = vor.u32 %v4171_v49, %v3153_v48  ;;  %v3158_v58 = vor.u32 %v4169_v50, %v3155_v52 }
  0x26   : > { %535 = vmatpush.bf16.msra.mxu3 %v3198_v39  ;;  %v3163_v56 = vld [vmem:[%s5972_s1 + $0x78] sm:$0xf0]  ;;  %v3162_v59 = vor.u32 %v4172_v54, %v3161_v53  ;;  %v3137_v60 = vld [vmem:[%s5972_s1 + $0x40] sm:$0xf]  ;;  %v4167_v61 = vld [vmem:[%s5972_s1 + $0x4c] sm:$0xf0] }
  0x27   : > { %v4165_v62 = vld [vmem:[%s5972_s1 + $0x44] sm:$0xf]  ;;  %v3166_v63 = vor.u32 %v4170_v55, %v3163_v56  ;;  %v3139_v0 = vld [vmem:[%s5972_s1 + $0x50] sm:$0xf0]  ;;  %v3145_v1 = vld [vmem:[%s5972_s1 + $0x48] sm:$0xf]  ;;  %v3138_v5 = vor.u32 %v4167_v61, %v3137_v60 }
  0x28   : > { %479 = vmatpush.bf16.msra.mxu0 %v3170_v45  ;;  %v4168_v2 = vld [vmem:[%s5972_s1 + $0x54] sm:$0xf0]  ;;  %v4166_v3 = vld [vmem:[%s5972_s1 + $0x4c] sm:$0xf]  ;;  %v3147_v4 = vld [vmem:[%s5972_s1 + $0x58] sm:$0xf0]  ;;  %v3142_v7 = vor.u32 %v4165_v62, %v3139_v0 }
  0x29   : > { %498 = vmatpush.bf16.msra.mxu1 %v3174_v46  ;;  %517 = vmatpush.bf16.msra.mxu2 %v3178_v47  ;;  %v3121_v6 = vld [vmem:[%s5972_s1 + $0x20] sm:$0xf]  ;;  %v3146_v8 = vor.u32 %v4168_v2, %v3145_v1  ;;  %v4163_v9 = vld [vmem:[%s5972_s1 + $0x2c] sm:$0xf0]  ;;  %v4161_v10 = vld [vmem:[%s5972_s1 + $0x24] sm:$0xf]  ;;  %v3150_v12 = vor.u32 %v4166_v3, %v3147_v4 }
  0x2a   : > { %536 = vmatpush.bf16.msra.mxu3 %v3182_v51  ;;  %v3123_v11 = vld [vmem:[%s5972_s1 + $0x30] sm:$0xf0]  ;;  %v3129_v13 = vld [vmem:[%s5972_s1 + $0x28] sm:$0xf]  ;;  %v4164_v14 = vld [vmem:[%s5972_s1 + $0x34] sm:$0xf0]  ;;  %v3122_v17 = vor.u32 %v4163_v9, %v3121_v6 }
  0x2b   : > { %v4162_v15 = vld [vmem:[%s5972_s1 + $0x2c] sm:$0xf]  ;;  %v3131_v16 = vld [vmem:[%s5972_s1 + $0x38] sm:$0xf0]  ;;  %v3105_v18 = vld [vmem:[%s5972_s1] sm:$0xf]  ;;  %v3126_v19 = vor.u32 %v4161_v10, %v3123_v11  ;;  %v3130_v20 = vor.u32 %v4164_v14, %v3129_v13 }
  0x2c   : > { %480 = vmatpush.bf16.msra.mxu0 %v3154_v57  ;;  %v4159_v21 = vld [vmem:[%s5972_s1 + $0xc] sm:$0xf0]  ;;  %v4157_v22 = vld [vmem:[%s5972_s1 + $0x4] sm:$0xf]  ;;  %v3107_v23 = vld [vmem:[%s5972_s1 + $0x10] sm:$0xf0]  ;;  %v3134_v24 = vor.u32 %v4162_v15, %v3131_v16 }
  0x2d   : > { %499 = vmatpush.bf16.msra.mxu1 %v3158_v58  ;;  %518 = vmatpush.bf16.msra.mxu2 %v3162_v59  ;;  %v3113_v25 = vld [vmem:[%s5972_s1 + $0x8] sm:$0xf]  ;;  %v4160_v26 = vld [vmem:[%s5972_s1 + $0x14] sm:$0xf0]  ;;  %v4158_v27 = vld [vmem:[%s5972_s1 + $0xc] sm:$0xf]  ;;  %v3106_v31 = vor.u32 %v4159_v21, %v3105_v18  ;;  %v3110_v34 = vor.u32 %v4157_v22, %v3107_v23 }
  0x2e   : > { %537 = vmatpush.bf16.msra.mxu3 %v3166_v63  ;;  %v3115_v28 = vld [vmem:[%s5972_s1 + $0x18] sm:$0xf0]  ;;  %v3345_v29 = vld [vmem:[#allocation4 + $0xe0] sm:$0xf]  ;;  %v4219_v30 = vld [vmem:[#allocation4 + $0xec] sm:$0xf0]  ;;  %v3114_v35 = vor.u32 %v4160_v26, %v3113_v25 }
  0x2f   : > { %v4217_v32 = vld [vmem:[#allocation4 + $0xe4] sm:$0xf]  ;;  %v3347_v33 = vld [vmem:[#allocation4 + $0xf0] sm:$0xf0]  ;;  %v3118_v37 = vor.u32 %v4158_v27, %v3115_v28  ;;  %v3346_v38 = vor.u32 %v4219_v30, %v3345_v29  ;;  %v3353_v39 = vld [vmem:[#allocation4 + $0xe8] sm:$0xf] }
  0x30   : > { %481 = vmatpush.bf16.msra.mxu0 %v3138_v5  ;;  %v4155_v36 = vld [vmem:[%s4697_s11] sm:$0xff]  ;;  %v4220_v40 = vld [vmem:[#allocation4 + $0xf4] sm:$0xf0]  ;;  %v4218_v41 = vld [vmem:[#allocation4 + $0xec] sm:$0xf]  ;;  %v3350_v42 = vor.u32 %v4217_v32, %v3347_v33  ;;  %s1712_s29 = sadd.s32 1, %s4688_s30 }
  0x31   : > { %500 = vmatpush.bf16.msra.mxu1 %v3142_v7  ;;  %519 = vmatpush.bf16.msra.mxu2 %v3146_v8  ;;  %v3355_v43 = vld [vmem:[#allocation4 + $0xf8] sm:$0xf0]  ;;  %v3329_v44 = vld [vmem:[#allocation4 + $0xc0] sm:$0xf]  ;;  %v4215_v45 = vld [vmem:[#allocation4 + $0xcc] sm:$0xf0]  ;;  %v3354_v48 = vor.u32 %v4220_v40, %v3353_v39 }
  0x32   : > { %538 = vmatpush.bf16.msra.mxu3 %v3150_v12  ;;  %v4213_v46 = vld [vmem:[#allocation4 + $0xc4] sm:$0xf]  ;;  %v3331_v47 = vld [vmem:[#allocation4 + $0xd0] sm:$0xf0]  ;;  %v3358_v49 = vor.u32 %v4218_v41, %v3355_v43  ;;  %v3330_v50 = vor.u32 %v4215_v45, %v3329_v44  ;;  %v3337_v51 = vld [vmem:[#allocation4 + $0xc8] sm:$0xf] }
  0x33   : > { %v4216_v52 = vld [vmem:[#allocation4 + $0xd4] sm:$0xf0]  ;;  %v4214_v53 = vld [vmem:[#allocation4 + $0xcc] sm:$0xf]  ;;  %v3334_v54 = vor.u32 %v4213_v46, %v3331_v47  ;;  %v3339_v55 = vld [vmem:[#allocation4 + $0xd8] sm:$0xf0] }
  0x34   : > { %482 = vmatpush.bf16.msra.mxu0 %v3122_v17  ;;  %v3313_v56 = vld [vmem:[#allocation4 + $0xa0] sm:$0xf]  ;;  %v4211_v57 = vld [vmem:[#allocation4 + $0xac] sm:$0xf0]  ;;  %v4209_v58 = vld [vmem:[#allocation4 + $0xa4] sm:$0xf]  ;;  %v3338_v60 = vor.u32 %v4216_v52, %v3337_v51  ;;  %v3342_v61 = vor.u32 %v4214_v53, %v3339_v55 }
  0x35   : > { %501 = vmatpush.bf16.msra.mxu1 %v3126_v19  ;;  %520 = vmatpush.bf16.msra.mxu2 %v3130_v20  ;;  %v3315_v59 = vld [vmem:[#allocation4 + $0xb0] sm:$0xf0]  ;;  %v3314_v62 = vor.u32 %v4211_v57, %v3313_v56  ;;  %v3321_v63 = vld [vmem:[#allocation4 + $0xa8] sm:$0xf]  ;;  %v4212_v0 = vld [vmem:[#allocation4 + $0xb4] sm:$0xf0] }
  0x36   : > { %539 = vmatpush.bf16.msra.mxu3 %v3134_v24  ;;  %v4210_v1 = vld [vmem:[#allocation4 + $0xac] sm:$0xf]  ;;  %v3318_v2 = vor.u32 %v4209_v58, %v3315_v59  ;;  %v3323_v3 = vld [vmem:[#allocation4 + $0xb8] sm:$0xf0]  ;;  %v3297_v4 = vld [vmem:[#allocation4 + $0x80] sm:$0xf]  ;;  %v3322_v8 = vor.u32 %v4212_v0, %v3321_v63 }
  0x37   : > { %v4207_v5 = vld [vmem:[#allocation4 + $0x8c] sm:$0xf0]  ;;  %v4205_v6 = vld [vmem:[#allocation4 + $0x84] sm:$0xf]  ;;  %v3299_v7 = vld [vmem:[#allocation4 + $0x90] sm:$0xf0]  ;;  %v3326_v9 = vor.u32 %v4210_v1, %v3323_v3 }
  0x38   : > { %483 = vmatpush.bf16.msra.mxu0 %v3106_v31  ;;  %v3298_v10 = vor.u32 %v4207_v5, %v3297_v4  ;;  %v3305_v11 = vld [vmem:[#allocation4 + $0x88] sm:$0xf]  ;;  %v4208_v12 = vld [vmem:[#allocation4 + $0x94] sm:$0xf0]  ;;  %v4206_v13 = vld [vmem:[#allocation4 + $0x8c] sm:$0xf]  ;;  %v3302_v14 = vor.u32 %v4205_v6, %v3299_v7 }
  0x39   : > { %502 = vmatpush.bf16.msra.mxu1 %v3110_v34  ;;  %521 = vmatpush.bf16.msra.mxu2 %v3114_v35  ;;  %v3307_v15 = vld [vmem:[#allocation4 + $0x98] sm:$0xf0]  ;;  %v3281_v16 = vld [vmem:[#allocation4 + $0x60] sm:$0xf]  ;;  %v4203_v17 = vld [vmem:[#allocation4 + $0x6c] sm:$0xf0]  ;;  %v3306_v20 = vor.u32 %v4208_v12, %v3305_v11 }
  0x3a   : > { %540 = vmatpush.bf16.msra.mxu3 %v3118_v37  ;;  %v4201_v18 = vld [vmem:[#allocation4 + $0x64] sm:$0xf]  ;;  %v3283_v19 = vld [vmem:[#allocation4 + $0x70] sm:$0xf0]  ;;  %v4156_v21 = vld [vmem:[%s4697_s11 + $0x8] sm:$0xff]  ;;  %v3310_v22 = vor.u32 %v4206_v13, %v3307_v15  ;;  %v3282_v23 = vor.u32 %v4203_v17, %v3281_v16  ;;  %p5388_p8 = scmp.lt.s32.totalorder %s1712_s29, 20 }
  0x3b   : > { %484 = vmatmul.bf16.vlgmr.msra.gmra.mxu0 %v4155_v36  ;;  %v3289_v24 = vld [vmem:[#allocation4 + $0x68] sm:$0xf]  ;;  %v4204_v25 = vld [vmem:[#allocation4 + $0x74] sm:$0xf0]  ;;  %v4202_v26 = vld [vmem:[#allocation4 + $0x6c] sm:$0xf]  ;;  %v3286_v27 = vor.u32 %v4201_v18, %v3283_v19 }
  0x3c   : > { %768 = vmatpush.bf16.msrb.mxu0 %v3346_v38  ;;  %503 = vmatmul.bf16.vlgmr.msra.gmra.mxu1 %v4155_v36  ;;  %v3291_v28 = vld [vmem:[#allocation4 + $0x78] sm:$0xf0]  ;;  %v3265_v29 = vld [vmem:[#allocation4 + $0x40] sm:$0xf]  ;;  %v4199_v30 = vld [vmem:[#allocation4 + $0x4c] sm:$0xf0]  ;;  %v3290_v33 = vor.u32 %v4204_v25, %v3289_v24 }
  0x3d   : > { %781 = vmatpush.bf16.msrb.mxu1 %v3350_v42  ;;  %522 = vmatmul.bf16.vlgmr.msra.gmra.mxu2 %v4155_v36  ;;  %v4197_v31 = vld [vmem:[#allocation4 + $0x44] sm:$0xf]  ;;  %v3267_v32 = vld [vmem:[#allocation4 + $0x50] sm:$0xf0]  ;;  %v3294_v34 = vor.u32 %v4202_v26, %v3291_v28  ;;  %v3266_v35 = vor.u32 %v4199_v30, %v3265_v29  ;;  %v4200_v37 = vld [vmem:[#allocation4 + $0x54] sm:$0xf0] }
  0x3e   : > { %541 = vmatmul.bf16.vlgmr.msra.gmra.mxu3 %v4155_v36  ;;  %794 = vmatpush.bf16.msrb.mxu2 %v3354_v48  ;;  %v3273_v36 = vld [vmem:[#allocation4 + $0x48] sm:$0xf]  ;;  %v4198_v38 = vld [vmem:[#allocation4 + $0x4c] sm:$0xf]  ;;  %v3270_v39 = vor.u32 %v4197_v31, %v3267_v32  ;;  %v3275_v40 = vld [vmem:[#allocation4 + $0x58] sm:$0xf0] }
  0x3f   : > { %807 = vmatpush.bf16.msrb.mxu3 %v3358_v49  ;;  %v3249_v41 = vld [vmem:[#allocation4 + $0x20] sm:$0xf]  ;;  %v4195_v42 = vld [vmem:[#allocation4 + $0x2c] sm:$0xf0]  ;;  %v4193_v43 = vld [vmem:[#allocation4 + $0x24] sm:$0xf]  ;;  %v3274_v45 = vor.u32 %v4200_v37, %v3273_v36  ;;  %v3278_v46 = vor.u32 %v4198_v38, %v3275_v40 }
  0x40   : > { %769 = vmatpush.bf16.msrb.mxu0 %v3330_v50  ;;  %v3251_v44 = vld [vmem:[#allocation4 + $0x30] sm:$0xf0]  ;;  %v3250_v47 = vor.u32 %v4195_v42, %v3249_v41  ;;  %v3257_v48 = vld [vmem:[#allocation4 + $0x28] sm:$0xf]  ;;  %v4196_v49 = vld [vmem:[#allocation4 + $0x34] sm:$0xf0] }
  0x41   : > { %782 = vmatpush.bf16.msrb.mxu1 %v3334_v54  ;;  %v4194_v50 = vld [vmem:[#allocation4 + $0x2c] sm:$0xf]  ;;  %v3254_v51 = vor.u32 %v4193_v43, %v3251_v44  ;;  %v3259_v52 = vld [vmem:[#allocation4 + $0x38] sm:$0xf0]  ;;  %v3233_v53 = vld [vmem:[#allocation4] sm:$0xf]  ;;  %v3258_v57 = vor.u32 %v4196_v49, %v3257_v48 }
  0x42   : > { %795 = vmatpush.bf16.msrb.mxu2 %v3338_v60  ;;  %v4191_v54 = vld [vmem:[#allocation4 + $0xc] sm:$0xf0]  ;;  %v4189_v55 = vld [vmem:[#allocation4 + $0x4] sm:$0xf]  ;;  %v3235_v56 = vld [vmem:[#allocation4 + $0x10] sm:$0xf0]  ;;  %v3262_v58 = vor.u32 %v4194_v50, %v3259_v52 }
  0x43   : > { %808 = vmatpush.bf16.msrb.mxu3 %v3342_v61  ;;  %v3234_v59 = vor.u32 %v4191_v54, %v3233_v53  ;;  %v3241_v60 = vld [vmem:[#allocation4 + $0x8] sm:$0xf]  ;;  %v4192_v61 = vld [vmem:[#allocation4 + $0x14] sm:$0xf0]  ;;  %v4190_v63 = vld [vmem:[#allocation4 + $0xc] sm:$0xf] }
  0x44   : > { %770 = vmatpush.bf16.msrb.mxu0 %v3314_v62  ;;  %v3238_v62 = vor.u32 %v4189_v55, %v3235_v56  ;;  %v3243_v0 = vld [vmem:[#allocation4 + $0x18] sm:$0xf0]  ;;  %v4904_v1 = vld [vmem:[%s5976_s5] sm:$0xff]  ;;  %v4251_v6 = vld [vmem:[%s5972_s1 + $0xec] sm:$0xf0]  ;;  %s2611_s20 = sadd.s32 3, %s4688_s30 }
  0x45   : > { %783 = vmatpush.bf16.msrb.mxu1 %v3318_v2  ;;  %v3242_v2 = vor.u32 %v4192_v61, %v3241_v60  ;;  %v3246_v3 = vor.u32 %v4190_v63, %v3243_v0  ;;  %v575_v4 = vpack.c.bf16 %v4904_v1, %v4904_v1  ;;  %v3474_v5 = vld [vmem:[%s5972_s1 + $0xe0] sm:$0xf]  ;;  %v4249_v7 = vld [vmem:[%s5972_s1 + $0xe4] sm:$0xf]  ;;  %v4252_v11 = vld [vmem:[%s5972_s1 + $0xf4] sm:$0xf0] }
  0x46   : > { %796 = vmatpush.bf16.msrb.mxu2 %v3322_v8  ;;  %v3475_v8 = vor.u32 %v4251_v6, %v3474_v5  ;;  %v3484_v15 = vld [vmem:[%s5972_s1 + $0xf8] sm:$0xf0]  ;;  %v3458_v17 = vld [vmem:[%s5972_s1 + $0xc0] sm:$0xf]  ;;  %v4247_v18 = vld [vmem:[%s5972_s1 + $0xcc] sm:$0xf0] }
  0x47   : > { %809 = vmatpush.bf16.msrb.mxu3 %v3326_v9  ;;  %v3476_v9 = vld [vmem:[%s5972_s1 + $0xf0] sm:$0xf0]  ;;  %v4245_v19 = vld [vmem:[%s5972_s1 + $0xc4] sm:$0xf]  ;;  %v4246_v26 = vld [vmem:[%s5972_s1 + $0xcc] sm:$0xf] }
  0x48   : > { %771 = vmatpush.bf16.msrb.mxu0 %v3298_v10  ;;  %v3482_v10 = vld [vmem:[%s5972_s1 + $0xe8] sm:$0xf]  ;;  %v3479_v12 = vor.u32 %v4249_v7, %v3476_v9  ;;  %v3442_v29 = vld [vmem:[%s5972_s1 + $0xa0] sm:$0xf]  ;;  %v4243_v30 = vld [vmem:[%s5972_s1 + $0xac] sm:$0xf0] }
  0x49   : > { %784 = vmatpush.bf16.msrb.mxu1 %v3302_v14  ;;  %v3483_v13 = vor.u32 %v4252_v11, %v3482_v10  ;;  %v4250_v14 = vld [vmem:[%s5972_s1 + $0xec] sm:$0xf]  ;;  %v4241_v31 = vld [vmem:[%s5972_s1 + $0xa4] sm:$0xf]  ;;  %v3443_v32 = vor.u32 %v4243_v30, %v3442_v29  ;;  %v3426_v41 = vld [vmem:[%s5972_s1 + $0x80] sm:$0xf] }
  0x4a   : > { %797 = vmatpush.bf16.msrb.mxu2 %v3306_v20  ;;  %v3487_v16 = vor.u32 %v4250_v14, %v3484_v15  ;;  %v3459_v20 = vor.u32 %v4247_v18, %v3458_v17  ;;  %v4242_v38 = vld [vmem:[%s5972_s1 + $0xac] sm:$0xf]  ;;  %v4239_v42 = vld [vmem:[%s5972_s1 + $0x8c] sm:$0xf0]  ;;  %v4237_v43 = vld [vmem:[%s5972_s1 + $0x84] sm:$0xf] }
  0x4b   : > { %810 = vmatpush.bf16.msrb.mxu3 %v3310_v22  ;;  %489 = vmatmul.bf16.gmra.mxu0 %v4156_v21  ;;  %v3466_v22 = vld [vmem:[%s5972_s1 + $0xc8] sm:$0xf]  ;;  %v3427_v44 = vor.u32 %v4239_v42, %v3426_v41  ;;  %v3436_v52 = vld [vmem:[%s5972_s1 + $0x98] sm:$0xf0]  ;;  %v3410_v55 = vld [vmem:[%s5972_s1 + $0x60] sm:$0xf] }
  0x4c   : > { %772 = vmatpush.bf16.msrb.mxu0 %v3282_v23  ;;  %508 = vmatmul.bf16.gmra.mxu1 %v4156_v21  ;;  %v4248_v23 = vld [vmem:[%s5972_s1 + $0xd4] sm:$0xf0]  ;;  %v4235_v56 = vld [vmem:[%s5972_s1 + $0x6c] sm:$0xf0]  ;;  %v3418_v60 = vld [vmem:[%s5972_s1 + $0x68] sm:$0xf] }
  0x4d   : > { %785 = vmatpush.bf16.msrb.mxu1 %v3286_v27  ;;  %527 = vmatmul.bf16.gmra.mxu2 %v4156_v21  ;;  %v3467_v25 = vor.u32 %v4248_v23, %v3466_v22  ;;  %v3468_v27 = vld [vmem:[%s5972_s1 + $0xd8] sm:$0xf0]  ;;  %v4236_v61 = vld [vmem:[%s5972_s1 + $0x74] sm:$0xf0]  ;;  %v4234_v0 = vld [vmem:[%s5972_s1 + $0x6c] sm:$0xf] }
  0x4e   : > { %546 = vmatmul.bf16.gmra.mxu3 %v4156_v21  ;;  %798 = vmatpush.bf16.msrb.mxu2 %v3290_v33  ;;  %v3460_v21 = vld [vmem:[%s5972_s1 + $0xd0] sm:$0xf0]  ;;  %v3471_v28 = vor.u32 %v4246_v26, %v3468_v27  ;;  %v3419_v63 = vor.u32 %v4236_v61, %v3418_v60  ;;  %v4231_v5 = vld [vmem:[%s5972_s1 + $0x4c] sm:$0xf0]  ;;  %v4229_v6 = vld [vmem:[%s5972_s1 + $0x44] sm:$0xf] }
  0x4f   : > { %811 = vmatpush.bf16.msrb.mxu3 %v3294_v34  ;;  %v3463_v24 = vor.u32 %v4245_v19, %v3460_v21  ;;  %v3444_v33 = vld [vmem:[%s5972_s1 + $0xb0] sm:$0xf0]  ;;  %v3450_v34 = vld [vmem:[%s5972_s1 + $0xa8] sm:$0xf]  ;;  %v4232_v11 = vld [vmem:[%s5972_s1 + $0x54] sm:$0xf0] }
  0x50   : > { %773 = vmatpush.bf16.msrb.mxu0 %v3266_v35  ;;  %v4244_v35 = vld [vmem:[%s5972_s1 + $0xb4] sm:$0xf0]  ;;  %v3447_v36 = vor.u32 %v4241_v31, %v3444_v33  ;;  %v3396_v9 = vld [vmem:[%s5972_s1 + $0x50] sm:$0xf0]  ;;  %v3402_v10 = vld [vmem:[%s5972_s1 + $0x48] sm:$0xf] }
  0x51   : > { %786 = vmatpush.bf16.msrb.mxu1 %v3270_v39  ;;  %v3451_v37 = vor.u32 %v4244_v35, %v3450_v34  ;;  %v3452_v39 = vld [vmem:[%s5972_s1 + $0xb8] sm:$0xf0]  ;;  %v3399_v14 = vor.u32 %v4229_v6, %v3396_v9  ;;  %v3403_v15 = vor.u32 %v4232_v11, %v3402_v10  ;;  %v4227_v21 = vld [vmem:[%s5972_s1 + $0x2c] sm:$0xf0]  ;;  %v4225_v22 = vld [vmem:[%s5972_s1 + $0x24] sm:$0xf] }
  0x52   : > { %799 = vmatpush.bf16.msrb.mxu2 %v3274_v45  ;;  %v3455_v40 = vor.u32 %v4242_v38, %v3452_v39  ;;  %v3428_v45 = vld [vmem:[%s5972_s1 + $0x90] sm:$0xf0]  ;;  %v3404_v17 = vld [vmem:[%s5972_s1 + $0x58] sm:$0xf0]  ;;  %v4228_v26 = vld [vmem:[%s5972_s1 + $0x34] sm:$0xf0] }
  0x53   : > { %812 = vmatpush.bf16.msrb.mxu3 %v3278_v46  ;;  %v3434_v46 = vld [vmem:[%s5972_s1 + $0x88] sm:$0xf]  ;;  %v3431_v49 = vor.u32 %v4237_v43, %v3428_v45  ;;  %v4226_v29 = vld [vmem:[%s5972_s1 + $0x2c] sm:$0xf]  ;;  %v3388_v30 = vld [vmem:[%s5972_s1 + $0x38] sm:$0xf0] }
  0x54   : > { %774 = vmatpush.bf16.msrb.mxu0 %v3250_v47  ;;  %v4240_v47 = vld [vmem:[%s5972_s1 + $0x94] sm:$0xf0]  ;;  %v3391_v31 = vor.u32 %v4226_v29, %v3388_v30  ;;  %v4223_v33 = vld [vmem:[%s5972_s1 + $0xc] sm:$0xf0]  ;;  %v4221_v34 = vld [vmem:[%s5972_s1 + $0x4] sm:$0xf] }
  0x55   : > { %787 = vmatpush.bf16.msrb.mxu1 %v3254_v51  ;;  %v3435_v50 = vor.u32 %v4240_v47, %v3434_v46  ;;  %v4238_v51 = vld [vmem:[%s5972_s1 + $0x8c] sm:$0xf]  ;;  %v3370_v38 = vld [vmem:[%s5972_s1 + $0x8] sm:$0xf]  ;;  %v4224_v39 = vld [vmem:[%s5972_s1 + $0x14] sm:$0xf0] }
  0x56   : > { %800 = vmatpush.bf16.msrb.mxu2 %v3258_v57  ;;  %v3439_v54 = vor.u32 %v4238_v51, %v3436_v52  ;;  %v4233_v57 = vld [vmem:[%s5972_s1 + $0x64] sm:$0xf]  ;;  %v3371_v43 = vor.u32 %v4224_v39, %v3370_v38  ;;  %v3372_v45 = vld [vmem:[%s5972_s1 + $0x18] sm:$0xf0]  ;;  %v3605_v46 = vld [vmem:[#allocation4 + $0xe0] sm:$0xf] }
  0x57   : > { %813 = vmatpush.bf16.msrb.mxu3 %v3262_v58  ;;  %v3411_v58 = vor.u32 %v4235_v56, %v3410_v55  ;;  %v4281_v51 = vld [vmem:[#allocation4 + $0xe4] sm:$0xf]  ;;  %v3607_v52 = vld [vmem:[#allocation4 + $0xf0] sm:$0xf0]  ;;  %v3613_v56 = vld [vmem:[#allocation4 + $0xe8] sm:$0xf] }
  0x58   : > { %775 = vmatpush.bf16.msrb.mxu0 %v3234_v59  ;;  %v3412_v59 = vld [vmem:[%s5972_s1 + $0x70] sm:$0xf0]  ;;  %v3610_v55 = vor.u32 %v4281_v51, %v3607_v52  ;;  %v3615_v60 = vld [vmem:[#allocation4 + $0xf8] sm:$0xf0]  ;;  %v3589_v61 = vld [vmem:[#allocation4 + $0xc0] sm:$0xf] }
  0x59   : > { %788 = vmatpush.bf16.msrb.mxu1 %v3238_v62  ;;  %v3415_v62 = vor.u32 %v4233_v57, %v3412_v59  ;;  %v4284_v57 = vld [vmem:[#allocation4 + $0xf4] sm:$0xf0]  ;;  %v3599_v9 = vld [vmem:[#allocation4 + $0xd8] sm:$0xf0]  ;;  %v5123_v10 = vld [vmem:[%s5974_s3] sm:$0xf] }
  0x5a   : > { %801 = vmatpush.bf16.msrb.mxu2 %v3242_v2  ;;  %v3420_v2 = vld [vmem:[%s5972_s1 + $0x78] sm:$0xf0]  ;;  %v3614_v59 = vor.u32 %v4284_v57, %v3613_v56  ;;  %v4280_v6 = vld [vmem:[#allocation4 + $0xd4] sm:$0xf0]  ;;  %v4274_v29 = vld [vmem:[#allocation4 + $0xac] sm:$0xf] }
  0x5b   : > { %814 = vmatpush.bf16.msrb.mxu3 %v3246_v3  ;;  %776 = vmatmul.bf16.vlgmr.msrb.gmra.mxu0 %v575_v4  ;;  %v3423_v3 = vor.u32 %v4234_v0, %v3420_v2  ;;  %v4277_v2 = vld [vmem:[#allocation4 + $0xc4] sm:$0xf]  ;;  %v3583_v30 = vld [vmem:[#allocation4 + $0xb8] sm:$0xf0]  ;;  %v4267_v56 = vld [vmem:[#allocation4 + $0x6c] sm:$0xf0] }
  0x5c   : > { %789 = vmatmul.bf16.vlgmr.msrb.gmra.mxu1 %v575_v4  ;;  %1014 = vmatpush.bf16.msra.mxu0 %v3475_v8  ;;  %v4269_v38 = vld [vmem:[#allocation4 + $0x84] sm:$0xf]  ;;  %s1139_s16 = scalar_select %p247_p7, 1, 0 }
  0x5d   : > { %802 = vmatmul.bf16.vlgmr.msrb.gmra.mxu2 %v575_v4  ;;  %1027 = vmatpush.bf16.msra.mxu1 %v3479_v12  ;;  %v4265_v57 = vld [vmem:[#allocation4 + $0x64] sm:$0xf]  ;;  %s1714_s8 = scalar_select %p5388_p8, 1, 0 }
  0x5e   : > { %815 = vmatmul.bf16.vlgmr.msrb.gmra.mxu3 %v575_v4  ;;  %1040 = vmatpush.bf16.msra.mxu2 %v3483_v13  ;;  %v3394_v4 = vld [vmem:[%s5972_s1 + $0x40] sm:$0xf]  ;;  %p5831_p10 = scmp.lt.s32.totalorder %s2611_s20, 20  ;;  %s2742_s24 = sadd.s32 4, %s4688_s30 }
  0x5f   : > { %1053 = vmatpush.bf16.msra.mxu3 %v3487_v16  ;;  %v3395_v8 = vor.u32 %v4231_v5, %v3394_v4  ;;  %v4230_v16 = vld [vmem:[%s5972_s1 + $0x4c] sm:$0xf]  ;;  %v3597_v4 = vld [vmem:[#allocation4 + $0xc8] sm:$0xf]  ;;  %p5889_p11 = scmp.lt.s32.totalorder %s2742_s24, 20  ;;  %s2873_s28 = sadd.s32 5, %s4688_s30 }
  0x60   : > { %1015 = vmatpush.bf16.msra.mxu0 %v3459_v20  ;;  %v3407_v19 = vor.u32 %v4230_v16, %v3404_v17  ;;  %v3378_v20 = vld [vmem:[%s5972_s1 + $0x20] sm:$0xf]  ;;  %v3598_v11 = vor.u32 %v4280_v6, %v3597_v4  ;;  %v4275_v17 = vld [vmem:[#allocation4 + $0xac] sm:$0xf0]  ;;  %v4266_v4 = vld [vmem:[#allocation4 + $0x6c] sm:$0xf] }
  0x61   : > { %1028 = vmatpush.bf16.msra.mxu1 %v3463_v24  ;;  %v3379_v23 = vor.u32 %v4227_v21, %v3378_v20  ;;  %v3380_v24 = vld [vmem:[%s5972_s1 + $0x30] sm:$0xf0]  ;;  %v3573_v16 = vld [vmem:[#allocation4 + $0xa0] sm:$0xf]  ;;  %v5149_v6 = vperm.slane %v5123_v10, 2  ;;  %p5915_p12 = scmp.lt.s32.totalorder %s2873_s28, 20 }
  0x62   : > { %1041 = vmatpush.bf16.msra.mxu2 %v3467_v25  ;;  %v3386_v25 = vld [vmem:[%s5972_s1 + $0x28] sm:$0xf]  ;;  %v3383_v27 = vor.u32 %v4225_v22, %v3380_v24  ;;  %v3359_v22 = vld [vmem:[%s4697_s11 + $0x10] sm:$0xf]  ;;  %v3575_v24 = vld [vmem:[#allocation4 + $0xb0] sm:$0xf0] }
  0x63   : > { %1054 = vmatpush.bf16.msra.mxu3 %v3471_v28  ;;  %v3387_v28 = vor.u32 %v4228_v26, %v3386_v25  ;;  %v3581_v25 = vld [vmem:[#allocation4 + $0xa8] sm:$0xf]  ;;  %s2613_s23 = scalar_select %p5831_p10, 1, 0 }
  0x64   : > { %1016 = vmatpush.bf16.msra.mxu0 %v3443_v32  ;;  %v3362_v32 = vld [vmem:[%s5972_s1] sm:$0xf]  ;;  %s2744_s27 = scalar_select %p5889_p11, 1, 0 }
  0x65   : > { %1029 = vmatpush.bf16.msra.mxu1 %v3447_v36  ;;  %v3363_v36 = vor.u32 %v4223_v33, %v3362_v32  ;;  %v5138_v32 = vperm.slane %v5123_v10, 1  ;;  %s2875_s7 = scalar_select %p5915_p12, 1, 0 }
  0x66   : > { %1042 = vmatpush.bf16.msra.mxu2 %v3451_v37  ;;  %v3364_v37 = vld [vmem:[%s5972_s1 + $0x10] sm:$0xf0]  ;;  %p4427_p13 = scmp.eq.s32.totalorder %s4681_s25, 2  ;;  %s3020_s13 = sshll.u32 %s5975_s4, 4  ;;  %s3021_s13 = int_to_ptr.hbm [resolvable:$true] %s3020_s13 }
  0x67   : > { %1055 = vmatpush.bf16.msra.mxu3 %v3455_v40  ;;  %v3367_v42 = vor.u32 %v4221_v34, %v3364_v37  ;;  %v3586_v34 = vor.u32 %v4274_v29, %v3583_v30  ;;  %v4271_v37 = vld [vmem:[#allocation4 + $0x8c] sm:$0xf0]  ;;  %s4635_s14 = smov 64   ;;  %s4636_s15 = smov 4  }
  0x68   : > { %1017 = vmatpush.bf16.msra.mxu0 %v3427_v44  ;;  %v4222_v44 = vld [vmem:[%s5972_s1 + $0xc] sm:$0xf] }
  0x69   : > { %1030 = vmatpush.bf16.msra.mxu1 %v3431_v49  ;;  %v3375_v49 = vor.u32 %v4222_v44, %v3372_v45  ;;  %v4272_v44 = vld [vmem:[#allocation4 + $0x94] sm:$0xf0] }
  0x6a   : > { %1043 = vmatpush.bf16.msra.mxu2 %v3435_v50  ;;  %v4283_v50 = vld [vmem:[#allocation4 + $0xec] sm:$0xf0] }
  0x6b   : > { %1056 = vmatpush.bf16.msra.mxu3 %v3439_v54  ;;  %v3606_v54 = vor.u32 %v4283_v50, %v3605_v46  ;;  %v3567_v50 = vld [vmem:[#allocation4 + $0x98] sm:$0xf0] }
  0x6c   : > { %1018 = vmatpush.bf16.msra.mxu0 %v3411_v58  ;;  %v4282_v58 = vld [vmem:[#allocation4 + $0xec] sm:$0xf] }
  0x6d   : > { %1031 = vmatpush.bf16.msra.mxu1 %v3415_v62  ;;  %v4279_v62 = vld [vmem:[#allocation4 + $0xcc] sm:$0xf0] }
  0x6e   : > { %1044 = vmatpush.bf16.msra.mxu2 %v3419_v63  ;;  %v3618_v63 = vor.u32 %v4282_v58, %v3615_v60  ;;  %v3590_v0 = vor.u32 %v4279_v62, %v3589_v61  ;;  %v3543_v62 = vld [vmem:[#allocation4 + $0x70] sm:$0xf0] }
  0x6f   : > { %1057 = vmatpush.bf16.msra.mxu3 %v3423_v3  ;;  %v3591_v3 = vld [vmem:[#allocation4 + $0xd0] sm:$0xf0] }
  0x70   : > { %1019 = vmatpush.bf16.msra.mxu0 %v3395_v8  ;;  %v3594_v5 = vor.u32 %v4277_v2, %v3591_v3  ;;  %v4278_v8 = vld [vmem:[#allocation4 + $0xcc] sm:$0xf]  ;;  %v4268_v3 = vld [vmem:[#allocation4 + $0x74] sm:$0xf0] }
  0x71   : > { %1032 = vmatpush.bf16.msra.mxu1 %v3399_v14  ;;  %v3602_v14 = vor.u32 %v4278_v8, %v3599_v9 }
  0x72   : > { %1045 = vmatpush.bf16.msra.mxu2 %v3403_v15 }
  0x73   : > { %1058 = vmatpush.bf16.msra.mxu3 %v3407_v19  ;;  %v4273_v19 = vld [vmem:[#allocation4 + $0xa4] sm:$0xf] }
  0x74   : > { %1020 = vmatpush.bf16.msra.mxu0 %v3379_v23  ;;  %v3574_v23 = vor.u32 %v4275_v17, %v3573_v16  ;;  %v4263_v16 = vld [vmem:[#allocation4 + $0x4c] sm:$0xf0] }
  0x75   : > { %1033 = vmatpush.bf16.msra.mxu1 %v3383_v27  ;;  %v3578_v27 = vor.u32 %v4273_v19, %v3575_v24 }
  0x76   : > { %1046 = vmatpush.bf16.msra.mxu2 %v3387_v28  ;;  %v4276_v28 = vld [vmem:[#allocation4 + $0xb4] sm:$0xf0] }
  0x77   : > { %1059 = vmatpush.bf16.msra.mxu3 %v3391_v31  ;;  %v5135_v31 = vperm.slane %v5123_v10, 0  ;;  %v3582_v33 = vor.u32 %v4276_v28, %v3581_v25  ;;  %v3533_v25 = vld [vmem:[#allocation4 + $0x48] sm:$0xf]  ;;  %v4262_v28 = vld [vmem:[#allocation4 + $0x4c] sm:$0xf] }
  0x78   : > { %1021 = vmatpush.bf16.msra.mxu0 %v3363_v36  ;;  %v3557_v36 = vld [vmem:[#allocation4 + $0x80] sm:$0xf] }
  0x79   : > { %1034 = vmatpush.bf16.msra.mxu1 %v3367_v42  ;;  %v3558_v39 = vor.u32 %v4271_v37, %v3557_v36  ;;  %v3559_v42 = vld [vmem:[#allocation4 + $0x90] sm:$0xf0]  ;;  %v4259_v36 = vld [vmem:[#allocation4 + $0x2c] sm:$0xf0] }
  0x7a   : > { %1047 = vmatpush.bf16.msra.mxu2 %v3371_v43  ;;  %v3565_v43 = vld [vmem:[#allocation4 + $0x88] sm:$0xf]  ;;  %v3562_v45 = vor.u32 %v4269_v38, %v3559_v42  ;;  %v3511_v42 = vld [vmem:[#allocation4 + $0x30] sm:$0xf0] }
  0x7b   : > { %1060 = vmatpush.bf16.msra.mxu3 %v3375_v49  ;;  %1022 = vmatmul.bf16.vlgmr.msra.gmra.mxu0 %v3359_v22  ;;  %v3566_v46 = vor.u32 %v4272_v44, %v3565_v43  ;;  %v4270_v49 = vld [vmem:[#allocation4 + $0x8c] sm:$0xf]  ;;  %v3517_v43 = vld [vmem:[#allocation4 + $0x28] sm:$0xf] }
  0x7c   : > { %1342 = vmatpush.bf16.msrb.mxu0 %v3606_v54  ;;  %1035 = vmatmul.bf16.vlgmr.msra.gmra.mxu1 %v3359_v22  ;;  %v3570_v51 = vor.u32 %v4270_v49, %v3567_v50 }
  0x7d   : > { %1355 = vmatpush.bf16.msrb.mxu1 %v3610_v55  ;;  %1048 = vmatmul.bf16.vlgmr.msra.gmra.mxu2 %v3359_v22  ;;  %v3541_v55 = vld [vmem:[#allocation4 + $0x60] sm:$0xf] }
  0x7e   : > { %1368 = vmatpush.bf16.msrb.mxu2 %v3614_v59  ;;  %1061 = vmatmul.bf16.vlgmr.msra.gmra.mxu3 %v3359_v22  ;;  %v3542_v61 = vor.u32 %v4267_v56, %v3541_v55  ;;  %v4261_v22 = vld [vmem:[#allocation4 + $0x44] sm:$0xf] }
  0x7f   : > { %1381 = vmatpush.bf16.msrb.mxu3 %v3618_v63  ;;  %v3549_v63 = vld [vmem:[#allocation4 + $0x68] sm:$0xf] }
  0x80   : > { %1343 = vmatpush.bf16.msrb.mxu0 %v3590_v0 }
  0x81   : > { %1356 = vmatpush.bf16.msrb.mxu1 %v3594_v5  ;;  %v3551_v5 = vld [vmem:[#allocation4 + $0x78] sm:$0xf0] }
  0x82   : > { %1369 = vmatpush.bf16.msrb.mxu2 %v3598_v11  ;;  %v3554_v9 = vor.u32 %v4266_v4, %v3551_v5  ;;  %v3503_v4 = vld [vmem:[#allocation4 + $0x18] sm:$0xf0] }
  0x83   : > { %1382 = vmatpush.bf16.msrb.mxu3 %v3602_v14  ;;  %v3525_v14 = vld [vmem:[#allocation4 + $0x40] sm:$0xf] }
  0x84   : > { %1344 = vmatpush.bf16.msrb.mxu0 %v3574_v23  ;;  %v3526_v19 = vor.u32 %v4263_v16, %v3525_v14  ;;  %v3527_v23 = vld [vmem:[#allocation4 + $0x50] sm:$0xf0]  ;;  %v5154_v16 = vperm.slane %v5123_v10, 3 }
  0x85   : > { %1357 = vmatpush.bf16.msrb.mxu1 %v3578_v27  ;;  %v3530_v24 = vor.u32 %v4261_v22, %v3527_v23  ;;  %v4264_v27 = vld [vmem:[#allocation4 + $0x54] sm:$0xf0] }
  0x86   : > { %1370 = vmatpush.bf16.msrb.mxu2 %v3582_v33  ;;  %v3534_v30 = vor.u32 %v4264_v27, %v3533_v25  ;;  %v3535_v33 = vld [vmem:[#allocation4 + $0x58] sm:$0xf0] }
  0x87   : > { %1383 = vmatpush.bf16.msrb.mxu3 %v3586_v34  ;;  %v3509_v34 = vld [vmem:[#allocation4 + $0x20] sm:$0xf]  ;;  %v3538_v38 = vor.u32 %v4262_v28, %v3535_v33 }
  0x88   : > { %1345 = vmatpush.bf16.msrb.mxu0 %v3558_v39  ;;  %v4257_v39 = vld [vmem:[#allocation4 + $0x24] sm:$0xf]  ;;  %v3510_v49 = vor.u32 %v4259_v36, %v3509_v34 }
  0x89   : > { %1358 = vmatpush.bf16.msrb.mxu1 %v3562_v45  ;;  %v3514_v50 = vor.u32 %v4257_v39, %v3511_v42 }
  0x8a   : > { %1371 = vmatpush.bf16.msrb.mxu2 %v3566_v46 }
  0x8b   : > { %1384 = vmatpush.bf16.msrb.mxu3 %v3570_v51  ;;  %v4260_v51 = vld [vmem:[#allocation4 + $0x34] sm:$0xf0] }
  0x8c   : > { %1346 = vmatpush.bf16.msrb.mxu0 %v3542_v61  ;;  %v3518_v56 = vor.u32 %v4260_v51, %v3517_v43  ;;  %v570_v51 = vld [vmem:[%s5977_s6] sm:$0xff] }
  0x8f   : > { %1385 = vmatpush.bf16.msrb.mxu3 %v3554_v9 }
  0x90   : > { %1347 = vmatpush.bf16.msrb.mxu0 %v3526_v19 }
  0x93   : > { %1386 = vmatpush.bf16.msrb.mxu3 %v3538_v38 }
  0x94   : > { %1348 = vmatpush.bf16.msrb.mxu0 %v3510_v49 }
  0xb8   : > { %v4998_v48 = vpop.f32.mrf.mxu0 }
  0xb9   : > { %v5006_v53 = vpop.f32.mrf.mxu1  ;;  %v486_v52 = vadd.f32 %v4998_v48, %v5135_v31  ;;  %v3546_v48 = vor.u32 %v4265_v57, %v3543_v62  ;;  %v3493_v57 = vld [vmem:[#allocation4] sm:$0xf] }
  0xba   : > { %v505_v58 = vadd.f32 %v5006_v53, %v5138_v32  ;;  %v3550_v53 = vor.u32 %v4268_v3, %v3549_v63  ;;  %v3495_v63 = vld [vmem:[#allocation4 + $0x10] sm:$0xf0]  ;;  %v4254_v3 = vld [vmem:[#allocation4 + $0xc] sm:$0xf] }
  0xbb   : > { %1359 = vmatpush.bf16.msrb.mxu1 %v3546_v48  ;;  %v4256_v48 = vld [vmem:[#allocation4 + $0x14] sm:$0xf0] }
  0xbc   : > { %1372 = vmatpush.bf16.msrb.mxu2 %v3550_v53 }
  0xbf   : > { %1360 = vmatpush.bf16.msrb.mxu1 %v3530_v24 }
  0xc0   : > { %v5041_v7 = vpop.f32.mrf.mxu2  ;;  %v5054_v13 = vpop.f32.mrf.mxu0  ;;  %1373 = vmatpush.bf16.msrb.mxu2 %v3534_v30 }
  0xc1   : > { %v5052_v12 = vpop.f32.mrf.mxu3  ;;  %v5062_v18 = vpop.f32.mrf.mxu1  ;;  %v524_v29 = vadd.f32 %v5041_v7, %v5149_v6  ;;  %v4258_v7 = vld [vmem:[#allocation4 + $0x2c] sm:$0xf] }
  0xc2   : > { %v543_v24 = vadd.f32 %v5052_v12, %v5154_v16 }
  0xc3   : > { %1361 = vmatpush.bf16.msrb.mxu1 %v3514_v50 }
  0xc4   : > { %1374 = vmatpush.bf16.msrb.mxu2 %v3518_v56 }
  0xc8   : > { %v5097_v35 = vpop.f32.mrf.mxu2  ;;  %v5110_v41 = vpop.f32.mrf.mxu0 }
  0xc9   : > { %v5108_v40 = vpop.f32.mrf.mxu3  ;;  %v5118_v47 = vpop.f32.mrf.mxu1 }
  0xd0   : > { %v5125_v15 = vpop.f32.mrf.mxu2  ;;  %v5129_v21 = vpop.f32.mrf.mxu0 }
  0xd1   : > { %v5127_v20 = vpop.f32.mrf.mxu3  ;;  %v5132_v26 = vpop.f32.mrf.mxu1 }
  0xd8   : > { %v5142_v54 = vpop.f32.mrf.mxu2  ;;  %v777_v60 = vpop.f32.mrf.mxu0 }
  0xd9   : > { %v5146_v59 = vpop.f32.mrf.mxu3  ;;  %v1071_v0 = vadd.f32 %v777_v60, %v486_v52  ;;  %v790_v2 = vpop.f32.mrf.mxu1  ;;  %v3519_v52 = vld [vmem:[#allocation4 + $0x38] sm:$0xf0]  ;;  %v4253_v60 = vld [vmem:[#allocation4 + $0x4] sm:$0xf] }
  0xda   : > { %v1072_v8 = vadd.f32 %v790_v2, %v505_v58  ;;  %v4255_v58 = vld [vmem:[#allocation4 + $0xc] sm:$0xf0]  ;;  %v3522_v62 = vor.u32 %v4258_v7, %v3519_v52  ;;  %v3498_v9 = vor.u32 %v4253_v60, %v3495_v63  ;;  %v1140_v52 = vstv %s1139_s16  ;;  %s3004_s16 = sadd.s32 6, %s4688_s30 }
  0xdb   : > { %v3488_v11 = vmul.f32 -1.442695, %v1071_v0  ;;  %v3501_v0 = vld [vmem:[#allocation4 + $0x8] sm:$0xf]  ;;  %v3494_v53 = vor.u32 %v4255_v58, %v3493_v57  ;;  %vm5163_vm8 = vcmp.eq.s32.totalorder %v1140_v52, 1  ;;  %p5947_p0 = scmp.lt.s32.totalorder %s3004_s16, 20 }
  0xdc   : > { %v3489_v17 = vmul.f32 -1.442695, %v1072_v8  ;;  %v3502_v14 = vor.u32 %v4256_v48, %v3501_v0  ;;  %1387 = vmatpush.bf16.msrb.mxu3 %v3522_v62  ;;  %1362 = vmatpush.bf16.msrb.mxu1 %v3498_v9  ;;  %v4305_v52 = vld [vmem:[%s5972_s1 + $0xa4] sm:$0xf]  ;;  %v3686_v0 = vld [vmem:[%s5972_s1 + $0x80] sm:$0xf] }
  0xdd   : > { %4444 = vpow2.f32 %v3488_v11  ;;  %1349 = vmatpush.bf16.msrb.mxu0 %v3494_v53 }
  0xde   : > { %4446 = vpow2.f32 %v3489_v17  ;;  %v3506_v17 = vor.u32 %v4254_v3, %v3503_v4  ;;  %1375 = vmatpush.bf16.msrb.mxu2 %v3502_v14 }
  0xe0   : > { %v803_v37 = vpop.f32.mrf.mxu2  ;;  %v779_v46 = vpop.f32.mrf.mxu0  ;;  %1388 = vmatpush.bf16.msrb.mxu3 %v3506_v17 }
  0xe1   : > { %v1073_v44 = vadd.f32 %v803_v37, %v524_v29  ;;  %v816_v45 = vpop.f32.mrf.mxu3  ;;  %v792_v55 = vpop.f32.mrf.mxu1 }
  0xe2   : > { %v1074_v28 = vadd.f32 %v816_v45, %v543_v24 }
  0xe3   : > { %v3490_v61 = vmul.f32 -1.442695, %v1073_v44  ;;  %v4445_v2 = vpop.eup %4444 }
  0xe4   : > { %v4447_v5 = vpop.eup %4446  ;;  %v1084_v8 = vadd.f32 1.0, %v4445_v2 }
  0xe5   : > { %4448 = vpow2.f32 %v3490_v61  ;;  %v1085_v11 = vadd.f32 1.0, %v4447_v5 }
  0xe6   : > { %4450 = vrcp.f32 %v1084_v8  ;;  %v1098_v36 = vand.u32 2147483648, %v1084_v8  ;;  %v1096_v39 = vand.u32 2147483647, %v1084_v8  ;;  %vm1092_vm2 = vweird.f32 %v1084_v8 }
  0xe7   : > { %4452 = vrcp.f32 %v1085_v11  ;;  %v1113_v37 = vand.u32 2147483648, %v1085_v11  ;;  %v1111_v42 = vand.u32 2147483647, %v1085_v11  ;;  %vm1107_vm3 = vweird.f32 %v1085_v11 }
  0xe8   : > { %v805_v19 = vpop.f32.mrf.mxu2  ;;  %v1099_v46 = vor.u32 1.1754944e-38, %v1098_v36  ;;  %vm1097_vm6 = vcmp.eq.f32.partialorder %v1096_v39, 8.507059e+37  ;;  %v3720_v39 = vld [vmem:[%s5972_s1 + $0xd0] sm:$0xf0] }
  0xe9   : > { %v818_v22 = vpop.f32.mrf.mxu3  ;;  %v1114_v50 = vor.u32 1.1754944e-38, %v1113_v37  ;;  %vm1112_vm7 = vcmp.eq.f32.partialorder %v1111_v42, 8.507059e+37  ;;  %v4311_v37 = vld [vmem:[%s5972_s1 + $0xcc] sm:$0xf0] }
  0xea   : > { %v3734_v22 = vld [vmem:[%s5972_s1 + $0xe0] sm:$0xf] }
  0xeb   : > { %v4449_v23 = vpop.eup %4448 }
  0xec   : > { %v1086_v25 = vadd.f32 1.0, %v4449_v23  ;;  %v4451_v27 = vpop.eup %4450  ;;  %v4315_v23 = vld [vmem:[%s5972_s1 + $0xec] sm:$0xf0] }
  0xed   : > { %v4453_v10 = vpop.eup %4452  ;;  %v1088_v29 = vmul.f32 %v4451_v27, %v1084_v8  ;;  %vm1093_vm0 = vweird.f32 %v4451_v27  ;;  %v3735_v24 = vor.u32 %v4315_v23, %v3734_v22  ;;  %v3696_v22 = vld [vmem:[%s5972_s1 + $0x98] sm:$0xf0] }
  0xee   : > { %4454 = vrcp.f32 %v1086_v25  ;;  %v1103_v30 = vmul.f32 %v4453_v10, %v1085_v11  ;;  %vm1108_vm1 = vweird.f32 %v4453_v10  ;;  %vm1094_vm4 = vmor %vm1092_vm2, %vm1093_vm0  ;;  %v1128_v3 = vand.u32 2147483648, %v1086_v25 }
  0xef   : > { %v1089_v33 = vsub.f32 1.0, %v1088_v29  ;;  %4456 = vtanh.f32 %v1074_v28  ;;  %vm1109_vm5 = vmor %vm1107_vm3, %vm1108_vm1  ;;  %vm1122_vm10 = vweird.f32 %v1086_v25  ;;  %v1126_v5 = vand.u32 2147483647, %v1086_v25  ;;  %v4316_v28 = vld [vmem:[%s5972_s1 + $0xf4] sm:$0xf0]  ;;  %1588 = vmatpush.bf16.msra.mxu0 %v3735_v24 }
  0xf0   : > { %v1104_v34 = vsub.f32 1.0, %v1103_v30  ;;  %v1129_v53 = vor.u32 1.1754944e-38, %v1128_v3  ;;  %v4314_v30 = vld [vmem:[%s5972_s1 + $0xec] sm:$0xf]  ;;  %v4301_v3 = vld [vmem:[%s5972_s1 + $0x84] sm:$0xf] }
  0xf1   : > { %v1090_v38 = vmul.f32 %v4451_v27, %v1089_v33  ;;  %vm1127_vm12 = vcmp.eq.f32.partialorder %v1126_v5, 8.507059e+37  ;;  %v3744_v33 = vld [vmem:[%s5972_s1 + $0xf8] sm:$0xf0]  ;;  %v3688_v5 = vld [vmem:[%s5972_s1 + $0x90] sm:$0xf0] }
  0xf2   : > { %v1105_v12 = vmul.f32 %v4453_v10, %v1104_v34  ;;  %v3718_v34 = vld [vmem:[%s5972_s1 + $0xc0] sm:$0xf]  ;;  %v3747_v36 = vor.u32 %v4314_v30, %v3744_v33 }
  0xf3   : > { %v1091_v44 = vadd.f32 %v4451_v27, %v1090_v38  ;;  %v4309_v38 = vld [vmem:[%s5972_s1 + $0xc4] sm:$0xf]  ;;  %v3670_v33 = vld [vmem:[%s5972_s1 + $0x60] sm:$0xf] }
  0xf4   : > { %v4455_v43 = vpop.eup %4454  ;;  %v1106_v49 = vadd.f32 %v4453_v10, %v1105_v12  ;;  %v3719_v12 = vor.u32 %v4311_v37, %v3718_v34  ;;  %v3723_v42 = vor.u32 %v4309_v38, %v3720_v39  ;;  %1627 = vmatpush.bf16.msra.mxu3 %v3747_v36  ;;  %v4299_v34 = vld [vmem:[%s5972_s1 + $0x6c] sm:$0xf0]  ;;  %v4297_v36 = vld [vmem:[%s5972_s1 + $0x64] sm:$0xf]  ;;  %v3672_v38 = vld [vmem:[%s5972_s1 + $0x70] sm:$0xf0] }
  0xf5   : > { %v1118_v45 = vmul.f32 %v4455_v43, %v1086_v25  ;;  %v1095_v7 = vsel %vm1094_vm4, %v4451_v27, %v1091_v44  ;;  %v4457_v55 = vpop.eup %4456  ;;  %vm1123_vm9 = vweird.f32 %v4455_v43  ;;  %v3736_v25 = vld [vmem:[%s5972_s1 + $0xf0] sm:$0xf0]  ;;  %v3742_v27 = vld [vmem:[%s5972_s1 + $0xe8] sm:$0xf]  ;;  %v4312_v44 = vld [vmem:[%s5972_s1 + $0xd4] sm:$0xf0]  ;;  %v3671_v37 = vor.u32 %v4299_v34, %v3670_v33 }
  0xf6   : > { %v1100_v57 = vsel %vm1097_vm6, %v1099_v46, %v1095_v7  ;;  %v1110_v58 = vsel %vm1109_vm5, %v4453_v10, %v1106_v49  ;;  %vm1124_vm11 = vmor %vm1122_vm10, %vm1123_vm9  ;;  %v3743_v29 = vor.u32 %v4316_v28, %v3742_v27  ;;  %v3728_v49 = vld [vmem:[%s5972_s1 + $0xd8] sm:$0xf0]  ;;  %1589 = vmatpush.bf16.msra.mxu0 %v3719_v12  ;;  %v4307_v7 = vld [vmem:[%s5972_s1 + $0xac] sm:$0xf0] }
  0xf7   : > { %v1119_v56 = vsub.f32 1.0, %v1118_v45  ;;  %v1115_v60 = vsel %vm1112_vm7, %v1114_v50, %v1110_v58  ;;  %v1134_v61 = vmul.f32 %v4457_v55, %v1100_v57  ;;  %v4310_v45 = vld [vmem:[%s5972_s1 + $0xcc] sm:$0xf]  ;;  %v3710_v57 = vld [vmem:[%s5972_s1 + $0xa8] sm:$0xf] }
  0xf8   : > { %v1133_v63 = vmul.f32 %v1115_v60, %v570_v51  ;;  %1614 = vmatpush.bf16.msra.mxu2 %v3743_v29  ;;  %v3731_v50 = vor.u32 %v4310_v45, %v3728_v49  ;;  %v4308_v58 = vld [vmem:[%s5972_s1 + $0xb4] sm:$0xf0]  ;;  %v3678_v39 = vld [vmem:[%s5972_s1 + $0x68] sm:$0xf]  ;;  %v3680_v45 = vld [vmem:[%s5972_s1 + $0x78] sm:$0xf0] }
  0xf9   : > { %v1120_v62 = vmul.f32 %v4455_v43, %v1119_v56  ;;  %v3704_v56 = vld [vmem:[%s5972_s1 + $0xb0] sm:$0xf0]  ;;  %v5276_v24 = vpop.f32.mrf.mxu1  ;;  %v4300_v12 = vld [vmem:[%s5972_s1 + $0x74] sm:$0xf0]  ;;  %v3654_v49 = vld [vmem:[%s5972_s1 + $0x40] sm:$0xf] }
  0xfa   : > { %v1135_v2 = vadd.f32 %v1134_v61, %v1133_v63  ;;  %1628 = vmatpush.bf16.msra.mxu3 %v3731_v50  ;;  %v3707_v60 = vor.u32 %v4305_v52, %v3704_v56  ;;  %v3711_v61 = vor.u32 %v4308_v58, %v3710_v57  ;;  %v3712_v63 = vld [vmem:[%s5972_s1 + $0xb8] sm:$0xf0]  ;;  %5981 = vst [vmem:[#allocation11_spill] sm:$0xff] %v5276_v24  ;;  %v4295_v50 = vld [vmem:[%s5972_s1 + $0x4c] sm:$0xf0] }
  0xfb   : > { %v1121_v48 = vadd.f32 %v4455_v43, %v1120_v62  ;;  %v4306_v62 = vld [vmem:[%s5972_s1 + $0xac] sm:$0xf]  ;;  %v3656_v52 = vld [vmem:[%s5972_s1 + $0x50] sm:$0xf0]  ;;  %v4296_v56 = vld [vmem:[%s5972_s1 + $0x54] sm:$0xf0] }
  0xfc   : > { %4458 = vtanh.f32 %v1135_v2  ;;  %v5169_v4 = vsel %vm5163_vm8, %v1135_v2, %v570_v51  ;;  %v3702_v51 = vld [vmem:[%s5972_s1 + $0xa0] sm:$0xf]  ;;  %v3715_v2 = vor.u32 %v4306_v62, %v3712_v63  ;;  %v4288_v33 = vld [vmem:[%s5972_s1 + $0x14] sm:$0xf0] }
  0xfd   : > { %v1125_v8 = vsel %vm1124_vm11, %v4455_v43, %v1121_v48  ;;  %v3726_v43 = vld [vmem:[%s5972_s1 + $0xc8] sm:$0xf]  ;;  %v3703_v55 = vor.u32 %v4307_v7, %v3702_v51  ;;  %v4303_v48 = vld [vmem:[%s5972_s1 + $0x8c] sm:$0xf0]  ;;  %v4293_v51 = vld [vmem:[%s5972_s1 + $0x44] sm:$0xf]  ;;  %v3655_v7 = vor.u32 %v4295_v50, %v3654_v49 }
  0xfe   : > { %v1130_v11 = vsel %vm1127_vm12, %v1129_v53, %v1125_v8  ;;  %v3727_v46 = vor.u32 %v4312_v44, %v3726_v43  ;;  %v3687_v8 = vor.u32 %v4303_v48, %v3686_v0  ;;  %v3694_v53 = vld [vmem:[%s5972_s1 + $0x88] sm:$0xf]  ;;  %1629 = vmatpush.bf16.msra.mxu3 %v3715_v2  ;;  %v3679_v43 = vor.u32 %v4300_v12, %v3678_v39  ;;  %v4298_v44 = vld [vmem:[%s5972_s1 + $0x6c] sm:$0xf]  ;;  %v3638_v63 = vld [vmem:[%s5972_s1 + $0x20] sm:$0xf] }
  0xff   : > { %1590 = vmatpush.bf16.msra.mxu0 %v3703_v55  ;;  %v3662_v55 = vld [vmem:[%s5972_s1 + $0x48] sm:$0xf]  ;;  %v3659_v57 = vor.u32 %v4293_v51, %v3656_v52  ;;  %v4291_v0 = vld [vmem:[%s5972_s1 + $0x2c] sm:$0xf0]  ;;  %v4289_v2 = vld [vmem:[%s5972_s1 + $0x24] sm:$0xf] }
 0x100   : > { %1615 = vmatpush.bf16.msra.mxu2 %v3727_v46  ;;  %v5278_v27 = vpop.f32.mrf.mxu2  ;;  %v3683_v46 = vor.u32 %v4298_v44, %v3680_v45  ;;  %v3663_v58 = vor.u32 %v4296_v56, %v3662_v55  ;;  %v3639_v48 = vor.u32 %v4291_v0, %v3638_v63  ;;  %v3865_v39 = vld [vmem:[#allocation4 + $0xe0] sm:$0xf]  ;;  %v3867_v44 = vld [vmem:[#allocation4 + $0xf0] sm:$0xf0]  ;;  %v3873_v49 = vld [vmem:[#allocation4 + $0xe8] sm:$0xf] }
 0x101   : > { %5982 = vst [vmem:[#allocation12_spill] sm:$0xff] %v5278_v27  ;;  %v1038_v28 = vpop.f32.mrf.mxu1  ;;  %v4348_v50 = vld [vmem:[#allocation4 + $0xf4] sm:$0xf0]  ;;  %v4346_v51 = vld [vmem:[#allocation4 + $0xec] sm:$0xf] }
 0x102   : > { %v4459_v9 = vpop.eup %4458  ;;  %v3875_v52 = vld [vmem:[#allocation4 + $0xf8] sm:$0xf0]  ;;  %v3849_v55 = vld [vmem:[#allocation4 + $0xc0] sm:$0xf]  ;;  %v4343_v56 = vld [vmem:[#allocation4 + $0xcc] sm:$0xf0] }
 0x103   : > { %v1137_v14 = vmul.f32 %v4459_v9, %v1130_v11  ;;  %v4304_v9 = vld [vmem:[%s5972_s1 + $0x94] sm:$0xf0]  ;;  %v4302_v11 = vld [vmem:[%s5972_s1 + $0x8c] sm:$0xf]  ;;  %1591 = vmatpush.bf16.msra.mxu0 %v3687_v8 }
 0x104   : > { %1616 = vmatpush.bf16.msra.mxu2 %v3711_v61  ;;  %v3699_v23 = vor.u32 %v4302_v11, %v3696_v22  ;;  %v3664_v61 = vld [vmem:[%s5972_s1 + $0x58] sm:$0xf0]  ;;  %v4292_v8 = vld [vmem:[%s5972_s1 + $0x34] sm:$0xf0]  ;;  %v4290_v11 = vld [vmem:[%s5972_s1 + $0x2c] sm:$0xf] }
 0x105   : > { %v5174_v17 = vsel %vm5163_vm8, %v1137_v14, %v4904_v1  ;;  %v4313_v1 = vld [vmem:[%s5972_s1 + $0xe4] sm:$0xf]  ;;  %v3691_v14 = vor.u32 %v4301_v3, %v3688_v5  ;;  %v3640_v3 = vld [vmem:[%s5972_s1 + $0x30] sm:$0xf0]  ;;  %v3646_v5 = vld [vmem:[%s5972_s1 + $0x28] sm:$0xf] }
 0x106   : > { %v1149_v19 = vpack.c.bf16 %v5174_v17, %v5174_v17  ;;  %v3739_v10 = vor.u32 %v4313_v1, %v3736_v25  ;;  %1630 = vmatpush.bf16.msra.mxu3 %v3699_v23  ;;  %v5274_v1 = vpop.f32.mrf.mxu0  ;;  %v3622_v22 = vld [vmem:[%s5972_s1] sm:$0xf]  ;;  %v4287_v23 = vld [vmem:[%s5972_s1 + $0xc] sm:$0xf0]  ;;  %v4344_v0 = vld [vmem:[#allocation4 + $0xd4] sm:$0xf0] }
 0x107   : > { %5980 = vst [vmem:[#allocation10_spill] sm:$0xff] %v5274_v1  ;;  %1592 = vmatpush.bf16.msra.mxu0 %v3671_v37  ;;  %v3623_v28 = vor.u32 %v4287_v23, %v3622_v22  ;;  %v4286_v37 = vld [vmem:[%s5972_s1 + $0xc] sm:$0xf]  ;;  %v3841_v22 = vld [vmem:[#allocation4 + $0xa8] sm:$0xf] }
 0x108   : > { %1350 = vmatmul.bf16.vlgmr.msrb.gmra.mxu0 %v1149_v19  ;;  %1363 = vmatmul.bf16.vlgmr.msrb.gmra.mxu1 %v1149_v19  ;;  %v1051_v29 = vpop.f32.mrf.mxu2 }
 0x109   : > { %1376 = vmatmul.bf16.vlgmr.msrb.gmra.mxu2 %v1149_v19  ;;  %1389 = vmatmul.bf16.vlgmr.msrb.gmra.mxu3 %v1149_v19  ;;  %v3695_v19 = vor.u32 %v4304_v9, %v3694_v53  ;;  %v3643_v53 = vor.u32 %v4289_v2, %v3640_v3  ;;  %v3647_v9 = vor.u32 %v4292_v8, %v3646_v5  ;;  %v3624_v29 = vld [vmem:[%s5972_s1 + $0x10] sm:$0xf0]  ;;  %v4342_v2 = vld [vmem:[#allocation4 + $0xcc] sm:$0xf]  ;;  %v3833_v8 = vld [vmem:[#allocation4 + $0xa0] sm:$0xf] }
 0x10a   : > { %1601 = vmatpush.bf16.msra.mxu1 %v3739_v10  ;;  %v5280_v10 = vpop.f32.mrf.mxu3  ;;  %1631 = vmatpush.bf16.msra.mxu3 %v3683_v46 }
 0x10b   : > { %1617 = vmatpush.bf16.msra.mxu2 %v3695_v19  ;;  %5983 = vst [vmem:[#allocation13_spill] sm:$0xff] %v5280_v10  ;;  %1593 = vmatpush.bf16.msra.mxu0 %v3655_v7  ;;  %v3874_v7 = vor.u32 %v4348_v50, %v3873_v49  ;;  %v488_v50 = vadd.f32 %v5054_v13, %v5135_v31  ;;  %v4330_v13 = vld [vmem:[#allocation4 + $0x6c] sm:$0xf] }
 0x10e   : > { %1602 = vmatpush.bf16.msra.mxu1 %v3723_v42  ;;  %v1025_v25 = vpop.f32.mrf.mxu0  ;;  %v3675_v42 = vor.u32 %v4297_v36, %v3672_v38  ;;  %v3632_v38 = vld [vmem:[%s5972_s1 + $0x18] sm:$0xf0] }
 0x10f   : > { %1618 = vmatpush.bf16.msra.mxu2 %v3679_v43  ;;  %1594 = vmatpush.bf16.msra.mxu0 %v3639_v48  ;;  %v4285_v25 = vld [vmem:[%s5972_s1 + $0x4] sm:$0xf]  ;;  %v3635_v12 = vor.u32 %v4286_v37, %v3632_v38  ;;  %v3859_v48 = vld [vmem:[#allocation4 + $0xd8] sm:$0xf0] }
 0x110   : > { %v3627_v34 = vor.u32 %v4285_v25, %v3624_v29  ;;  %v4345_v43 = vld [vmem:[#allocation4 + $0xe4] sm:$0xf]  ;;  %v3862_v5 = vor.u32 %v4342_v2, %v3859_v48  ;;  %v4340_v25 = vld [vmem:[#allocation4 + $0xb4] sm:$0xf0]  ;;  %v3843_v29 = vld [vmem:[#allocation4 + $0xb8] sm:$0xf0] }
 0x111   : > { %v3870_v46 = vor.u32 %v4345_v43, %v3867_v44  ;;  %v4333_v37 = vld [vmem:[#allocation4 + $0x84] sm:$0xf] }
 0x112   : > { %1603 = vmatpush.bf16.msra.mxu1 %v3707_v60  ;;  %v1064_v30 = vpop.f32.mrf.mxu3  ;;  %v4294_v60 = vld [vmem:[%s5972_s1 + $0x4c] sm:$0xf] }
 0x113   : > { %v3667_v62 = vor.u32 %v4294_v60, %v3664_v61  ;;  %1619 = vmatpush.bf16.msra.mxu2 %v3663_v58  ;;  %v3630_v30 = vld [vmem:[%s5972_s1 + $0x8] sm:$0xf]  ;;  %1595 = vmatpush.bf16.msra.mxu0 %v3623_v28  ;;  %v3850_v58 = vor.u32 %v4343_v56, %v3849_v55  ;;  %v4341_v60 = vld [vmem:[#allocation4 + $0xc4] sm:$0xf]  ;;  %v3851_v61 = vld [vmem:[#allocation4 + $0xd0] sm:$0xf0] }
 0x114   : > { %v3631_v36 = vor.u32 %v4288_v33, %v3630_v30  ;;  %v3854_v63 = vor.u32 %v4341_v60, %v3851_v61  ;;  %v4338_v28 = vld [vmem:[#allocation4 + $0xac] sm:$0xf]  ;;  %v3842_v30 = vor.u32 %v4340_v25, %v3841_v22  ;;  %v4329_v55 = vld [vmem:[#allocation4 + $0x64] sm:$0xf]  ;;  %v3803_v60 = vld [vmem:[#allocation4 + $0x70] sm:$0xf0] }
 0x115   : > { %1632 = vmatpush.bf16.msra.mxu3 %v3667_v62  ;;  %v3857_v62 = vld [vmem:[#allocation4 + $0xc8] sm:$0xf]  ;;  %v3846_v33 = vor.u32 %v4338_v28, %v3843_v29  ;;  %v3806_v2 = vor.u32 %v4329_v55, %v3803_v60  ;;  %v4328_v25 = vld [vmem:[#allocation4 + $0x54] sm:$0xf0]  ;;  %v4326_v28 = vld [vmem:[#allocation4 + $0x4c] sm:$0xf]  ;;  %v526_v29 = vadd.f32 %v5097_v35, %v5149_v6 }
 0x116   : > { %1604 = vmatpush.bf16.msra.mxu1 %v3691_v14  ;;  %v3648_v14 = vld [vmem:[%s5972_s1 + $0x38] sm:$0xf0]  ;;  %v3858_v3 = vor.u32 %v4344_v0, %v3857_v62  ;;  %v3809_v61 = vld [vmem:[#allocation4 + $0x68] sm:$0xf]  ;;  %v4332_v62 = vld [vmem:[#allocation4 + $0x74] sm:$0xf0] }
 0x117   : > { %v3651_v19 = vor.u32 %v4290_v11, %v3648_v14  ;;  %1620 = vmatpush.bf16.msra.mxu2 %v3647_v9  ;;  %v4337_v9 = vld [vmem:[#allocation4 + $0xa4] sm:$0xf]  ;;  %v3619_v11 = vld [vmem:[%s4697_s11 + $0x14] sm:$0xf]  ;;  %v3810_v48 = vor.u32 %v4332_v62, %v3809_v61  ;;  %v4324_v35 = vld [vmem:[#allocation4 + $0x34] sm:$0xf0] }
 0x118   : > { %1596 = vmatmul.bf16.vlgmr.msra.gmra.mxu0 %v3619_v11  ;;  %v3753_v55 = vld [vmem:[#allocation4] sm:$0xf]  ;;  %v3755_v61 = vld [vmem:[#allocation4 + $0x10] sm:$0xf0]  ;;  %v3761_v62 = vld [vmem:[#allocation4 + $0x8] sm:$0xf] }
 0x119   : > { %1633 = vmatpush.bf16.msra.mxu3 %v3651_v19  ;;  %v3835_v19 = vld [vmem:[#allocation4 + $0xb0] sm:$0xf0] }
 0x11a   : > { %1605 = vmatpush.bf16.msra.mxu1 %v3675_v42  ;;  %v4347_v42 = vld [vmem:[#allocation4 + $0xec] sm:$0xf0]  ;;  %v3838_v23 = vor.u32 %v4337_v9, %v3835_v19 }
 0x11b   : > { %1621 = vmatpush.bf16.msra.mxu2 %v3631_v36  ;;  %v3866_v45 = vor.u32 %v4347_v42, %v3865_v39  ;;  %v4335_v36 = vld [vmem:[#allocation4 + $0x8c] sm:$0xf0]  ;;  %v3819_v39 = vld [vmem:[#allocation4 + $0x90] sm:$0xf0]  ;;  %v4336_v42 = vld [vmem:[#allocation4 + $0x94] sm:$0xf0] }
 0x11c   : > { %v3822_v43 = vor.u32 %v4333_v37, %v3819_v39  ;;  %v4327_v9 = vld [vmem:[#allocation4 + $0x4c] sm:$0xf0] }
 0x11d   : > { %1634 = vmatpush.bf16.msra.mxu3 %v3635_v12  ;;  %1917 = vmatpush.bf16.msrb.mxu0 %v3866_v45  ;;  %v3825_v12 = vld [vmem:[#allocation4 + $0x88] sm:$0xf]  ;;  %v4334_v45 = vld [vmem:[#allocation4 + $0x8c] sm:$0xf] }
 0x11e   : > { %1606 = vmatpush.bf16.msra.mxu1 %v3659_v57  ;;  %v3878_v57 = vor.u32 %v4346_v51, %v3875_v52  ;;  %1622 = vmatmul.bf16.vlgmr.msra.gmra.mxu2 %v3619_v11  ;;  %v3826_v44 = vor.u32 %v4336_v42, %v3825_v12  ;;  %v507_v51 = vadd.f32 %v5062_v18, %v5138_v32  ;;  %v4331_v52 = vld [vmem:[#allocation4 + $0x6c] sm:$0xf0]  ;;  %v4321_v12 = vld [vmem:[#allocation4 + $0x24] sm:$0xf]  ;;  %v3771_v42 = vld [vmem:[#allocation4 + $0x30] sm:$0xf0] }
 0x11f   : > { %1943 = vmatpush.bf16.msrb.mxu2 %v3874_v7  ;;  %v3801_v7 = vld [vmem:[#allocation4 + $0x60] sm:$0xf] }
 0x120   : > { %1635 = vmatmul.bf16.vlgmr.msra.gmra.mxu3 %v3619_v11 }
 0x121   : > { %1956 = vmatpush.bf16.msrb.mxu3 %v3878_v57  ;;  %1918 = vmatpush.bf16.msrb.mxu0 %v3850_v58  ;;  %v3802_v58 = vor.u32 %v4331_v52, %v3801_v7  ;;  %v3779_v7 = vld [vmem:[#allocation4 + $0x38] sm:$0xf0] }
 0x122   : > { %1607 = vmatpush.bf16.msra.mxu1 %v3643_v53  ;;  %v4339_v53 = vld [vmem:[#allocation4 + $0xac] sm:$0xf0] }
 0x123   : > { %v3834_v14 = vor.u32 %v4339_v53, %v3833_v8  ;;  %1944 = vmatpush.bf16.msrb.mxu2 %v3858_v3  ;;  %v3811_v3 = vld [vmem:[#allocation4 + $0x78] sm:$0xf0]  ;;  %v3785_v53 = vld [vmem:[#allocation4 + $0x40] sm:$0xf] }
 0x124   : > { %v3814_v18 = vor.u32 %v4330_v13, %v3811_v3  ;;  %v3786_v19 = vor.u32 %v4327_v9, %v3785_v53 }
 0x125   : > { %1957 = vmatpush.bf16.msrb.mxu3 %v3862_v5  ;;  %1919 = vmatpush.bf16.msrb.mxu0 %v3834_v14  ;;  %v3787_v14 = vld [vmem:[#allocation4 + $0x50] sm:$0xf0] }
 0x126   : > { %1608 = vmatpush.bf16.msra.mxu1 %v3627_v34  ;;  %v3817_v34 = vld [vmem:[#allocation4 + $0x80] sm:$0xf] }
 0x127   : > { %v3818_v38 = vor.u32 %v4335_v36, %v3817_v34  ;;  %1945 = vmatpush.bf16.msrb.mxu2 %v3842_v30  ;;  %v3769_v34 = vld [vmem:[#allocation4 + $0x20] sm:$0xf]  ;;  %v4323_v36 = vld [vmem:[#allocation4 + $0x2c] sm:$0xf0] }
 0x129   : > { %1609 = vmatmul.bf16.vlgmr.msra.gmra.mxu1 %v3619_v11  ;;  %1958 = vmatpush.bf16.msrb.mxu3 %v3846_v33  ;;  %v4325_v11 = vld [vmem:[#allocation4 + $0x44] sm:$0xf]  ;;  %v3795_v33 = vld [vmem:[#allocation4 + $0x58] sm:$0xf0] }
 0x12a   : > { %1930 = vmatpush.bf16.msrb.mxu1 %v3870_v46  ;;  %v3827_v46 = vld [vmem:[#allocation4 + $0x98] sm:$0xf0]  ;;  %1920 = vmatpush.bf16.msrb.mxu0 %v3818_v38  ;;  %v3790_v22 = vor.u32 %v4325_v11, %v3787_v14  ;;  %v3798_v39 = vor.u32 %v4326_v28, %v3795_v33 }
 0x12b   : > { %v3830_v49 = vor.u32 %v4334_v45, %v3827_v46  ;;  %1946 = vmatpush.bf16.msrb.mxu2 %v3826_v44 }
 0x12d   : > { %1959 = vmatpush.bf16.msrb.mxu3 %v3830_v49  ;;  %v3770_v49 = vor.u32 %v4323_v36, %v3769_v34 }
 0x12e   : > { %1931 = vmatpush.bf16.msrb.mxu1 %v3854_v63  ;;  %1921 = vmatpush.bf16.msrb.mxu0 %v3802_v58 }
 0x12f   : > { %1947 = vmatpush.bf16.msrb.mxu2 %v3810_v48  ;;  %v3763_v48 = vld [vmem:[#allocation4 + $0x18] sm:$0xf0] }
 0x131   : > { %1960 = vmatpush.bf16.msrb.mxu3 %v3814_v18 }
 0x132   : > { %1932 = vmatpush.bf16.msrb.mxu1 %v3838_v23  ;;  %v3793_v23 = vld [vmem:[#allocation4 + $0x48] sm:$0xf]  ;;  %1922 = vmatpush.bf16.msrb.mxu0 %v3786_v19 }
 0x133   : > { %v3794_v30 = vor.u32 %v4328_v25, %v3793_v23 }
 0x135   : > { %1948 = vmatpush.bf16.msrb.mxu2 %v3794_v30  ;;  %1961 = vmatpush.bf16.msrb.mxu3 %v3798_v39 }
 0x136   : > { %1933 = vmatpush.bf16.msrb.mxu1 %v3822_v43  ;;  %v3777_v43 = vld [vmem:[#allocation4 + $0x28] sm:$0xf]  ;;  %1923 = vmatpush.bf16.msrb.mxu0 %v3770_v49 }
 0x137   : > { %v3778_v52 = vor.u32 %v4324_v35, %v3777_v43 }
 0x139   : > { %1949 = vmatpush.bf16.msrb.mxu2 %v3778_v52 }
 0x13a   : > { %1934 = vmatpush.bf16.msrb.mxu1 %v3806_v2  ;;  %v4318_v2 = vld [vmem:[#allocation4 + $0xc] sm:$0xf] }
 0x13b   : > { %v3766_v9 = vor.u32 %v4318_v2, %v3763_v48 }
 0x13e   : > { %1935 = vmatpush.bf16.msrb.mxu1 %v3790_v22  ;;  %v545_v22 = vadd.f32 %v5108_v40, %v5154_v16 }
 0x185   : > { %v1351_v56 = vpop.f32.mrf.mxu0  ;;  %v1364_v57 = vpop.f32.mrf.mxu1 }
 0x186   : > { %v1645_v63 = vadd.f32 %v1351_v56, %v488_v50  ;;  %v1646_v0 = vadd.f32 %v1364_v57, %v507_v51  ;;  %v3774_v50 = vor.u32 %v4321_v12, %v3771_v42  ;;  %v4322_v51 = vld [vmem:[#allocation4 + $0x2c] sm:$0xf]  ;;  %v4319_v56 = vld [vmem:[#allocation4 + $0xc] sm:$0xf0]  ;;  %v4317_v57 = vld [vmem:[#allocation4 + $0x4] sm:$0xf] }
 0x187   : > { %v3782_v60 = vor.u32 %v4322_v51, %v3779_v7  ;;  %v3754_v18 = vor.u32 %v4319_v56, %v3753_v55  ;;  %v1715_v51 = vstv %s1714_s8  ;;  %s4634_s8 = smov [#allocation7]  }
 0x188   : > { %v3748_v5 = vmul.f32 -1.442695, %v1645_v63  ;;  %v3749_v8 = vmul.f32 -1.442695, %v1646_v0  ;;  %v4320_v0 = vld [vmem:[#allocation4 + $0x14] sm:$0xf0]  ;;  %1936 = vmatpush.bf16.msrb.mxu1 %v3774_v50 }
 0x189   : > { %v3762_v53 = vor.u32 %v4320_v0, %v3761_v62  ;;  %1962 = vmatpush.bf16.msrb.mxu3 %v3782_v60  ;;  %1924 = vmatpush.bf16.msrb.mxu0 %v3754_v18  ;;  %vm1716_vm5 = vcmp.eq.s32.totalorder %v1715_v51, 1  ;;  %s3018_s9 = sshll.u32 %s4634_s8, 4  ;;  %s3019_s9 = int_to_ptr.vmem [resolvable:$true] %s3018_s9 }
 0x18a   : > { %4460 = vpow2.f32 %v3748_v5  ;;  %v3758_v5 = vor.u32 %v4317_v57, %v3755_v61  ;;  %4418 = dma.vmem_to_hbm [thread:$0]  (%p4427_p13), %s3019_s9, 448, %s3021_s13, [#allocation6], %s4635_s14, %s4635_s14, %s4636_s15  }
 0x18b   : > { %4462 = vpow2.f32 %v3749_v8  ;;  %1950 = vmatpush.bf16.msrb.mxu2 %v3762_v53 }
 0x18c   : > { %v1377_v37 = vpop.f32.mrf.mxu2  ;;  %v1390_v38 = vpop.f32.mrf.mxu3  ;;  %1937 = vmatpush.bf16.msrb.mxu1 %v3758_v5 }
 0x18d   : > { %v1647_v44 = vadd.f32 %v1377_v37, %v526_v29  ;;  %v1353_v45 = vpop.f32.mrf.mxu0  ;;  %v1366_v46 = vpop.f32.mrf.mxu1  ;;  %1963 = vmatpush.bf16.msrb.mxu3 %v3766_v9  ;;  %v1648_v28 = vadd.f32 %v1390_v38, %v545_v22  ;;  %v4002_v22 = vld [vmem:[%s5972_s1 + $0xe8] sm:$0xf] }
 0x18f   : > { %v3750_v58 = vmul.f32 -1.442695, %v1647_v44 }
 0x190   : > { %v4461_v63 = vpop.eup %4460 }
 0x191   : > { %v4463_v13 = vpop.eup %4462  ;;  %v1658_v3 = vadd.f32 1.0, %v4461_v63  ;;  %4464 = vpow2.f32 %v3750_v58 }
 0x192   : > { %v1659_v8 = vadd.f32 1.0, %v4463_v13 }
 0x193   : > { %4466 = vrcp.f32 %v1658_v3  ;;  %v1672_v37 = vand.u32 2147483648, %v1658_v3  ;;  %v1670_v12 = vand.u32 2147483647, %v1658_v3  ;;  %vm1666_vm15 = vweird.f32 %v1658_v3 }
 0x194   : > { %4468 = vrcp.f32 %v1659_v8  ;;  %v1379_v11 = vpop.f32.mrf.mxu2  ;;  %v1392_v14 = vpop.f32.mrf.mxu3  ;;  %v1687_v39 = vand.u32 2147483648, %v1659_v8  ;;  %v1685_v42 = vand.u32 2147483647, %v1659_v8  ;;  %vm1681_vm0 = vweird.f32 %v1659_v8 }
 0x195   : > { %v1673_v46 = vor.u32 1.1754944e-38, %v1672_v37  ;;  %vm1671_vm3 = vcmp.eq.f32.partialorder %v1670_v12, 8.507059e+37  ;;  %v4379_v11 = vld [vmem:[%s5972_s1 + $0xec] sm:$0xf0]  ;;  %v4373_v37 = vld [vmem:[%s5972_s1 + $0xc4] sm:$0xf] }
 0x196   : > { %v1688_v50 = vor.u32 1.1754944e-38, %v1687_v39  ;;  %vm1686_vm4 = vcmp.eq.f32.partialorder %v1685_v42, 8.507059e+37  ;;  %v3980_v39 = vld [vmem:[%s5972_s1 + $0xd0] sm:$0xf0]  ;;  %v4376_v42 = vld [vmem:[%s5972_s1 + $0xd4] sm:$0xf0] }
 0x197   : > { %v4465_v19 = vpop.eup %4464  ;;  %v3983_v12 = vor.u32 %v4373_v37, %v3980_v39  ;;  %v3932_v37 = vld [vmem:[%s5972_s1 + $0x70] sm:$0xf0]  ;;  %v3938_v39 = vld [vmem:[%s5972_s1 + $0x68] sm:$0xf] }
 0x198   : > { %v1660_v23 = vadd.f32 1.0, %v4465_v19  ;;  %v3996_v19 = vld [vmem:[%s5972_s1 + $0xf0] sm:$0xf0] }
 0x199   : > { %v4467_v25 = vpop.eup %4466 }
 0x19a   : > { %v4469_v29 = vpop.eup %4468  ;;  %v1662_v30 = vmul.f32 %v4467_v25, %v1658_v3  ;;  %4470 = vrcp.f32 %v1660_v23  ;;  %vm1667_vm13 = vweird.f32 %v4467_v25  ;;  %v1702_v0 = vand.u32 2147483648, %v1660_v23 }
 0x19b   : > { %v1677_v33 = vmul.f32 %v4469_v29, %v1659_v8  ;;  %4472 = vtanh.f32 %v1648_v28  ;;  %vm1682_vm14 = vweird.f32 %v4469_v29  ;;  %vm1668_vm1 = vmor %vm1666_vm15, %vm1667_vm13  ;;  %vm1696_vm7 = vweird.f32 %v1660_v23 }
 0x19c   : > { %v1663_v34 = vsub.f32 1.0, %v1662_v30  ;;  %vm1683_vm2 = vmor %vm1681_vm0, %vm1682_vm14  ;;  %v1700_v48 = vand.u32 2147483647, %v1660_v23  ;;  %v1703_v3 = vor.u32 1.1754944e-38, %v1702_v0  ;;  %v4004_v30 = vld [vmem:[%s5972_s1 + $0xf8] sm:$0xf0] }
 0x19d   : > { %v1678_v36 = vsub.f32 1.0, %v1677_v33  ;;  %v3978_v33 = vld [vmem:[%s5972_s1 + $0xc0] sm:$0xf]  ;;  %v4365_v0 = vld [vmem:[%s5972_s1 + $0x84] sm:$0xf] }
 0x19e   : > { %v1664_v40 = vmul.f32 %v4467_v25, %v1663_v34  ;;  %vm1701_vm9 = vcmp.eq.f32.partialorder %v1700_v48, 8.507059e+37  ;;  %v3948_v48 = vld [vmem:[%s5972_s1 + $0x90] sm:$0xf0] }
 0x19f   : > { %v1679_v38 = vmul.f32 %v4469_v29, %v1678_v36  ;;  %v4375_v36 = vld [vmem:[%s5972_s1 + $0xcc] sm:$0xf0] }
 0x1a0   : > { %v4471_v43 = vpop.eup %4470  ;;  %v1665_v44 = vadd.f32 %v4467_v25, %v1664_v40  ;;  %v3979_v40 = vor.u32 %v4375_v36, %v3978_v33  ;;  %v4363_v33 = vld [vmem:[%s5972_s1 + $0x6c] sm:$0xf0] }
 0x1a1   : > { %v1692_v45 = vmul.f32 %v4471_v43, %v1660_v23  ;;  %v1680_v49 = vadd.f32 %v4469_v29, %v1679_v38  ;;  %v4473_v7 = vpop.eup %4472  ;;  %vm1697_vm6 = vweird.f32 %v4471_v43  ;;  %v4380_v23 = vld [vmem:[%s5972_s1 + $0xf4] sm:$0xf0]  ;;  %v3986_v38 = vld [vmem:[%s5972_s1 + $0xc8] sm:$0xf] }
 0x1a2   : > { %v1669_v35 = vsel %vm1668_vm1, %v4467_v25, %v1665_v44  ;;  %vm1698_vm8 = vmor %vm1696_vm7, %vm1697_vm6  ;;  %v4003_v28 = vor.u32 %v4380_v23, %v4002_v22  ;;  %v3987_v44 = vor.u32 %v4376_v42, %v3986_v38  ;;  %v5505_v22 = vpop.f32.mrf.mxu2  ;;  %v4362_v42 = vld [vmem:[%s5972_s1 + $0x6c] sm:$0xf] }
 0x1a3   : > { %v1693_v52 = vsub.f32 1.0, %v1692_v45  ;;  %v1674_v55 = vsel %vm1671_vm3, %v1673_v46, %v1669_v35  ;;  %v1684_v56 = vsel %vm1683_vm2, %v4469_v29, %v1680_v49  ;;  %v4378_v29 = vld [vmem:[%s5972_s1 + $0xec] sm:$0xf]  ;;  %v3988_v45 = vld [vmem:[%s5972_s1 + $0xd8] sm:$0xf0]  ;;  %5987 = vst [vmem:[#allocation16_spill] sm:$0xff] %v5505_v22 }
 0x1a4   : > { %v1689_v57 = vsel %vm1686_vm4, %v1688_v50, %v1684_v56  ;;  %v1708_v58 = vmul.f32 %v4473_v7, %v1674_v55  ;;  %v4007_v34 = vor.u32 %v4378_v29, %v4004_v30  ;;  %2189 = vmatpush.bf16.msra.mxu2 %v4003_v28  ;;  %v3962_v49 = vld [vmem:[%s5972_s1 + $0xa0] sm:$0xf]  ;;  %v4371_v50 = vld [vmem:[%s5972_s1 + $0xac] sm:$0xf0]  ;;  %v4369_v35 = vld [vmem:[%s5972_s1 + $0xa4] sm:$0xf] }
 0x1a5   : > { %v1694_v60 = vmul.f32 %v4471_v43, %v1693_v52  ;;  %v1707_v61 = vmul.f32 %v1689_v57, %v5169_v4  ;;  %v3963_v51 = vor.u32 %v4371_v50, %v3962_v49  ;;  %v3964_v7 = vld [vmem:[%s5972_s1 + $0xb0] sm:$0xf0]  ;;  %v3970_v52 = vld [vmem:[%s5972_s1 + $0xa8] sm:$0xf]  ;;  %v4372_v55 = vld [vmem:[%s5972_s1 + $0xb4] sm:$0xf0] }
 0x1a6   : > { %2202 = vmatpush.bf16.msra.mxu3 %v4007_v34  ;;  %v3967_v56 = vor.u32 %v4369_v35, %v3964_v7  ;;  %v3971_v57 = vor.u32 %v4372_v55, %v3970_v52  ;;  %v3930_v30 = vld [vmem:[%s5972_s1 + $0x60] sm:$0xf]  ;;  %v4361_v34 = vld [vmem:[%s5972_s1 + $0x64] sm:$0xf]  ;;  %v3916_v35 = vld [vmem:[%s5972_s1 + $0x50] sm:$0xf0] }
 0x1a7   : > { %v1709_v62 = vadd.f32 %v1708_v58, %v1707_v61  ;;  %v1695_v63 = vadd.f32 %v4471_v43, %v1694_v60  ;;  %v4370_v58 = vld [vmem:[%s5972_s1 + $0xac] sm:$0xf]  ;;  %v3972_v60 = vld [vmem:[%s5972_s1 + $0xb8] sm:$0xf0]  ;;  %v3946_v61 = vld [vmem:[%s5972_s1 + $0x80] sm:$0xf]  ;;  %v3931_v36 = vor.u32 %v4363_v33, %v3930_v30 }
 0x1a8   : > { %2190 = vmatpush.bf16.msra.mxu2 %v3987_v44  ;;  %v4357_v49 = vld [vmem:[%s5972_s1 + $0x44] sm:$0xf]  ;;  %v4360_v7 = vld [vmem:[%s5972_s1 + $0x54] sm:$0xf0] }
 0x1a9   : > { %4474 = vtanh.f32 %v1709_v62  ;;  %v5397_v2 = vsel %vm1716_vm5, %v1709_v62, %v5169_v4  ;;  %v1699_v13 = vsel %vm1698_vm8, %v4471_v43, %v1695_v63  ;;  %v3994_v4 = vld [vmem:[%s5972_s1 + $0xe0] sm:$0xf]  ;;  %v4374_v43 = vld [vmem:[%s5972_s1 + $0xcc] sm:$0xf]  ;;  %v3975_v62 = vor.u32 %v4370_v58, %v3972_v60  ;;  %v4367_v63 = vld [vmem:[%s5972_s1 + $0x8c] sm:$0xf0] }
 0x1aa   : > { %v1704_v5 = vsel %vm1701_vm9, %v1703_v3, %v1699_v13  ;;  %v3995_v14 = vor.u32 %v4379_v11, %v3994_v4  ;;  %v3991_v46 = vor.u32 %v4374_v43, %v3988_v45  ;;  %v3947_v13 = vor.u32 %v4367_v63, %v3946_v61  ;;  %v3954_v3 = vld [vmem:[%s5972_s1 + $0x88] sm:$0xf]  ;;  %v3956_v4 = vld [vmem:[%s5972_s1 + $0x98] sm:$0xf0]  ;;  %v1625_v28 = vpop.f32.mrf.mxu2  ;;  %v3914_v45 = vld [vmem:[%s5972_s1 + $0x40] sm:$0xf] }
 0x1ab   : > { %v3940_v43 = vld [vmem:[%s5972_s1 + $0x78] sm:$0xf0]  ;;  %v3919_v52 = vor.u32 %v4357_v49, %v3916_v35  ;;  %v3898_v60 = vld [vmem:[%s5972_s1 + $0x20] sm:$0xf]  ;;  %v4355_v61 = vld [vmem:[%s5972_s1 + $0x2c] sm:$0xf0] }
 0x1ac   : > { %2163 = vmatpush.bf16.msra.mxu0 %v3995_v14  ;;  %2203 = vmatpush.bf16.msra.mxu3 %v3991_v46  ;;  %v5503_v14 = vpop.f32.mrf.mxu1  ;;  %v3943_v44 = vor.u32 %v4362_v42, %v3940_v43  ;;  %v4359_v46 = vld [vmem:[%s5972_s1 + $0x4c] sm:$0xf0]  ;;  %v3899_v63 = vor.u32 %v4355_v61, %v3898_v60  ;;  %v3884_v28 = vld [vmem:[%s5972_s1 + $0x10] sm:$0xf0]  ;;  %v4352_v30 = vld [vmem:[%s5972_s1 + $0x14] sm:$0xf0] }
 0x1ad   : > { %2191 = vmatpush.bf16.msra.mxu2 %v3971_v57  ;;  %5986 = vst [vmem:[#allocation15_spill] sm:$0xff] %v5503_v14  ;;  %v3915_v50 = vor.u32 %v4359_v46, %v3914_v45  ;;  %v3924_v57 = vld [vmem:[%s5972_s1 + $0x58] sm:$0xf0]  ;;  %v4127_v42 = vld [vmem:[#allocation4 + $0xf0] sm:$0xf0] }
 0x1ae   : > { %v4133_v45 = vld [vmem:[#allocation4 + $0xe8] sm:$0xf]  ;;  %v4412_v46 = vld [vmem:[#allocation4 + $0xf4] sm:$0xf0]  ;;  %v4410_v49 = vld [vmem:[#allocation4 + $0xec] sm:$0xf] }
 0x1af   : > { %v4475_v18 = vpop.eup %4474  ;;  %v4135_v35 = vld [vmem:[#allocation4 + $0xf8] sm:$0xf0]  ;;  %v4408_v61 = vld [vmem:[#allocation4 + $0xd4] sm:$0xf0] }
 0x1b0   : > { %v1711_v8 = vmul.f32 %v4475_v18, %v1704_v5  ;;  %2164 = vmatpush.bf16.msra.mxu0 %v3979_v40  ;;  %v4368_v18 = vld [vmem:[%s5972_s1 + $0x94] sm:$0xf0]  ;;  %v4366_v5 = vld [vmem:[%s5972_s1 + $0x8c] sm:$0xf]  ;;  %2204 = vmatpush.bf16.msra.mxu3 %v3975_v62  ;;  %v4353_v62 = vld [vmem:[%s5972_s1 + $0x24] sm:$0xf] }
 0x1b1   : > { %v3959_v11 = vor.u32 %v4366_v5, %v3956_v4  ;;  %v4364_v40 = vld [vmem:[%s5972_s1 + $0x74] sm:$0xf0]  ;;  %v4354_v5 = vld [vmem:[%s5972_s1 + $0x2c] sm:$0xf]  ;;  %v3882_v4 = vld [vmem:[%s5972_s1] sm:$0xf] }
 0x1b2   : > { %v5401_v53 = vsel %vm1716_vm5, %v1711_v8, %v5174_v17  ;;  %v4377_v17 = vld [vmem:[%s5972_s1 + $0xe4] sm:$0xf]  ;;  %v3951_v8 = vor.u32 %v4365_v0, %v3948_v48  ;;  %v3939_v38 = vor.u32 %v4364_v40, %v3938_v39  ;;  %v3900_v0 = vld [vmem:[%s5972_s1 + $0x30] sm:$0xf0]  ;;  %v3906_v48 = vld [vmem:[%s5972_s1 + $0x28] sm:$0xf] }
 0x1b3   : > { %v1724_v9 = vpack.c.bf16 %v5401_v53, %v5401_v53  ;;  %v3999_v25 = vor.u32 %v4377_v17, %v3996_v19  ;;  %v5501_v17 = vpop.f32.mrf.mxu0  ;;  %v4125_v39 = vld [vmem:[#allocation4 + $0xe0] sm:$0xf] }
 0x1b4   : > { %2165 = vmatpush.bf16.msra.mxu0 %v3963_v51  ;;  %2205 = vmatpush.bf16.msra.mxu3 %v3959_v11  ;;  %5985 = vst [vmem:[#allocation14_spill] sm:$0xff] %v5501_v17  ;;  %v1612_v23 = vpop.f32.mrf.mxu1  ;;  %v3922_v51 = vld [vmem:[%s5972_s1 + $0x48] sm:$0xf]  ;;  %v4351_v11 = vld [vmem:[%s5972_s1 + $0xc] sm:$0xf0] }
 0x1b5   : > { %1925 = vmatmul.bf16.vlgmr.msrb.gmra.mxu0 %v1724_v9  ;;  %1938 = vmatmul.bf16.vlgmr.msrb.gmra.mxu1 %v1724_v9  ;;  %v3923_v55 = vor.u32 %v4360_v7, %v3922_v51  ;;  %v3883_v23 = vor.u32 %v4351_v11, %v3882_v4  ;;  %v4109_v51 = vld [vmem:[#allocation4 + $0xc0] sm:$0xf]  ;;  %v4407_v7 = vld [vmem:[#allocation4 + $0xcc] sm:$0xf0]  ;;  %v4101_v4 = vld [vmem:[#allocation4 + $0xa8] sm:$0xf] }
 0x1b6   : > { %1951 = vmatmul.bf16.vlgmr.msrb.gmra.mxu2 %v1724_v9  ;;  %1964 = vmatmul.bf16.vlgmr.msrb.gmra.mxu3 %v1724_v9  ;;  %v3955_v9 = vor.u32 %v4368_v18, %v3954_v3  ;;  %v3903_v3 = vor.u32 %v4353_v62, %v3900_v0  ;;  %v4406_v62 = vld [vmem:[#allocation4 + $0xcc] sm:$0xf] }
 0x1b7   : > { %2176 = vmatpush.bf16.msra.mxu1 %v3999_v25  ;;  %v5507_v25 = vpop.f32.mrf.mxu3 }
 0x1b8   : > { %2166 = vmatpush.bf16.msra.mxu0 %v3947_v13  ;;  %2192 = vmatpush.bf16.msra.mxu2 %v3955_v9  ;;  %5988 = vst [vmem:[#allocation17_spill] sm:$0xff] %v5507_v25  ;;  %v4356_v13 = vld [vmem:[%s5972_s1 + $0x34] sm:$0xf0] }
 0x1b9   : > { %2206 = vmatpush.bf16.msra.mxu3 %v3943_v44  ;;  %v3907_v18 = vor.u32 %v4356_v13, %v3906_v48  ;;  %v4093_v13 = vld [vmem:[#allocation4 + $0xa0] sm:$0xf] }
 0x1bb   : > { %2177 = vmatpush.bf16.msra.mxu1 %v3983_v12  ;;  %v1599_v19 = vpop.f32.mrf.mxu0  ;;  %v3935_v12 = vor.u32 %v4361_v34, %v3932_v37  ;;  %v3892_v37 = vld [vmem:[%s5972_s1 + $0x18] sm:$0xf0] }
 0x1bc   : > { %2167 = vmatpush.bf16.msra.mxu0 %v3931_v36  ;;  %2193 = vmatpush.bf16.msra.mxu2 %v3939_v38  ;;  %v4349_v19 = vld [vmem:[%s5972_s1 + $0x4] sm:$0xf]  ;;  %v4350_v36 = vld [vmem:[%s5972_s1 + $0xc] sm:$0xf] }
 0x1bd   : > { %v3887_v33 = vor.u32 %v4349_v19, %v3884_v28  ;;  %v3895_v40 = vor.u32 %v4350_v36, %v3892_v37  ;;  %v4409_v38 = vld [vmem:[#allocation4 + $0xe4] sm:$0xf]  ;;  %v4404_v19 = vld [vmem:[#allocation4 + $0xb4] sm:$0xf0]  ;;  %v4103_v28 = vld [vmem:[#allocation4 + $0xb8] sm:$0xf0] }
 0x1be   : > { %v5607_v44 = vor.u32 %v4409_v38, %v4127_v42  ;;  %v4397_v36 = vld [vmem:[#allocation4 + $0x84] sm:$0xf] }
 0x1bf   : > { %2178 = vmatpush.bf16.msra.mxu1 %v3967_v56  ;;  %v1638_v29 = vpop.f32.mrf.mxu3  ;;  %v4358_v56 = vld [vmem:[%s5972_s1 + $0x4c] sm:$0xf] }
 0x1c0   : > { %2168 = vmatpush.bf16.msra.mxu0 %v3915_v50  ;;  %v3927_v58 = vor.u32 %v4358_v56, %v3924_v57  ;;  %2194 = vmatpush.bf16.msra.mxu2 %v3923_v55  ;;  %v3890_v29 = vld [vmem:[%s5972_s1 + $0x8] sm:$0xf]  ;;  %v5609_v50 = vor.u32 %v4412_v46, %v4133_v45  ;;  %v5615_v55 = vor.u32 %v4407_v7, %v4109_v51  ;;  %v4405_v56 = vld [vmem:[#allocation4 + $0xc4] sm:$0xf]  ;;  %v4111_v57 = vld [vmem:[#allocation4 + $0xd0] sm:$0xf0] }
 0x1c1   : > { %v3891_v34 = vor.u32 %v4352_v30, %v3890_v29  ;;  %v5618_v60 = vor.u32 %v4405_v56, %v4111_v57  ;;  %v5634_v29 = vor.u32 %v4404_v19, %v4101_v4  ;;  %v4398_v45 = vld [vmem:[#allocation4 + $0x8c] sm:$0xf]  ;;  %v4087_v46 = vld [vmem:[#allocation4 + $0x98] sm:$0xf0]  ;;  %v510_v51 = vadd.f32 %v5118_v47, %v5138_v32  ;;  %v4061_v7 = vld [vmem:[#allocation4 + $0x60] sm:$0xf] }
 0x1c2   : > { %2207 = vmatpush.bf16.msra.mxu3 %v3927_v58  ;;  %v4117_v58 = vld [vmem:[#allocation4 + $0xc8] sm:$0xf]  ;;  %v4395_v56 = vld [vmem:[#allocation4 + $0x6c] sm:$0xf0]  ;;  %v4393_v57 = vld [vmem:[#allocation4 + $0x64] sm:$0xf] }
 0x1c3   : > { %2179 = vmatpush.bf16.msra.mxu1 %v3951_v8  ;;  %v3908_v8 = vld [vmem:[%s5972_s1 + $0x38] sm:$0xf0]  ;;  %v5621_v0 = vor.u32 %v4408_v61, %v4117_v58 }
 0x1c4   : > { %2169 = vmatpush.bf16.msra.mxu0 %v3899_v63  ;;  %v3911_v9 = vor.u32 %v4354_v5, %v3908_v8  ;;  %2195 = vmatpush.bf16.msra.mxu2 %v3907_v18  ;;  %v4119_v63 = vld [vmem:[#allocation4 + $0xd8] sm:$0xf0]  ;;  %v4401_v18 = vld [vmem:[#allocation4 + $0xa4] sm:$0xf]  ;;  %v3879_v5 = vld [vmem:[%s4697_s11 + $0x18] sm:$0xf] }
 0x1c5   : > { %v5623_v48 = vor.u32 %v4406_v62, %v4119_v63  ;;  %v5656_v62 = vor.u32 %v4395_v56, %v4061_v7  ;;  %v4063_v63 = vld [vmem:[#allocation4 + $0x70] sm:$0xf0]  ;;  %v4071_v4 = vld [vmem:[#allocation4 + $0x78] sm:$0xf0]  ;;  %s2287_s11 = sadd.s32 2, %s4688_s30 }
 0x1c6   : > { %2208 = vmatpush.bf16.msra.mxu3 %v3911_v9  ;;  %v4095_v9 = vld [vmem:[#allocation4 + $0xb0] sm:$0xf0]  ;;  %v4055_v56 = vld [vmem:[#allocation4 + $0x58] sm:$0xf0]  ;;  %p5725_p9 = scmp.lt.s32.totalorder %s2287_s11, 20 }
 0x1c7   : > { %2180 = vmatpush.bf16.msra.mxu1 %v3935_v12  ;;  %v4411_v12 = vld [vmem:[#allocation4 + $0xec] sm:$0xf0]  ;;  %v5631_v11 = vor.u32 %v4401_v18, %v4095_v9  ;;  %v4394_v9 = vld [vmem:[#allocation4 + $0x6c] sm:$0xf]  ;;  %s3006_s30 = scalar_select %p5947_p0, 1, 0 }
 0x1c8   : > { %2170 = vmatpush.bf16.msra.mxu0 %v3883_v23  ;;  %2196 = vmatpush.bf16.msra.mxu2 %v3891_v34  ;;  %v5605_v43 = vor.u32 %v4411_v12, %v4125_v39  ;;  %v4402_v23 = vld [vmem:[#allocation4 + $0xac] sm:$0xf]  ;;  %v4399_v34 = vld [vmem:[#allocation4 + $0x8c] sm:$0xf0]  ;;  %v4079_v39 = vld [vmem:[#allocation4 + $0x90] sm:$0xf0]  ;;  %v5664_v19 = vor.u32 %v4394_v9, %v4071_v4 }
 0x1c9   : > { %v5636_v30 = vor.u32 %v4402_v23, %v4103_v28  ;;  %v4400_v12 = vld [vmem:[#allocation4 + $0x94] sm:$0xf0]  ;;  %v5643_v38 = vor.u32 %v4397_v36, %v4079_v39  ;;  %v4389_v36 = vld [vmem:[#allocation4 + $0x44] sm:$0xf]  ;;  %v4047_v39 = vld [vmem:[#allocation4 + $0x50] sm:$0xf0] }
 0x1ca   : > { %2209 = vmatpush.bf16.msra.mxu3 %v3895_v40  ;;  %v4085_v40 = vld [vmem:[#allocation4 + $0x88] sm:$0xf]  ;;  %s2289_s19 = scalar_select %p5725_p9, 1, 0 }
 0x1cb   : > { %2181 = vmatpush.bf16.msra.mxu1 %v3919_v52  ;;  %v5613_v52 = vor.u32 %v4410_v49, %v4135_v35  ;;  %2171 = vmatmul.bf16.vlgmr.msra.gmra.mxu0 %v3879_v5  ;;  %v5645_v42 = vor.u32 %v4400_v12, %v4085_v40  ;;  %v5648_v49 = vor.u32 %v4398_v45, %v4087_v46  ;;  %v4053_v45 = vld [vmem:[#allocation4 + $0x48] sm:$0xf]  ;;  %v4392_v46 = vld [vmem:[#allocation4 + $0x54] sm:$0xf0] }
 0x1cc   : > { %2492 = vmatpush.bf16.msrb.mxu0 %v5605_v43  ;;  %2518 = vmatpush.bf16.msrb.mxu2 %v5609_v50  ;;  %v491_v35 = vadd.f32 %v5110_v41, %v5135_v31  ;;  %v5659_v41 = vor.u32 %v4393_v57, %v4063_v63  ;;  %v5671_v12 = vor.u32 %v4389_v36, %v4047_v39  ;;  %v4029_v57 = vld [vmem:[#allocation4 + $0x20] sm:$0xf]  ;;  %v4039_v36 = vld [vmem:[#allocation4 + $0x38] sm:$0xf0]  ;;  %v2290_v10 = vstv %s2289_s19 }
 0x1cd   : > { %2197 = vmatmul.bf16.vlgmr.msra.gmra.mxu2 %v3879_v5  ;;  %2210 = vmatmul.bf16.vlgmr.msra.gmra.mxu3 %v3879_v5  ;;  %v5676_v7 = vor.u32 %v4392_v46, %v4053_v45  ;;  %v4013_v45 = vld [vmem:[#allocation4] sm:$0xf]  ;;  %v4383_v46 = vld [vmem:[#allocation4 + $0xc] sm:$0xf0]  ;;  %vm2291_vm2 = vcmp.eq.s32.totalorder %v2290_v10, 1 }
 0x1ce   : > { %2531 = vmatpush.bf16.msrb.mxu3 %v5613_v52 }
 0x1cf   : > { %2182 = vmatpush.bf16.msra.mxu1 %v3903_v3  ;;  %v4403_v3 = vld [vmem:[#allocation4 + $0xac] sm:$0xf0] }
 0x1d0   : > { %2493 = vmatpush.bf16.msrb.mxu0 %v5615_v55  ;;  %v5628_v8 = vor.u32 %v4403_v3, %v4093_v13  ;;  %2519 = vmatpush.bf16.msrb.mxu2 %v5621_v0  ;;  %v4069_v13 = vld [vmem:[#allocation4 + $0x68] sm:$0xf]  ;;  %v4396_v3 = vld [vmem:[#allocation4 + $0x74] sm:$0xf0] }
 0x1d1   : > { %v5661_v47 = vor.u32 %v4396_v3, %v4069_v13  ;;  %v4385_v3 = vld [vmem:[#allocation4 + $0x24] sm:$0xf] }
 0x1d2   : > { %2532 = vmatpush.bf16.msrb.mxu3 %v5623_v48 }
 0x1d3   : > { %2183 = vmatpush.bf16.msra.mxu1 %v3887_v33  ;;  %v4077_v33 = vld [vmem:[#allocation4 + $0x80] sm:$0xf] }
 0x1d4   : > { %2494 = vmatpush.bf16.msrb.mxu0 %v5628_v8  ;;  %v5640_v37 = vor.u32 %v4399_v34, %v4077_v33  ;;  %2520 = vmatpush.bf16.msrb.mxu2 %v5634_v29  ;;  %v4045_v33 = vld [vmem:[#allocation4 + $0x40] sm:$0xf]  ;;  %v4391_v34 = vld [vmem:[#allocation4 + $0x4c] sm:$0xf0] }
 0x1d5   : > { %v5669_v40 = vor.u32 %v4391_v34, %v4045_v33  ;;  %v4388_v33 = vld [vmem:[#allocation4 + $0x34] sm:$0xf0]  ;;  %v4386_v34 = vld [vmem:[#allocation4 + $0x2c] sm:$0xf] }
 0x1d6   : > { %2184 = vmatmul.bf16.vlgmr.msra.gmra.mxu1 %v3879_v5  ;;  %2533 = vmatpush.bf16.msrb.mxu3 %v5636_v30 }
 0x1d7   : > { %2505 = vmatpush.bf16.msrb.mxu1 %v5607_v44 }
 0x1d8   : > { %2495 = vmatpush.bf16.msrb.mxu0 %v5640_v37  ;;  %2521 = vmatpush.bf16.msrb.mxu2 %v5645_v42 }
 0x1da   : > { %2534 = vmatpush.bf16.msrb.mxu3 %v5648_v49 }
 0x1db   : > { %2506 = vmatpush.bf16.msrb.mxu1 %v5618_v60 }
 0x1dc   : > { %2496 = vmatpush.bf16.msrb.mxu0 %v5656_v62  ;;  %2522 = vmatpush.bf16.msrb.mxu2 %v5661_v47 }
 0x1de   : > { %2535 = vmatpush.bf16.msrb.mxu3 %v5664_v19 }
 0x1df   : > { %2507 = vmatpush.bf16.msrb.mxu1 %v5631_v11 }
 0x1e0   : > { %2497 = vmatpush.bf16.msrb.mxu0 %v5669_v40  ;;  %2523 = vmatpush.bf16.msrb.mxu2 %v5676_v7 }
 0x1e3   : > { %2508 = vmatpush.bf16.msrb.mxu1 %v5643_v38 }
 0x1e7   : > { %2509 = vmatpush.bf16.msrb.mxu1 %v5659_v41 }
 0x1eb   : > { %2510 = vmatpush.bf16.msrb.mxu1 %v5671_v12 }
 0x232   : > { %v1926_v58 = vpop.f32.mrf.mxu0  ;;  %v1939_v61 = vpop.f32.mrf.mxu1 }
 0x233   : > { %v2220_v18 = vadd.f32 %v1926_v58, %v491_v35  ;;  %v2221_v5 = vadd.f32 %v1939_v61, %v510_v51  ;;  %v4390_v35 = vld [vmem:[#allocation4 + $0x4c] sm:$0xf]  ;;  %v529_v51 = vadd.f32 %v5125_v15, %v5149_v6  ;;  %v4387_v58 = vld [vmem:[#allocation4 + $0x2c] sm:$0xf0] }
 0x234   : > { %v5678_v13 = vor.u32 %v4390_v35, %v4055_v56  ;;  %v5682_v15 = vor.u32 %v4387_v58, %v4029_v57  ;;  %v4381_v35 = vld [vmem:[#allocation4 + $0x4] sm:$0xf]  ;;  %v5690_v56 = vor.u32 %v4386_v34, %v4039_v36  ;;  %v4021_v57 = vld [vmem:[#allocation4 + $0x8] sm:$0xf] }
 0x235   : > { %v4008_v23 = vmul.f32 -1.442695, %v2220_v18  ;;  %v4009_v28 = vmul.f32 -1.442695, %v2221_v5  ;;  %v4031_v18 = vld [vmem:[#allocation4 + $0x30] sm:$0xf0] }
 0x236   : > { %v4037_v5 = vld [vmem:[#allocation4 + $0x28] sm:$0xf]  ;;  %2536 = vmatpush.bf16.msrb.mxu3 %v5678_v13  ;;  %2498 = vmatpush.bf16.msrb.mxu0 %v5682_v15 }
 0x237   : > { %4476 = vpow2.f32 %v4008_v23  ;;  %v5687_v39 = vor.u32 %v4388_v33, %v4037_v5  ;;  %v5696_v5 = vor.u32 %v4383_v46, %v4013_v45 }
 0x238   : > { %4478 = vpow2.f32 %v4009_v28  ;;  %v5684_v28 = vor.u32 %v4385_v3, %v4031_v18  ;;  %v4384_v3 = vld [vmem:[#allocation4 + $0x14] sm:$0xf0]  ;;  %v4382_v18 = vld [vmem:[#allocation4 + $0xc] sm:$0xf] }
 0x239   : > { %v1952_v61 = vpop.f32.mrf.mxu2  ;;  %v1965_v63 = vpop.f32.mrf.mxu3  ;;  %2524 = vmatpush.bf16.msrb.mxu2 %v5687_v39  ;;  %v5703_v34 = vor.u32 %v4384_v3, %v4021_v57 }
 0x23a   : > { %v2222_v9 = vadd.f32 %v1952_v61, %v529_v51  ;;  %v1928_v4 = vpop.f32.mrf.mxu0  ;;  %v1941_v23 = vpop.f32.mrf.mxu1  ;;  %v4015_v61 = vld [vmem:[#allocation4 + $0x10] sm:$0xf0]  ;;  %2511 = vmatpush.bf16.msrb.mxu1 %v5684_v28  ;;  %2537 = vmatpush.bf16.msrb.mxu3 %v5690_v56 }
 0x23b   : > { %v4023_v4 = vld [vmem:[#allocation4 + $0x18] sm:$0xf0]  ;;  %2499 = vmatpush.bf16.msrb.mxu0 %v5696_v5 }
 0x23c   : > { %v4010_v51 = vmul.f32 -1.442695, %v2222_v9  ;;  %v5698_v9 = vor.u32 %v4381_v35, %v4015_v61  ;;  %v5707_v36 = vor.u32 %v4382_v18, %v4023_v4  ;;  %v548_v35 = vadd.f32 %v5127_v20, %v5154_v16 }
 0x23d   : > { %v4477_v58 = vpop.eup %4476  ;;  %2525 = vmatpush.bf16.msrb.mxu2 %v5703_v34 }
 0x23e   : > { %v4479_v23 = vpop.eup %4478  ;;  %v5692_v25 = vadd.f32 1.0, %v4477_v58  ;;  %4480 = vpow2.f32 %v4010_v51  ;;  %2512 = vmatpush.bf16.msrb.mxu1 %v5698_v9  ;;  %2538 = vmatpush.bf16.msrb.mxu3 %v5707_v36  ;;  %v2223_v58 = vadd.f32 %v1965_v63, %v548_v35 }
 0x23f   : > { %v5700_v33 = vadd.f32 1.0, %v4479_v23  ;;  %2623 = vmatpush.bf16.msra.mxu0 %v5605_v43 }
 0x240   : > { %4482 = vrcp.f32 %v5692_v25  ;;  %v2247_v23 = vand.u32 2147483648, %v5692_v25  ;;  %vm2241_vm12 = vweird.f32 %v5692_v25 }
 0x241   : > { %4484 = vrcp.f32 %v5700_v33  ;;  %v1954_v51 = vpop.f32.mrf.mxu2  ;;  %v1967_v45 = vpop.f32.mrf.mxu3  ;;  %2649 = vmatpush.bf16.msra.mxu2 %v5609_v50  ;;  %vm2256_vm13 = vweird.f32 %v5700_v33 }
 0x242   : > { %2636 = vmatpush.bf16.msra.mxu1 %v5607_v44  ;;  %2662 = vmatpush.bf16.msra.mxu3 %v5613_v52  ;;  %v2262_v51 = vand.u32 2147483648, %v5700_v33 }
 0x243   : > { %2624 = vmatpush.bf16.msra.mxu0 %v5615_v55 }
 0x244   : > { %v4481_v46 = vpop.eup %4480  ;;  %v2263_v14 = vor.u32 1.1754944e-38, %v2262_v51 }
 0x245   : > { %v5719_v61 = vadd.f32 1.0, %v4481_v46  ;;  %2650 = vmatpush.bf16.msra.mxu2 %v5621_v0  ;;  %v2245_v46 = vand.u32 2147483647, %v5692_v25 }
 0x246   : > { %v4483_v57 = vpop.eup %4482  ;;  %2637 = vmatpush.bf16.msra.mxu1 %v5618_v60  ;;  %2663 = vmatpush.bf16.msra.mxu3 %v5623_v48 }
 0x247   : > { %v4485_v3 = vpop.eup %4484  ;;  %v2237_v18 = vmul.f32 %v4483_v57, %v5692_v25  ;;  %4486 = vrcp.f32 %v5719_v61  ;;  %vm2242_vm10 = vweird.f32 %v4483_v57  ;;  %2625 = vmatpush.bf16.msra.mxu0 %v5628_v8  ;;  %vm2246_vm0 = vcmp.eq.f32.partialorder %v2245_v46, 8.507059e+37 }
 0x248   : > { %v2252_v20 = vmul.f32 %v4485_v3, %v5700_v33  ;;  %4488 = vtanh.f32 %v2223_v58  ;;  %vm2257_vm11 = vweird.f32 %v4485_v3  ;;  %vm2243_vm14 = vmor %vm2241_vm12, %vm2242_vm10  ;;  %vm2271_vm4 = vweird.f32 %v5719_v61  ;;  %v5814_v10 = vpop.f32.mrf.mxu0 }
 0x249   : > { %v2238_v4 = vsub.f32 1.0, %v2237_v18  ;;  %v2260_v18 = vand.u32 2147483647, %v5700_v33  ;;  %2651 = vmatpush.bf16.msra.mxu2 %v5634_v29  ;;  %vm2258_vm15 = vmor %vm2256_vm13, %vm2257_vm11  ;;  %5990 = vst [vmem:[#allocation18_spill] sm:$0xff] %v5814_v10 }
 0x24a   : > { %v2253_v63 = vsub.f32 1.0, %v2252_v20  ;;  %2638 = vmatpush.bf16.msra.mxu1 %v5631_v11  ;;  %2664 = vmatpush.bf16.msra.mxu3 %v5636_v30 }
 0x24b   : > { %v2239_v45 = vmul.f32 %v4483_v57, %v2238_v4  ;;  %v2248_v4 = vor.u32 1.1754944e-38, %v2247_v23  ;;  %2626 = vmatpush.bf16.msra.mxu0 %v5640_v37  ;;  %vm2261_vm1 = vcmp.eq.f32.partialorder %v2260_v18, 8.507059e+37 }
 0x24c   : > { %v2254_v35 = vmul.f32 %v4485_v3, %v2253_v63 }
 0x24d   : > { %v4487_v20 = vpop.eup %4486  ;;  %v2240_v22 = vadd.f32 %v4483_v57, %v2239_v45  ;;  %2652 = vmatpush.bf16.msra.mxu2 %v5645_v42 }
 0x24e   : > { %v2267_v58 = vmul.f32 %v4487_v20, %v5719_v61  ;;  %v2255_v63 = vadd.f32 %v4485_v3, %v2254_v35  ;;  %v4489_v25 = vpop.eup %4488  ;;  %2639 = vmatpush.bf16.msra.mxu1 %v5643_v38  ;;  %2665 = vmatpush.bf16.msra.mxu3 %v5648_v49  ;;  %vm2272_vm3 = vweird.f32 %v4487_v20 }
 0x24f   : > { %v2244_v17 = vsel %vm2243_vm14, %v4483_v57, %v2240_v22  ;;  %2627 = vmatpush.bf16.msra.mxu0 %v5656_v62  ;;  %vm2273_vm5 = vmor %vm2271_vm4, %vm2272_vm3 }
 0x250   : > { %v2268_v45 = vsub.f32 1.0, %v2267_v58  ;;  %v2249_v27 = vsel %vm2246_vm0, %v2248_v4, %v2244_v17  ;;  %v2259_v24 = vsel %vm2258_vm15, %v4485_v3, %v2255_v63  ;;  %v2174_v18 = vpop.f32.mrf.mxu0  ;;  %v5820_v4 = vpop.f32.mrf.mxu3 }
 0x251   : > { %v2264_v33 = vsel %vm2261_vm1, %v2263_v14, %v2259_v24  ;;  %v2283_v1 = vmul.f32 %v4489_v25, %v2249_v27  ;;  %2653 = vmatpush.bf16.msra.mxu2 %v5661_v47  ;;  %v2277_v24 = vand.u32 2147483648, %v5719_v61  ;;  %v2275_v14 = vand.u32 2147483647, %v5719_v61  ;;  %5993 = vst [vmem:[#allocation21_spill] sm:$0xff] %v5820_v4 }
 0x252   : > { %v2269_v23 = vmul.f32 %v4487_v20, %v2268_v45  ;;  %v2282_v22 = vmul.f32 %v2264_v33, %v5397_v2  ;;  %2640 = vmatpush.bf16.msra.mxu1 %v5659_v41  ;;  %2666 = vmatpush.bf16.msra.mxu3 %v5664_v19  ;;  %v493_v45 = vadd.f32 %v5129_v21, %v5135_v31 }
 0x253   : > { %2628 = vmatpush.bf16.msra.mxu0 %v5669_v40  ;;  %v2278_v3 = vor.u32 1.1754944e-38, %v2277_v24  ;;  %vm2276_vm6 = vcmp.eq.f32.partialorder %v2275_v14, 8.507059e+37  ;;  %v512_v33 = vadd.f32 %v5132_v26, %v5138_v32 }
 0x254   : > { %v2284_v57 = vadd.f32 %v2283_v1, %v2282_v22  ;;  %v2270_v17 = vadd.f32 %v4487_v20, %v2269_v23 }
 0x255   : > { %2654 = vmatpush.bf16.msra.mxu2 %v5676_v7 }
 0x256   : > { %4490 = vtanh.f32 %v2284_v57  ;;  %v5760_v27 = vsel %vm2291_vm2, %v2284_v57, %v5397_v2  ;;  %2641 = vmatpush.bf16.msra.mxu1 %v5671_v12  ;;  %v2274_v1 = vsel %vm2273_vm5, %v4487_v20, %v2270_v17  ;;  %2667 = vmatpush.bf16.msra.mxu3 %v5678_v13  ;;  %v5818_v20 = vpop.f32.mrf.mxu2 }
 0x257   : > { %2629 = vmatpush.bf16.msra.mxu0 %v5682_v15  ;;  %v2279_v51 = vsel %vm2276_vm6, %v2278_v3, %v2274_v1  ;;  %5992 = vst [vmem:[#allocation20_spill] sm:$0xff] %v5818_v20  ;;  %v531_v1 = vadd.f32 %v5142_v54, %v5149_v6  ;;  %v550_v54 = vadd.f32 %v5146_v59, %v5154_v16 }
 0x258   : > { %v2213_v25 = vpop.f32.mrf.mxu3 }
 0x259   : > { %2655 = vmatpush.bf16.msra.mxu2 %v5687_v39 }
 0x25a   : > { %2642 = vmatpush.bf16.msra.mxu1 %v5684_v28  ;;  %2668 = vmatpush.bf16.msra.mxu3 %v5690_v56 }
 0x25b   : > { %2630 = vmatpush.bf16.msra.mxu0 %v5696_v5 }
 0x25c   : > { %v4491_v2 = vpop.eup %4490 }
 0x25d   : > { %v2286_v46 = vmul.f32 %v4491_v2, %v2279_v51  ;;  %2656 = vmatpush.bf16.msra.mxu2 %v5703_v34 }
 0x25e   : > { %2643 = vmatpush.bf16.msra.mxu1 %v5698_v9  ;;  %2669 = vmatpush.bf16.msra.mxu3 %v5707_v36  ;;  %v2200_v63 = vpop.f32.mrf.mxu2 }
 0x25f   : > { %v5774_v61 = vsel %vm2291_vm2, %v2286_v46, %v5401_v53  ;;  %v5816_v53 = vpop.f32.mrf.mxu1 }
 0x260   : > { %v2299_v35 = vpack.c.bf16 %v5774_v61, %v5774_v61  ;;  %5991 = vst [vmem:[#allocation19_spill] sm:$0xff] %v5816_v53 }
 0x262   : > { %2500 = vmatmul.bf16.vlgmr.msrb.gmra.mxu0 %v2299_v35  ;;  %2513 = vmatmul.bf16.vlgmr.msrb.gmra.mxu1 %v2299_v35 }
 0x263   : > { %2526 = vmatmul.bf16.vlgmr.msrb.gmra.mxu2 %v2299_v35  ;;  %2539 = vmatmul.bf16.vlgmr.msrb.gmra.mxu3 %v2299_v35 }
 0x264   : > { %2754 = vmatpush.bf16.msrb.mxu0 %v5605_v43  ;;  %2767 = vmatpush.bf16.msrb.mxu1 %v5607_v44 }
 0x265   : > { %2780 = vmatpush.bf16.msrb.mxu2 %v5609_v50  ;;  %2793 = vmatpush.bf16.msrb.mxu3 %v5613_v52 }
 0x267   : > { %v2187_v58 = vpop.f32.mrf.mxu1 }
 0x268   : > { %2755 = vmatpush.bf16.msrb.mxu0 %v5615_v55  ;;  %2768 = vmatpush.bf16.msrb.mxu1 %v5618_v60 }
 0x269   : > { %2781 = vmatpush.bf16.msrb.mxu2 %v5621_v0  ;;  %2794 = vmatpush.bf16.msrb.mxu3 %v5623_v48 }
 0x26c   : > { %2756 = vmatpush.bf16.msrb.mxu0 %v5628_v8  ;;  %2769 = vmatpush.bf16.msrb.mxu1 %v5631_v11 }
 0x26d   : > { %2782 = vmatpush.bf16.msrb.mxu2 %v5634_v29  ;;  %2795 = vmatpush.bf16.msrb.mxu3 %v5636_v30 }
 0x270   : > { %2757 = vmatpush.bf16.msrb.mxu0 %v5640_v37  ;;  %2770 = vmatpush.bf16.msrb.mxu1 %v5643_v38 }
 0x271   : > { %2783 = vmatpush.bf16.msrb.mxu2 %v5645_v42  ;;  %2796 = vmatpush.bf16.msrb.mxu3 %v5648_v49 }
 0x274   : > { %2758 = vmatpush.bf16.msrb.mxu0 %v5656_v62  ;;  %2771 = vmatpush.bf16.msrb.mxu1 %v5659_v41 }
 0x275   : > { %2784 = vmatpush.bf16.msrb.mxu2 %v5661_v47  ;;  %2797 = vmatpush.bf16.msrb.mxu3 %v5664_v19 }
 0x278   : > { %2759 = vmatpush.bf16.msrb.mxu0 %v5669_v40  ;;  %2772 = vmatpush.bf16.msrb.mxu1 %v5671_v12 }
 0x279   : > { %2785 = vmatpush.bf16.msrb.mxu2 %v5676_v7  ;;  %2798 = vmatpush.bf16.msrb.mxu3 %v5678_v13 }
 0x27c   : > { %2760 = vmatpush.bf16.msrb.mxu0 %v5682_v15  ;;  %2773 = vmatpush.bf16.msrb.mxu1 %v5684_v28 }
 0x27d   : > { %2786 = vmatpush.bf16.msrb.mxu2 %v5687_v39  ;;  %2799 = vmatpush.bf16.msrb.mxu3 %v5690_v56 }
 0x280   : > { %2761 = vmatpush.bf16.msrb.mxu0 %v5696_v5  ;;  %2774 = vmatpush.bf16.msrb.mxu1 %v5698_v9 }
 0x281   : > { %2787 = vmatpush.bf16.msrb.mxu2 %v5703_v34  ;;  %2800 = vmatpush.bf16.msrb.mxu3 %v5707_v36 }
 0x2df   : > { %v2501_v23 = vpop.f32.mrf.mxu0  ;;  %v2514_v22 = vpop.f32.mrf.mxu1 }
 0x2e0   : > { %v2544_v57 = vadd.f32 %v2501_v23, %v493_v45  ;;  %v2545_v17 = vadd.f32 %v2514_v22, %v512_v33 }
 0x2e2   : > { %v4139_v24 = vmul.f32 -1.442695, %v2544_v57  ;;  %v4140_v14 = vmul.f32 -1.442695, %v2545_v17 }
 0x2e4   : > { %4492 = vpow2.f32 %v4139_v24 }
 0x2e5   : > { %4494 = vpow2.f32 %v4140_v14 }
 0x2e6   : > { %v2527_v3 = vpop.f32.mrf.mxu2  ;;  %v2540_v2 = vpop.f32.mrf.mxu3 }
 0x2e7   : > { %v2546_v51 = vadd.f32 %v2527_v3, %v531_v1  ;;  %v2503_v46 = vpop.f32.mrf.mxu0  ;;  %v2516_v21 = vpop.f32.mrf.mxu1  ;;  %v2547_v57 = vadd.f32 %v2540_v2, %v550_v54 }
 0x2e9   : > { %v4141_v35 = vmul.f32 -1.442695, %v2546_v51 }
 0x2ea   : > { %v4493_v18 = vpop.eup %4492 }
 0x2eb   : > { %v4495_v26 = vpop.eup %4494  ;;  %v2557_v58 = vadd.f32 1.0, %v4493_v18  ;;  %4496 = vpow2.f32 %v4141_v35 }
 0x2ec   : > { %v2558_v63 = vadd.f32 1.0, %v4495_v26 }
 0x2ed   : > { %4498 = vrcp.f32 %v2557_v58  ;;  %v2571_v51 = vand.u32 2147483648, %v2557_v58  ;;  %v2569_v59 = vand.u32 2147483647, %v2557_v58  ;;  %vm2565_vm9 = vweird.f32 %v2557_v58 }
 0x2ee   : > { %4500 = vrcp.f32 %v2558_v63  ;;  %v2529_v25 = vpop.f32.mrf.mxu2  ;;  %v2542_v45 = vpop.f32.mrf.mxu3  ;;  %v2586_v46 = vand.u32 2147483648, %v2558_v63  ;;  %v2584_v35 = vand.u32 2147483647, %v2558_v63  ;;  %vm2580_vm10 = vweird.f32 %v2558_v63 }
 0x2ef   : > { %v2572_v45 = vor.u32 1.1754944e-38, %v2571_v51  ;;  %vm2570_vm13 = vcmp.eq.f32.partialorder %v2569_v59, 8.507059e+37 }
 0x2f0   : > { %v2587_v54 = vor.u32 1.1754944e-38, %v2586_v46  ;;  %vm2585_vm14 = vcmp.eq.f32.partialorder %v2584_v35, 8.507059e+37 }
 0x2f1   : > { %v4497_v33 = vpop.eup %4496 }
 0x2f2   : > { %v2559_v23 = vadd.f32 1.0, %v4497_v33 }
 0x2f3   : > { %v4499_v22 = vpop.eup %4498 }
 0x2f4   : > { %v4501_v17 = vpop.eup %4500  ;;  %v2561_v24 = vmul.f32 %v4499_v22, %v2557_v58  ;;  %4502 = vrcp.f32 %v2559_v23  ;;  %vm2566_vm7 = vweird.f32 %v4499_v22  ;;  %v2601_v51 = vand.u32 2147483648, %v2559_v23 }
 0x2f5   : > { %v2576_v14 = vmul.f32 %v4501_v17, %v2558_v63  ;;  %4504 = vtanh.f32 %v2547_v57  ;;  %vm2581_vm8 = vweird.f32 %v4501_v17  ;;  %vm2567_vm11 = vmor %vm2565_vm9, %vm2566_vm7  ;;  %vm2595_vm1 = vweird.f32 %v2559_v23 }
 0x2f6   : > { %v2562_v1 = vsub.f32 1.0, %v2561_v24  ;;  %vm2582_vm12 = vmor %vm2580_vm10, %vm2581_vm8  ;;  %v2614_v24 = vstv %s2613_s23  ;;  %v2599_v46 = vand.u32 2147483647, %v2559_v23  ;;  %v2602_v59 = vor.u32 1.1754944e-38, %v2601_v51 }
 0x2f7   : > { %v2577_v3 = vsub.f32 1.0, %v2576_v14  ;;  %vm2615_vm15 = vcmp.eq.s32.totalorder %v2614_v24, 1 }
 0x2f8   : > { %v2563_v21 = vmul.f32 %v4499_v22, %v2562_v1  ;;  %vm2600_vm3 = vcmp.eq.f32.partialorder %v2599_v46, 8.507059e+37 }
 0x2f9   : > { %v2578_v2 = vmul.f32 %v4501_v17, %v2577_v3 }
 0x2fa   : > { %v4503_v18 = vpop.eup %4502  ;;  %v2564_v26 = vadd.f32 %v4499_v22, %v2563_v21 }
 0x2fb   : > { %v2591_v25 = vmul.f32 %v4503_v18, %v2559_v23  ;;  %v2579_v33 = vadd.f32 %v4501_v17, %v2578_v2  ;;  %v4505_v14 = vpop.eup %4504  ;;  %vm2596_vm0 = vweird.f32 %v4503_v18 }
 0x2fc   : > { %v2568_v57 = vsel %vm2567_vm11, %v4499_v22, %v2564_v26  ;;  %vm2597_vm2 = vmor %vm2595_vm1, %vm2596_vm0 }
 0x2fd   : > { %v2592_v1 = vsub.f32 1.0, %v2591_v25  ;;  %v2573_v4 = vsel %vm2570_vm13, %v2572_v45, %v2568_v57  ;;  %v2583_v20 = vsel %vm2582_vm12, %v4501_v17, %v2579_v33 }
 0x2fe   : > { %v2588_v3 = vsel %vm2585_vm14, %v2587_v54, %v2583_v20  ;;  %v2607_v53 = vmul.f32 %v4505_v14, %v2573_v4 }
 0x2ff   : > { %v2593_v10 = vmul.f32 %v4503_v18, %v2592_v1  ;;  %v2606_v58 = vmul.f32 %v2588_v3, %v5760_v27 }
 0x301   : > { %v2608_v63 = vadd.f32 %v2607_v53, %v2606_v58  ;;  %v2594_v21 = vadd.f32 %v4503_v18, %v2593_v10 }
 0x303   : > { %4506 = vtanh.f32 %v2608_v63  ;;  %v5840_v22 = vsel %vm2615_vm15, %v2608_v63, %v5760_v27  ;;  %v2598_v17 = vsel %vm2597_vm2, %v4503_v18, %v2594_v21  ;;  %v2745_v63 = vstv %s2744_s27 }
 0x304   : > { %v2603_v4 = vsel %vm2600_vm3, %v2602_v59, %v2598_v17  ;;  %vm2746_vm12 = vcmp.eq.s32.totalorder %v2745_v63, 1 }
 0x309   : > { %v4507_v20 = vpop.eup %4506 }
 0x30a   : > { %v2610_v2 = vmul.f32 %v4507_v20, %v2603_v4 }
 0x30c   : > { %v5844_v53 = vsel %vm2615_vm15, %v2610_v2, %v5774_v61 }
 0x30d   : > { %v2622_v10 = vpack.c.bf16 %v5844_v53, %v5844_v53 }
 0x30f   : > { %2631 = vmatmul.bf16.vlgmr.msra.gmra.mxu0 %v2622_v10  ;;  %2644 = vmatmul.bf16.vlgmr.msra.gmra.mxu1 %v2622_v10 }
 0x310   : > { %2657 = vmatmul.bf16.vlgmr.msra.gmra.mxu2 %v2622_v10  ;;  %2670 = vmatmul.bf16.vlgmr.msra.gmra.mxu3 %v2622_v10 }
 0x311   : > { %2885 = vmatpush.bf16.msra.mxu0 %v5605_v43  ;;  %2898 = vmatpush.bf16.msra.mxu1 %v5607_v44  ;;  %v5995_v43 = vld [vmem:[#allocation10_spill] sm:$0xff] }
 0x312   : > { %2911 = vmatpush.bf16.msra.mxu2 %v5609_v50  ;;  %2924 = vmatpush.bf16.msra.mxu3 %v5613_v52  ;;  %v1024_v44 = vadd.f32 %v5995_v43, %v5135_v31  ;;  %v5996_v50 = vld [vmem:[#allocation11_spill] sm:$0xff] }
 0x313   : > { %v1037_v52 = vadd.f32 %v5996_v50, %v5138_v32 }
 0x315   : > { %2886 = vmatpush.bf16.msra.mxu0 %v5615_v55  ;;  %2899 = vmatpush.bf16.msra.mxu1 %v5618_v60 }
 0x316   : > { %2912 = vmatpush.bf16.msra.mxu2 %v5621_v0  ;;  %2925 = vmatpush.bf16.msra.mxu3 %v5623_v48 }
 0x319   : > { %2887 = vmatpush.bf16.msra.mxu0 %v5628_v8  ;;  %2900 = vmatpush.bf16.msra.mxu1 %v5631_v11 }
 0x31a   : > { %2913 = vmatpush.bf16.msra.mxu2 %v5634_v29  ;;  %2926 = vmatpush.bf16.msra.mxu3 %v5636_v30  ;;  %v5997_v29 = vld [vmem:[#allocation12_spill] sm:$0xff] }
 0x31b   : > { %v1050_v30 = vadd.f32 %v5997_v29, %v5149_v6 }
 0x31d   : > { %2888 = vmatpush.bf16.msra.mxu0 %v5640_v37  ;;  %2901 = vmatpush.bf16.msra.mxu1 %v5643_v38 }
 0x31e   : > { %2914 = vmatpush.bf16.msra.mxu2 %v5645_v42  ;;  %2927 = vmatpush.bf16.msra.mxu3 %v5648_v49 }
 0x321   : > { %2889 = vmatpush.bf16.msra.mxu0 %v5656_v62  ;;  %2902 = vmatpush.bf16.msra.mxu1 %v5659_v41 }
 0x322   : > { %2915 = vmatpush.bf16.msra.mxu2 %v5661_v47  ;;  %2928 = vmatpush.bf16.msra.mxu3 %v5664_v19 }
 0x325   : > { %2890 = vmatpush.bf16.msra.mxu0 %v5669_v40  ;;  %2903 = vmatpush.bf16.msra.mxu1 %v5671_v12 }
 0x326   : > { %2916 = vmatpush.bf16.msra.mxu2 %v5676_v7  ;;  %2929 = vmatpush.bf16.msra.mxu3 %v5678_v13 }
 0x329   : > { %2891 = vmatpush.bf16.msra.mxu0 %v5682_v15  ;;  %2904 = vmatpush.bf16.msra.mxu1 %v5684_v28  ;;  %v5998_v28 = vld [vmem:[#allocation13_spill] sm:$0xff] }
 0x32a   : > { %2917 = vmatpush.bf16.msra.mxu2 %v5687_v39  ;;  %2930 = vmatpush.bf16.msra.mxu3 %v5690_v56  ;;  %v1063_v39 = vadd.f32 %v5998_v28, %v5154_v16 }
 0x32d   : > { %2892 = vmatpush.bf16.msra.mxu0 %v5696_v5  ;;  %2905 = vmatpush.bf16.msra.mxu1 %v5698_v9 }
 0x32e   : > { %2918 = vmatpush.bf16.msra.mxu2 %v5703_v34  ;;  %2931 = vmatpush.bf16.msra.mxu3 %v5707_v36 }
 0x38c   : > { %v2632_v55 = vpop.f32.mrf.mxu0  ;;  %v2645_v60 = vpop.f32.mrf.mxu1 }
 0x38d   : > { %v2675_v0 = vadd.f32 %v2632_v55, %v1024_v44  ;;  %v2676_v48 = vadd.f32 %v2645_v60, %v1037_v52 }
 0x38f   : > { %v4142_v8 = vmul.f32 -1.442695, %v2675_v0  ;;  %v4143_v11 = vmul.f32 -1.442695, %v2676_v48 }
 0x391   : > { %4508 = vpow2.f32 %v4142_v8 }
 0x392   : > { %4510 = vpow2.f32 %v4143_v11 }
 0x393   : > { %v2658_v37 = vpop.f32.mrf.mxu2  ;;  %v2671_v38 = vpop.f32.mrf.mxu3 }
 0x394   : > { %v2677_v42 = vadd.f32 %v2658_v37, %v1050_v30  ;;  %v2634_v49 = vpop.f32.mrf.mxu0  ;;  %v2647_v62 = vpop.f32.mrf.mxu1  ;;  %v2678_v9 = vadd.f32 %v2671_v38, %v1063_v39  ;;  %v6001_v37 = vld [vmem:[#allocation15_spill] sm:$0xff] }
 0x395   : > { %v1611_v38 = vadd.f32 %v6001_v37, %v5138_v32 }
 0x396   : > { %v4144_v41 = vmul.f32 -1.442695, %v2677_v42 }
 0x397   : > { %v4509_v47 = vpop.eup %4508 }
 0x398   : > { %v4511_v19 = vpop.eup %4510  ;;  %v2688_v40 = vadd.f32 1.0, %v4509_v47  ;;  %4512 = vpow2.f32 %v4144_v41 }
 0x399   : > { %v2689_v12 = vadd.f32 1.0, %v4511_v19  ;;  %v6002_v19 = vld [vmem:[#allocation16_spill] sm:$0xff] }
 0x39a   : > { %4514 = vrcp.f32 %v2688_v40  ;;  %v2702_v35 = vand.u32 2147483648, %v2688_v40  ;;  %v2700_v25 = vand.u32 2147483647, %v2688_v40  ;;  %vm2696_vm6 = vweird.f32 %v2688_v40 }
 0x39b   : > { %4516 = vrcp.f32 %v2689_v12  ;;  %v2660_v7 = vpop.f32.mrf.mxu2  ;;  %v2673_v13 = vpop.f32.mrf.mxu3  ;;  %v2717_v18 = vand.u32 2147483648, %v2689_v12  ;;  %v2715_v33 = vand.u32 2147483647, %v2689_v12  ;;  %vm2711_vm7 = vweird.f32 %v2689_v12 }
 0x39c   : > { %v2703_v14 = vor.u32 1.1754944e-38, %v2702_v35  ;;  %vm2701_vm10 = vcmp.eq.f32.partialorder %v2700_v25, 8.507059e+37 }
 0x39d   : > { %v2718_v3 = vor.u32 1.1754944e-38, %v2717_v18  ;;  %vm2716_vm11 = vcmp.eq.f32.partialorder %v2715_v33, 8.507059e+37 }
 0x39e   : > { %v4513_v15 = vpop.eup %4512 }
 0x39f   : > { %v2690_v56 = vadd.f32 1.0, %v4513_v15 }
 0x3a0   : > { %v4515_v5 = vpop.eup %4514 }
 0x3a1   : > { %v4517_v34 = vpop.eup %4516  ;;  %v2692_v36 = vmul.f32 %v4515_v5, %v2688_v40  ;;  %4518 = vrcp.f32 %v2690_v56  ;;  %vm2697_vm4 = vweird.f32 %v4515_v5  ;;  %v2732_v44 = vand.u32 2147483648, %v2690_v56 }
 0x3a2   : > { %v2707_v27 = vmul.f32 %v4517_v34, %v2689_v12  ;;  %4520 = vtanh.f32 %v2678_v9  ;;  %vm2712_vm5 = vweird.f32 %v4517_v34  ;;  %vm2698_vm8 = vmor %vm2696_vm6, %vm2697_vm4  ;;  %vm2726_vm14 = vweird.f32 %v2690_v56 }
 0x3a3   : > { %v2693_v61 = vsub.f32 1.0, %v2692_v36  ;;  %vm2713_vm9 = vmor %vm2711_vm7, %vm2712_vm5  ;;  %v2730_v52 = vand.u32 2147483647, %v2690_v56  ;;  %v2733_v60 = vor.u32 1.1754944e-38, %v2732_v44  ;;  %v1624_v40 = vadd.f32 %v6002_v19, %v5149_v6 }
 0x3a4   : > { %v2708_v23 = vsub.f32 1.0, %v2707_v27 }
 0x3a5   : > { %v2694_v26 = vmul.f32 %v4515_v5, %v2693_v61  ;;  %vm2731_vm0 = vcmp.eq.f32.partialorder %v2730_v52, 8.507059e+37 }
 0x3a6   : > { %v2709_v45 = vmul.f32 %v4517_v34, %v2708_v23  ;;  %v6003_v23 = vld [vmem:[#allocation17_spill] sm:$0xff] }
 0x3a7   : > { %v4519_v54 = vpop.eup %4518  ;;  %v2695_v57 = vadd.f32 %v4515_v5, %v2694_v26  ;;  %v1637_v35 = vadd.f32 %v6003_v23, %v5154_v16 }
 0x3a8   : > { %v2722_v24 = vmul.f32 %v4519_v54, %v2690_v56  ;;  %v2710_v1 = vadd.f32 %v4517_v34, %v2709_v45  ;;  %v4521_v21 = vpop.eup %4520  ;;  %vm2727_vm13 = vweird.f32 %v4519_v54 }
 0x3a9   : > { %v2699_v58 = vsel %vm2698_vm8, %v4515_v5, %v2695_v57  ;;  %vm2728_vm15 = vmor %vm2726_vm14, %vm2727_vm13 }
 0x3aa   : > { %v2723_v51 = vsub.f32 1.0, %v2722_v24  ;;  %v2704_v46 = vsel %vm2701_vm10, %v2703_v14, %v2699_v58  ;;  %v2714_v17 = vsel %vm2713_vm9, %v4517_v34, %v2710_v1 }
 0x3ab   : > { %v2719_v59 = vsel %vm2716_vm11, %v2718_v3, %v2714_v17  ;;  %v2738_v20 = vmul.f32 %v4521_v21, %v2704_v46 }
 0x3ac   : > { %v2724_v4 = vmul.f32 %v4519_v54, %v2723_v51  ;;  %v2737_v2 = vmul.f32 %v2719_v59, %v5840_v22 }
 0x3ae   : > { %v2739_v10 = vadd.f32 %v2738_v20, %v2737_v2  ;;  %v2725_v43 = vadd.f32 %v4519_v54, %v2724_v4 }
 0x3b0   : > { %4522 = vtanh.f32 %v2739_v10  ;;  %v5898_v50 = vsel %vm2746_vm12, %v2739_v10, %v5840_v22  ;;  %v2729_v55 = vsel %vm2728_vm15, %v4519_v54, %v2725_v43  ;;  %v6000_v22 = vld [vmem:[#allocation14_spill] sm:$0xff]  ;;  %v2876_v10 = vstv %s2875_s7 }
 0x3b1   : > { %v2734_v48 = vsel %vm2731_vm0, %v2733_v60, %v2729_v55  ;;  %v1598_v30 = vadd.f32 %v6000_v22, %v5135_v31  ;;  %vm2877_vm9 = vcmp.eq.s32.totalorder %v2876_v10, 1 }
 0x3b6   : > { %v4523_v0 = vpop.eup %4522 }
 0x3b7   : > { %v2741_v8 = vmul.f32 %v4523_v0, %v2734_v48 }
 0x3b9   : > { %v5902_v11 = vsel %vm2746_vm12, %v2741_v8, %v5844_v53 }
 0x3ba   : > { %v2753_v29 = vpack.c.bf16 %v5902_v11, %v5902_v11 }
 0x3bc   : > { %2762 = vmatmul.bf16.vlgmr.msrb.gmra.mxu0 %v2753_v29  ;;  %2775 = vmatmul.bf16.vlgmr.msrb.gmra.mxu1 %v2753_v29 }
 0x3bd   : > { %2788 = vmatmul.bf16.vlgmr.msrb.gmra.mxu2 %v2753_v29  ;;  %2801 = vmatmul.bf16.vlgmr.msrb.gmra.mxu3 %v2753_v29 }
 0x439   : > { %v2763_v42 = vpop.f32.mrf.mxu0  ;;  %v2776_v49 = vpop.f32.mrf.mxu1 }
 0x43a   : > { %v2806_v62 = vadd.f32 %v2763_v42, %v1598_v30  ;;  %v2807_v41 = vadd.f32 %v2776_v49, %v1611_v38 }
 0x43c   : > { %v4145_v47 = vmul.f32 -1.442695, %v2806_v62  ;;  %v4146_v53 = vmul.f32 -1.442695, %v2807_v41 }
 0x43e   : > { %4524 = vpow2.f32 %v4145_v47 }
 0x43f   : > { %4526 = vpow2.f32 %v4146_v53 }
 0x440   : > { %v2789_v12 = vpop.f32.mrf.mxu2  ;;  %v2802_v7 = vpop.f32.mrf.mxu3 }
 0x441   : > { %v2808_v13 = vadd.f32 %v2789_v12, %v1624_v40  ;;  %v2765_v15 = vpop.f32.mrf.mxu0  ;;  %v2778_v28 = vpop.f32.mrf.mxu1  ;;  %v2809_v25 = vadd.f32 %v2802_v7, %v1637_v35  ;;  %v6006_v40 = vld [vmem:[#allocation19_spill] sm:$0xff] }
 0x442   : > { %v2186_v12 = vadd.f32 %v6006_v40, %v5138_v32 }
 0x443   : > { %v4147_v39 = vmul.f32 -1.442695, %v2808_v13 }
 0x444   : > { %v4525_v56 = vpop.eup %4524 }
 0x445   : > { %v4527_v5 = vpop.eup %4526  ;;  %v2819_v9 = vadd.f32 1.0, %v4525_v56  ;;  %4528 = vpow2.f32 %v4147_v39 }
 0x446   : > { %v2820_v34 = vadd.f32 1.0, %v4527_v5  ;;  %v6007_v5 = vld [vmem:[#allocation20_spill] sm:$0xff] }
 0x447   : > { %4530 = vrcp.f32 %v2819_v9  ;;  %v2833_v14 = vand.u32 2147483648, %v2819_v9  ;;  %v2831_v58 = vand.u32 2147483647, %v2819_v9  ;;  %vm2827_vm3 = vweird.f32 %v2819_v9 }
 0x448   : > { %4532 = vrcp.f32 %v2820_v34  ;;  %v2791_v36 = vpop.f32.mrf.mxu2  ;;  %v2804_v27 = vpop.f32.mrf.mxu3  ;;  %v2848_v1 = vand.u32 2147483648, %v2820_v34  ;;  %v2846_v21 = vand.u32 2147483647, %v2820_v34  ;;  %vm2842_vm4 = vweird.f32 %v2820_v34 }
 0x449   : > { %v2834_v59 = vor.u32 1.1754944e-38, %v2833_v14  ;;  %vm2832_vm7 = vcmp.eq.f32.partialorder %v2831_v58, 8.507059e+37 }
 0x44a   : > { %v2849_v4 = vor.u32 1.1754944e-38, %v2848_v1  ;;  %vm2847_vm8 = vcmp.eq.f32.partialorder %v2846_v21, 8.507059e+37 }
 0x44b   : > { %v4529_v61 = vpop.eup %4528 }
 0x44c   : > { %v2821_v18 = vadd.f32 1.0, %v4529_v61 }
 0x44d   : > { %v4531_v26 = vpop.eup %4530 }
 0x44e   : > { %v4533_v45 = vpop.eup %4532  ;;  %v2823_v33 = vmul.f32 %v4531_v26, %v2819_v9  ;;  %4534 = vrcp.f32 %v2821_v18  ;;  %vm2828_vm1 = vweird.f32 %v4531_v26  ;;  %v2863_v30 = vand.u32 2147483648, %v2821_v18 }
 0x44f   : > { %v2838_v54 = vmul.f32 %v4533_v45, %v2820_v34  ;;  %4536 = vtanh.f32 %v2809_v25  ;;  %vm2843_vm2 = vweird.f32 %v4533_v45  ;;  %vm2829_vm5 = vmor %vm2827_vm3, %vm2828_vm1  ;;  %vm2857_vm11 = vweird.f32 %v2821_v18 }
 0x450   : > { %v2824_v57 = vsub.f32 1.0, %v2823_v33  ;;  %vm2844_vm6 = vmor %vm2842_vm4, %vm2843_vm2  ;;  %v2861_v38 = vand.u32 2147483647, %v2821_v18  ;;  %v2864_v49 = vor.u32 1.1754944e-38, %v2863_v30  ;;  %v2199_v9 = vadd.f32 %v6007_v5, %v5149_v6  ;;  %v6008_v6 = vld [vmem:[#allocation21_spill] sm:$0xff] }
 0x451   : > { %v2839_v24 = vsub.f32 1.0, %v2838_v54  ;;  %v2212_v54 = vadd.f32 %v6008_v6, %v5154_v16 }
 0x452   : > { %v2825_v3 = vmul.f32 %v4531_v26, %v2824_v57  ;;  %vm2862_vm13 = vcmp.eq.f32.partialorder %v2861_v38, 8.507059e+37 }
 0x453   : > { %v2840_v63 = vmul.f32 %v4533_v45, %v2839_v24 }
 0x454   : > { %v4535_v51 = vpop.eup %4534  ;;  %v2826_v46 = vadd.f32 %v4531_v26, %v2825_v3 }
 0x455   : > { %v2853_v17 = vmul.f32 %v4535_v51, %v2821_v18  ;;  %v2841_v20 = vadd.f32 %v4533_v45, %v2840_v63  ;;  %v4537_v43 = vpop.eup %4536  ;;  %vm2858_vm10 = vweird.f32 %v4535_v51 }
 0x456   : > { %v2830_v2 = vsel %vm2829_vm5, %v4531_v26, %v2826_v46  ;;  %vm2859_vm12 = vmor %vm2857_vm11, %vm2858_vm10 }
 0x457   : > { %v2854_v44 = vsub.f32 1.0, %v2853_v17  ;;  %v2835_v52 = vsel %vm2832_vm7, %v2834_v59, %v2830_v2  ;;  %v2845_v55 = vsel %vm2844_vm6, %v4533_v45, %v2841_v20 }
 0x458   : > { %v2850_v60 = vsel %vm2847_vm8, %v2849_v4, %v2845_v55  ;;  %v2869_v0 = vmul.f32 %v4537_v43, %v2835_v52 }
 0x459   : > { %v2855_v48 = vmul.f32 %v4535_v51, %v2854_v44  ;;  %v2868_v8 = vmul.f32 %v2850_v60, %v5898_v50  ;;  %v3007_v60 = vstv %s3006_s30 }
 0x45a   : > { %vm3008_vm6 = vcmp.eq.s32.totalorder %v3007_v60, 1 }
 0x45b   : > { %v2870_v29 = vadd.f32 %v2869_v0, %v2868_v8  ;;  %v2856_v22 = vadd.f32 %v4535_v51, %v2855_v48 }
 0x45d   : > { %4538 = vtanh.f32 %v2870_v29  ;;  %v5924_v37 = vsel %vm2877_vm9, %v2870_v29, %v5898_v50  ;;  %v2860_v42 = vsel %vm2859_vm12, %v4535_v51, %v2856_v22  ;;  %v6005_v50 = vld [vmem:[#allocation18_spill] sm:$0xff] }
 0x45e   : > { %v2865_v41 = vsel %vm2862_vm13, %v2864_v49, %v2860_v42 }
 0x463   : > { %v4539_v62 = vpop.eup %4538 }
 0x464   : > { %v2872_v47 = vmul.f32 %v4539_v62, %v2865_v41 }
 0x466   : > { %v5928_v53 = vsel %vm2877_vm9, %v2872_v47, %v5902_v11  ;;  %v2173_v11 = vadd.f32 %v6005_v50, %v5135_v31 }
 0x467   : > { %v2884_v19 = vpack.c.bf16 %v5928_v53, %v5928_v53 }
 0x469   : > { %2893 = vmatmul.bf16.vlgmr.msra.gmra.mxu0 %v2884_v19  ;;  %2906 = vmatmul.bf16.vlgmr.msra.gmra.mxu1 %v2884_v19 }
 0x46a   : > { %2919 = vmatmul.bf16.vlgmr.msra.gmra.mxu2 %v2884_v19  ;;  %2932 = vmatmul.bf16.vlgmr.msra.gmra.mxu3 %v2884_v19 }
 0x4e6   : > { %v2894_v7 = vpop.f32.mrf.mxu0  ;;  %v2907_v13 = vpop.f32.mrf.mxu1 }
 0x4e7   : > { %v2937_v15 = vadd.f32 %v2894_v7, %v2173_v11  ;;  %v2938_v28 = vadd.f32 %v2907_v13, %v2186_v12 }
 0x4e9   : > { %v4148_v39 = vmul.f32 -1.442695, %v2937_v15  ;;  %v4149_v56 = vmul.f32 -1.442695, %v2938_v28 }
 0x4eb   : > { %4540 = vpow2.f32 %v4148_v39 }
 0x4ec   : > { %4542 = vpow2.f32 %v4149_v56 }
 0x4ed   : > { %v2920_v34 = vpop.f32.mrf.mxu2  ;;  %v2933_v36 = vpop.f32.mrf.mxu3 }
 0x4ee   : > { %v2939_v27 = vadd.f32 %v2920_v34, %v2199_v9  ;;  %v2896_v61 = vpop.f32.mrf.mxu0  ;;  %v2909_v31 = vpop.f32.mrf.mxu1  ;;  %v2940_v14 = vadd.f32 %v2933_v36, %v2212_v54 }
 0x4f0   : > { %v4150_v23 = vmul.f32 -1.442695, %v2939_v27 }
 0x4f1   : > { %v4541_v35 = vpop.eup %4540 }
 0x4f2   : > { %v4543_v32 = vpop.eup %4542  ;;  %v2950_v18 = vadd.f32 1.0, %v4541_v35  ;;  %4544 = vpow2.f32 %v4150_v23 }
 0x4f3   : > { %v2951_v26 = vadd.f32 1.0, %v4543_v32 }
 0x4f4   : > { %4546 = vrcp.f32 %v2950_v18  ;;  %v2964_v51 = vand.u32 2147483648, %v2950_v18  ;;  %v2962_v16 = vand.u32 2147483647, %v2950_v18  ;;  %vm2958_vm0 = vweird.f32 %v2950_v18 }
 0x4f5   : > { %4548 = vrcp.f32 %v2951_v26  ;;  %v2922_v25 = vpop.f32.mrf.mxu2  ;;  %v2935_v45 = vpop.f32.mrf.mxu3  ;;  %v2979_v46 = vand.u32 2147483648, %v2951_v26  ;;  %v2977_v20 = vand.u32 2147483647, %v2951_v26  ;;  %vm2973_vm1 = vweird.f32 %v2951_v26 }
 0x4f6   : > { %v2965_v43 = vor.u32 1.1754944e-38, %v2964_v51  ;;  %vm2963_vm4 = vcmp.eq.f32.partialorder %v2962_v16, 8.507059e+37 }
 0x4f7   : > { %v2980_v52 = vor.u32 1.1754944e-38, %v2979_v46  ;;  %vm2978_vm5 = vcmp.eq.f32.partialorder %v2977_v20, 8.507059e+37 }
 0x4f8   : > { %v4545_v33 = vpop.eup %4544 }
 0x4f9   : > { %v2952_v57 = vadd.f32 1.0, %v4545_v33 }
 0x4fa   : > { %v4547_v24 = vpop.eup %4546 }
 0x4fb   : > { %v4549_v1 = vpop.eup %4548  ;;  %v2954_v3 = vmul.f32 %v4547_v24, %v2950_v18  ;;  %4550 = vrcp.f32 %v2952_v57  ;;  %vm2959_vm14 = vweird.f32 %v4547_v24  ;;  %v2994_v41 = vand.u32 2147483648, %v2952_v57 }
 0x4fc   : > { %v2969_v58 = vmul.f32 %v4549_v1, %v2951_v26  ;;  %4552 = vtanh.f32 %v2940_v14  ;;  %vm2974_vm15 = vweird.f32 %v4549_v1  ;;  %vm2960_vm2 = vmor %vm2958_vm0, %vm2959_vm14  ;;  %vm2988_vm8 = vweird.f32 %v2952_v57 }
 0x4fd   : > { %v2955_v63 = vsub.f32 1.0, %v2954_v3  ;;  %vm2975_vm3 = vmor %vm2973_vm1, %vm2974_vm15  ;;  %v2992_v19 = vand.u32 2147483647, %v2952_v57  ;;  %v2995_v11 = vor.u32 1.1754944e-38, %v2994_v41 }
 0x4fe   : > { %v2970_v21 = vsub.f32 1.0, %v2969_v58 }
 0x4ff   : > { %v2956_v17 = vmul.f32 %v4547_v24, %v2955_v63  ;;  %vm2993_vm10 = vcmp.eq.f32.partialorder %v2992_v19, 8.507059e+37 }
 0x500   : > { %v2971_v59 = vmul.f32 %v4549_v1, %v2970_v21 }
 0x501   : > { %v4551_v4 = vpop.eup %4550  ;;  %v2957_v2 = vadd.f32 %v4547_v24, %v2956_v17 }
 0x502   : > { %v2984_v10 = vmul.f32 %v4551_v4, %v2952_v57  ;;  %v2972_v44 = vadd.f32 %v4549_v1, %v2971_v59  ;;  %v4553_v0 = vpop.eup %4552  ;;  %vm2989_vm7 = vweird.f32 %v4551_v4 }
 0x503   : > { %v2961_v55 = vsel %vm2960_vm2, %v4547_v24, %v2957_v2  ;;  %vm2990_vm9 = vmor %vm2988_vm8, %vm2989_vm7 }
 0x504   : > { %v2985_v48 = vsub.f32 1.0, %v2984_v10  ;;  %v2966_v8 = vsel %vm2963_vm4, %v2965_v43, %v2961_v55  ;;  %v2976_v29 = vsel %vm2975_vm3, %v4549_v1, %v2972_v44 }
 0x505   : > { %v2981_v22 = vsel %vm2978_vm5, %v2980_v52, %v2976_v29  ;;  %v3000_v30 = vmul.f32 %v4553_v0, %v2966_v8 }
 0x506   : > { %v2986_v38 = vmul.f32 %v4551_v4, %v2985_v48  ;;  %v2999_v42 = vmul.f32 %v2981_v22, %v5924_v37 }
 0x508   : > { %v3001_v49 = vadd.f32 %v3000_v30, %v2999_v42  ;;  %v2987_v62 = vadd.f32 %v4551_v4, %v2986_v38 }
 0x50a   : > { %4554 = vtanh.f32 %v3001_v49  ;;  %v3010_v47 = vsel %vm3008_vm6, %v3001_v49, %v5924_v37  ;;  %v2991_v50 = vsel %vm2990_vm9, %v4551_v4, %v2987_v62 }
 0x50b   : > { %3012 = vst [vmem:[%s5977_s6] sm:$0xff] %v3010_v47  ;;  %v2996_v12 = vsel %vm2993_vm10, %v2995_v11, %v2991_v50 }
 0x510   : > { %v4555_v40 = vpop.eup %4554 }
 0x511   : > { %v3003_v7 = vmul.f32 %v4555_v40, %v2996_v12 }
 0x513   : > { %v3009_v13 = vsel %vm3008_vm6, %v3003_v7, %v5928_v53 }
 0x514   : > { %3011 = vst [vmem:[%s5976_s5] sm:$0xff] %v3009_v13 }
 0x515   : > { %4623 = dma.done.wait (%p4427_p13), [#allocation6], 448  }
 0x516   : > { %4625 = vsyncadd (%p4427_p13), [#allocation6], 4294966848 }
 0x517 PF: > { %s19_s21 = sadd.s32 1, %s4628_s21  }
 0x518   : > { %p16_p1 = scmp.ge.s32.totalorder %s19_s21, 5  }
 0x51a   :  { %18 = sbr.rel (!%p16_p1) target bundleno = 2 (0x2), region = 97 }
 0x51f   :  { %3049 = vsyncpa [#allocation5], 1 }
 0x520   :  { %3051 = vsyncpa [#allocation5 + $0x1], 1 }
 0x521   :  { %3052 = vsyncpa [#allocation6], 1 }
 0x522   :  { %3054 = vsyncpa [#allocation6 + $0x1], 1 }

// kernel: encoder_forward.2
= control target key start
LH: loop header
LB: loop body
LE: loop exit
PB: predicated region body
PF: predicated region fallthrough
CT: control target
= control target key end

     0   :  { %s5675_s21 = smov 0   ;;  %s8099_s0 = inlined_call_operand.vmem [shape: bf16[21,8,128], index: 0, kind: input, shape index: {}]   ;;  %s8100_s1 = inlined_call_operand.vmem [shape: bf16[128,512], index: 1, kind: input, shape index: {}]   ;;  %s8101_s2 = inlined_call_operand.vmem [shape: bf16[128,512], index: 2, kind: input, shape index: {}]   ;;  %s8102_s3 = inlined_call_operand.vmem [shape: f32[1,512], index: 3, kind: input, shape index: {}]   ;;  %s8103_s4 = inlined_call_operand.vmem [shape: bf16[21,8,128], index: 4, kind: output, shape index: {0}]   ;;  %s8104_s5 = inlined_call_operand.vmem [shape: f32[8,128], index: 5, kind: output, shape index: {1}]   ;;  %s8105_s6 = inlined_call_operand.vmem [shape: f32[8,128], index: 6, kind: output, shape index: {2}]  }
   0x1 LB: > { %s3689_s22 = sadd.s32 4294967295, %s5637_s21   ;;  %p3693_p0 = scmp.ge.s32.totalorder %s5637_s21, 1  ;;  %s5637_s21 = sphi %s5675_s21, %s17_s21  }
   0x2   : > { %p208_p1 = scmp.lt.s32.totalorder %s5637_s21, 4 }
   0x4   : > { %p209_p2 = pnand %p3693_p0, %p208_p1 }
   0x5   : > { %s5683_s23 = smul.u32 (!%p209_p2), 7, %s3689_s22  ;;  %p3696_p4 = scmp.ne.s32.totalorder (!%p209_p2), %s3689_s22, 0 }
   0x6   : > { %212 = sbr.rel (%p209_p2) target bundleno = 1298 (0x512), region = 36 }
   0x7   : > { %p239_p3 = scmp.lt.s32.totalorder (!%p209_p2), %s5683_s23, 20 }
   0xb   : > { %s240_s24 = scalar_select %p239_p3, %s5683_s23, 20 }
   0xc   : > { %253 = sbr.rel (%p3696_p4) target bundleno = 20 (0x14), region = 40 }
   0xd   : > { %s3694_s25 = sshll.u32 %s240_s24, 2 }
   0xe   : > { %s5692_s28 = scalar_lea.vmem %s8099_s0, %s3694_s25  ;;  %s5697_s7 = scalar_lea.vmem %s8103_s4, %s3694_s25 }
  0x11   : > { %v5639_v0 = vmov 0.0  }
  0x12   : > { %254 = vst [vmem:[%s8104_s5] sm:$0xff] %v5639_v0 }
  0x13   : > { %255 = vst [vmem:[%s8105_s6] sm:$0xff] %v5639_v0 }
  0x14 PF: > { %v3819_v1 = vld [vmem:[%s8100_s1 + $0xe0] sm:$0xf]  ;;  %v5171_v2 = vld [vmem:[%s8100_s1 + $0xec] sm:$0xf0]  ;;  %v5169_v3 = vld [vmem:[%s8100_s1 + $0xe4] sm:$0xf] }
  0x15   : > { %v3820_v4 = vor.u32 %v5171_v2, %v3819_v1  ;;  %v3821_v5 = vld [vmem:[%s8100_s1 + $0xf0] sm:$0xf0]  ;;  %v3827_v6 = vld [vmem:[%s8100_s1 + $0xe8] sm:$0xf]  ;;  %v5172_v7 = vld [vmem:[%s8100_s1 + $0xf4] sm:$0xf0] }
  0x16   : > { %v3824_v8 = vor.u32 %v5169_v3, %v3821_v5  ;;  %v3828_v9 = vor.u32 %v5172_v7, %v3827_v6  ;;  %v5170_v10 = vld [vmem:[%s8100_s1 + $0xec] sm:$0xf]  ;;  %v3829_v11 = vld [vmem:[%s8100_s1 + $0xf8] sm:$0xf0]  ;;  %v3803_v12 = vld [vmem:[%s8100_s1 + $0xc0] sm:$0xf] }
  0x17   : > { %474 = vmatpush.bf16.msra.mxu0 %v3820_v4  ;;  %v3832_v13 = vor.u32 %v5170_v10, %v3829_v11  ;;  %v5167_v14 = vld [vmem:[%s8100_s1 + $0xcc] sm:$0xf0]  ;;  %v5165_v15 = vld [vmem:[%s8100_s1 + $0xc4] sm:$0xf]  ;;  %v3805_v16 = vld [vmem:[%s8100_s1 + $0xd0] sm:$0xf0] }
  0x18   : > { %493 = vmatpush.bf16.msra.mxu1 %v3824_v8  ;;  %512 = vmatpush.bf16.msra.mxu2 %v3828_v9  ;;  %v3804_v17 = vor.u32 %v5167_v14, %v3803_v12  ;;  %v3808_v18 = vor.u32 %v5165_v15, %v3805_v16  ;;  %v3811_v19 = vld [vmem:[%s8100_s1 + $0xc8] sm:$0xf]  ;;  %v5168_v20 = vld [vmem:[%s8100_s1 + $0xd4] sm:$0xf0]  ;;  %v5166_v21 = vld [vmem:[%s8100_s1 + $0xcc] sm:$0xf] }
  0x19   : > { %531 = vmatpush.bf16.msra.mxu3 %v3832_v13  ;;  %v3812_v22 = vor.u32 %v5168_v20, %v3811_v19  ;;  %v3813_v23 = vld [vmem:[%s8100_s1 + $0xd8] sm:$0xf0]  ;;  %v3787_v24 = vld [vmem:[%s8100_s1 + $0xa0] sm:$0xf]  ;;  %v5163_v25 = vld [vmem:[%s8100_s1 + $0xac] sm:$0xf0] }
  0x1a   : > { %v3816_v26 = vor.u32 %v5166_v21, %v3813_v23  ;;  %v5161_v27 = vld [vmem:[%s8100_s1 + $0xa4] sm:$0xf]  ;;  %v3789_v28 = vld [vmem:[%s8100_s1 + $0xb0] sm:$0xf0]  ;;  %v3795_v29 = vld [vmem:[%s8100_s1 + $0xa8] sm:$0xf]  ;;  %v3788_v30 = vor.u32 %v5163_v25, %v3787_v24 }
  0x1b   : > { %475 = vmatpush.bf16.msra.mxu0 %v3804_v17  ;;  %v5164_v31 = vld [vmem:[%s8100_s1 + $0xb4] sm:$0xf0]  ;;  %v5162_v32 = vld [vmem:[%s8100_s1 + $0xac] sm:$0xf]  ;;  %v3797_v33 = vld [vmem:[%s8100_s1 + $0xb8] sm:$0xf0]  ;;  %v3792_v34 = vor.u32 %v5161_v27, %v3789_v28 }
  0x1c   : > { %494 = vmatpush.bf16.msra.mxu1 %v3808_v18  ;;  %513 = vmatpush.bf16.msra.mxu2 %v3812_v22  ;;  %v3796_v35 = vor.u32 %v5164_v31, %v3795_v29  ;;  %v3771_v36 = vld [vmem:[%s8100_s1 + $0x80] sm:$0xf]  ;;  %v5159_v37 = vld [vmem:[%s8100_s1 + $0x8c] sm:$0xf0]  ;;  %v5157_v38 = vld [vmem:[%s8100_s1 + $0x84] sm:$0xf]  ;;  %v3800_v39 = vor.u32 %v5162_v32, %v3797_v33 }
  0x1d   : > { %532 = vmatpush.bf16.msra.mxu3 %v3816_v26  ;;  %v3773_v40 = vld [vmem:[%s8100_s1 + $0x90] sm:$0xf0]  ;;  %v3779_v41 = vld [vmem:[%s8100_s1 + $0x88] sm:$0xf]  ;;  %v5160_v42 = vld [vmem:[%s8100_s1 + $0x94] sm:$0xf0]  ;;  %v3772_v45 = vor.u32 %v5159_v37, %v3771_v36 }
  0x1e   : > { %v5158_v43 = vld [vmem:[%s8100_s1 + $0x8c] sm:$0xf]  ;;  %v3781_v44 = vld [vmem:[%s8100_s1 + $0x98] sm:$0xf0]  ;;  %v3776_v46 = vor.u32 %v5157_v38, %v3773_v40  ;;  %v3780_v47 = vor.u32 %v5160_v42, %v3779_v41  ;;  %v3755_v48 = vld [vmem:[%s8100_s1 + $0x60] sm:$0xf] }
  0x1f   : > { %476 = vmatpush.bf16.msra.mxu0 %v3788_v30  ;;  %v5155_v49 = vld [vmem:[%s8100_s1 + $0x6c] sm:$0xf0]  ;;  %v5153_v50 = vld [vmem:[%s8100_s1 + $0x64] sm:$0xf]  ;;  %v3784_v51 = vor.u32 %v5158_v43, %v3781_v44  ;;  %v3757_v52 = vld [vmem:[%s8100_s1 + $0x70] sm:$0xf0] }
  0x20   : > { %495 = vmatpush.bf16.msra.mxu1 %v3792_v34  ;;  %514 = vmatpush.bf16.msra.mxu2 %v3796_v35  ;;  %v3763_v53 = vld [vmem:[%s8100_s1 + $0x68] sm:$0xf]  ;;  %v5156_v54 = vld [vmem:[%s8100_s1 + $0x74] sm:$0xf0]  ;;  %v5154_v55 = vld [vmem:[%s8100_s1 + $0x6c] sm:$0xf]  ;;  %v3756_v57 = vor.u32 %v5155_v49, %v3755_v48  ;;  %v3760_v58 = vor.u32 %v5153_v50, %v3757_v52 }
  0x21   : > { %533 = vmatpush.bf16.msra.mxu3 %v3800_v39  ;;  %v3765_v56 = vld [vmem:[%s8100_s1 + $0x78] sm:$0xf0]  ;;  %v3764_v59 = vor.u32 %v5156_v54, %v3763_v53  ;;  %v3739_v60 = vld [vmem:[%s8100_s1 + $0x40] sm:$0xf]  ;;  %v5151_v61 = vld [vmem:[%s8100_s1 + $0x4c] sm:$0xf0] }
  0x22   : > { %v5149_v62 = vld [vmem:[%s8100_s1 + $0x44] sm:$0xf]  ;;  %v3768_v63 = vor.u32 %v5154_v55, %v3765_v56  ;;  %v3741_v0 = vld [vmem:[%s8100_s1 + $0x50] sm:$0xf0]  ;;  %v3747_v1 = vld [vmem:[%s8100_s1 + $0x48] sm:$0xf]  ;;  %v3740_v5 = vor.u32 %v5151_v61, %v3739_v60 }
  0x23   : > { %477 = vmatpush.bf16.msra.mxu0 %v3772_v45  ;;  %v5152_v2 = vld [vmem:[%s8100_s1 + $0x54] sm:$0xf0]  ;;  %v5150_v3 = vld [vmem:[%s8100_s1 + $0x4c] sm:$0xf]  ;;  %v3749_v4 = vld [vmem:[%s8100_s1 + $0x58] sm:$0xf0]  ;;  %v3744_v6 = vor.u32 %v5149_v62, %v3741_v0 }
  0x24   : > { %496 = vmatpush.bf16.msra.mxu1 %v3776_v46  ;;  %515 = vmatpush.bf16.msra.mxu2 %v3780_v47  ;;  %v3748_v7 = vor.u32 %v5152_v2, %v3747_v1  ;;  %v3723_v8 = vld [vmem:[%s8100_s1 + $0x20] sm:$0xf]  ;;  %v5147_v9 = vld [vmem:[%s8100_s1 + $0x2c] sm:$0xf0]  ;;  %v5145_v10 = vld [vmem:[%s8100_s1 + $0x24] sm:$0xf]  ;;  %v3752_v11 = vor.u32 %v5150_v3, %v3749_v4 }
  0x25   : > { %534 = vmatpush.bf16.msra.mxu3 %v3784_v51  ;;  %v3725_v12 = vld [vmem:[%s8100_s1 + $0x30] sm:$0xf0]  ;;  %v3731_v13 = vld [vmem:[%s8100_s1 + $0x28] sm:$0xf]  ;;  %v5148_v14 = vld [vmem:[%s8100_s1 + $0x34] sm:$0xf0]  ;;  %v3724_v17 = vor.u32 %v5147_v9, %v3723_v8 }
  0x26   : > { %v5146_v15 = vld [vmem:[%s8100_s1 + $0x2c] sm:$0xf]  ;;  %v3733_v16 = vld [vmem:[%s8100_s1 + $0x38] sm:$0xf0]  ;;  %v3707_v18 = vld [vmem:[%s8100_s1] sm:$0xf]  ;;  %v3728_v19 = vor.u32 %v5145_v10, %v3725_v12  ;;  %v3732_v20 = vor.u32 %v5148_v14, %v3731_v13 }
  0x27   : > { %478 = vmatpush.bf16.msra.mxu0 %v3756_v57  ;;  %v5143_v21 = vld [vmem:[%s8100_s1 + $0xc] sm:$0xf0]  ;;  %v5141_v22 = vld [vmem:[%s8100_s1 + $0x4] sm:$0xf]  ;;  %v3709_v23 = vld [vmem:[%s8100_s1 + $0x10] sm:$0xf0]  ;;  %v3736_v24 = vor.u32 %v5146_v15, %v3733_v16 }
  0x28   : > { %497 = vmatpush.bf16.msra.mxu1 %v3760_v58  ;;  %516 = vmatpush.bf16.msra.mxu2 %v3764_v59  ;;  %v3715_v25 = vld [vmem:[%s8100_s1 + $0x8] sm:$0xf]  ;;  %v5144_v26 = vld [vmem:[%s8100_s1 + $0x14] sm:$0xf0]  ;;  %v5142_v27 = vld [vmem:[%s8100_s1 + $0xc] sm:$0xf]  ;;  %v3708_v31 = vor.u32 %v5143_v21, %v3707_v18  ;;  %v3712_v34 = vor.u32 %v5141_v22, %v3709_v23 }
  0x29   : > { %535 = vmatpush.bf16.msra.mxu3 %v3768_v63  ;;  %v3717_v28 = vld [vmem:[%s8100_s1 + $0x18] sm:$0xf0]  ;;  %v3947_v29 = vld [vmem:[%s8101_s2 + $0xe0] sm:$0xf]  ;;  %v5203_v30 = vld [vmem:[%s8101_s2 + $0xec] sm:$0xf0]  ;;  %v3716_v35 = vor.u32 %v5144_v26, %v3715_v25 }
  0x2a   : > { %v5201_v32 = vld [vmem:[%s8101_s2 + $0xe4] sm:$0xf]  ;;  %v3949_v33 = vld [vmem:[%s8101_s2 + $0xf0] sm:$0xf0]  ;;  %v3720_v37 = vor.u32 %v5142_v27, %v3717_v28  ;;  %v3948_v38 = vor.u32 %v5203_v30, %v3947_v29  ;;  %v3955_v39 = vld [vmem:[%s8101_s2 + $0xe8] sm:$0xf] }
  0x2b   : > { %479 = vmatpush.bf16.msra.mxu0 %v3740_v5  ;;  %v5139_v36 = vld [vmem:[%s5692_s28] sm:$0xff]  ;;  %v5204_v40 = vld [vmem:[%s8101_s2 + $0xf4] sm:$0xf0]  ;;  %v5202_v41 = vld [vmem:[%s8101_s2 + $0xec] sm:$0xf]  ;;  %v3952_v42 = vor.u32 %v5201_v32, %v3949_v33  ;;  %s1711_s30 = sadd.s32 1, %s5683_s23 }
  0x2c   : > { %498 = vmatpush.bf16.msra.mxu1 %v3744_v6  ;;  %517 = vmatpush.bf16.msra.mxu2 %v3748_v7  ;;  %v3957_v43 = vld [vmem:[%s8101_s2 + $0xf8] sm:$0xf0]  ;;  %v3931_v44 = vld [vmem:[%s8101_s2 + $0xc0] sm:$0xf]  ;;  %v5199_v45 = vld [vmem:[%s8101_s2 + $0xcc] sm:$0xf0]  ;;  %v3956_v48 = vor.u32 %v5204_v40, %v3955_v39 }
  0x2d   : > { %536 = vmatpush.bf16.msra.mxu3 %v3752_v11  ;;  %v5197_v46 = vld [vmem:[%s8101_s2 + $0xc4] sm:$0xf]  ;;  %v3933_v47 = vld [vmem:[%s8101_s2 + $0xd0] sm:$0xf0]  ;;  %v3960_v49 = vor.u32 %v5202_v41, %v3957_v43  ;;  %v3932_v50 = vor.u32 %v5199_v45, %v3931_v44  ;;  %v3939_v51 = vld [vmem:[%s8101_s2 + $0xc8] sm:$0xf] }
  0x2e   : > { %v5200_v52 = vld [vmem:[%s8101_s2 + $0xd4] sm:$0xf0]  ;;  %v5198_v53 = vld [vmem:[%s8101_s2 + $0xcc] sm:$0xf]  ;;  %v3936_v54 = vor.u32 %v5197_v46, %v3933_v47  ;;  %v3941_v55 = vld [vmem:[%s8101_s2 + $0xd8] sm:$0xf0] }
  0x2f   : > { %480 = vmatpush.bf16.msra.mxu0 %v3724_v17  ;;  %v3915_v56 = vld [vmem:[%s8101_s2 + $0xa0] sm:$0xf]  ;;  %v5195_v57 = vld [vmem:[%s8101_s2 + $0xac] sm:$0xf0]  ;;  %v5193_v58 = vld [vmem:[%s8101_s2 + $0xa4] sm:$0xf]  ;;  %v3940_v60 = vor.u32 %v5200_v52, %v3939_v51  ;;  %v3944_v61 = vor.u32 %v5198_v53, %v3941_v55 }
  0x30   : > { %499 = vmatpush.bf16.msra.mxu1 %v3728_v19  ;;  %518 = vmatpush.bf16.msra.mxu2 %v3732_v20  ;;  %v3917_v59 = vld [vmem:[%s8101_s2 + $0xb0] sm:$0xf0]  ;;  %v3916_v62 = vor.u32 %v5195_v57, %v3915_v56  ;;  %v3923_v63 = vld [vmem:[%s8101_s2 + $0xa8] sm:$0xf]  ;;  %v5196_v0 = vld [vmem:[%s8101_s2 + $0xb4] sm:$0xf0] }
  0x31   : > { %537 = vmatpush.bf16.msra.mxu3 %v3736_v24  ;;  %v5194_v1 = vld [vmem:[%s8101_s2 + $0xac] sm:$0xf]  ;;  %v3920_v2 = vor.u32 %v5193_v58, %v3917_v59  ;;  %v3925_v3 = vld [vmem:[%s8101_s2 + $0xb8] sm:$0xf0]  ;;  %v3899_v4 = vld [vmem:[%s8101_s2 + $0x80] sm:$0xf]  ;;  %v3924_v8 = vor.u32 %v5196_v0, %v3923_v63 }
  0x32   : > { %v5191_v5 = vld [vmem:[%s8101_s2 + $0x8c] sm:$0xf0]  ;;  %v5189_v6 = vld [vmem:[%s8101_s2 + $0x84] sm:$0xf]  ;;  %v3901_v7 = vld [vmem:[%s8101_s2 + $0x90] sm:$0xf0]  ;;  %v3928_v9 = vor.u32 %v5194_v1, %v3925_v3 }
  0x33   : > { %481 = vmatpush.bf16.msra.mxu0 %v3708_v31  ;;  %v3900_v10 = vor.u32 %v5191_v5, %v3899_v4  ;;  %v3907_v11 = vld [vmem:[%s8101_s2 + $0x88] sm:$0xf]  ;;  %v5192_v12 = vld [vmem:[%s8101_s2 + $0x94] sm:$0xf0]  ;;  %v5190_v13 = vld [vmem:[%s8101_s2 + $0x8c] sm:$0xf]  ;;  %v3904_v14 = vor.u32 %v5189_v6, %v3901_v7 }
  0x34   : > { %500 = vmatpush.bf16.msra.mxu1 %v3712_v34  ;;  %519 = vmatpush.bf16.msra.mxu2 %v3716_v35  ;;  %v3909_v15 = vld [vmem:[%s8101_s2 + $0x98] sm:$0xf0]  ;;  %v3883_v16 = vld [vmem:[%s8101_s2 + $0x60] sm:$0xf]  ;;  %v5187_v17 = vld [vmem:[%s8101_s2 + $0x6c] sm:$0xf0]  ;;  %v3908_v20 = vor.u32 %v5192_v12, %v3907_v11 }
  0x35   : > { %538 = vmatpush.bf16.msra.mxu3 %v3720_v37  ;;  %v5185_v18 = vld [vmem:[%s8101_s2 + $0x64] sm:$0xf]  ;;  %v3885_v19 = vld [vmem:[%s8101_s2 + $0x70] sm:$0xf0]  ;;  %v5140_v21 = vld [vmem:[%s5692_s28 + $0x8] sm:$0xff]  ;;  %v3912_v22 = vor.u32 %v5190_v13, %v3909_v15  ;;  %v3884_v23 = vor.u32 %v5187_v17, %v3883_v16  ;;  %p6962_p5 = scmp.lt.s32.totalorder %s1711_s30, 20 }
  0x36   : > { %482 = vmatmul.bf16.vlgmr.msra.gmra.mxu0 %v5139_v36  ;;  %v3891_v24 = vld [vmem:[%s8101_s2 + $0x68] sm:$0xf]  ;;  %v5188_v25 = vld [vmem:[%s8101_s2 + $0x74] sm:$0xf0]  ;;  %v5186_v26 = vld [vmem:[%s8101_s2 + $0x6c] sm:$0xf]  ;;  %v3888_v27 = vor.u32 %v5185_v18, %v3885_v19 }
  0x37   : > { %766 = vmatpush.bf16.msrb.mxu0 %v3948_v38  ;;  %501 = vmatmul.bf16.vlgmr.msra.gmra.mxu1 %v5139_v36  ;;  %v3893_v28 = vld [vmem:[%s8101_s2 + $0x78] sm:$0xf0]  ;;  %v3867_v29 = vld [vmem:[%s8101_s2 + $0x40] sm:$0xf]  ;;  %v5183_v30 = vld [vmem:[%s8101_s2 + $0x4c] sm:$0xf0]  ;;  %v3892_v33 = vor.u32 %v5188_v25, %v3891_v24 }
  0x38   : > { %779 = vmatpush.bf16.msrb.mxu1 %v3952_v42  ;;  %520 = vmatmul.bf16.vlgmr.msra.gmra.mxu2 %v5139_v36  ;;  %v5181_v31 = vld [vmem:[%s8101_s2 + $0x44] sm:$0xf]  ;;  %v3869_v32 = vld [vmem:[%s8101_s2 + $0x50] sm:$0xf0]  ;;  %v3896_v34 = vor.u32 %v5186_v26, %v3893_v28  ;;  %v3868_v35 = vor.u32 %v5183_v30, %v3867_v29  ;;  %v5184_v37 = vld [vmem:[%s8101_s2 + $0x54] sm:$0xf0] }
  0x39   : > { %539 = vmatmul.bf16.vlgmr.msra.gmra.mxu3 %v5139_v36  ;;  %792 = vmatpush.bf16.msrb.mxu2 %v3956_v48  ;;  %v3875_v36 = vld [vmem:[%s8101_s2 + $0x48] sm:$0xf]  ;;  %v5182_v38 = vld [vmem:[%s8101_s2 + $0x4c] sm:$0xf]  ;;  %v3872_v39 = vor.u32 %v5181_v31, %v3869_v32  ;;  %v3877_v40 = vld [vmem:[%s8101_s2 + $0x58] sm:$0xf0] }
  0x3a   : > { %805 = vmatpush.bf16.msrb.mxu3 %v3960_v49  ;;  %v3851_v41 = vld [vmem:[%s8101_s2 + $0x20] sm:$0xf]  ;;  %v5179_v42 = vld [vmem:[%s8101_s2 + $0x2c] sm:$0xf0]  ;;  %v5177_v43 = vld [vmem:[%s8101_s2 + $0x24] sm:$0xf]  ;;  %v3876_v45 = vor.u32 %v5184_v37, %v3875_v36  ;;  %v3880_v46 = vor.u32 %v5182_v38, %v3877_v40 }
  0x3b   : > { %767 = vmatpush.bf16.msrb.mxu0 %v3932_v50  ;;  %v3853_v44 = vld [vmem:[%s8101_s2 + $0x30] sm:$0xf0]  ;;  %v3852_v47 = vor.u32 %v5179_v42, %v3851_v41  ;;  %v3859_v48 = vld [vmem:[%s8101_s2 + $0x28] sm:$0xf]  ;;  %v5180_v49 = vld [vmem:[%s8101_s2 + $0x34] sm:$0xf0] }
  0x3c   : > { %780 = vmatpush.bf16.msrb.mxu1 %v3936_v54  ;;  %v5178_v50 = vld [vmem:[%s8101_s2 + $0x2c] sm:$0xf]  ;;  %v3856_v51 = vor.u32 %v5177_v43, %v3853_v44  ;;  %v3861_v52 = vld [vmem:[%s8101_s2 + $0x38] sm:$0xf0]  ;;  %v3835_v53 = vld [vmem:[%s8101_s2] sm:$0xf]  ;;  %v3860_v57 = vor.u32 %v5180_v49, %v3859_v48 }
  0x3d   : > { %793 = vmatpush.bf16.msrb.mxu2 %v3940_v60  ;;  %v5175_v54 = vld [vmem:[%s8101_s2 + $0xc] sm:$0xf0]  ;;  %v5173_v55 = vld [vmem:[%s8101_s2 + $0x4] sm:$0xf]  ;;  %v3837_v56 = vld [vmem:[%s8101_s2 + $0x10] sm:$0xf0]  ;;  %v3864_v58 = vor.u32 %v5178_v50, %v3861_v52 }
  0x3e   : > { %806 = vmatpush.bf16.msrb.mxu3 %v3944_v61  ;;  %v3836_v59 = vor.u32 %v5175_v54, %v3835_v53  ;;  %v3843_v60 = vld [vmem:[%s8101_s2 + $0x8] sm:$0xf]  ;;  %v5176_v61 = vld [vmem:[%s8101_s2 + $0x14] sm:$0xf0]  ;;  %v5174_v63 = vld [vmem:[%s8101_s2 + $0xc] sm:$0xf] }
  0x3f   : > { %768 = vmatpush.bf16.msrb.mxu0 %v3916_v62  ;;  %v3840_v62 = vor.u32 %v5173_v55, %v3837_v56  ;;  %v3845_v0 = vld [vmem:[%s8101_s2 + $0x18] sm:$0xf0]  ;;  %v6094_v1 = vld [vmem:[%s8104_s5] sm:$0xff]  ;;  %v5235_v6 = vld [vmem:[%s8100_s1 + $0xec] sm:$0xf0]  ;;  %s2288_s24 = sadd.s32 2, %s5683_s23 }
  0x40   : > { %781 = vmatpush.bf16.msrb.mxu1 %v3920_v2  ;;  %v3844_v2 = vor.u32 %v5176_v61, %v3843_v60  ;;  %v3848_v3 = vor.u32 %v5174_v63, %v3845_v0  ;;  %v573_v4 = vpack.c.bf16 %v6094_v1, %v6094_v1  ;;  %v4076_v5 = vld [vmem:[%s8100_s1 + $0xe0] sm:$0xf]  ;;  %v5233_v7 = vld [vmem:[%s8100_s1 + $0xe4] sm:$0xf]  ;;  %v5236_v11 = vld [vmem:[%s8100_s1 + $0xf4] sm:$0xf0] }
  0x41   : > { %794 = vmatpush.bf16.msrb.mxu2 %v3924_v8  ;;  %v4077_v8 = vor.u32 %v5235_v6, %v4076_v5  ;;  %v4086_v15 = vld [vmem:[%s8100_s1 + $0xf8] sm:$0xf0]  ;;  %v4060_v17 = vld [vmem:[%s8100_s1 + $0xc0] sm:$0xf]  ;;  %v5231_v18 = vld [vmem:[%s8100_s1 + $0xcc] sm:$0xf0] }
  0x42   : > { %807 = vmatpush.bf16.msrb.mxu3 %v3928_v9  ;;  %v4078_v9 = vld [vmem:[%s8100_s1 + $0xf0] sm:$0xf0]  ;;  %v5229_v19 = vld [vmem:[%s8100_s1 + $0xc4] sm:$0xf]  ;;  %v5230_v26 = vld [vmem:[%s8100_s1 + $0xcc] sm:$0xf] }
  0x43   : > { %769 = vmatpush.bf16.msrb.mxu0 %v3900_v10  ;;  %v4084_v10 = vld [vmem:[%s8100_s1 + $0xe8] sm:$0xf]  ;;  %v4081_v12 = vor.u32 %v5233_v7, %v4078_v9  ;;  %v4044_v29 = vld [vmem:[%s8100_s1 + $0xa0] sm:$0xf]  ;;  %v5227_v30 = vld [vmem:[%s8100_s1 + $0xac] sm:$0xf0] }
  0x44   : > { %782 = vmatpush.bf16.msrb.mxu1 %v3904_v14  ;;  %v4085_v13 = vor.u32 %v5236_v11, %v4084_v10  ;;  %v5234_v14 = vld [vmem:[%s8100_s1 + $0xec] sm:$0xf]  ;;  %v5225_v31 = vld [vmem:[%s8100_s1 + $0xa4] sm:$0xf]  ;;  %v4045_v32 = vor.u32 %v5227_v30, %v4044_v29  ;;  %v4028_v41 = vld [vmem:[%s8100_s1 + $0x80] sm:$0xf] }
  0x45   : > { %795 = vmatpush.bf16.msrb.mxu2 %v3908_v20  ;;  %v4089_v16 = vor.u32 %v5234_v14, %v4086_v15  ;;  %v4061_v20 = vor.u32 %v5231_v18, %v4060_v17  ;;  %v5226_v38 = vld [vmem:[%s8100_s1 + $0xac] sm:$0xf]  ;;  %v5223_v42 = vld [vmem:[%s8100_s1 + $0x8c] sm:$0xf0]  ;;  %v5221_v43 = vld [vmem:[%s8100_s1 + $0x84] sm:$0xf] }
  0x46   : > { %808 = vmatpush.bf16.msrb.mxu3 %v3912_v22  ;;  %487 = vmatmul.bf16.gmra.mxu0 %v5140_v21  ;;  %v4068_v22 = vld [vmem:[%s8100_s1 + $0xc8] sm:$0xf]  ;;  %v4029_v44 = vor.u32 %v5223_v42, %v4028_v41  ;;  %v4038_v52 = vld [vmem:[%s8100_s1 + $0x98] sm:$0xf0]  ;;  %v4012_v55 = vld [vmem:[%s8100_s1 + $0x60] sm:$0xf] }
  0x47   : > { %770 = vmatpush.bf16.msrb.mxu0 %v3884_v23  ;;  %506 = vmatmul.bf16.gmra.mxu1 %v5140_v21  ;;  %v5232_v23 = vld [vmem:[%s8100_s1 + $0xd4] sm:$0xf0]  ;;  %v5219_v56 = vld [vmem:[%s8100_s1 + $0x6c] sm:$0xf0]  ;;  %v4020_v60 = vld [vmem:[%s8100_s1 + $0x68] sm:$0xf] }
  0x48   : > { %783 = vmatpush.bf16.msrb.mxu1 %v3888_v27  ;;  %525 = vmatmul.bf16.gmra.mxu2 %v5140_v21  ;;  %v4069_v25 = vor.u32 %v5232_v23, %v4068_v22  ;;  %v4070_v27 = vld [vmem:[%s8100_s1 + $0xd8] sm:$0xf0]  ;;  %v5220_v61 = vld [vmem:[%s8100_s1 + $0x74] sm:$0xf0]  ;;  %v5218_v0 = vld [vmem:[%s8100_s1 + $0x6c] sm:$0xf] }
  0x49   : > { %544 = vmatmul.bf16.gmra.mxu3 %v5140_v21  ;;  %796 = vmatpush.bf16.msrb.mxu2 %v3892_v33  ;;  %v4062_v21 = vld [vmem:[%s8100_s1 + $0xd0] sm:$0xf0]  ;;  %v4073_v28 = vor.u32 %v5230_v26, %v4070_v27  ;;  %v4021_v63 = vor.u32 %v5220_v61, %v4020_v60  ;;  %v5215_v5 = vld [vmem:[%s8100_s1 + $0x4c] sm:$0xf0]  ;;  %v5213_v6 = vld [vmem:[%s8100_s1 + $0x44] sm:$0xf] }
  0x4a   : > { %809 = vmatpush.bf16.msrb.mxu3 %v3896_v34  ;;  %v4065_v24 = vor.u32 %v5229_v19, %v4062_v21  ;;  %v4046_v33 = vld [vmem:[%s8100_s1 + $0xb0] sm:$0xf0]  ;;  %v4052_v34 = vld [vmem:[%s8100_s1 + $0xa8] sm:$0xf]  ;;  %v5216_v11 = vld [vmem:[%s8100_s1 + $0x54] sm:$0xf0] }
  0x4b   : > { %771 = vmatpush.bf16.msrb.mxu0 %v3868_v35  ;;  %v5228_v35 = vld [vmem:[%s8100_s1 + $0xb4] sm:$0xf0]  ;;  %v4049_v36 = vor.u32 %v5225_v31, %v4046_v33  ;;  %v3998_v9 = vld [vmem:[%s8100_s1 + $0x50] sm:$0xf0]  ;;  %v4004_v10 = vld [vmem:[%s8100_s1 + $0x48] sm:$0xf] }
  0x4c   : > { %784 = vmatpush.bf16.msrb.mxu1 %v3872_v39  ;;  %v4053_v37 = vor.u32 %v5228_v35, %v4052_v34  ;;  %v4054_v39 = vld [vmem:[%s8100_s1 + $0xb8] sm:$0xf0]  ;;  %v4001_v14 = vor.u32 %v5213_v6, %v3998_v9  ;;  %v4005_v15 = vor.u32 %v5216_v11, %v4004_v10  ;;  %v5211_v21 = vld [vmem:[%s8100_s1 + $0x2c] sm:$0xf0]  ;;  %v5209_v22 = vld [vmem:[%s8100_s1 + $0x24] sm:$0xf] }
  0x4d   : > { %797 = vmatpush.bf16.msrb.mxu2 %v3876_v45  ;;  %v4057_v40 = vor.u32 %v5226_v38, %v4054_v39  ;;  %v4030_v45 = vld [vmem:[%s8100_s1 + $0x90] sm:$0xf0]  ;;  %v4006_v17 = vld [vmem:[%s8100_s1 + $0x58] sm:$0xf0]  ;;  %v5212_v26 = vld [vmem:[%s8100_s1 + $0x34] sm:$0xf0] }
  0x4e   : > { %810 = vmatpush.bf16.msrb.mxu3 %v3880_v46  ;;  %v4036_v46 = vld [vmem:[%s8100_s1 + $0x88] sm:$0xf]  ;;  %v4033_v49 = vor.u32 %v5221_v43, %v4030_v45  ;;  %v5210_v29 = vld [vmem:[%s8100_s1 + $0x2c] sm:$0xf]  ;;  %v3990_v30 = vld [vmem:[%s8100_s1 + $0x38] sm:$0xf0] }
  0x4f   : > { %772 = vmatpush.bf16.msrb.mxu0 %v3852_v47  ;;  %v5224_v47 = vld [vmem:[%s8100_s1 + $0x94] sm:$0xf0]  ;;  %v3993_v31 = vor.u32 %v5210_v29, %v3990_v30  ;;  %v5207_v33 = vld [vmem:[%s8100_s1 + $0xc] sm:$0xf0]  ;;  %v5205_v34 = vld [vmem:[%s8100_s1 + $0x4] sm:$0xf] }
  0x50   : > { %785 = vmatpush.bf16.msrb.mxu1 %v3856_v51  ;;  %v4037_v50 = vor.u32 %v5224_v47, %v4036_v46  ;;  %v5222_v51 = vld [vmem:[%s8100_s1 + $0x8c] sm:$0xf]  ;;  %v3972_v38 = vld [vmem:[%s8100_s1 + $0x8] sm:$0xf]  ;;  %v5208_v39 = vld [vmem:[%s8100_s1 + $0x14] sm:$0xf0] }
  0x51   : > { %798 = vmatpush.bf16.msrb.mxu2 %v3860_v57  ;;  %v4041_v54 = vor.u32 %v5222_v51, %v4038_v52  ;;  %v5217_v57 = vld [vmem:[%s8100_s1 + $0x64] sm:$0xf]  ;;  %v3973_v43 = vor.u32 %v5208_v39, %v3972_v38  ;;  %v3974_v45 = vld [vmem:[%s8100_s1 + $0x18] sm:$0xf0]  ;;  %v4207_v46 = vld [vmem:[%s8101_s2 + $0xe0] sm:$0xf] }
  0x52   : > { %811 = vmatpush.bf16.msrb.mxu3 %v3864_v58  ;;  %v4013_v58 = vor.u32 %v5219_v56, %v4012_v55  ;;  %v5265_v51 = vld [vmem:[%s8101_s2 + $0xe4] sm:$0xf]  ;;  %v4209_v52 = vld [vmem:[%s8101_s2 + $0xf0] sm:$0xf0]  ;;  %v4215_v56 = vld [vmem:[%s8101_s2 + $0xe8] sm:$0xf] }
  0x53   : > { %773 = vmatpush.bf16.msrb.mxu0 %v3836_v59  ;;  %v4014_v59 = vld [vmem:[%s8100_s1 + $0x70] sm:$0xf0]  ;;  %v4212_v55 = vor.u32 %v5265_v51, %v4209_v52  ;;  %v4217_v60 = vld [vmem:[%s8101_s2 + $0xf8] sm:$0xf0]  ;;  %v4191_v61 = vld [vmem:[%s8101_s2 + $0xc0] sm:$0xf] }
  0x54   : > { %786 = vmatpush.bf16.msrb.mxu1 %v3840_v62  ;;  %v4017_v62 = vor.u32 %v5217_v57, %v4014_v59  ;;  %v5268_v57 = vld [vmem:[%s8101_s2 + $0xf4] sm:$0xf0]  ;;  %v4201_v9 = vld [vmem:[%s8101_s2 + $0xd8] sm:$0xf0]  ;;  %v6361_v10 = vld [vmem:[%s8102_s3] sm:$0xf] }
  0x55   : > { %799 = vmatpush.bf16.msrb.mxu2 %v3844_v2  ;;  %v4022_v2 = vld [vmem:[%s8100_s1 + $0x78] sm:$0xf0]  ;;  %v4216_v59 = vor.u32 %v5268_v57, %v4215_v56  ;;  %v5264_v6 = vld [vmem:[%s8101_s2 + $0xd4] sm:$0xf0]  ;;  %v5258_v29 = vld [vmem:[%s8101_s2 + $0xac] sm:$0xf] }
  0x56   : > { %812 = vmatpush.bf16.msrb.mxu3 %v3848_v3  ;;  %774 = vmatmul.bf16.vlgmr.msrb.gmra.mxu0 %v573_v4  ;;  %v4025_v3 = vor.u32 %v5218_v0, %v4022_v2  ;;  %v5261_v2 = vld [vmem:[%s8101_s2 + $0xc4] sm:$0xf]  ;;  %v4185_v30 = vld [vmem:[%s8101_s2 + $0xb8] sm:$0xf0]  ;;  %v5251_v56 = vld [vmem:[%s8101_s2 + $0x6c] sm:$0xf0] }
  0x57   : > { %787 = vmatmul.bf16.vlgmr.msrb.gmra.mxu1 %v573_v4  ;;  %1012 = vmatpush.bf16.msra.mxu0 %v4077_v8  ;;  %v5253_v38 = vld [vmem:[%s8101_s2 + $0x84] sm:$0xf]  ;;  %s1137_s8 = scalar_select %p239_p3, 1, 0 }
  0x58   : > { %800 = vmatmul.bf16.vlgmr.msrb.gmra.mxu2 %v573_v4  ;;  %1025 = vmatpush.bf16.msra.mxu1 %v4081_v12  ;;  %v5249_v57 = vld [vmem:[%s8101_s2 + $0x64] sm:$0xf]  ;;  %s1713_s9 = scalar_select %p6962_p5, 1, 0 }
  0x59   : > { %813 = vmatmul.bf16.vlgmr.msrb.gmra.mxu3 %v573_v4  ;;  %1038 = vmatpush.bf16.msra.mxu2 %v4085_v13  ;;  %v3996_v4 = vld [vmem:[%s8100_s1 + $0x40] sm:$0xf]  ;;  %p7384_p6 = scmp.lt.s32.totalorder %s2288_s24, 20  ;;  %s2614_s29 = sadd.s32 3, %s5683_s23 }
  0x5a   : > { %1051 = vmatpush.bf16.msra.mxu3 %v4089_v16  ;;  %v3997_v8 = vor.u32 %v5215_v5, %v3996_v4  ;;  %v5214_v16 = vld [vmem:[%s8100_s1 + $0x4c] sm:$0xf]  ;;  %v4199_v4 = vld [vmem:[%s8101_s2 + $0xc8] sm:$0xf]  ;;  %p7610_p7 = scmp.lt.s32.totalorder %s2614_s29, 20  ;;  %s2939_s11 = sadd.s32 4, %s5683_s23 }
  0x5b   : > { %1013 = vmatpush.bf16.msra.mxu0 %v4061_v20  ;;  %v4009_v19 = vor.u32 %v5214_v16, %v4006_v17  ;;  %v3980_v20 = vld [vmem:[%s8100_s1 + $0x20] sm:$0xf]  ;;  %v4200_v11 = vor.u32 %v5264_v6, %v4199_v4  ;;  %v5259_v17 = vld [vmem:[%s8101_s2 + $0xac] sm:$0xf0]  ;;  %v4153_v4 = vld [vmem:[%s8101_s2 + $0x78] sm:$0xf0] }
  0x5c   : > { %1026 = vmatpush.bf16.msra.mxu1 %v4065_v24  ;;  %v3981_v23 = vor.u32 %v5211_v21, %v3980_v20  ;;  %v3982_v24 = vld [vmem:[%s8100_s1 + $0x30] sm:$0xf0]  ;;  %v4175_v16 = vld [vmem:[%s8101_s2 + $0xa0] sm:$0xf]  ;;  %p7831_p8 = scmp.lt.s32.totalorder %s2939_s11, 20  ;;  %s3264_s16 = sadd.s32 5, %s5683_s23 }
  0x5d   : > { %1039 = vmatpush.bf16.msra.mxu2 %v4069_v25  ;;  %v3988_v25 = vld [vmem:[%s8100_s1 + $0x28] sm:$0xf]  ;;  %v3985_v27 = vor.u32 %v5209_v22, %v3982_v24  ;;  %v3961_v22 = vld [vmem:[%s5692_s28 + $0x10] sm:$0xf]  ;;  %v4177_v24 = vld [vmem:[%s8101_s2 + $0xb0] sm:$0xf0] }
  0x5e   : > { %1052 = vmatpush.bf16.msra.mxu3 %v4073_v28  ;;  %v3989_v28 = vor.u32 %v5212_v26, %v3988_v25  ;;  %v4183_v25 = vld [vmem:[%s8101_s2 + $0xa8] sm:$0xf]  ;;  %s2941_s13 = scalar_select %p7831_p8, 1, 0 }
  0x5f   : > { %1014 = vmatpush.bf16.msra.mxu0 %v4045_v32  ;;  %v3964_v32 = vld [vmem:[%s8100_s1] sm:$0xf]  ;;  %p8049_p9 = scmp.lt.s32.totalorder %s3264_s16, 20  ;;  %s3589_s19 = sadd.s32 6, %s5683_s23 }
  0x60   : > { %1027 = vmatpush.bf16.msra.mxu1 %v4049_v36  ;;  %v3965_v36 = vor.u32 %v5207_v33, %v3964_v32  ;;  %v6400_v32 = vperm.slane %v6361_v10, 1  ;;  %p8078_p10 = scmp.lt.s32.totalorder %s3589_s19, 20 }
  0x61   : > { %1040 = vmatpush.bf16.msra.mxu2 %v4053_v37  ;;  %v3966_v37 = vld [vmem:[%s8100_s1 + $0x10] sm:$0xf0]  ;;  %s3266_s18 = scalar_select %p8049_p9, 1, 0 }
  0x62   : > { %1053 = vmatpush.bf16.msra.mxu3 %v4057_v40  ;;  %v3969_v42 = vor.u32 %v5205_v34, %v3966_v37  ;;  %v4188_v34 = vor.u32 %v5258_v29, %v4185_v30  ;;  %v5255_v37 = vld [vmem:[%s8101_s2 + $0x8c] sm:$0xf0]  ;;  %s3591_s23 = scalar_select %p8078_p10, 1, 0 }
  0x63   : > { %1015 = vmatpush.bf16.msra.mxu0 %v4029_v44  ;;  %v5206_v44 = vld [vmem:[%s8100_s1 + $0xc] sm:$0xf] }
  0x64   : > { %1028 = vmatpush.bf16.msra.mxu1 %v4033_v49  ;;  %v3977_v49 = vor.u32 %v5206_v44, %v3974_v45  ;;  %v5256_v44 = vld [vmem:[%s8101_s2 + $0x94] sm:$0xf0] }
  0x65   : > { %1041 = vmatpush.bf16.msra.mxu2 %v4037_v50  ;;  %v5267_v50 = vld [vmem:[%s8101_s2 + $0xec] sm:$0xf0] }
  0x66   : > { %1054 = vmatpush.bf16.msra.mxu3 %v4041_v54  ;;  %v4208_v54 = vor.u32 %v5267_v50, %v4207_v46  ;;  %v4169_v50 = vld [vmem:[%s8101_s2 + $0x98] sm:$0xf0] }
  0x67   : > { %1016 = vmatpush.bf16.msra.mxu0 %v4013_v58  ;;  %v5266_v58 = vld [vmem:[%s8101_s2 + $0xec] sm:$0xf] }
  0x68   : > { %1029 = vmatpush.bf16.msra.mxu1 %v4017_v62  ;;  %v5263_v62 = vld [vmem:[%s8101_s2 + $0xcc] sm:$0xf0] }
  0x69   : > { %1042 = vmatpush.bf16.msra.mxu2 %v4021_v63  ;;  %v4220_v63 = vor.u32 %v5266_v58, %v4217_v60  ;;  %v4192_v0 = vor.u32 %v5263_v62, %v4191_v61  ;;  %v4145_v61 = vld [vmem:[%s8101_s2 + $0x70] sm:$0xf0]  ;;  %v4151_v62 = vld [vmem:[%s8101_s2 + $0x68] sm:$0xf] }
  0x6a   : > { %1055 = vmatpush.bf16.msra.mxu3 %v4025_v3  ;;  %v4193_v3 = vld [vmem:[%s8101_s2 + $0xd0] sm:$0xf0] }
  0x6b   : > { %1017 = vmatpush.bf16.msra.mxu0 %v3997_v8  ;;  %v4196_v5 = vor.u32 %v5261_v2, %v4193_v3  ;;  %v5262_v8 = vld [vmem:[%s8101_s2 + $0xcc] sm:$0xf]  ;;  %v4148_v2 = vor.u32 %v5249_v57, %v4145_v61  ;;  %v4095_v57 = vld [vmem:[%s8101_s2] sm:$0xf] }
  0x6c   : > { %1030 = vmatpush.bf16.msra.mxu1 %v4001_v14  ;;  %v4204_v14 = vor.u32 %v5262_v8, %v4201_v9  ;;  %v5250_v3 = vld [vmem:[%s8101_s2 + $0x6c] sm:$0xf] }
  0x6d   : > { %1043 = vmatpush.bf16.msra.mxu2 %v4005_v15  ;;  %v4156_v9 = vor.u32 %v5250_v3, %v4153_v4  ;;  %v4105_v3 = vld [vmem:[%s8101_s2 + $0x18] sm:$0xf0] }
  0x6e   : > { %1056 = vmatpush.bf16.msra.mxu3 %v4009_v19  ;;  %v5257_v19 = vld [vmem:[%s8101_s2 + $0xa4] sm:$0xf] }
  0x6f   : > { %1018 = vmatpush.bf16.msra.mxu0 %v3981_v23  ;;  %v4176_v23 = vor.u32 %v5259_v17, %v4175_v16  ;;  %v5247_v16 = vld [vmem:[%s8101_s2 + $0x4c] sm:$0xf0] }
  0x70   : > { %1031 = vmatpush.bf16.msra.mxu1 %v3985_v27  ;;  %v4180_v27 = vor.u32 %v5257_v19, %v4177_v24 }
  0x71   : > { %1044 = vmatpush.bf16.msra.mxu2 %v3989_v28  ;;  %v5260_v28 = vld [vmem:[%s8101_s2 + $0xb4] sm:$0xf0] }
  0x72   : > { %1057 = vmatpush.bf16.msra.mxu3 %v3993_v31  ;;  %v6397_v31 = vperm.slane %v6361_v10, 0  ;;  %v4184_v33 = vor.u32 %v5260_v28, %v4183_v25  ;;  %v4135_v25 = vld [vmem:[%s8101_s2 + $0x48] sm:$0xf]  ;;  %v5246_v28 = vld [vmem:[%s8101_s2 + $0x4c] sm:$0xf] }
  0x73   : > { %1019 = vmatpush.bf16.msra.mxu0 %v3965_v36  ;;  %v4159_v36 = vld [vmem:[%s8101_s2 + $0x80] sm:$0xf] }
  0x74   : > { %1032 = vmatpush.bf16.msra.mxu1 %v3969_v42  ;;  %v4160_v39 = vor.u32 %v5255_v37, %v4159_v36  ;;  %v4161_v42 = vld [vmem:[%s8101_s2 + $0x90] sm:$0xf0]  ;;  %v5243_v36 = vld [vmem:[%s8101_s2 + $0x2c] sm:$0xf0] }
  0x75   : > { %1045 = vmatpush.bf16.msra.mxu2 %v3973_v43  ;;  %v4167_v43 = vld [vmem:[%s8101_s2 + $0x88] sm:$0xf]  ;;  %v4164_v45 = vor.u32 %v5253_v38, %v4161_v42 }
  0x76   : > { %1058 = vmatpush.bf16.msra.mxu3 %v3977_v49  ;;  %1020 = vmatmul.bf16.vlgmr.msra.gmra.mxu0 %v3961_v22  ;;  %v4168_v46 = vor.u32 %v5256_v44, %v4167_v43  ;;  %v5254_v49 = vld [vmem:[%s8101_s2 + $0x8c] sm:$0xf]  ;;  %v4119_v42 = vld [vmem:[%s8101_s2 + $0x28] sm:$0xf] }
  0x77   : > { %1341 = vmatpush.bf16.msrb.mxu0 %v4208_v54  ;;  %1033 = vmatmul.bf16.vlgmr.msra.gmra.mxu1 %v3961_v22  ;;  %v4172_v51 = vor.u32 %v5254_v49, %v4169_v50  ;;  %v5244_v50 = vld [vmem:[%s8101_s2 + $0x34] sm:$0xf0] }
  0x78   : > { %1354 = vmatpush.bf16.msrb.mxu1 %v4212_v55  ;;  %1046 = vmatmul.bf16.vlgmr.msra.gmra.mxu2 %v3961_v22  ;;  %v4143_v55 = vld [vmem:[%s8101_s2 + $0x60] sm:$0xf] }
  0x79   : > { %1367 = vmatpush.bf16.msrb.mxu2 %v4216_v59  ;;  %1059 = vmatmul.bf16.vlgmr.msra.gmra.mxu3 %v3961_v22  ;;  %v4144_v60 = vor.u32 %v5251_v56, %v4143_v55  ;;  %v5245_v22 = vld [vmem:[%s8101_s2 + $0x44] sm:$0xf]  ;;  %v4120_v56 = vor.u32 %v5244_v50, %v4119_v42 }
  0x7a   : > { %1380 = vmatpush.bf16.msrb.mxu3 %v4220_v63  ;;  %v568_v50 = vld [vmem:[%s8105_s6] sm:$0xff] }
  0x7b   : > { %1342 = vmatpush.bf16.msrb.mxu0 %v4192_v0 }
  0x7c   : > { %1355 = vmatpush.bf16.msrb.mxu1 %v4196_v5  ;;  %v6459_v5 = vperm.slane %v6361_v10, 2 }
  0x7d   : > { %1368 = vmatpush.bf16.msrb.mxu2 %v4200_v11 }
  0x7e   : > { %1381 = vmatpush.bf16.msrb.mxu3 %v4204_v14  ;;  %v4127_v14 = vld [vmem:[%s8101_s2 + $0x40] sm:$0xf] }
  0x7f   : > { %1343 = vmatpush.bf16.msrb.mxu0 %v4176_v23  ;;  %v4128_v19 = vor.u32 %v5247_v16, %v4127_v14  ;;  %v4129_v23 = vld [vmem:[%s8101_s2 + $0x50] sm:$0xf0]  ;;  %v6536_v16 = vperm.slane %v6361_v10, 3 }
  0x80   : > { %1356 = vmatpush.bf16.msrb.mxu1 %v4180_v27  ;;  %v4132_v24 = vor.u32 %v5245_v22, %v4129_v23  ;;  %v5248_v27 = vld [vmem:[%s8101_s2 + $0x54] sm:$0xf0] }
  0x81   : > { %1369 = vmatpush.bf16.msrb.mxu2 %v4184_v33  ;;  %v4136_v30 = vor.u32 %v5248_v27, %v4135_v25  ;;  %v4137_v33 = vld [vmem:[%s8101_s2 + $0x58] sm:$0xf0] }
  0x82   : > { %1382 = vmatpush.bf16.msrb.mxu3 %v4188_v34  ;;  %v4111_v34 = vld [vmem:[%s8101_s2 + $0x20] sm:$0xf]  ;;  %v4140_v38 = vor.u32 %v5246_v28, %v4137_v33 }
  0x83   : > { %1344 = vmatpush.bf16.msrb.mxu0 %v4160_v39  ;;  %v4113_v39 = vld [vmem:[%s8101_s2 + $0x30] sm:$0xf0] }
  0x84   : > { %1357 = vmatpush.bf16.msrb.mxu1 %v4164_v45 }
  0x85   : > { %1370 = vmatpush.bf16.msrb.mxu2 %v4168_v46  ;;  %v4112_v46 = vor.u32 %v5243_v36, %v4111_v34 }
  0x86   : > { %1383 = vmatpush.bf16.msrb.mxu3 %v4172_v51  ;;  %v5242_v51 = vld [vmem:[%s8101_s2 + $0x2c] sm:$0xf] }
  0x87   : > { %1345 = vmatpush.bf16.msrb.mxu0 %v4144_v60 }
  0x88   : > { %1358 = vmatpush.bf16.msrb.mxu1 %v4148_v2  ;;  %v5240_v2 = vld [vmem:[%s8101_s2 + $0x14] sm:$0xf0] }
  0x8a   : > { %1384 = vmatpush.bf16.msrb.mxu3 %v4156_v9 }
  0x8b   : > { %1346 = vmatpush.bf16.msrb.mxu0 %v4128_v19 }
  0x8c   : > { %1359 = vmatpush.bf16.msrb.mxu1 %v4132_v24 }
  0x8e   : > { %1385 = vmatpush.bf16.msrb.mxu3 %v4140_v38 }
  0x8f   : > { %1347 = vmatpush.bf16.msrb.mxu0 %v4112_v46 }
  0xb3   : > { %v6188_v48 = vpop.f32.mrf.mxu0 }
  0xb4   : > { %v6196_v53 = vpop.f32.mrf.mxu1  ;;  %v484_v52 = vadd.f32 %v6188_v48, %v6397_v31 }
  0xb5   : > { %v503_v58 = vadd.f32 %v6196_v53, %v6400_v32  ;;  %v5252_v53 = vld [vmem:[%s8101_s2 + $0x74] sm:$0xf0] }
  0xb6   : > { %v4152_v8 = vor.u32 %v5252_v53, %v4151_v62  ;;  %v4097_v62 = vld [vmem:[%s8101_s2 + $0x10] sm:$0xf0]  ;;  %v5238_v53 = vld [vmem:[%s8101_s2 + $0xc] sm:$0xf] }
  0xb8   : > { %1371 = vmatpush.bf16.msrb.mxu2 %v4152_v8 }
  0xbb   : > { %v6231_v7 = vpop.f32.mrf.mxu2  ;;  %v6244_v13 = vpop.f32.mrf.mxu0 }
  0xbc   : > { %v6242_v12 = vpop.f32.mrf.mxu3  ;;  %v6252_v18 = vpop.f32.mrf.mxu1  ;;  %v522_v29 = vadd.f32 %v6231_v7, %v6459_v5  ;;  %v5241_v7 = vld [vmem:[%s8101_s2 + $0x24] sm:$0xf]  ;;  %1372 = vmatpush.bf16.msrb.mxu2 %v4136_v30 }
  0xbd   : > { %v4116_v49 = vor.u32 %v5241_v7, %v4113_v39  ;;  %v541_v24 = vadd.f32 %v6242_v12, %v6536_v16 }
  0xbf   : > { %1360 = vmatpush.bf16.msrb.mxu1 %v4116_v49 }
  0xc0   : > { %1373 = vmatpush.bf16.msrb.mxu2 %v4120_v56 }
  0xc3   : > { %v6287_v35 = vpop.f32.mrf.mxu2  ;;  %v6300_v41 = vpop.f32.mrf.mxu0 }
  0xc4   : > { %v6298_v40 = vpop.f32.mrf.mxu3  ;;  %v6311_v47 = vpop.f32.mrf.mxu1 }
  0xcb   : > { %v6363_v15 = vpop.f32.mrf.mxu2  ;;  %v6376_v21 = vpop.f32.mrf.mxu0 }
  0xcc   : > { %v6374_v20 = vpop.f32.mrf.mxu3  ;;  %v6385_v26 = vpop.f32.mrf.mxu1 }
  0xd3   : > { %v6428_v54 = vpop.f32.mrf.mxu2  ;;  %v775_v48 = vpop.f32.mrf.mxu0 }
  0xd4   : > { %v6441_v59 = vpop.f32.mrf.mxu3  ;;  %v1069_v63 = vadd.f32 %v775_v48, %v484_v52  ;;  %v788_v0 = vpop.f32.mrf.mxu1  ;;  %v4121_v52 = vld [vmem:[%s8101_s2 + $0x38] sm:$0xf0]  ;;  %v5237_v48 = vld [vmem:[%s8101_s2 + $0x4] sm:$0xf] }
  0xd5   : > { %v1070_v6 = vadd.f32 %v788_v0, %v503_v58  ;;  %v5239_v58 = vld [vmem:[%s8101_s2 + $0xc] sm:$0xf0]  ;;  %v4124_v61 = vor.u32 %v5242_v51, %v4121_v52  ;;  %v4100_v9 = vor.u32 %v5237_v48, %v4097_v62  ;;  %v1138_v52 = vstv %s1137_s8  ;;  %s2616_s8 = scalar_select %p7610_p7, 1, 0 }
  0xd6   : > { %v4090_v11 = vmul.f32 -1.442695, %v1069_v63  ;;  %v4103_v63 = vld [vmem:[%s8101_s2 + $0x8] sm:$0xf]  ;;  %v4096_v8 = vor.u32 %v5239_v58, %v4095_v57  ;;  %vm6545_vm8 = vcmp.eq.s32.totalorder %v1138_v52, 1 }
  0xd7   : > { %v4091_v17 = vmul.f32 -1.442695, %v1070_v6  ;;  %v4104_v14 = vor.u32 %v5240_v2, %v4103_v63  ;;  %1386 = vmatpush.bf16.msrb.mxu3 %v4124_v61  ;;  %1361 = vmatpush.bf16.msrb.mxu1 %v4100_v9  ;;  %v5289_v52 = vld [vmem:[%s8100_s1 + $0xa4] sm:$0xf]  ;;  %v4288_v63 = vld [vmem:[%s8100_s1 + $0x80] sm:$0xf] }
  0xd8   : > { %5519 = vpow2.f32 %v4090_v11  ;;  %1348 = vmatpush.bf16.msrb.mxu0 %v4096_v8 }
  0xd9   : > { %5521 = vpow2.f32 %v4091_v17  ;;  %v4108_v17 = vor.u32 %v5238_v53, %v4105_v3  ;;  %1374 = vmatpush.bf16.msrb.mxu2 %v4104_v14 }
  0xdb   : > { %v801_v37 = vpop.f32.mrf.mxu2  ;;  %v777_v45 = vpop.f32.mrf.mxu0  ;;  %1387 = vmatpush.bf16.msrb.mxu3 %v4108_v17 }
  0xdc   : > { %v1071_v43 = vadd.f32 %v801_v37, %v522_v29  ;;  %v814_v44 = vpop.f32.mrf.mxu3  ;;  %v790_v55 = vpop.f32.mrf.mxu1 }
  0xdd   : > { %v1072_v28 = vadd.f32 %v814_v44, %v541_v24 }
  0xde   : > { %v4092_v60 = vmul.f32 -1.442695, %v1071_v43  ;;  %v5520_v0 = vpop.eup %5519 }
  0xdf   : > { %v5522_v4 = vpop.eup %5521  ;;  %v1082_v6 = vadd.f32 1.0, %v5520_v0 }
  0xe0   : > { %5523 = vpow2.f32 %v4092_v60  ;;  %v1083_v11 = vadd.f32 1.0, %v5522_v4 }
  0xe1   : > { %5525 = vrcp.f32 %v1082_v6  ;;  %v1096_v36 = vand.u32 2147483648, %v1082_v6  ;;  %v1094_v7 = vand.u32 2147483647, %v1082_v6  ;;  %vm1090_vm2 = vweird.f32 %v1082_v6 }
  0xe2   : > { %5527 = vrcp.f32 %v1083_v11  ;;  %v1111_v37 = vand.u32 2147483648, %v1083_v11  ;;  %v1109_v39 = vand.u32 2147483647, %v1083_v11  ;;  %vm1105_vm3 = vweird.f32 %v1083_v11 }
  0xe3   : > { %v803_v19 = vpop.f32.mrf.mxu2  ;;  %v1097_v45 = vor.u32 1.1754944e-38, %v1096_v36  ;;  %vm1095_vm6 = vcmp.eq.f32.partialorder %v1094_v7, 8.507059e+37  ;;  %v4322_v7 = vld [vmem:[%s8100_s1 + $0xd0] sm:$0xf0] }
  0xe4   : > { %v816_v22 = vpop.f32.mrf.mxu3  ;;  %v1112_v49 = vor.u32 1.1754944e-38, %v1111_v37  ;;  %vm1110_vm7 = vcmp.eq.f32.partialorder %v1109_v39, 8.507059e+37  ;;  %v5295_v37 = vld [vmem:[%s8100_s1 + $0xcc] sm:$0xf0] }
  0xe5   : > { %v4336_v22 = vld [vmem:[%s8100_s1 + $0xe0] sm:$0xf] }
  0xe6   : > { %v5524_v23 = vpop.eup %5523 }
  0xe7   : > { %v1084_v25 = vadd.f32 1.0, %v5524_v23  ;;  %v5526_v27 = vpop.eup %5525  ;;  %v5299_v23 = vld [vmem:[%s8100_s1 + $0xec] sm:$0xf0] }
  0xe8   : > { %v5528_v10 = vpop.eup %5527  ;;  %v1086_v29 = vmul.f32 %v5526_v27, %v1082_v6  ;;  %vm1091_vm0 = vweird.f32 %v5526_v27  ;;  %v4337_v24 = vor.u32 %v5299_v23, %v4336_v22  ;;  %v4298_v22 = vld [vmem:[%s8100_s1 + $0x98] sm:$0xf0] }
  0xe9   : > { %5529 = vrcp.f32 %v1084_v25  ;;  %v1101_v30 = vmul.f32 %v5528_v10, %v1083_v11  ;;  %vm1106_vm1 = vweird.f32 %v5528_v10  ;;  %vm1092_vm4 = vmor %vm1090_vm2, %vm1091_vm0  ;;  %v1126_v53 = vand.u32 2147483648, %v1084_v25 }
  0xea   : > { %v1087_v33 = vsub.f32 1.0, %v1086_v29  ;;  %5531 = vtanh.f32 %v1072_v28  ;;  %vm1107_vm5 = vmor %vm1105_vm3, %vm1106_vm1  ;;  %vm1120_vm10 = vweird.f32 %v1084_v25  ;;  %v1124_v4 = vand.u32 2147483647, %v1084_v25  ;;  %v5300_v28 = vld [vmem:[%s8100_s1 + $0xf4] sm:$0xf0]  ;;  %1587 = vmatpush.bf16.msra.mxu0 %v4337_v24 }
  0xeb   : > { %v1102_v34 = vsub.f32 1.0, %v1101_v30  ;;  %v1127_v8 = vor.u32 1.1754944e-38, %v1126_v53  ;;  %v5298_v30 = vld [vmem:[%s8100_s1 + $0xec] sm:$0xf]  ;;  %v5285_v53 = vld [vmem:[%s8100_s1 + $0x84] sm:$0xf] }
  0xec   : > { %v1088_v38 = vmul.f32 %v5526_v27, %v1087_v33  ;;  %vm1125_vm12 = vcmp.eq.f32.partialorder %v1124_v4, 8.507059e+37  ;;  %v4346_v33 = vld [vmem:[%s8100_s1 + $0xf8] sm:$0xf0]  ;;  %v4290_v4 = vld [vmem:[%s8100_s1 + $0x90] sm:$0xf0] }
  0xed   : > { %v1103_v12 = vmul.f32 %v5528_v10, %v1102_v34  ;;  %v4320_v34 = vld [vmem:[%s8100_s1 + $0xc0] sm:$0xf]  ;;  %v4349_v36 = vor.u32 %v5298_v30, %v4346_v33 }
  0xee   : > { %v1089_v43 = vadd.f32 %v5526_v27, %v1088_v38  ;;  %v5293_v38 = vld [vmem:[%s8100_s1 + $0xc4] sm:$0xf]  ;;  %v4272_v33 = vld [vmem:[%s8100_s1 + $0x60] sm:$0xf] }
  0xef   : > { %v5530_v42 = vpop.eup %5529  ;;  %v1104_v46 = vadd.f32 %v5528_v10, %v1103_v12  ;;  %v4321_v12 = vor.u32 %v5295_v37, %v4320_v34  ;;  %v4325_v39 = vor.u32 %v5293_v38, %v4322_v7  ;;  %1626 = vmatpush.bf16.msra.mxu3 %v4349_v36  ;;  %v5283_v34 = vld [vmem:[%s8100_s1 + $0x6c] sm:$0xf0]  ;;  %v5281_v36 = vld [vmem:[%s8100_s1 + $0x64] sm:$0xf]  ;;  %v4274_v38 = vld [vmem:[%s8100_s1 + $0x70] sm:$0xf0] }
  0xf0   : > { %v1116_v44 = vmul.f32 %v5530_v42, %v1084_v25  ;;  %v1093_v51 = vsel %vm1092_vm4, %v5526_v27, %v1089_v43  ;;  %v5532_v55 = vpop.eup %5531  ;;  %vm1121_vm9 = vweird.f32 %v5530_v42  ;;  %v4338_v25 = vld [vmem:[%s8100_s1 + $0xf0] sm:$0xf0]  ;;  %v4344_v27 = vld [vmem:[%s8100_s1 + $0xe8] sm:$0xf]  ;;  %v5296_v43 = vld [vmem:[%s8100_s1 + $0xd4] sm:$0xf0]  ;;  %v4273_v37 = vor.u32 %v5283_v34, %v4272_v33 }
  0xf1   : > { %v1098_v57 = vsel %vm1095_vm6, %v1097_v45, %v1093_v51  ;;  %v1108_v58 = vsel %vm1107_vm5, %v5528_v10, %v1104_v46  ;;  %vm1122_vm11 = vmor %vm1120_vm10, %vm1121_vm9  ;;  %v4345_v29 = vor.u32 %v5300_v28, %v4344_v27  ;;  %v4330_v46 = vld [vmem:[%s8100_s1 + $0xd8] sm:$0xf0]  ;;  %1588 = vmatpush.bf16.msra.mxu0 %v4321_v12  ;;  %v5291_v51 = vld [vmem:[%s8100_s1 + $0xac] sm:$0xf0] }
  0xf2   : > { %v1117_v56 = vsub.f32 1.0, %v1116_v44  ;;  %v1113_v48 = vsel %vm1110_vm7, %v1112_v49, %v1108_v58  ;;  %v1132_v60 = vmul.f32 %v5532_v55, %v1098_v57  ;;  %v5294_v44 = vld [vmem:[%s8100_s1 + $0xcc] sm:$0xf]  ;;  %v4312_v57 = vld [vmem:[%s8100_s1 + $0xa8] sm:$0xf] }
  0xf3   : > { %v1131_v62 = vmul.f32 %v1113_v48, %v568_v50  ;;  %1613 = vmatpush.bf16.msra.mxu2 %v4345_v29  ;;  %v4333_v49 = vor.u32 %v5294_v44, %v4330_v46  ;;  %v5292_v58 = vld [vmem:[%s8100_s1 + $0xb4] sm:$0xf0]  ;;  %v4280_v7 = vld [vmem:[%s8100_s1 + $0x68] sm:$0xf]  ;;  %v4282_v44 = vld [vmem:[%s8100_s1 + $0x78] sm:$0xf0] }
  0xf4   : > { %v1118_v61 = vmul.f32 %v5530_v42, %v1117_v56  ;;  %v4306_v56 = vld [vmem:[%s8100_s1 + $0xb0] sm:$0xf0]  ;;  %v6658_v24 = vpop.f32.mrf.mxu1  ;;  %v5284_v12 = vld [vmem:[%s8100_s1 + $0x74] sm:$0xf0]  ;;  %v4256_v46 = vld [vmem:[%s8100_s1 + $0x40] sm:$0xf] }
  0xf5   : > { %v1133_v0 = vadd.f32 %v1132_v60, %v1131_v62  ;;  %1627 = vmatpush.bf16.msra.mxu3 %v4333_v49  ;;  %v4309_v48 = vor.u32 %v5289_v52, %v4306_v56  ;;  %v4313_v60 = vor.u32 %v5292_v58, %v4312_v57  ;;  %v4314_v62 = vld [vmem:[%s8100_s1 + $0xb8] sm:$0xf0]  ;;  %v5279_v49 = vld [vmem:[%s8100_s1 + $0x4c] sm:$0xf0]  ;;  %v4258_v52 = vld [vmem:[%s8100_s1 + $0x50] sm:$0xf0] }
  0xf6   : > { %v1119_v2 = vadd.f32 %v5530_v42, %v1118_v61  ;;  %v5290_v61 = vld [vmem:[%s8100_s1 + $0xac] sm:$0xf]  ;;  %v5280_v56 = vld [vmem:[%s8100_s1 + $0x54] sm:$0xf0] }
  0xf7   : > { %5533 = vtanh.f32 %v1133_v0  ;;  %v6551_v3 = vsel %vm6545_vm8, %v1133_v0, %v568_v50  ;;  %v4304_v50 = vld [vmem:[%s8100_s1 + $0xa0] sm:$0xf]  ;;  %v4317_v0 = vor.u32 %v5290_v61, %v4314_v62  ;;  %v5272_v33 = vld [vmem:[%s8100_s1 + $0x14] sm:$0xf0] }
  0xf8   : > { %v1123_v6 = vsel %vm1122_vm11, %v5530_v42, %v1119_v2  ;;  %v4328_v42 = vld [vmem:[%s8100_s1 + $0xc8] sm:$0xf]  ;;  %v4305_v55 = vor.u32 %v5291_v51, %v4304_v50  ;;  %v5287_v2 = vld [vmem:[%s8100_s1 + $0x8c] sm:$0xf0]  ;;  %v5277_v50 = vld [vmem:[%s8100_s1 + $0x44] sm:$0xf]  ;;  %v4257_v51 = vor.u32 %v5279_v49, %v4256_v46 }
  0xf9   : > { %v1128_v11 = vsel %vm1125_vm12, %v1127_v8, %v1123_v6  ;;  %v4329_v45 = vor.u32 %v5296_v43, %v4328_v42  ;;  %v4289_v6 = vor.u32 %v5287_v2, %v4288_v63  ;;  %v4296_v8 = vld [vmem:[%s8100_s1 + $0x88] sm:$0xf]  ;;  %1628 = vmatpush.bf16.msra.mxu3 %v4317_v0  ;;  %v4281_v42 = vor.u32 %v5284_v12, %v4280_v7  ;;  %v5282_v43 = vld [vmem:[%s8100_s1 + $0x6c] sm:$0xf]  ;;  %v4240_v62 = vld [vmem:[%s8100_s1 + $0x20] sm:$0xf] }
  0xfa   : > { %1589 = vmatpush.bf16.msra.mxu0 %v4305_v55  ;;  %v4264_v55 = vld [vmem:[%s8100_s1 + $0x48] sm:$0xf]  ;;  %v4261_v57 = vor.u32 %v5277_v50, %v4258_v52  ;;  %v5275_v63 = vld [vmem:[%s8100_s1 + $0x2c] sm:$0xf0]  ;;  %v5273_v0 = vld [vmem:[%s8100_s1 + $0x24] sm:$0xf] }
  0xfb   : > { %1614 = vmatpush.bf16.msra.mxu2 %v4329_v45  ;;  %v6660_v27 = vpop.f32.mrf.mxu2  ;;  %v4285_v45 = vor.u32 %v5282_v43, %v4282_v44  ;;  %v4265_v58 = vor.u32 %v5280_v56, %v4264_v55  ;;  %v4241_v2 = vor.u32 %v5275_v63, %v4240_v62  ;;  %v4467_v7 = vld [vmem:[%s8101_s2 + $0xe0] sm:$0xf]  ;;  %v4469_v43 = vld [vmem:[%s8101_s2 + $0xf0] sm:$0xf0]  ;;  %v4475_v46 = vld [vmem:[%s8101_s2 + $0xe8] sm:$0xf] }
  0xfc   : > { %v1036_v28 = vpop.f32.mrf.mxu1  ;;  %v5332_v49 = vld [vmem:[%s8101_s2 + $0xf4] sm:$0xf0]  ;;  %v5330_v50 = vld [vmem:[%s8101_s2 + $0xec] sm:$0xf]  ;;  %v4477_v52 = vld [vmem:[%s8101_s2 + $0xf8] sm:$0xf0] }
  0xfd   : > { %v5534_v9 = vpop.eup %5533  ;;  %v4451_v55 = vld [vmem:[%s8101_s2 + $0xc0] sm:$0xf]  ;;  %v5327_v56 = vld [vmem:[%s8101_s2 + $0xcc] sm:$0xf0]  ;;  %v5328_v63 = vld [vmem:[%s8101_s2 + $0xd4] sm:$0xf0] }
  0xfe   : > { %v1135_v14 = vmul.f32 %v5534_v9, %v1128_v11  ;;  %v5288_v9 = vld [vmem:[%s8100_s1 + $0x94] sm:$0xf0]  ;;  %v5286_v11 = vld [vmem:[%s8100_s1 + $0x8c] sm:$0xf]  ;;  %1590 = vmatpush.bf16.msra.mxu0 %v4289_v6 }
  0xff   : > { %1615 = vmatpush.bf16.msra.mxu2 %v4313_v60  ;;  %v4301_v23 = vor.u32 %v5286_v11, %v4298_v22  ;;  %v4266_v60 = vld [vmem:[%s8100_s1 + $0x58] sm:$0xf0]  ;;  %v5276_v6 = vld [vmem:[%s8100_s1 + $0x34] sm:$0xf0]  ;;  %v5274_v11 = vld [vmem:[%s8100_s1 + $0x2c] sm:$0xf] }
 0x100   : > { %v6556_v17 = vsel %vm6545_vm8, %v1135_v14, %v6094_v1  ;;  %v5297_v1 = vld [vmem:[%s8100_s1 + $0xe4] sm:$0xf]  ;;  %v4293_v14 = vor.u32 %v5285_v53, %v4290_v4  ;;  %v4242_v53 = vld [vmem:[%s8100_s1 + $0x30] sm:$0xf0]  ;;  %v4248_v4 = vld [vmem:[%s8100_s1 + $0x28] sm:$0xf] }
 0x101   : > { %v1148_v19 = vpack.c.bf16 %v6556_v17, %v6556_v17  ;;  %v4341_v10 = vor.u32 %v5297_v1, %v4338_v25  ;;  %1629 = vmatpush.bf16.msra.mxu3 %v4301_v23  ;;  %v6656_v1 = vpop.f32.mrf.mxu0  ;;  %v4224_v22 = vld [vmem:[%s8100_s1] sm:$0xf]  ;;  %v5271_v23 = vld [vmem:[%s8100_s1 + $0xc] sm:$0xf0] }
 0x102   : > { %1591 = vmatpush.bf16.msra.mxu0 %v4273_v37  ;;  %v4225_v28 = vor.u32 %v5271_v23, %v4224_v22  ;;  %v5270_v37 = vld [vmem:[%s8100_s1 + $0xc] sm:$0xf]  ;;  %v4443_v22 = vld [vmem:[%s8101_s2 + $0xa8] sm:$0xf] }
 0x103   : > { %1349 = vmatmul.bf16.vlgmr.msrb.gmra.mxu0 %v1148_v19  ;;  %1362 = vmatmul.bf16.vlgmr.msrb.gmra.mxu1 %v1148_v19  ;;  %v1049_v29 = vpop.f32.mrf.mxu2 }
 0x104   : > { %1375 = vmatmul.bf16.vlgmr.msrb.gmra.mxu2 %v1148_v19  ;;  %1388 = vmatmul.bf16.vlgmr.msrb.gmra.mxu3 %v1148_v19  ;;  %v4297_v19 = vor.u32 %v5288_v9, %v4296_v8  ;;  %v4245_v8 = vor.u32 %v5273_v0, %v4242_v53  ;;  %v4249_v9 = vor.u32 %v5276_v6, %v4248_v4  ;;  %v4226_v29 = vld [vmem:[%s8100_s1 + $0x10] sm:$0xf0]  ;;  %v5326_v0 = vld [vmem:[%s8101_s2 + $0xcc] sm:$0xf]  ;;  %v4435_v6 = vld [vmem:[%s8101_s2 + $0xa0] sm:$0xf] }
 0x105   : > { %1600 = vmatpush.bf16.msra.mxu1 %v4341_v10  ;;  %v6662_v10 = vpop.f32.mrf.mxu3  ;;  %1630 = vmatpush.bf16.msra.mxu3 %v4285_v45 }
 0x106   : > { %1616 = vmatpush.bf16.msra.mxu2 %v4297_v19  ;;  %1592 = vmatpush.bf16.msra.mxu0 %v4257_v51  ;;  %v4476_v51 = vor.u32 %v5332_v49, %v4475_v46  ;;  %v486_v49 = vadd.f32 %v6244_v13, %v6397_v31 }
 0x109   : > { %1601 = vmatpush.bf16.msra.mxu1 %v4325_v39  ;;  %v1023_v25 = vpop.f32.mrf.mxu0  ;;  %v4277_v39 = vor.u32 %v5281_v36, %v4274_v38  ;;  %v4234_v38 = vld [vmem:[%s8100_s1 + $0x18] sm:$0xf0] }
 0x10a   : > { %1617 = vmatpush.bf16.msra.mxu2 %v4281_v42  ;;  %1593 = vmatpush.bf16.msra.mxu0 %v4241_v2  ;;  %v5269_v25 = vld [vmem:[%s8100_s1 + $0x4] sm:$0xf]  ;;  %v4237_v12 = vor.u32 %v5270_v37, %v4234_v38  ;;  %v4461_v2 = vld [vmem:[%s8101_s2 + $0xd8] sm:$0xf0] }
 0x10b   : > { %v4229_v34 = vor.u32 %v5269_v25, %v4226_v29  ;;  %v5329_v42 = vld [vmem:[%s8101_s2 + $0xe4] sm:$0xf]  ;;  %v4464_v4 = vor.u32 %v5326_v0, %v4461_v2  ;;  %v5324_v25 = vld [vmem:[%s8101_s2 + $0xb4] sm:$0xf0]  ;;  %v4445_v29 = vld [vmem:[%s8101_s2 + $0xb8] sm:$0xf0] }
 0x10c   : > { %v4472_v45 = vor.u32 %v5329_v42, %v4469_v43  ;;  %v5317_v37 = vld [vmem:[%s8101_s2 + $0x84] sm:$0xf]  ;;  %v5314_v0 = vld [vmem:[%s8101_s2 + $0x6c] sm:$0xf]  ;;  %v4413_v2 = vld [vmem:[%s8101_s2 + $0x78] sm:$0xf0] }
 0x10d   : > { %1602 = vmatpush.bf16.msra.mxu1 %v4309_v48  ;;  %v1062_v30 = vpop.f32.mrf.mxu3  ;;  %v5278_v48 = vld [vmem:[%s8100_s1 + $0x4c] sm:$0xf] }
 0x10e   : > { %v4269_v61 = vor.u32 %v5278_v48, %v4266_v60  ;;  %1618 = vmatpush.bf16.msra.mxu2 %v4265_v58  ;;  %v4232_v30 = vld [vmem:[%s8100_s1 + $0x8] sm:$0xf]  ;;  %1594 = vmatpush.bf16.msra.mxu0 %v4225_v28  ;;  %v4452_v58 = vor.u32 %v5327_v56, %v4451_v55  ;;  %v5325_v48 = vld [vmem:[%s8101_s2 + $0xc4] sm:$0xf]  ;;  %v4453_v60 = vld [vmem:[%s8101_s2 + $0xd0] sm:$0xf0] }
 0x10f   : > { %v4233_v36 = vor.u32 %v5272_v33, %v4232_v30  ;;  %v4456_v62 = vor.u32 %v5325_v48, %v4453_v60  ;;  %v5322_v28 = vld [vmem:[%s8101_s2 + $0xac] sm:$0xf]  ;;  %v4444_v30 = vor.u32 %v5324_v25, %v4443_v22  ;;  %v5313_v55 = vld [vmem:[%s8101_s2 + $0x64] sm:$0xf]  ;;  %v5316_v48 = vld [vmem:[%s8101_s2 + $0x74] sm:$0xf0] }
 0x110   : > { %1631 = vmatpush.bf16.msra.mxu3 %v4269_v61  ;;  %v4459_v61 = vld [vmem:[%s8101_s2 + $0xc8] sm:$0xf]  ;;  %v4448_v33 = vor.u32 %v5322_v28, %v4445_v29  ;;  %v5312_v25 = vld [vmem:[%s8101_s2 + $0x54] sm:$0xf0]  ;;  %v5310_v28 = vld [vmem:[%s8101_s2 + $0x4c] sm:$0xf]  ;;  %v524_v29 = vadd.f32 %v6287_v35, %v6459_v5 }
 0x111   : > { %1603 = vmatpush.bf16.msra.mxu1 %v4293_v14  ;;  %v4250_v14 = vld [vmem:[%s8100_s1 + $0x38] sm:$0xf0]  ;;  %v4460_v53 = vor.u32 %v5328_v63, %v4459_v61  ;;  %v5305_v35 = vld [vmem:[%s8101_s2 + $0x24] sm:$0xf] }
 0x112   : > { %v4253_v19 = vor.u32 %v5274_v11, %v4250_v14  ;;  %1619 = vmatpush.bf16.msra.mxu2 %v4249_v9  ;;  %v5321_v9 = vld [vmem:[%s8101_s2 + $0xa4] sm:$0xf]  ;;  %v4221_v11 = vld [vmem:[%s5692_s28 + $0x14] sm:$0xf] }
 0x113   : > { %1595 = vmatmul.bf16.vlgmr.msra.gmra.mxu0 %v4221_v11 }
 0x114   : > { %1632 = vmatpush.bf16.msra.mxu3 %v4253_v19  ;;  %v4437_v19 = vld [vmem:[%s8101_s2 + $0xb0] sm:$0xf0] }
 0x115   : > { %1604 = vmatpush.bf16.msra.mxu1 %v4277_v39  ;;  %v5331_v39 = vld [vmem:[%s8101_s2 + $0xec] sm:$0xf0]  ;;  %v4440_v23 = vor.u32 %v5321_v9, %v4437_v19 }
 0x116   : > { %1620 = vmatpush.bf16.msra.mxu2 %v4233_v36  ;;  %v4468_v44 = vor.u32 %v5331_v39, %v4467_v7  ;;  %v5319_v36 = vld [vmem:[%s8101_s2 + $0x8c] sm:$0xf0]  ;;  %v4421_v7 = vld [vmem:[%s8101_s2 + $0x90] sm:$0xf0]  ;;  %v5320_v39 = vld [vmem:[%s8101_s2 + $0x94] sm:$0xf0] }
 0x117   : > { %v4424_v42 = vor.u32 %v5317_v37, %v4421_v7  ;;  %v5311_v9 = vld [vmem:[%s8101_s2 + $0x4c] sm:$0xf0] }
 0x118   : > { %1633 = vmatpush.bf16.msra.mxu3 %v4237_v12  ;;  %1918 = vmatpush.bf16.msrb.mxu0 %v4468_v44  ;;  %v4427_v12 = vld [vmem:[%s8101_s2 + $0x88] sm:$0xf]  ;;  %v5318_v44 = vld [vmem:[%s8101_s2 + $0x8c] sm:$0xf] }
 0x119   : > { %1605 = vmatpush.bf16.msra.mxu1 %v4261_v57  ;;  %v4480_v57 = vor.u32 %v5330_v50, %v4477_v52  ;;  %1621 = vmatmul.bf16.vlgmr.msra.gmra.mxu2 %v4221_v11  ;;  %v4428_v43 = vor.u32 %v5320_v39, %v4427_v12  ;;  %v505_v50 = vadd.f32 %v6252_v18, %v6400_v32  ;;  %v5315_v52 = vld [vmem:[%s8101_s2 + $0x6c] sm:$0xf0]  ;;  %v4405_v18 = vld [vmem:[%s8101_s2 + $0x70] sm:$0xf0]  ;;  %v4379_v39 = vld [vmem:[%s8101_s2 + $0x28] sm:$0xf] }
 0x11a   : > { %1944 = vmatpush.bf16.msrb.mxu2 %v4476_v51  ;;  %v4403_v51 = vld [vmem:[%s8101_s2 + $0x60] sm:$0xf]  ;;  %v4373_v12 = vld [vmem:[%s8101_s2 + $0x30] sm:$0xf0] }
 0x11b   : > { %1634 = vmatmul.bf16.vlgmr.msra.gmra.mxu3 %v4221_v11  ;;  %v4404_v13 = vor.u32 %v5315_v52, %v4403_v51  ;;  %v4381_v51 = vld [vmem:[%s8101_s2 + $0x38] sm:$0xf0] }
 0x11c   : > { %1957 = vmatpush.bf16.msrb.mxu3 %v4480_v57  ;;  %1919 = vmatpush.bf16.msrb.mxu0 %v4452_v58  ;;  %v4411_v58 = vld [vmem:[%s8101_s2 + $0x68] sm:$0xf] }
 0x11d   : > { %1606 = vmatpush.bf16.msra.mxu1 %v4245_v8  ;;  %v5323_v8 = vld [vmem:[%s8101_s2 + $0xac] sm:$0xf0]  ;;  %v4412_v63 = vor.u32 %v5316_v48, %v4411_v58  ;;  %v4357_v58 = vld [vmem:[%s8101_s2 + $0x10] sm:$0xf0]  ;;  %v4363_v48 = vld [vmem:[%s8101_s2 + $0x8] sm:$0xf] }
 0x11e   : > { %v4436_v14 = vor.u32 %v5323_v8, %v4435_v6  ;;  %1945 = vmatpush.bf16.msrb.mxu2 %v4460_v53  ;;  %v4416_v53 = vor.u32 %v5314_v0, %v4413_v2  ;;  %v4387_v8 = vld [vmem:[%s8101_s2 + $0x40] sm:$0xf] }
 0x11f   : > { %v4388_v19 = vor.u32 %v5311_v9, %v4387_v8 }
 0x120   : > { %1958 = vmatpush.bf16.msrb.mxu3 %v4464_v4  ;;  %1920 = vmatpush.bf16.msrb.mxu0 %v4436_v14  ;;  %v4389_v14 = vld [vmem:[%s8101_s2 + $0x50] sm:$0xf0] }
 0x121   : > { %1607 = vmatpush.bf16.msra.mxu1 %v4229_v34  ;;  %v4419_v34 = vld [vmem:[%s8101_s2 + $0x80] sm:$0xf] }
 0x122   : > { %v4420_v38 = vor.u32 %v5319_v36, %v4419_v34  ;;  %1946 = vmatpush.bf16.msrb.mxu2 %v4444_v30  ;;  %v4371_v34 = vld [vmem:[%s8101_s2 + $0x20] sm:$0xf]  ;;  %v5307_v36 = vld [vmem:[%s8101_s2 + $0x2c] sm:$0xf0] }
 0x124   : > { %1608 = vmatmul.bf16.vlgmr.msra.gmra.mxu1 %v4221_v11  ;;  %1959 = vmatpush.bf16.msrb.mxu3 %v4448_v33  ;;  %v5309_v11 = vld [vmem:[%s8101_s2 + $0x44] sm:$0xf]  ;;  %v4397_v33 = vld [vmem:[%s8101_s2 + $0x58] sm:$0xf0] }
 0x125   : > { %1931 = vmatpush.bf16.msrb.mxu1 %v4472_v45  ;;  %v4429_v45 = vld [vmem:[%s8101_s2 + $0x98] sm:$0xf0]  ;;  %1921 = vmatpush.bf16.msrb.mxu0 %v4420_v38  ;;  %v4392_v22 = vor.u32 %v5309_v11, %v4389_v14  ;;  %v4400_v7 = vor.u32 %v5310_v28, %v4397_v33 }
 0x126   : > { %v4432_v46 = vor.u32 %v5318_v44, %v4429_v45  ;;  %1947 = vmatpush.bf16.msrb.mxu2 %v4428_v43  ;;  %v4372_v45 = vor.u32 %v5307_v36, %v4371_v34 }
 0x128   : > { %1960 = vmatpush.bf16.msrb.mxu3 %v4432_v46  ;;  %v4376_v46 = vor.u32 %v5305_v35, %v4373_v12 }
 0x129   : > { %1932 = vmatpush.bf16.msrb.mxu1 %v4456_v62  ;;  %v4408_v62 = vor.u32 %v5313_v55, %v4405_v18  ;;  %1922 = vmatpush.bf16.msrb.mxu0 %v4404_v13  ;;  %v4355_v55 = vld [vmem:[%s8101_s2] sm:$0xf] }
 0x12a   : > { %1948 = vmatpush.bf16.msrb.mxu2 %v4412_v63  ;;  %v4365_v63 = vld [vmem:[%s8101_s2 + $0x18] sm:$0xf0] }
 0x12c   : > { %1961 = vmatpush.bf16.msrb.mxu3 %v4416_v53 }
 0x12d   : > { %1933 = vmatpush.bf16.msrb.mxu1 %v4440_v23  ;;  %v4395_v23 = vld [vmem:[%s8101_s2 + $0x48] sm:$0xf]  ;;  %1923 = vmatpush.bf16.msrb.mxu0 %v4388_v19 }
 0x12e   : > { %v4396_v30 = vor.u32 %v5312_v25, %v4395_v23 }
 0x130   : > { %1949 = vmatpush.bf16.msrb.mxu2 %v4396_v30  ;;  %1962 = vmatpush.bf16.msrb.mxu3 %v4400_v7 }
 0x131   : > { %1934 = vmatpush.bf16.msrb.mxu1 %v4424_v42  ;;  %1924 = vmatpush.bf16.msrb.mxu0 %v4372_v45 }
 0x135   : > { %1935 = vmatpush.bf16.msrb.mxu1 %v4408_v62  ;;  %v5302_v62 = vld [vmem:[%s8101_s2 + $0xc] sm:$0xf] }
 0x136   : > { %v4368_v9 = vor.u32 %v5302_v62, %v4365_v63 }
 0x139   : > { %1936 = vmatpush.bf16.msrb.mxu1 %v4392_v22  ;;  %v543_v22 = vadd.f32 %v6298_v40, %v6536_v16 }
 0x13d   : > { %1937 = vmatpush.bf16.msrb.mxu1 %v4376_v46 }
 0x180   : > { %v1350_v56 = vpop.f32.mrf.mxu0  ;;  %v1363_v57 = vpop.f32.mrf.mxu1 }
 0x181   : > { %v1644_v60 = vadd.f32 %v1350_v56, %v486_v49  ;;  %v1645_v61 = vadd.f32 %v1363_v57, %v505_v50  ;;  %v5308_v49 = vld [vmem:[%s8101_s2 + $0x34] sm:$0xf0]  ;;  %v5306_v50 = vld [vmem:[%s8101_s2 + $0x2c] sm:$0xf]  ;;  %v5303_v56 = vld [vmem:[%s8101_s2 + $0xc] sm:$0xf0] }
 0x182   : > { %v4380_v52 = vor.u32 %v5308_v49, %v4379_v39  ;;  %v5301_v57 = vld [vmem:[%s8101_s2 + $0x4] sm:$0xf]  ;;  %v4384_v18 = vor.u32 %v5306_v50, %v4381_v51  ;;  %v4356_v53 = vor.u32 %v5303_v56, %v4355_v55  ;;  %v1714_v50 = vstv %s1713_s9 }
 0x183   : > { %v4350_v4 = vmul.f32 -1.442695, %v1644_v60  ;;  %v4351_v6 = vmul.f32 -1.442695, %v1645_v61  ;;  %v5304_v61 = vld [vmem:[%s8101_s2 + $0x14] sm:$0xf0] }
 0x184   : > { %1950 = vmatpush.bf16.msrb.mxu2 %v4380_v52  ;;  %v4364_v8 = vor.u32 %v5304_v61, %v4363_v48  ;;  %1963 = vmatpush.bf16.msrb.mxu3 %v4384_v18  ;;  %vm1715_vm5 = vcmp.eq.s32.totalorder %v1714_v50, 1  ;;  %v5353_v50 = vld [vmem:[%s8100_s1 + $0xa4] sm:$0xf] }
 0x185   : > { %5535 = vpow2.f32 %v4350_v4  ;;  %v4360_v4 = vor.u32 %v5301_v57, %v4357_v58  ;;  %1925 = vmatpush.bf16.msrb.mxu0 %v4356_v53 }
 0x186   : > { %5537 = vpow2.f32 %v4351_v6 }
 0x187   : > { %v1376_v37 = vpop.f32.mrf.mxu2  ;;  %v1389_v38 = vpop.f32.mrf.mxu3  ;;  %1938 = vmatpush.bf16.msrb.mxu1 %v4360_v4 }
 0x188   : > { %v1646_v42 = vadd.f32 %v1376_v37, %v524_v29  ;;  %v1352_v43 = vpop.f32.mrf.mxu0  ;;  %v1365_v44 = vpop.f32.mrf.mxu1  ;;  %1951 = vmatpush.bf16.msrb.mxu2 %v4364_v8  ;;  %1964 = vmatpush.bf16.msrb.mxu3 %v4368_v9  ;;  %v1647_v28 = vadd.f32 %v1389_v38, %v543_v22 }
 0x18a   : > { %v4352_v13 = vmul.f32 -1.442695, %v1646_v42 }
 0x18b   : > { %v5536_v60 = vpop.eup %5535 }
 0x18c   : > { %v5538_v0 = vpop.eup %5537  ;;  %v1657_v2 = vadd.f32 1.0, %v5536_v60  ;;  %5539 = vpow2.f32 %v4352_v13 }
 0x18d   : > { %v1658_v6 = vadd.f32 1.0, %v5538_v0 }
 0x18e   : > { %5541 = vrcp.f32 %v1657_v2  ;;  %v1671_v37 = vand.u32 2147483648, %v1657_v2  ;;  %v1669_v35 = vand.u32 2147483647, %v1657_v2  ;;  %vm1665_vm15 = vweird.f32 %v1657_v2 }
 0x18f   : > { %5543 = vrcp.f32 %v1658_v6  ;;  %v1378_v11 = vpop.f32.mrf.mxu2  ;;  %v1391_v14 = vpop.f32.mrf.mxu3  ;;  %v1686_v7 = vand.u32 2147483648, %v1658_v6  ;;  %v1684_v12 = vand.u32 2147483647, %v1658_v6  ;;  %vm1680_vm0 = vweird.f32 %v1658_v6 }
 0x190   : > { %v1672_v44 = vor.u32 1.1754944e-38, %v1671_v37  ;;  %vm1670_vm3 = vcmp.eq.f32.partialorder %v1669_v35, 8.507059e+37  ;;  %v4596_v11 = vld [vmem:[%s8100_s1 + $0xe0] sm:$0xf]  ;;  %v5363_v14 = vld [vmem:[%s8100_s1 + $0xec] sm:$0xf0] }
 0x191   : > { %v1687_v46 = vor.u32 1.1754944e-38, %v1686_v7  ;;  %vm1685_vm4 = vcmp.eq.f32.partialorder %v1684_v12, 8.507059e+37  ;;  %v4597_v22 = vor.u32 %v5363_v14, %v4596_v11  ;;  %v5359_v37 = vld [vmem:[%s8100_s1 + $0xcc] sm:$0xf0]  ;;  %v5357_v7 = vld [vmem:[%s8100_s1 + $0xc4] sm:$0xf] }
 0x192   : > { %v5540_v19 = vpop.eup %5539  ;;  %v4588_v12 = vld [vmem:[%s8100_s1 + $0xc8] sm:$0xf]  ;;  %v4558_v11 = vld [vmem:[%s8100_s1 + $0x98] sm:$0xf0] }
 0x193   : > { %v1659_v23 = vadd.f32 1.0, %v5540_v19  ;;  %v5361_v19 = vld [vmem:[%s8100_s1 + $0xe4] sm:$0xf]  ;;  %2164 = vmatpush.bf16.msra.mxu0 %v4597_v22 }
 0x194   : > { %v5542_v25 = vpop.eup %5541 }
 0x195   : > { %v5544_v29 = vpop.eup %5543  ;;  %v1661_v30 = vmul.f32 %v5542_v25, %v1657_v2  ;;  %5545 = vrcp.f32 %v1659_v23  ;;  %vm1666_vm13 = vweird.f32 %v5542_v25  ;;  %v1701_v61 = vand.u32 2147483648, %v1659_v23 }
 0x196   : > { %v1676_v33 = vmul.f32 %v5544_v29, %v1658_v6  ;;  %5547 = vtanh.f32 %v1647_v28  ;;  %vm1681_vm14 = vweird.f32 %v5544_v29  ;;  %vm1667_vm1 = vmor %vm1665_vm15, %vm1666_vm13  ;;  %vm1695_vm7 = vweird.f32 %v1659_v23 }
 0x197   : > { %v1662_v34 = vsub.f32 1.0, %v1661_v30  ;;  %vm1682_vm2 = vmor %vm1680_vm0, %vm1681_vm14  ;;  %v1699_v63 = vand.u32 2147483647, %v1659_v23  ;;  %v1702_v2 = vor.u32 1.1754944e-38, %v1701_v61  ;;  %v5362_v30 = vld [vmem:[%s8100_s1 + $0xec] sm:$0xf] }
 0x198   : > { %v1677_v36 = vsub.f32 1.0, %v1676_v33  ;;  %v4606_v33 = vld [vmem:[%s8100_s1 + $0xf8] sm:$0xf0]  ;;  %v5351_v61 = vld [vmem:[%s8100_s1 + $0x8c] sm:$0xf0] }
 0x199   : > { %v1663_v40 = vmul.f32 %v5542_v25, %v1662_v34  ;;  %vm1700_vm9 = vcmp.eq.f32.partialorder %v1699_v63, 8.507059e+37  ;;  %v4580_v34 = vld [vmem:[%s8100_s1 + $0xc0] sm:$0xf]  ;;  %v5349_v63 = vld [vmem:[%s8100_s1 + $0x84] sm:$0xf] }
 0x19a   : > { %v1678_v38 = vmul.f32 %v5544_v29, %v1677_v36  ;;  %v4609_v36 = vor.u32 %v5362_v30, %v4606_v33  ;;  %v4581_v35 = vor.u32 %v5359_v37, %v4580_v34  ;;  %v4532_v33 = vld [vmem:[%s8100_s1 + $0x60] sm:$0xf]  ;;  %v5347_v34 = vld [vmem:[%s8100_s1 + $0x6c] sm:$0xf0] }
 0x19b   : > { %v5546_v39 = vpop.eup %5545  ;;  %v1664_v42 = vadd.f32 %v5542_v25, %v1663_v40  ;;  %v4582_v40 = vld [vmem:[%s8100_s1 + $0xd0] sm:$0xf0]  ;;  %v4533_v37 = vor.u32 %v5347_v34, %v4532_v33  ;;  %v5336_v33 = vld [vmem:[%s8100_s1 + $0x14] sm:$0xf0] }
 0x19c   : > { %v1691_v43 = vmul.f32 %v5546_v39, %v1659_v23  ;;  %v1679_v45 = vadd.f32 %v5544_v29, %v1678_v38  ;;  %v5548_v51 = vpop.eup %5547  ;;  %vm1696_vm6 = vweird.f32 %v5546_v39  ;;  %v4604_v23 = vld [vmem:[%s8100_s1 + $0xe8] sm:$0xf]  ;;  %v4585_v38 = vor.u32 %v5357_v7, %v4582_v40  ;;  %2203 = vmatpush.bf16.msra.mxu3 %v4609_v36  ;;  %2165 = vmatpush.bf16.msra.mxu0 %v4581_v35  ;;  %v5345_v36 = vld [vmem:[%s8100_s1 + $0x64] sm:$0xf]  ;;  %v4534_v7 = vld [vmem:[%s8100_s1 + $0x70] sm:$0xf0] }
 0x19d   : > { %v1668_v49 = vsel %vm1667_vm1, %v5542_v25, %v1664_v42  ;;  %vm1697_vm8 = vmor %vm1695_vm7, %vm1696_vm6  ;;  %v5364_v25 = vld [vmem:[%s8100_s1 + $0xf4] sm:$0xf0]  ;;  %v5358_v42 = vld [vmem:[%s8100_s1 + $0xcc] sm:$0xf] }
 0x19e   : > { %v1692_v52 = vsub.f32 1.0, %v1691_v43  ;;  %v1673_v55 = vsel %vm1670_vm3, %v1672_v44, %v1668_v49  ;;  %v1683_v56 = vsel %vm1682_vm2, %v5544_v29, %v1679_v45  ;;  %v4605_v29 = vor.u32 %v5364_v25, %v4604_v23  ;;  %v4590_v44 = vld [vmem:[%s8100_s1 + $0xd8] sm:$0xf0]  ;;  %v5355_v49 = vld [vmem:[%s8100_s1 + $0xac] sm:$0xf0]  ;;  %v7082_v23 = vpop.f32.mrf.mxu2 }
 0x19f   : > { %v1688_v57 = vsel %vm1685_vm4, %v1687_v46, %v1683_v56  ;;  %v1707_v13 = vmul.f32 %v5548_v51, %v1673_v55  ;;  %v4593_v45 = vor.u32 %v5358_v42, %v4590_v44  ;;  %v4564_v46 = vld [vmem:[%s8100_s1 + $0xa0] sm:$0xf]  ;;  %v4572_v55 = vld [vmem:[%s8100_s1 + $0xa8] sm:$0xf]  ;;  %v5356_v56 = vld [vmem:[%s8100_s1 + $0xb4] sm:$0xf0] }
 0x1a0   : > { %v1693_v18 = vmul.f32 %v5546_v39, %v1692_v52  ;;  %v1706_v58 = vmul.f32 %v1688_v57, %v6551_v3  ;;  %2190 = vmatpush.bf16.msra.mxu2 %v4605_v29  ;;  %v4565_v51 = vor.u32 %v5355_v49, %v4564_v46  ;;  %v4566_v52 = vld [vmem:[%s8100_s1 + $0xb0] sm:$0xf0]  ;;  %v4540_v40 = vld [vmem:[%s8100_s1 + $0x68] sm:$0xf]  ;;  %v5348_v35 = vld [vmem:[%s8100_s1 + $0x74] sm:$0xf0] }
 0x1a1   : > { %2204 = vmatpush.bf16.msra.mxu3 %v4593_v45  ;;  %v4569_v57 = vor.u32 %v5353_v50, %v4566_v52  ;;  %v7080_v22 = vpop.f32.mrf.mxu1  ;;  %v4542_v42 = vld [vmem:[%s8100_s1 + $0x78] sm:$0xf0]  ;;  %v4516_v44 = vld [vmem:[%s8100_s1 + $0x40] sm:$0xf]  ;;  %v5343_v45 = vld [vmem:[%s8100_s1 + $0x4c] sm:$0xf0] }
 0x1a2   : > { %v1708_v48 = vadd.f32 %v1707_v13, %v1706_v58  ;;  %v1694_v60 = vadd.f32 %v5546_v39, %v1693_v18  ;;  %v4573_v13 = vor.u32 %v5356_v56, %v4572_v55  ;;  %v5354_v18 = vld [vmem:[%s8100_s1 + $0xac] sm:$0xf]  ;;  %v4574_v58 = vld [vmem:[%s8100_s1 + $0xb8] sm:$0xf0]  ;;  %2166 = vmatpush.bf16.msra.mxu0 %v4565_v51  ;;  %v5341_v46 = vld [vmem:[%s8100_s1 + $0x44] sm:$0xf]  ;;  %v4517_v49 = vor.u32 %v5343_v45, %v4516_v44 }
 0x1a3   : > { %v4518_v50 = vld [vmem:[%s8100_s1 + $0x50] sm:$0xf0]  ;;  %v4524_v51 = vld [vmem:[%s8100_s1 + $0x48] sm:$0xf]  ;;  %v5344_v52 = vld [vmem:[%s8100_s1 + $0x54] sm:$0xf0] }
 0x1a4   : > { %5549 = vtanh.f32 %v1708_v48  ;;  %v6971_v62 = vsel %vm1715_vm5, %v1708_v48, %v6551_v3  ;;  %v1698_v0 = vsel %vm1697_vm8, %v5546_v39, %v1694_v60  ;;  %v5360_v39 = vld [vmem:[%s8100_s1 + $0xd4] sm:$0xf0]  ;;  %v4548_v48 = vld [vmem:[%s8100_s1 + $0x80] sm:$0xf]  ;;  %v4577_v60 = vor.u32 %v5354_v18, %v4574_v58  ;;  %v4735_v44 = vld [vmem:[%s8101_s2 + $0xe8] sm:$0xf] }
 0x1a5   : > { %v1703_v4 = vsel %vm1700_vm9, %v1702_v2, %v1698_v0  ;;  %v4589_v43 = vor.u32 %v5360_v39, %v4588_v12  ;;  %v4550_v0 = vld [vmem:[%s8100_s1 + $0x90] sm:$0xf0]  ;;  %v4549_v2 = vor.u32 %v5351_v61, %v4548_v48  ;;  %v4541_v12 = vor.u32 %v5348_v35, %v4540_v40  ;;  %v5346_v39 = vld [vmem:[%s8100_s1 + $0x6c] sm:$0xf]  ;;  %v4500_v58 = vld [vmem:[%s8100_s1 + $0x20] sm:$0xf] }
 0x1a6   : > { %2205 = vmatpush.bf16.msra.mxu3 %v4577_v60  ;;  %v1624_v29 = vpop.f32.mrf.mxu2  ;;  %v4521_v55 = vor.u32 %v5341_v46, %v4518_v50  ;;  %v4525_v56 = vor.u32 %v5344_v52, %v4524_v51  ;;  %v5339_v48 = vld [vmem:[%s8100_s1 + $0x2c] sm:$0xf0]  ;;  %v5337_v60 = vld [vmem:[%s8100_s1 + $0x24] sm:$0xf]  ;;  %v4727_v40 = vld [vmem:[%s8101_s2 + $0xe0] sm:$0xf] }
 0x1a7   : > { %2191 = vmatpush.bf16.msra.mxu2 %v4589_v43  ;;  %2167 = vmatpush.bf16.msra.mxu0 %v4549_v2  ;;  %v4545_v43 = vor.u32 %v5346_v39, %v4542_v42  ;;  %v4501_v61 = vor.u32 %v5339_v48, %v4500_v58  ;;  %v5340_v2 = vld [vmem:[%s8100_s1 + $0x34] sm:$0xf0]  ;;  %v4486_v29 = vld [vmem:[%s8100_s1 + $0x10] sm:$0xf0]  ;;  %v5394_v46 = vld [vmem:[%s8101_s2 + $0xec] sm:$0xf] }
 0x1a8   : > { %v4729_v39 = vld [vmem:[%s8101_s2 + $0xf0] sm:$0xf0]  ;;  %v5396_v45 = vld [vmem:[%s8101_s2 + $0xf4] sm:$0xf0]  ;;  %v4737_v50 = vld [vmem:[%s8101_s2 + $0xf8] sm:$0xf0] }
 0x1a9   : > { %v1611_v25 = vpop.f32.mrf.mxu1  ;;  %v4711_v51 = vld [vmem:[%s8101_s2 + $0xc0] sm:$0xf]  ;;  %v5391_v52 = vld [vmem:[%s8101_s2 + $0xcc] sm:$0xf0]  ;;  %v5392_v48 = vld [vmem:[%s8101_s2 + $0xd4] sm:$0xf0] }
 0x1aa   : > { %v5550_v53 = vpop.eup %5549 }
 0x1ab   : > { %v1710_v6 = vmul.f32 %v5550_v53, %v1703_v4  ;;  %v4556_v53 = vld [vmem:[%s8100_s1 + $0x88] sm:$0xf]  ;;  %v5352_v4 = vld [vmem:[%s8100_s1 + $0x94] sm:$0xf0]  ;;  %2192 = vmatpush.bf16.msra.mxu2 %v4573_v13  ;;  %2168 = vmatpush.bf16.msra.mxu0 %v4533_v37  ;;  %v4526_v13 = vld [vmem:[%s8100_s1 + $0x58] sm:$0xf0] }
 0x1ac   : > { %v5334_v37 = vld [vmem:[%s8100_s1 + $0xc] sm:$0xf] }
 0x1ad   : > { %v6975_v8 = vsel %vm1715_vm5, %v1710_v6, %v6556_v17  ;;  %v5350_v6 = vld [vmem:[%s8100_s1 + $0x8c] sm:$0xf] }
 0x1ae   : > { %v1725_v9 = vpack.c.bf16 %v6975_v8, %v6975_v8  ;;  %v5496_v3 = vpack.c.bf16 %v6975_v8, %v6556_v17  ;;  %v4598_v17 = vld [vmem:[%s8100_s1 + $0xf0] sm:$0xf0]  ;;  %v4561_v14 = vor.u32 %v5350_v6, %v4558_v11  ;;  %v5338_v6 = vld [vmem:[%s8100_s1 + $0x2c] sm:$0xf]  ;;  %v4484_v11 = vld [vmem:[%s8100_s1] sm:$0xf] }
 0x1af   : > { %v4601_v28 = vor.u32 %v5361_v19, %v4598_v17  ;;  %v7078_v19 = vpop.f32.mrf.mxu0  ;;  %2169 = vmatpush.bf16.msra.mxu0 %v4517_v49  ;;  %v4736_v49 = vor.u32 %v5396_v45, %v4735_v44  ;;  %v489_v45 = vadd.f32 %v6300_v41, %v6397_v31 }
 0x1b0   : > { %1926 = vmatmul.bf16.vlgmr.msrb.gmra.mxu0 %v1725_v9  ;;  %5497 = vst [vmem:[%s5697_s7] sm:$0xff] %v5496_v3   ;;  %1939 = vmatmul.bf16.vlgmr.msrb.gmra.mxu1 %v1725_v9  ;;  %v4557_v3 = vor.u32 %v5352_v4, %v4556_v53 }
 0x1b1   : > { %1952 = vmatmul.bf16.vlgmr.msrb.gmra.mxu2 %v1725_v9  ;;  %1965 = vmatmul.bf16.vlgmr.msrb.gmra.mxu3 %v1725_v9  ;;  %v4553_v9 = vor.u32 %v5349_v63, %v4550_v0  ;;  %v4502_v63 = vld [vmem:[%s8100_s1 + $0x30] sm:$0xf0]  ;;  %v4508_v0 = vld [vmem:[%s8100_s1 + $0x28] sm:$0xf] }
 0x1b2   : > { %2177 = vmatpush.bf16.msra.mxu1 %v4601_v28  ;;  %2193 = vmatpush.bf16.msra.mxu2 %v4557_v3  ;;  %v7084_v28 = vpop.f32.mrf.mxu3  ;;  %v4505_v53 = vor.u32 %v5337_v60, %v4502_v63  ;;  %v4509_v4 = vor.u32 %v5340_v2, %v4508_v0  ;;  %v5390_v60 = vld [vmem:[%s8101_s2 + $0xcc] sm:$0xf]  ;;  %v4695_v2 = vld [vmem:[%s8101_s2 + $0xa0] sm:$0xf] }
 0x1b3   : > { %2206 = vmatpush.bf16.msra.mxu3 %v4561_v14  ;;  %2170 = vmatpush.bf16.msra.mxu0 %v4501_v61  ;;  %v5335_v14 = vld [vmem:[%s8100_s1 + $0xc] sm:$0xf0]  ;;  %v4721_v61 = vld [vmem:[%s8101_s2 + $0xd8] sm:$0xf0] }
 0x1b4   : > { %v4485_v25 = vor.u32 %v5335_v14, %v4484_v11  ;;  %v4724_v0 = vor.u32 %v5390_v60, %v4721_v61  ;;  %v4703_v11 = vld [vmem:[%s8101_s2 + $0xa8] sm:$0xf]  ;;  %v5378_v60 = vld [vmem:[%s8101_s2 + $0x6c] sm:$0xf]  ;;  %v4673_v61 = vld [vmem:[%s8101_s2 + $0x78] sm:$0xf0] }
 0x1b6   : > { %2178 = vmatpush.bf16.msra.mxu1 %v4585_v38  ;;  %v4537_v38 = vor.u32 %v5345_v36, %v4534_v7  ;;  %2194 = vmatpush.bf16.msra.mxu2 %v4541_v12  ;;  %v4494_v7 = vld [vmem:[%s8100_s1 + $0x18] sm:$0xf0]  ;;  %v5393_v12 = vld [vmem:[%s8101_s2 + $0xe4] sm:$0xf] }
 0x1b7   : > { %v1598_v17 = vpop.f32.mrf.mxu0  ;;  %2207 = vmatpush.bf16.msra.mxu3 %v4545_v43  ;;  %2171 = vmatpush.bf16.msra.mxu0 %v4485_v25  ;;  %v4497_v35 = vor.u32 %v5334_v37, %v4494_v7  ;;  %v4732_v43 = vor.u32 %v5393_v12, %v4729_v39  ;;  %v5386_v25 = vld [vmem:[%s8101_s2 + $0xac] sm:$0xf]  ;;  %v5381_v37 = vld [vmem:[%s8101_s2 + $0x84] sm:$0xf] }
 0x1b8   : > { %v5333_v17 = vld [vmem:[%s8100_s1 + $0x4] sm:$0xf] }
 0x1b9   : > { %v4489_v34 = vor.u32 %v5333_v17, %v4486_v29  ;;  %v5388_v17 = vld [vmem:[%s8101_s2 + $0xb4] sm:$0xf0]  ;;  %v4705_v29 = vld [vmem:[%s8101_s2 + $0xb8] sm:$0xf0] }
 0x1ba   : > { %2179 = vmatpush.bf16.msra.mxu1 %v4569_v57  ;;  %v1637_v30 = vpop.f32.mrf.mxu3  ;;  %v5342_v57 = vld [vmem:[%s8100_s1 + $0x4c] sm:$0xf]  ;;  %2195 = vmatpush.bf16.msra.mxu2 %v4525_v56  ;;  %v4712_v56 = vor.u32 %v5391_v52, %v4711_v51  ;;  %v5377_v51 = vld [vmem:[%s8101_s2 + $0x64] sm:$0xf] }
 0x1bb   : > { %v4529_v18 = vor.u32 %v5342_v57, %v4526_v13  ;;  %v4492_v30 = vld [vmem:[%s8100_s1 + $0x8] sm:$0xf]  ;;  %v5389_v57 = vld [vmem:[%s8101_s2 + $0xc4] sm:$0xf]  ;;  %v4713_v13 = vld [vmem:[%s8101_s2 + $0xd0] sm:$0xf0] }
 0x1bc   : > { %v4493_v36 = vor.u32 %v5336_v33, %v4492_v30  ;;  %v4716_v58 = vor.u32 %v5389_v57, %v4713_v13  ;;  %v4704_v30 = vor.u32 %v5388_v17, %v4703_v11  ;;  %v4708_v33 = vor.u32 %v5386_v25, %v4705_v29  ;;  %v5380_v57 = vld [vmem:[%s8101_s2 + $0x74] sm:$0xf0]  ;;  %v5374_v25 = vld [vmem:[%s8101_s2 + $0x4c] sm:$0xf] }
 0x1bd   : > { %2208 = vmatpush.bf16.msra.mxu3 %v4529_v18  ;;  %v4719_v18 = vld [vmem:[%s8101_s2 + $0xc8] sm:$0xf]  ;;  %v5376_v17 = vld [vmem:[%s8101_s2 + $0x54] sm:$0xf0]  ;;  %v527_v29 = vadd.f32 %v6363_v15, %v6459_v5  ;;  %v5369_v15 = vld [vmem:[%s8101_s2 + $0x24] sm:$0xf] }
 0x1be   : > { %2180 = vmatpush.bf16.msra.mxu1 %v4553_v9  ;;  %v4510_v9 = vld [vmem:[%s8100_s1 + $0x38] sm:$0xf0]  ;;  %2196 = vmatpush.bf16.msra.mxu2 %v4509_v4  ;;  %v4720_v63 = vor.u32 %v5392_v48, %v4719_v18  ;;  %v5385_v4 = vld [vmem:[%s8101_s2 + $0xa4] sm:$0xf] }
 0x1bf   : > { %v4513_v3 = vor.u32 %v5338_v6, %v4510_v9  ;;  %v4481_v6 = vld [vmem:[%s5692_s28 + $0x18] sm:$0xf]  ;;  %s2290_s28 = scalar_select %p7384_p6, 1, 0 }
 0x1c0   : > { %2172 = vmatmul.bf16.vlgmr.msra.gmra.mxu0 %v4481_v6 }
 0x1c1   : > { %2209 = vmatpush.bf16.msra.mxu3 %v4513_v3  ;;  %v4697_v3 = vld [vmem:[%s8101_s2 + $0xb0] sm:$0xf0] }
 0x1c2   : > { %2181 = vmatpush.bf16.msra.mxu1 %v4537_v38  ;;  %v5395_v38 = vld [vmem:[%s8101_s2 + $0xec] sm:$0xf0]  ;;  %2197 = vmatpush.bf16.msra.mxu2 %v4493_v36  ;;  %v4700_v14 = vor.u32 %v5385_v4, %v4697_v3 }
 0x1c3   : > { %v4728_v42 = vor.u32 %v5395_v38, %v4727_v40  ;;  %v5383_v36 = vld [vmem:[%s8101_s2 + $0x8c] sm:$0xf0]  ;;  %v4681_v40 = vld [vmem:[%s8101_s2 + $0x90] sm:$0xf0]  ;;  %v5384_v38 = vld [vmem:[%s8101_s2 + $0x94] sm:$0xf0] }
 0x1c4   : > { %v4684_v12 = vor.u32 %v5381_v37, %v4681_v40  ;;  %v5375_v4 = vld [vmem:[%s8101_s2 + $0x4c] sm:$0xf0] }
 0x1c5   : > { %2210 = vmatpush.bf16.msra.mxu3 %v4497_v35  ;;  %2495 = vmatpush.bf16.msrb.mxu0 %v4728_v42  ;;  %v4687_v35 = vld [vmem:[%s8101_s2 + $0x88] sm:$0xf]  ;;  %v5382_v42 = vld [vmem:[%s8101_s2 + $0x8c] sm:$0xf] }
 0x1c6   : > { %2182 = vmatpush.bf16.msra.mxu1 %v4521_v55  ;;  %v4740_v55 = vor.u32 %v5394_v46, %v4737_v50  ;;  %2521 = vmatpush.bf16.msrb.mxu2 %v4736_v49  ;;  %v4688_v39 = vor.u32 %v5384_v38, %v4687_v35  ;;  %v508_v46 = vadd.f32 %v6311_v47, %v6400_v32  ;;  %v4663_v49 = vld [vmem:[%s8101_s2 + $0x60] sm:$0xf]  ;;  %v5379_v50 = vld [vmem:[%s8101_s2 + $0x6c] sm:$0xf0]  ;;  %v4665_v47 = vld [vmem:[%s8101_s2 + $0x70] sm:$0xf0] }
 0x1c7   : > { %2198 = vmatmul.bf16.vlgmr.msra.gmra.mxu2 %v4481_v6  ;;  %v4664_v41 = vor.u32 %v5379_v50, %v4663_v49  ;;  %v4633_v35 = vld [vmem:[%s8101_s2 + $0x30] sm:$0xf0]  ;;  %v4639_v38 = vld [vmem:[%s8101_s2 + $0x28] sm:$0xf]  ;;  %v4641_v49 = vld [vmem:[%s8101_s2 + $0x38] sm:$0xf0] }
 0x1c8   : > { %2211 = vmatmul.bf16.vlgmr.msra.gmra.mxu3 %v4481_v6 }
 0x1c9   : > { %2534 = vmatpush.bf16.msrb.mxu3 %v4740_v55  ;;  %2496 = vmatpush.bf16.msrb.mxu0 %v4712_v56  ;;  %v4671_v56 = vld [vmem:[%s8101_s2 + $0x68] sm:$0xf] }
 0x1ca   : > { %2183 = vmatpush.bf16.msra.mxu1 %v4505_v53  ;;  %v5387_v53 = vld [vmem:[%s8101_s2 + $0xac] sm:$0xf0]  ;;  %2522 = vmatpush.bf16.msrb.mxu2 %v4720_v63  ;;  %v4672_v48 = vor.u32 %v5380_v57, %v4671_v56  ;;  %v4676_v63 = vor.u32 %v5378_v60, %v4673_v61  ;;  %v4617_v56 = vld [vmem:[%s8101_s2 + $0x10] sm:$0xf0]  ;;  %v4623_v57 = vld [vmem:[%s8101_s2 + $0x8] sm:$0xf] }
 0x1cb   : > { %v4696_v9 = vor.u32 %v5387_v53, %v4695_v2  ;;  %v4647_v53 = vld [vmem:[%s8101_s2 + $0x40] sm:$0xf] }
 0x1cc   : > { %v4648_v3 = vor.u32 %v5375_v4, %v4647_v53 }
 0x1cd   : > { %2535 = vmatpush.bf16.msrb.mxu3 %v4724_v0  ;;  %2497 = vmatpush.bf16.msrb.mxu0 %v4696_v9  ;;  %v4649_v9 = vld [vmem:[%s8101_s2 + $0x50] sm:$0xf0] }
 0x1ce   : > { %2184 = vmatpush.bf16.msra.mxu1 %v4489_v34  ;;  %v4679_v34 = vld [vmem:[%s8101_s2 + $0x80] sm:$0xf]  ;;  %2523 = vmatpush.bf16.msrb.mxu2 %v4704_v30 }
 0x1cf   : > { %v4680_v7 = vor.u32 %v5383_v36, %v4679_v34  ;;  %v4631_v34 = vld [vmem:[%s8101_s2 + $0x20] sm:$0xf]  ;;  %v5371_v36 = vld [vmem:[%s8101_s2 + $0x2c] sm:$0xf0] }
 0x1d1   : > { %2185 = vmatmul.bf16.vlgmr.msra.gmra.mxu1 %v4481_v6  ;;  %2536 = vmatpush.bf16.msrb.mxu3 %v4708_v33  ;;  %v5373_v6 = vld [vmem:[%s8101_s2 + $0x44] sm:$0xf]  ;;  %v4657_v33 = vld [vmem:[%s8101_s2 + $0x58] sm:$0xf0] }
 0x1d2   : > { %2508 = vmatpush.bf16.msrb.mxu1 %v4732_v43  ;;  %v4689_v43 = vld [vmem:[%s8101_s2 + $0x98] sm:$0xf0]  ;;  %2498 = vmatpush.bf16.msrb.mxu0 %v4680_v7  ;;  %v4652_v11 = vor.u32 %v5373_v6, %v4649_v9  ;;  %v4660_v40 = vor.u32 %v5374_v25, %v4657_v33 }
 0x1d3   : > { %v4692_v44 = vor.u32 %v5382_v42, %v4689_v43  ;;  %2524 = vmatpush.bf16.msrb.mxu2 %v4688_v39  ;;  %v4632_v43 = vor.u32 %v5371_v36, %v4631_v34 }
 0x1d5   : > { %2537 = vmatpush.bf16.msrb.mxu3 %v4692_v44  ;;  %v4636_v44 = vor.u32 %v5369_v15, %v4633_v35 }
 0x1d6   : > { %2509 = vmatpush.bf16.msrb.mxu1 %v4716_v58  ;;  %v4668_v58 = vor.u32 %v5377_v51, %v4665_v47  ;;  %2499 = vmatpush.bf16.msrb.mxu0 %v4664_v41  ;;  %v4615_v51 = vld [vmem:[%s8101_s2] sm:$0xf] }
 0x1d7   : > { %2525 = vmatpush.bf16.msrb.mxu2 %v4672_v48  ;;  %v4625_v48 = vld [vmem:[%s8101_s2 + $0x18] sm:$0xf0] }
 0x1d9   : > { %2538 = vmatpush.bf16.msrb.mxu3 %v4676_v63 }
 0x1da   : > { %2510 = vmatpush.bf16.msrb.mxu1 %v4700_v14  ;;  %v4655_v14 = vld [vmem:[%s8101_s2 + $0x48] sm:$0xf]  ;;  %2500 = vmatpush.bf16.msrb.mxu0 %v4648_v3 }
 0x1db   : > { %v4656_v30 = vor.u32 %v5376_v17, %v4655_v14 }
 0x1dd   : > { %2526 = vmatpush.bf16.msrb.mxu2 %v4656_v30  ;;  %2539 = vmatpush.bf16.msrb.mxu3 %v4660_v40 }
 0x1de   : > { %2511 = vmatpush.bf16.msrb.mxu1 %v4684_v12  ;;  %2501 = vmatpush.bf16.msrb.mxu0 %v4632_v43 }
 0x1e2   : > { %2512 = vmatpush.bf16.msrb.mxu1 %v4668_v58  ;;  %v5366_v58 = vld [vmem:[%s8101_s2 + $0xc] sm:$0xf] }
 0x1e3   : > { %v4628_v4 = vor.u32 %v5366_v58, %v4625_v48 }
 0x1e6   : > { %2513 = vmatpush.bf16.msrb.mxu1 %v4652_v11  ;;  %v546_v11 = vadd.f32 %v6374_v20, %v6536_v16 }
 0x1ea   : > { %2514 = vmatpush.bf16.msrb.mxu1 %v4636_v44 }
 0x22d   : > { %v1927_v52 = vpop.f32.mrf.mxu0  ;;  %v1940_v55 = vpop.f32.mrf.mxu1 }
 0x22e   : > { %v2221_v13 = vadd.f32 %v1927_v52, %v489_v45  ;;  %v2222_v18 = vadd.f32 %v1940_v55, %v508_v46  ;;  %v5372_v45 = vld [vmem:[%s8101_s2 + $0x34] sm:$0xf0]  ;;  %v5370_v46 = vld [vmem:[%s8101_s2 + $0x2c] sm:$0xf]  ;;  %v5367_v52 = vld [vmem:[%s8101_s2 + $0xc] sm:$0xf0] }
 0x22f   : > { %v4640_v50 = vor.u32 %v5372_v45, %v4639_v38  ;;  %v5365_v55 = vld [vmem:[%s8101_s2 + $0x4] sm:$0xf]  ;;  %v4644_v47 = vor.u32 %v5370_v46, %v4641_v49  ;;  %v4616_v63 = vor.u32 %v5367_v52, %v4615_v51  ;;  %v2291_v46 = vstv %s2290_s28 }
 0x230   : > { %v4610_v0 = vmul.f32 -1.442695, %v2221_v13  ;;  %v4611_v2 = vmul.f32 -1.442695, %v2222_v18  ;;  %v5368_v18 = vld [vmem:[%s8101_s2 + $0x14] sm:$0xf0] }
 0x231   : > { %2527 = vmatpush.bf16.msrb.mxu2 %v4640_v50  ;;  %v4624_v53 = vor.u32 %v5368_v18, %v4623_v57  ;;  %2540 = vmatpush.bf16.msrb.mxu3 %v4644_v47  ;;  %vm2292_vm2 = vcmp.eq.s32.totalorder %v2291_v46, 1 }
 0x232   : > { %5551 = vpow2.f32 %v4610_v0  ;;  %v4620_v0 = vor.u32 %v5365_v55, %v4617_v56  ;;  %2502 = vmatpush.bf16.msrb.mxu0 %v4616_v63 }
 0x233   : > { %5553 = vpow2.f32 %v4611_v2 }
 0x234   : > { %v1953_v37 = vpop.f32.mrf.mxu2  ;;  %v1966_v7 = vpop.f32.mrf.mxu3  ;;  %2515 = vmatpush.bf16.msrb.mxu1 %v4620_v0 }
 0x235   : > { %v2223_v12 = vadd.f32 %v1953_v37, %v527_v29  ;;  %v1929_v39 = vpop.f32.mrf.mxu0  ;;  %v1942_v42 = vpop.f32.mrf.mxu1  ;;  %2528 = vmatpush.bf16.msrb.mxu2 %v4624_v53  ;;  %2541 = vmatpush.bf16.msrb.mxu3 %v4628_v4  ;;  %v2224_v25 = vadd.f32 %v1966_v7, %v546_v11 }
 0x237   : > { %v4612_v41 = vmul.f32 -1.442695, %v2223_v12 }
 0x238   : > { %v5552_v13 = vpop.eup %5551 }
 0x239   : > { %v5554_v60 = vpop.eup %5553  ;;  %v2234_v61 = vadd.f32 1.0, %v5552_v13  ;;  %5555 = vpow2.f32 %v4612_v41 }
 0x23a   : > { %v2235_v2 = vadd.f32 1.0, %v5554_v60 }
 0x23b   : > { %5557 = vrcp.f32 %v2234_v61  ;;  %v2248_v37 = vand.u32 2147483648, %v2234_v61  ;;  %v2246_v15 = vand.u32 2147483647, %v2234_v61  ;;  %vm2242_vm12 = vweird.f32 %v2234_v61 }
 0x23c   : > { %5559 = vrcp.f32 %v2235_v2  ;;  %v1955_v6 = vpop.f32.mrf.mxu2  ;;  %v1968_v9 = vpop.f32.mrf.mxu3  ;;  %v2263_v40 = vand.u32 2147483648, %v2235_v2  ;;  %v2261_v35 = vand.u32 2147483647, %v2235_v2  ;;  %vm2257_vm13 = vweird.f32 %v2235_v2 }
 0x23d   : > { %v2249_v42 = vor.u32 1.1754944e-38, %v2248_v37  ;;  %vm2247_vm0 = vcmp.eq.f32.partialorder %v2246_v15, 8.507059e+37  ;;  %v5428_v37 = vld [vmem:[%s8101_s2 + $0xf4] sm:$0xf0]  ;;  %v5426_v15 = vld [vmem:[%s8101_s2 + $0xec] sm:$0xf] }
 0x23e   : > { %v2264_v44 = vor.u32 1.1754944e-38, %v2263_v40  ;;  %vm2262_vm1 = vcmp.eq.f32.partialorder %v2261_v35, 8.507059e+37 }
 0x23f   : > { %v5556_v3 = vpop.eup %5555 }
 0x240   : > { %v2236_v14 = vadd.f32 1.0, %v5556_v3 }
 0x241   : > { %v5558_v17 = vpop.eup %5557 }
 0x242   : > { %v5560_v29 = vpop.eup %5559  ;;  %v2238_v30 = vmul.f32 %v5558_v17, %v2234_v61  ;;  %5561 = vrcp.f32 %v2236_v14  ;;  %vm2243_vm10 = vweird.f32 %v5558_v17  ;;  %v2278_v18 = vand.u32 2147483648, %v2236_v14 }
 0x243   : > { %v2253_v33 = vmul.f32 %v5560_v29, %v2235_v2  ;;  %5563 = vtanh.f32 %v2224_v25  ;;  %vm2258_vm11 = vweird.f32 %v5560_v29  ;;  %vm2244_vm14 = vmor %vm2242_vm12, %vm2243_vm10  ;;  %vm2272_vm4 = vweird.f32 %v2236_v14  ;;  %v4858_v25 = vld [vmem:[%s8101_s2 + $0xe0] sm:$0xf] }
 0x244   : > { %v2239_v34 = vsub.f32 1.0, %v2238_v30  ;;  %vm2259_vm15 = vmor %vm2257_vm13, %vm2258_vm11  ;;  %v2276_v48 = vand.u32 2147483647, %v2236_v14  ;;  %v2279_v61 = vor.u32 1.1754944e-38, %v2278_v18  ;;  %v5425_v30 = vld [vmem:[%s8101_s2 + $0xe4] sm:$0xf] }
 0x245   : > { %v2254_v36 = vsub.f32 1.0, %v2253_v33  ;;  %v5420_v18 = vld [vmem:[%s8101_s2 + $0xb4] sm:$0xf0] }
 0x246   : > { %v2240_v20 = vmul.f32 %v5558_v17, %v2239_v34  ;;  %vm2277_vm6 = vcmp.eq.f32.partialorder %v2276_v48, 8.507059e+37  ;;  %v4860_v34 = vld [vmem:[%s8101_s2 + $0xf0] sm:$0xf0] }
 0x247   : > { %v2255_v7 = vmul.f32 %v5560_v29, %v2254_v36  ;;  %v4866_v36 = vld [vmem:[%s8101_s2 + $0xe8] sm:$0xf]  ;;  %v4863_v40 = vor.u32 %v5425_v30, %v4860_v34  ;;  %v4820_v34 = vld [vmem:[%s8101_s2 + $0x98] sm:$0xf0] }
 0x248   : > { %v5562_v38 = vpop.eup %5561  ;;  %v2241_v12 = vadd.f32 %v5558_v17, %v2240_v20  ;;  %v4867_v20 = vor.u32 %v5428_v37, %v4866_v36  ;;  %v491_v37 = vadd.f32 %v6376_v21, %v6397_v31 }
 0x249   : > { %v2268_v39 = vmul.f32 %v5562_v38, %v2236_v14  ;;  %v2256_v43 = vadd.f32 %v5560_v29, %v2255_v7  ;;  %v5564_v49 = vpop.eup %5563  ;;  %vm2273_vm3 = vweird.f32 %v5562_v38  ;;  %v4868_v7 = vld [vmem:[%s8101_s2 + $0xf8] sm:$0xf0]  ;;  %2833 = vmatpush.bf16.msra.mxu1 %v4863_v40  ;;  %v510_v40 = vadd.f32 %v6385_v26, %v6400_v32  ;;  %v4796_v26 = vld [vmem:[%s8101_s2 + $0x70] sm:$0xf0] }
 0x24a   : > { %v2245_v45 = vsel %vm2244_vm14, %v5558_v17, %v2241_v12  ;;  %vm2274_vm5 = vmor %vm2272_vm4, %vm2273_vm3  ;;  %v7405_v3 = vpop.f32.mrf.mxu2  ;;  %v4871_v35 = vor.u32 %v5426_v15, %v4868_v7  ;;  %2846 = vmatpush.bf16.msra.mxu2 %v4867_v20  ;;  %v5423_v12 = vld [vmem:[%s8101_s2 + $0xcc] sm:$0xf0]  ;;  %v4794_v20 = vld [vmem:[%s8101_s2 + $0x60] sm:$0xf] }
 0x24b   : > { %v2269_v50 = vsub.f32 1.0, %v2268_v39  ;;  %v2250_v51 = vsel %vm2247_vm0, %v2249_v42, %v2245_v45  ;;  %v2260_v52 = vsel %vm2259_vm15, %v5560_v29, %v2256_v43  ;;  %v7407_v14 = vpop.f32.mrf.mxu3  ;;  %v5427_v29 = vld [vmem:[%s8101_s2 + $0xec] sm:$0xf0]  ;;  %v5421_v39 = vld [vmem:[%s8101_s2 + $0xc4] sm:$0xf] }
 0x24c   : > { %v2265_v55 = vsel %vm2262_vm1, %v2264_v44, %v2260_v52  ;;  %v2284_v41 = vmul.f32 %v5564_v49, %v2250_v51  ;;  %v4859_v33 = vor.u32 %v5427_v29, %v4858_v25  ;;  %2859 = vmatpush.bf16.msra.mxu3 %v4871_v35  ;;  %v4844_v43 = vld [vmem:[%s8101_s2 + $0xd0] sm:$0xf0]  ;;  %v4850_v44 = vld [vmem:[%s8101_s2 + $0xc8] sm:$0xf]  ;;  %v5424_v45 = vld [vmem:[%s8101_s2 + $0xd4] sm:$0xf0] }
 0x24d   : > { %v2270_v47 = vmul.f32 %v5562_v38, %v2269_v50  ;;  %v2283_v56 = vmul.f32 %v2265_v55, %v6971_v62  ;;  %v4847_v46 = vor.u32 %v5421_v39, %v4844_v43  ;;  %v4851_v49 = vor.u32 %v5424_v45, %v4850_v44  ;;  %v5422_v50 = vld [vmem:[%s8101_s2 + $0xcc] sm:$0xf]  ;;  %v4852_v51 = vld [vmem:[%s8101_s2 + $0xd8] sm:$0xf0]  ;;  %v4826_v55 = vld [vmem:[%s8101_s2 + $0xa0] sm:$0xf] }
 0x24e   : > { %v7403_v6 = vpop.f32.mrf.mxu1  ;;  %2820 = vmatpush.bf16.msra.mxu0 %v4859_v33  ;;  %v4855_v52 = vor.u32 %v5422_v50, %v4852_v51  ;;  %v5416_v25 = vld [vmem:[%s8101_s2 + $0x94] sm:$0xf0]  ;;  %v5414_v33 = vld [vmem:[%s8101_s2 + $0x8c] sm:$0xf]  ;;  %v5411_v15 = vld [vmem:[%s8101_s2 + $0x6c] sm:$0xf0] }
 0x24f   : > { %v2285_v57 = vadd.f32 %v2284_v41, %v2283_v56  ;;  %v2271_v13 = vadd.f32 %v5562_v38, %v2270_v47  ;;  %2834 = vmatpush.bf16.msra.mxu1 %v4847_v46  ;;  %2847 = vmatpush.bf16.msra.mxu2 %v4851_v49  ;;  %v5419_v41 = vld [vmem:[%s8101_s2 + $0xac] sm:$0xf0]  ;;  %v5417_v47 = vld [vmem:[%s8101_s2 + $0xa4] sm:$0xf]  ;;  %v4823_v36 = vor.u32 %v5414_v33, %v4820_v34  ;;  %v5412_v39 = vld [vmem:[%s8101_s2 + $0x74] sm:$0xf0] }
 0x250   : > { %2860 = vmatpush.bf16.msra.mxu3 %v4855_v52  ;;  %v4827_v56 = vor.u32 %v5419_v41, %v4826_v55  ;;  %v5409_v7 = vld [vmem:[%s8101_s2 + $0x64] sm:$0xf]  ;;  %v4795_v21 = vor.u32 %v5411_v15, %v4794_v20  ;;  %v5410_v46 = vld [vmem:[%s8101_s2 + $0x6c] sm:$0xf]  ;;  %v4804_v49 = vld [vmem:[%s8101_s2 + $0x78] sm:$0xf0] }
 0x251   : > { %5565 = vtanh.f32 %v2285_v57  ;;  %v7393_v58 = vsel %vm2292_vm2, %v2285_v57, %v6971_v62  ;;  %v2275_v60 = vsel %vm2274_vm5, %v5562_v38, %v2271_v13  ;;  %v7401_v62 = vpop.f32.mrf.mxu0  ;;  %v4842_v38 = vld [vmem:[%s8101_s2 + $0xc0] sm:$0xf]  ;;  %v4828_v57 = vld [vmem:[%s8101_s2 + $0xb0] sm:$0xf0]  ;;  %v4834_v13 = vld [vmem:[%s8101_s2 + $0xa8] sm:$0xf]  ;;  %v4799_v44 = vor.u32 %v5409_v7, %v4796_v26 }
 0x252   : > { %v2280_v0 = vsel %vm2277_vm6, %v2279_v61, %v2275_v60  ;;  %v2201_v17 = vpop.f32.mrf.mxu2  ;;  %v4843_v42 = vor.u32 %v5423_v12, %v4842_v38  ;;  %v4831_v48 = vor.u32 %v5417_v47, %v4828_v57  ;;  %v4835_v60 = vor.u32 %v5420_v18, %v4834_v13  ;;  %v5418_v61 = vld [vmem:[%s8101_s2 + $0xac] sm:$0xf]  ;;  %v4802_v12 = vld [vmem:[%s8101_s2 + $0x68] sm:$0xf]  ;;  %v4778_v55 = vld [vmem:[%s8101_s2 + $0x40] sm:$0xf] }
 0x253   : > { %v4812_v17 = vld [vmem:[%s8101_s2 + $0x90] sm:$0xf0]  ;;  %v4803_v45 = vor.u32 %v5412_v39, %v4802_v12  ;;  %v4807_v50 = vor.u32 %v5410_v46, %v4804_v49  ;;  %v5407_v41 = vld [vmem:[%s8101_s2 + $0x4c] sm:$0xf0]  ;;  %v5405_v47 = vld [vmem:[%s8101_s2 + $0x44] sm:$0xf] }
 0x254   : > { %2821 = vmatpush.bf16.msra.mxu0 %v4843_v42  ;;  %2835 = vmatpush.bf16.msra.mxu1 %v4831_v48  ;;  %v4779_v57 = vor.u32 %v5407_v41, %v4778_v55  ;;  %v4786_v18 = vld [vmem:[%s8101_s2 + $0x48] sm:$0xf]  ;;  %v5408_v48 = vld [vmem:[%s8101_s2 + $0x54] sm:$0xf0]  ;;  %v4772_v20 = vld [vmem:[%s8101_s2 + $0x38] sm:$0xf0] }
 0x255   : > { %2848 = vmatpush.bf16.msra.mxu2 %v4835_v60  ;;  %v5406_v60 = vld [vmem:[%s8101_s2 + $0x4c] sm:$0xf]  ;;  %v4748_v12 = vld [vmem:[%s8101_s2 + $0x10] sm:$0xf0]  ;;  %v4754_v39 = vld [vmem:[%s8101_s2 + $0x8] sm:$0xf] }
 0x256   : > { %v2188_v11 = vpop.f32.mrf.mxu1  ;;  %v5398_v46 = vld [vmem:[%s8101_s2 + $0xc] sm:$0xf]  ;;  %v4756_v49 = vld [vmem:[%s8101_s2 + $0x18] sm:$0xf0] }
 0x257   : > { %v5566_v63 = vpop.eup %5565  ;;  %v4759_v41 = vor.u32 %v5398_v46, %v4756_v49 }
 0x258   : > { %v2287_v2 = vmul.f32 %v5566_v63, %v2280_v0  ;;  %v4836_v63 = vld [vmem:[%s8101_s2 + $0xb8] sm:$0xf0]  ;;  %2822 = vmatpush.bf16.msra.mxu0 %v4827_v56  ;;  %v4780_v56 = vld [vmem:[%s8101_s2 + $0x50] sm:$0xf0] }
 0x259   : > { %v2175_v9 = vpop.f32.mrf.mxu0  ;;  %v4839_v0 = vor.u32 %v5418_v61, %v4836_v63  ;;  %v4783_v13 = vor.u32 %v5405_v47, %v4780_v56  ;;  %v529_v61 = vadd.f32 %v6428_v54, %v6459_v5  ;;  %v4787_v63 = vor.u32 %v5408_v48, %v4786_v18 }
 0x25a   : > { %v7397_v53 = vsel %vm2292_vm2, %v2287_v2, %v6975_v8  ;;  %v2214_v8 = vpop.f32.mrf.mxu3  ;;  %v4810_v2 = vld [vmem:[%s8101_s2 + $0x80] sm:$0xf]  ;;  %v5413_v9 = vld [vmem:[%s8101_s2 + $0x84] sm:$0xf] }
 0x25b   : > { %v2302_v4 = vpack.c.bf16 %v7397_v53, %v7397_v53  ;;  %2861 = vmatpush.bf16.msra.mxu3 %v4839_v0  ;;  %v4818_v8 = vld [vmem:[%s8101_s2 + $0x88] sm:$0xf]  ;;  %v4815_v29 = vor.u32 %v5413_v9, %v4812_v17  ;;  %v4788_v0 = vld [vmem:[%s8101_s2 + $0x58] sm:$0xf0] }
 0x25c   : > { %v4819_v30 = vor.u32 %v5416_v25, %v4818_v8  ;;  %v4791_v17 = vor.u32 %v5406_v60, %v4788_v0  ;;  %v5401_v8 = vld [vmem:[%s8101_s2 + $0x24] sm:$0xf]  ;;  %v4764_v25 = vld [vmem:[%s8101_s2 + $0x30] sm:$0xf0] }
 0x25d   : > { %2503 = vmatmul.bf16.vlgmr.msrb.gmra.mxu0 %v2302_v4  ;;  %2516 = vmatmul.bf16.vlgmr.msrb.gmra.mxu1 %v2302_v4 }
 0x25e   : > { %2529 = vmatmul.bf16.vlgmr.msrb.gmra.mxu2 %v2302_v4  ;;  %2542 = vmatmul.bf16.vlgmr.msrb.gmra.mxu3 %v2302_v4  ;;  %v5415_v4 = vld [vmem:[%s8101_s2 + $0x8c] sm:$0xf0] }
 0x25f   : > { %v4811_v11 = vor.u32 %v5415_v4, %v4810_v2  ;;  %2836 = vmatpush.bf16.msra.mxu1 %v4815_v29  ;;  %2849 = vmatpush.bf16.msra.mxu2 %v4819_v30  ;;  %v4762_v2 = vld [vmem:[%s8101_s2 + $0x20] sm:$0xf]  ;;  %v5403_v4 = vld [vmem:[%s8101_s2 + $0x2c] sm:$0xf0]  ;;  %v4770_v29 = vld [vmem:[%s8101_s2 + $0x28] sm:$0xf] }
 0x260   : > { %2862 = vmatpush.bf16.msra.mxu3 %v4823_v36  ;;  %v4763_v54 = vor.u32 %v5403_v4, %v4762_v2  ;;  %v4767_v36 = vor.u32 %v5401_v8, %v4764_v25 }
 0x261   : > { %2823 = vmatpush.bf16.msra.mxu0 %v4811_v11 }
 0x263   : > { %2837 = vmatpush.bf16.msra.mxu1 %v4799_v44  ;;  %2850 = vmatpush.bf16.msra.mxu2 %v4803_v45  ;;  %v5400_v45 = vld [vmem:[%s8101_s2 + $0x14] sm:$0xf0] }
 0x264   : > { %2863 = vmatpush.bf16.msra.mxu3 %v4807_v50 }
 0x265   : > { %2824 = vmatpush.bf16.msra.mxu0 %v4795_v21  ;;  %v5397_v21 = vld [vmem:[%s8101_s2 + $0x4] sm:$0xf] }
 0x266   : > { %v4751_v44 = vor.u32 %v5397_v21, %v4748_v12 }
 0x267   : > { %2838 = vmatpush.bf16.msra.mxu1 %v4783_v13  ;;  %2851 = vmatpush.bf16.msra.mxu2 %v4787_v63  ;;  %v548_v13 = vadd.f32 %v6441_v59, %v6536_v16 }
 0x268   : > { %2864 = vmatpush.bf16.msra.mxu3 %v4791_v17 }
 0x269   : > { %2825 = vmatpush.bf16.msra.mxu0 %v4779_v57 }
 0x26b   : > { %2839 = vmatpush.bf16.msra.mxu1 %v4767_v36 }
 0x26d   : > { %2826 = vmatpush.bf16.msra.mxu0 %v4763_v54 }
 0x26f   : > { %2840 = vmatpush.bf16.msra.mxu1 %v4751_v44 }
 0x2da   : > { %v2504_v35 = vpop.f32.mrf.mxu0  ;;  %v2517_v38 = vpop.f32.mrf.mxu1 }
 0x2db   : > { %v2547_v42 = vadd.f32 %v2504_v35, %v491_v37  ;;  %v2548_v43 = vadd.f32 %v2517_v38, %v510_v40  ;;  %v5404_v37 = vld [vmem:[%s8101_s2 + $0x34] sm:$0xf0]  ;;  %v5402_v40 = vld [vmem:[%s8101_s2 + $0x2c] sm:$0xf]  ;;  %v4746_v35 = vld [vmem:[%s8101_s2] sm:$0xf] }
 0x2dc   : > { %v4771_v15 = vor.u32 %v5404_v37, %v4770_v29  ;;  %v4775_v7 = vor.u32 %v5402_v40, %v4772_v20  ;;  %v5399_v38 = vld [vmem:[%s8101_s2 + $0xc] sm:$0xf0]  ;;  %v2617_v40 = vstv %s2616_s8 }
 0x2dd   : > { %v4741_v51 = vmul.f32 -1.442695, %v2547_v42  ;;  %v4742_v52 = vmul.f32 -1.442695, %v2548_v43  ;;  %v4747_v43 = vor.u32 %v5399_v38, %v4746_v35  ;;  %vm2618_vm15 = vcmp.eq.s32.totalorder %v2617_v40, 1 }
 0x2de   : > { %2852 = vmatpush.bf16.msra.mxu2 %v4771_v15  ;;  %2865 = vmatpush.bf16.msra.mxu3 %v4775_v7  ;;  %v5449_v40 = vld [vmem:[%s8101_s2 + $0xa4] sm:$0xf] }
 0x2df   : > { %5567 = vpow2.f32 %v4741_v51  ;;  %2827 = vmatpush.bf16.msra.mxu0 %v4747_v43 }
 0x2e0   : > { %5569 = vpow2.f32 %v4742_v52  ;;  %v4755_v52 = vor.u32 %v5400_v45, %v4754_v39 }
 0x2e1   : > { %v2530_v9 = vpop.f32.mrf.mxu2  ;;  %v2543_v11 = vpop.f32.mrf.mxu3 }
 0x2e2   : > { %v2549_v30 = vadd.f32 %v2530_v9, %v529_v61  ;;  %v2506_v33 = vpop.f32.mrf.mxu0  ;;  %v2519_v34 = vpop.f32.mrf.mxu1  ;;  %2853 = vmatpush.bf16.msra.mxu2 %v4755_v52  ;;  %2866 = vmatpush.bf16.msra.mxu3 %v4759_v41  ;;  %v2550_v60 = vadd.f32 %v2543_v11, %v548_v13 }
 0x2e4   : > { %v4743_v26 = vmul.f32 -1.442695, %v2549_v30 }
 0x2e5   : > { %v5568_v42 = vpop.eup %5567 }
 0x2e6   : > { %v5570_v50 = vpop.eup %5569  ;;  %v2560_v51 = vadd.f32 1.0, %v5568_v42  ;;  %5571 = vpow2.f32 %v4743_v26 }
 0x2e7   : > { %v2561_v55 = vadd.f32 1.0, %v5570_v50 }
 0x2e8   : > { %5573 = vrcp.f32 %v2560_v51  ;;  %v2574_v9 = vand.u32 2147483648, %v2560_v51  ;;  %v2572_v59 = vand.u32 2147483647, %v2560_v51  ;;  %vm2568_vm9 = vweird.f32 %v2560_v51 }
 0x2e9   : > { %5575 = vrcp.f32 %v2561_v55  ;;  %v2532_v47 = vpop.f32.mrf.mxu2  ;;  %v2545_v56 = vpop.f32.mrf.mxu3  ;;  %v2589_v17 = vand.u32 2147483648, %v2561_v55  ;;  %v2587_v8 = vand.u32 2147483647, %v2561_v55  ;;  %vm2583_vm10 = vweird.f32 %v2561_v55 }
 0x2ea   : > { %v2575_v33 = vor.u32 1.1754944e-38, %v2574_v9  ;;  %vm2573_vm13 = vcmp.eq.f32.partialorder %v2572_v59, 8.507059e+37  ;;  %v4989_v47 = vld [vmem:[%s8101_s2 + $0xe0] sm:$0xf]  ;;  %v5459_v56 = vld [vmem:[%s8101_s2 + $0xec] sm:$0xf0] }
 0x2eb   : > { %v2590_v36 = vor.u32 1.1754944e-38, %v2589_v17  ;;  %vm2588_vm14 = vcmp.eq.f32.partialorder %v2587_v8, 8.507059e+37  ;;  %v4990_v13 = vor.u32 %v5459_v56, %v4989_v47  ;;  %v5455_v9 = vld [vmem:[%s8101_s2 + $0xcc] sm:$0xf0]  ;;  %v5453_v17 = vld [vmem:[%s8101_s2 + $0xc4] sm:$0xf] }
 0x2ec   : > { %v5572_v57 = vpop.eup %5571  ;;  %v4975_v59 = vld [vmem:[%s8101_s2 + $0xd0] sm:$0xf0]  ;;  %v5456_v8 = vld [vmem:[%s8101_s2 + $0xd4] sm:$0xf0]  ;;  %v4951_v47 = vld [vmem:[%s8101_s2 + $0x98] sm:$0xf0] }
 0x2ed   : > { %v2562_v18 = vadd.f32 1.0, %v5572_v57  ;;  %v5457_v57 = vld [vmem:[%s8101_s2 + $0xe4] sm:$0xf]  ;;  %3145 = vmatpush.bf16.msrb.mxu0 %v4990_v13  ;;  %v1035_v13 = vadd.f32 %v6658_v24, %v6400_v32  ;;  %v4927_v24 = vld [vmem:[%s8101_s2 + $0x70] sm:$0xf0] }
 0x2ee   : > { %v5574_v48 = vpop.eup %5573 }
 0x2ef   : > { %v5576_v61 = vpop.eup %5575  ;;  %v2564_v63 = vmul.f32 %v5574_v48, %v2560_v51  ;;  %5577 = vrcp.f32 %v2562_v18  ;;  %vm2569_vm7 = vweird.f32 %v5574_v48  ;;  %v2604_v43 = vand.u32 2147483648, %v2562_v18 }
 0x2f0   : > { %v2579_v0 = vmul.f32 %v5576_v61, %v2561_v55  ;;  %5579 = vtanh.f32 %v2550_v60  ;;  %vm2584_vm8 = vweird.f32 %v5576_v61  ;;  %vm2570_vm11 = vmor %vm2568_vm9, %vm2569_vm7  ;;  %vm2598_vm1 = vweird.f32 %v2562_v18 }
 0x2f1   : > { %v2565_v2 = vsub.f32 1.0, %v2564_v63  ;;  %vm2585_vm12 = vmor %vm2583_vm10, %vm2584_vm8  ;;  %v2602_v45 = vand.u32 2147483647, %v2562_v18  ;;  %v2605_v49 = vor.u32 1.1754944e-38, %v2604_v43  ;;  %v5458_v63 = vld [vmem:[%s8101_s2 + $0xec] sm:$0xf] }
 0x2f2   : > { %v2580_v4 = vsub.f32 1.0, %v2579_v0  ;;  %v4999_v0 = vld [vmem:[%s8101_s2 + $0xf8] sm:$0xf0]  ;;  %v5447_v43 = vld [vmem:[%s8101_s2 + $0x8c] sm:$0xf0] }
 0x2f3   : > { %v2566_v54 = vmul.f32 %v5574_v48, %v2565_v2  ;;  %vm2603_vm3 = vcmp.eq.f32.partialorder %v2602_v45, 8.507059e+37  ;;  %v5002_v2 = vor.u32 %v5458_v63, %v4999_v0  ;;  %v5445_v45 = vld [vmem:[%s8101_s2 + $0x84] sm:$0xf]  ;;  %v4933_v63 = vld [vmem:[%s8101_s2 + $0x68] sm:$0xf] }
 0x2f4   : > { %v2581_v11 = vmul.f32 %v5576_v61, %v2580_v4  ;;  %v4973_v4 = vld [vmem:[%s8101_s2 + $0xc0] sm:$0xf]  ;;  %v5444_v0 = vld [vmem:[%s8101_s2 + $0x74] sm:$0xf0] }
 0x2f5   : > { %v5578_v25 = vpop.eup %5577  ;;  %v2567_v29 = vadd.f32 %v5574_v48, %v2566_v54  ;;  %3184 = vmatpush.bf16.msrb.mxu3 %v5002_v2  ;;  %v4974_v54 = vor.u32 %v5455_v9, %v4973_v4 }
 0x2f6   : > { %v2594_v30 = vmul.f32 %v5578_v25, %v2562_v18  ;;  %v2582_v34 = vadd.f32 %v5576_v61, %v2581_v11  ;;  %v5580_v20 = vpop.eup %5579  ;;  %vm2599_vm0 = vweird.f32 %v5578_v25  ;;  %v4997_v18 = vld [vmem:[%s8101_s2 + $0xe8] sm:$0xf] }
 0x2f7   : > { %v2571_v37 = vsel %vm2570_vm11, %v5574_v48, %v2567_v29  ;;  %vm2600_vm2 = vmor %vm2598_vm1, %vm2599_vm0  ;;  %v5460_v48 = vld [vmem:[%s8101_s2 + $0xf4] sm:$0xf0]  ;;  %v4981_v11 = vld [vmem:[%s8101_s2 + $0xc8] sm:$0xf]  ;;  %3146 = vmatpush.bf16.msrb.mxu0 %v4974_v54 }
 0x2f8   : > { %v2595_v15 = vsub.f32 1.0, %v2594_v30  ;;  %v2576_v7 = vsel %vm2573_vm13, %v2575_v33, %v2571_v37  ;;  %v2586_v35 = vsel %vm2585_vm12, %v5576_v61, %v2582_v34  ;;  %v4998_v61 = vor.u32 %v5460_v48, %v4997_v18  ;;  %v5454_v30 = vld [vmem:[%s8101_s2 + $0xcc] sm:$0xf]  ;;  %v4983_v33 = vld [vmem:[%s8101_s2 + $0xd8] sm:$0xf0] }
 0x2f9   : > { %v2591_v38 = vsel %vm2588_vm14, %v2590_v36, %v2586_v35  ;;  %v2610_v21 = vmul.f32 %v5580_v20, %v2576_v7  ;;  %v4982_v29 = vor.u32 %v5456_v8, %v4981_v11  ;;  %v4986_v34 = vor.u32 %v5454_v30, %v4983_v33  ;;  %v4957_v36 = vld [vmem:[%s8101_s2 + $0xa0] sm:$0xf]  ;;  %v5451_v37 = vld [vmem:[%s8101_s2 + $0xac] sm:$0xf0]  ;;  %v4965_v7 = vld [vmem:[%s8101_s2 + $0xa8] sm:$0xf] }
 0x2fa   : > { %v2596_v26 = vmul.f32 %v5578_v25, %v2595_v15  ;;  %v2609_v12 = vmul.f32 %v2591_v38, %v7393_v58  ;;  %3171 = vmatpush.bf16.msrb.mxu2 %v4998_v61  ;;  %v4958_v20 = vor.u32 %v5451_v37, %v4957_v36  ;;  %v4959_v15 = vld [vmem:[%s8101_s2 + $0xb0] sm:$0xf0]  ;;  %v5452_v35 = vld [vmem:[%s8101_s2 + $0xb4] sm:$0xf0]  ;;  %v5443_v18 = vld [vmem:[%s8101_s2 + $0x6c] sm:$0xf0] }
 0x2fb   : > { %3185 = vmatpush.bf16.msrb.mxu3 %v4986_v34  ;;  %v4962_v38 = vor.u32 %v5449_v40, %v4959_v15  ;;  %v5441_v48 = vld [vmem:[%s8101_s2 + $0x64] sm:$0xf]  ;;  %v5442_v54 = vld [vmem:[%s8101_s2 + $0x6c] sm:$0xf]  ;;  %v5439_v30 = vld [vmem:[%s8101_s2 + $0x4c] sm:$0xf0] }
 0x2fc   : > { %v2611_v39 = vadd.f32 %v2610_v21, %v2609_v12  ;;  %v2597_v42 = vadd.f32 %v5578_v25, %v2596_v26  ;;  %v4966_v21 = vor.u32 %v5452_v35, %v4965_v7  ;;  %v5450_v26 = vld [vmem:[%s8101_s2 + $0xac] sm:$0xf]  ;;  %v4967_v12 = vld [vmem:[%s8101_s2 + $0xb8] sm:$0xf0]  ;;  %3147 = vmatpush.bf16.msrb.mxu0 %v4958_v20  ;;  %v4930_v9 = vor.u32 %v5441_v48, %v4927_v24  ;;  %v5437_v33 = vld [vmem:[%s8101_s2 + $0x44] sm:$0xf] }
 0x2fd   : > { %v4911_v34 = vld [vmem:[%s8101_s2 + $0x50] sm:$0xf0]  ;;  %v4917_v40 = vld [vmem:[%s8101_s2 + $0x48] sm:$0xf]  ;;  %v5440_v20 = vld [vmem:[%s8101_s2 + $0x54] sm:$0xf0]  ;;  %v1048_v7 = vadd.f32 %v6660_v27, %v6459_v5 }
 0x2fe   : > { %5581 = vtanh.f32 %v2611_v39  ;;  %v7619_v44 = vsel %vm2618_vm15, %v2611_v39, %v7393_v58  ;;  %v2601_v46 = vsel %vm2600_vm2, %v5578_v25, %v2597_v42  ;;  %v4978_v25 = vor.u32 %v5453_v17, %v4975_v59  ;;  %3172 = vmatpush.bf16.msrb.mxu2 %v4982_v29  ;;  %v4941_v42 = vld [vmem:[%s8101_s2 + $0x80] sm:$0xf]  ;;  %v4935_v59 = vld [vmem:[%s8101_s2 + $0x78] sm:$0xf0]  ;;  %v5438_v15 = vld [vmem:[%s8101_s2 + $0x4c] sm:$0xf] }
 0x2ff   : > { %v2606_v51 = vsel %vm2603_vm3, %v2605_v49, %v2601_v46  ;;  %v4970_v39 = vor.u32 %v5450_v26, %v4967_v12  ;;  %v4942_v46 = vor.u32 %v5447_v43, %v4941_v42  ;;  %v4943_v49 = vld [vmem:[%s8101_s2 + $0x90] sm:$0xf0]  ;;  %v4934_v17 = vor.u32 %v5444_v0, %v4933_v63  ;;  %v4909_v29 = vld [vmem:[%s8101_s2 + $0x40] sm:$0xf]  ;;  %v5435_v26 = vld [vmem:[%s8101_s2 + $0x2c] sm:$0xf0] }
 0x300   : > { %v4938_v11 = vor.u32 %v5442_v54, %v4935_v59  ;;  %v4910_v36 = vor.u32 %v5439_v30, %v4909_v29  ;;  %v4914_v37 = vor.u32 %v5437_v33, %v4911_v34  ;;  %v4918_v35 = vor.u32 %v5440_v20, %v4917_v40  ;;  %v5433_v43 = vld [vmem:[%s8101_s2 + $0x24] sm:$0xf]  ;;  %v5432_v0 = vld [vmem:[%s8101_s2 + $0x14] sm:$0xf0] }
 0x301   : > { %3186 = vmatpush.bf16.msrb.mxu3 %v4970_v39  ;;  %3148 = vmatpush.bf16.msrb.mxu0 %v4942_v46  ;;  %v4901_v46 = vld [vmem:[%s8101_s2 + $0x28] sm:$0xf]  ;;  %v1061_v30 = vadd.f32 %v6662_v10, %v6536_v16 }
 0x302   : > { %3173 = vmatpush.bf16.msrb.mxu2 %v4966_v21  ;;  %v4893_v21 = vld [vmem:[%s8101_s2 + $0x20] sm:$0xf] }
 0x303   : > { %v4894_v27 = vor.u32 %v5435_v26, %v4893_v21 }
 0x304   : > { %v5582_v50 = vpop.eup %5581 }
 0x305   : > { %v2613_v52 = vmul.f32 %v5582_v50, %v2606_v51  ;;  %v4949_v50 = vld [vmem:[%s8101_s2 + $0x88] sm:$0xf]  ;;  %v5448_v51 = vld [vmem:[%s8101_s2 + $0x94] sm:$0xf0] }
 0x307   : > { %v7623_v55 = vsel %vm2618_vm15, %v2613_v52, %v7397_v53  ;;  %v4946_v52 = vor.u32 %v5445_v45, %v4943_v49  ;;  %v4895_v45 = vld [vmem:[%s8101_s2 + $0x30] sm:$0xf0] }
 0x308   : > { %v2627_v41 = vpack.c.bf16 %v7623_v55, %v7623_v55  ;;  %v5501_v58 = vpack.c.bf16 %v7623_v55, %v7397_v53  ;;  %v4991_v53 = vld [vmem:[%s8101_s2 + $0xf0] sm:$0xf0] }
 0x309   : > { %v4994_v60 = vor.u32 %v5457_v57, %v4991_v53  ;;  %v1022_v57 = vadd.f32 %v6656_v1, %v6397_v31  ;;  %v4925_v53 = vld [vmem:[%s8101_s2 + $0x60] sm:$0xf] }
 0x30a   : > { %2828 = vmatmul.bf16.vlgmr.msra.gmra.mxu0 %v2627_v41  ;;  %5508 = vst [vmem:[%s5697_s7 + $0x8] sm:$0xff] %v5501_v58   ;;  %2841 = vmatmul.bf16.vlgmr.msra.gmra.mxu1 %v2627_v41  ;;  %v5446_v58 = vld [vmem:[%s8101_s2 + $0x8c] sm:$0xf]  ;;  %v4926_v1 = vor.u32 %v5443_v18, %v4925_v53  ;;  %v5431_v53 = vld [vmem:[%s8101_s2 + $0xc] sm:$0xf0] }
 0x30b   : > { %2854 = vmatmul.bf16.vlgmr.msra.gmra.mxu2 %v2627_v41  ;;  %2867 = vmatmul.bf16.vlgmr.msra.gmra.mxu3 %v2627_v41  ;;  %v4950_v41 = vor.u32 %v5448_v51, %v4949_v50  ;;  %v4954_v56 = vor.u32 %v5446_v58, %v4951_v47  ;;  %v5434_v58 = vld [vmem:[%s8101_s2 + $0x2c] sm:$0xf]  ;;  %v4903_v47 = vld [vmem:[%s8101_s2 + $0x38] sm:$0xf0]  ;;  %v5429_v18 = vld [vmem:[%s8101_s2 + $0x4] sm:$0xf] }
 0x30c   : > { %3158 = vmatpush.bf16.msrb.mxu1 %v4994_v60  ;;  %3149 = vmatpush.bf16.msrb.mxu0 %v4926_v1 }
 0x30d   : > { %3174 = vmatpush.bf16.msrb.mxu2 %v4950_v41  ;;  %3187 = vmatpush.bf16.msrb.mxu3 %v4954_v56  ;;  %v5436_v41 = vld [vmem:[%s8101_s2 + $0x34] sm:$0xf0] }
 0x30e   : > { %v4902_v56 = vor.u32 %v5436_v41, %v4901_v46 }
 0x310   : > { %3159 = vmatpush.bf16.msrb.mxu1 %v4978_v25  ;;  %3150 = vmatpush.bf16.msrb.mxu0 %v4910_v36 }
 0x311   : > { %3175 = vmatpush.bf16.msrb.mxu2 %v4934_v17  ;;  %3188 = vmatpush.bf16.msrb.mxu3 %v4938_v11 }
 0x314   : > { %3160 = vmatpush.bf16.msrb.mxu1 %v4962_v38  ;;  %v4919_v38 = vld [vmem:[%s8101_s2 + $0x58] sm:$0xf0]  ;;  %3151 = vmatpush.bf16.msrb.mxu0 %v4894_v27 }
 0x315   : > { %v4922_v42 = vor.u32 %v5438_v15, %v4919_v38  ;;  %3176 = vmatpush.bf16.msrb.mxu2 %v4918_v35 }
 0x317   : > { %3189 = vmatpush.bf16.msrb.mxu3 %v4922_v42 }
 0x318   : > { %3161 = vmatpush.bf16.msrb.mxu1 %v4946_v52  ;;  %v4898_v52 = vor.u32 %v5433_v43, %v4895_v45 }
 0x319   : > { %3177 = vmatpush.bf16.msrb.mxu2 %v4902_v56 }
 0x31c   : > { %3162 = vmatpush.bf16.msrb.mxu1 %v4930_v9 }
 0x320   : > { %3163 = vmatpush.bf16.msrb.mxu1 %v4914_v37 }
 0x324   : > { %3164 = vmatpush.bf16.msrb.mxu1 %v4898_v52 }
 0x387   : > { %v2829_v60 = vpop.f32.mrf.mxu0  ;;  %v2842_v61 = vpop.f32.mrf.mxu1 }
 0x388   : > { %v2872_v2 = vadd.f32 %v2829_v60, %v1022_v57  ;;  %v2873_v4 = vadd.f32 %v2842_v61, %v1035_v13  ;;  %v4906_v57 = vor.u32 %v5434_v58, %v4903_v47  ;;  %v4877_v13 = vld [vmem:[%s8101_s2] sm:$0xf]  ;;  %v4879_v60 = vld [vmem:[%s8101_s2 + $0x10] sm:$0xf0]  ;;  %v4885_v61 = vld [vmem:[%s8101_s2 + $0x8] sm:$0xf] }
 0x389   : > { %v4878_v24 = vor.u32 %v5431_v53, %v4877_v13  ;;  %v4882_v63 = vor.u32 %v5429_v18, %v4879_v60  ;;  %v4886_v54 = vor.u32 %v5432_v0, %v4885_v61 }
 0x38a   : > { %v4872_v8 = vmul.f32 -1.442695, %v2872_v2  ;;  %v4873_v25 = vmul.f32 -1.442695, %v2873_v4  ;;  %v5430_v2 = vld [vmem:[%s8101_s2 + $0xc] sm:$0xf]  ;;  %3190 = vmatpush.bf16.msrb.mxu3 %v4906_v57 }
 0x38b   : > { %v4887_v4 = vld [vmem:[%s8101_s2 + $0x18] sm:$0xf0]  ;;  %3152 = vmatpush.bf16.msrb.mxu0 %v4878_v24  ;;  %3165 = vmatpush.bf16.msrb.mxu1 %v4882_v63 }
 0x38c   : > { %5583 = vpow2.f32 %v4872_v8  ;;  %v4890_v11 = vor.u32 %v5430_v2, %v4887_v4  ;;  %3178 = vmatpush.bf16.msrb.mxu2 %v4886_v54 }
 0x38d   : > { %5585 = vpow2.f32 %v4873_v25 }
 0x38e   : > { %v2855_v12 = vpop.f32.mrf.mxu2  ;;  %v2868_v39 = vpop.f32.mrf.mxu3  ;;  %3191 = vmatpush.bf16.msrb.mxu3 %v4890_v11  ;;  %v5128_v11 = vld [vmem:[%s8101_s2 + $0xe8] sm:$0xf] }
 0x38f   : > { %v2874_v49 = vadd.f32 %v2855_v12, %v1048_v7  ;;  %v2831_v50 = vpop.f32.mrf.mxu0  ;;  %v2844_v51 = vpop.f32.mrf.mxu1  ;;  %v2875_v36 = vadd.f32 %v2868_v39, %v1061_v30  ;;  %v5490_v30 = vld [vmem:[%s8101_s2 + $0xec] sm:$0xf] }
 0x390   : > { %v2942_v50 = vstv %s2941_s13 }
 0x391   : > { %v4874_v48 = vmul.f32 -1.442695, %v2874_v49  ;;  %vm2943_vm12 = vcmp.eq.s32.totalorder %v2942_v50, 1 }
 0x392   : > { %v5584_v1 = vpop.eup %5583 }
 0x393   : > { %v5586_v9 = vpop.eup %5585  ;;  %v2885_v17 = vadd.f32 1.0, %v5584_v1  ;;  %5587 = vpow2.f32 %v4874_v48 }
 0x394   : > { %v2886_v59 = vadd.f32 1.0, %v5586_v9 }
 0x395   : > { %5589 = vrcp.f32 %v2885_v17  ;;  %v2899_v35 = vand.u32 2147483648, %v2885_v17  ;;  %v2897_v10 = vand.u32 2147483647, %v2885_v17  ;;  %vm2893_vm6 = vweird.f32 %v2885_v17 }
 0x396   : > { %5591 = vrcp.f32 %v2886_v59  ;;  %v2857_v8 = vpop.f32.mrf.mxu2  ;;  %v2870_v25 = vpop.f32.mrf.mxu3  ;;  %v2914_v38 = vand.u32 2147483648, %v2886_v59  ;;  %v2912_v12 = vand.u32 2147483647, %v2886_v59  ;;  %vm2908_vm7 = vweird.f32 %v2886_v59 }
 0x397   : > { %v2900_v43 = vor.u32 1.1754944e-38, %v2899_v35  ;;  %vm2898_vm10 = vcmp.eq.f32.partialorder %v2897_v10, 8.507059e+37  ;;  %v5492_v8 = vld [vmem:[%s8101_s2 + $0xf4] sm:$0xf0]  ;;  %v5486_v10 = vld [vmem:[%s8101_s2 + $0xcc] sm:$0xf] }
 0x398   : > { %v2915_v46 = vor.u32 1.1754944e-38, %v2914_v38  ;;  %vm2913_vm11 = vcmp.eq.f32.partialorder %v2912_v12, 8.507059e+37  ;;  %v5488_v35 = vld [vmem:[%s8101_s2 + $0xd4] sm:$0xf0] }
 0x399   : > { %v5588_v29 = vpop.eup %5587 }
 0x39a   : > { %v2887_v33 = vadd.f32 1.0, %v5588_v29  ;;  %v5129_v29 = vor.u32 %v5492_v8, %v5128_v11  ;;  %v5064_v11 = vld [vmem:[%s8101_s2 + $0x68] sm:$0xf]  ;;  %v5476_v8 = vld [vmem:[%s8101_s2 + $0x74] sm:$0xf0] }
 0x39b   : > { %v5590_v34 = vpop.eup %5589 }
 0x39c   : > { %v5592_v37 = vpop.eup %5591  ;;  %v2889_v40 = vmul.f32 %v5590_v34, %v2885_v17  ;;  %5593 = vrcp.f32 %v2887_v33  ;;  %vm2894_vm4 = vweird.f32 %v5590_v34  ;;  %v2929_v48 = vand.u32 2147483648, %v2887_v33  ;;  %v5491_v17 = vld [vmem:[%s8101_s2 + $0xec] sm:$0xf0]  ;;  %3496 = vmatpush.bf16.msra.mxu2 %v5129_v29 }
 0x39d   : > { %v2904_v20 = vmul.f32 %v5592_v37, %v2886_v59  ;;  %5595 = vtanh.f32 %v2875_v36  ;;  %vm2909_vm5 = vweird.f32 %v5592_v37  ;;  %vm2895_vm8 = vmor %vm2893_vm6, %vm2894_vm4  ;;  %vm2923_vm14 = vweird.f32 %v2887_v33  ;;  %v5122_v59 = vld [vmem:[%s8101_s2 + $0xf0] sm:$0xf0]  ;;  %v5104_v36 = vld [vmem:[%s8101_s2 + $0xc0] sm:$0xf] }
 0x39e   : > { %v2890_v15 = vsub.f32 1.0, %v2889_v40  ;;  %vm2910_vm9 = vmor %vm2908_vm7, %vm2909_vm5  ;;  %v2927_v61 = vand.u32 2147483647, %v2887_v33  ;;  %v2930_v24 = vor.u32 1.1754944e-38, %v2929_v48  ;;  %v5485_v40 = vld [vmem:[%s8101_s2 + $0xc4] sm:$0xf] }
 0x39f   : > { %v2905_v7 = vsub.f32 1.0, %v2904_v20  ;;  %v5480_v48 = vld [vmem:[%s8101_s2 + $0x94] sm:$0xf0] }
 0x3a0   : > { %v2891_v21 = vmul.f32 %v5590_v34, %v2890_v15  ;;  %vm2928_vm0 = vcmp.eq.f32.partialorder %v2927_v61, 8.507059e+37  ;;  %v5106_v15 = vld [vmem:[%s8101_s2 + $0xd0] sm:$0xf0] }
 0x3a1   : > { %v2906_v26 = vmul.f32 %v5592_v37, %v2905_v7  ;;  %v5112_v7 = vld [vmem:[%s8101_s2 + $0xc8] sm:$0xf]  ;;  %v5109_v38 = vor.u32 %v5485_v40, %v5106_v15  ;;  %v5040_v15 = vld [vmem:[%s8101_s2 + $0x40] sm:$0xf] }
 0x3a2   : > { %v5594_v39 = vpop.eup %5593  ;;  %v2892_v42 = vadd.f32 %v5590_v34, %v2891_v21  ;;  %v5113_v21 = vor.u32 %v5488_v35, %v5112_v7  ;;  %v5471_v7 = vld [vmem:[%s8101_s2 + $0x4c] sm:$0xf0]  ;;  %v5469_v35 = vld [vmem:[%s8101_s2 + $0x44] sm:$0xf] }
 0x3a3   : > { %v2919_v27 = vmul.f32 %v5594_v39, %v2887_v33  ;;  %v2907_v45 = vadd.f32 %v5592_v37, %v2906_v26  ;;  %v5596_v51 = vpop.eup %5595  ;;  %vm2924_vm13 = vweird.f32 %v5594_v39  ;;  %v5130_v33 = vld [vmem:[%s8101_s2 + $0xf8] sm:$0xf0] }
 0x3a4   : > { %v2896_v49 = vsel %vm2895_vm8, %v5590_v34, %v2892_v42  ;;  %vm2925_vm15 = vmor %vm2923_vm14, %vm2924_vm13  ;;  %v5133_v34 = vor.u32 %v5490_v30, %v5130_v33  ;;  %v5114_v26 = vld [vmem:[%s8101_s2 + $0xd8] sm:$0xf0]  ;;  %3497 = vmatpush.bf16.msra.mxu2 %v5113_v21  ;;  %v5483_v42 = vld [vmem:[%s8101_s2 + $0xac] sm:$0xf0]  ;;  %v5065_v33 = vor.u32 %v5476_v8, %v5064_v11  ;;  %v5041_v21 = vor.u32 %v5471_v7, %v5040_v15 }
 0x3a5   : > { %v2920_v52 = vsub.f32 1.0, %v2919_v27  ;;  %v2901_v41 = vsel %vm2898_vm10, %v2900_v43, %v2896_v49  ;;  %v2911_v58 = vsel %vm2910_vm9, %v5592_v37, %v2907_v45  ;;  %v5487_v37 = vld [vmem:[%s8101_s2 + $0xcc] sm:$0xf0]  ;;  %v5117_v12 = vor.u32 %v5486_v10, %v5114_v26  ;;  %v5481_v27 = vld [vmem:[%s8101_s2 + $0xa4] sm:$0xf] }
 0x3a6   : > { %v2916_v47 = vsel %vm2913_vm11, %v2915_v46, %v2911_v58  ;;  %v2935_v56 = vmul.f32 %v5596_v51, %v2901_v41  ;;  %3509 = vmatpush.bf16.msra.mxu3 %v5133_v34  ;;  %v5105_v20 = vor.u32 %v5487_v37, %v5104_v36  ;;  %v5090_v45 = vld [vmem:[%s8101_s2 + $0xb0] sm:$0xf0]  ;;  %v5096_v46 = vld [vmem:[%s8101_s2 + $0xa8] sm:$0xf]  ;;  %v5484_v49 = vld [vmem:[%s8101_s2 + $0xb4] sm:$0xf0] }
 0x3a7   : > { %v2921_v57 = vmul.f32 %v5594_v39, %v2920_v52  ;;  %v2934_v13 = vmul.f32 %v2916_v47, %v7619_v44  ;;  %v5093_v50 = vor.u32 %v5481_v27, %v5090_v45  ;;  %v5097_v51 = vor.u32 %v5484_v49, %v5096_v46  ;;  %v5482_v52 = vld [vmem:[%s8101_s2 + $0xac] sm:$0xf]  ;;  %v5098_v41 = vld [vmem:[%s8101_s2 + $0xb8] sm:$0xf0]  ;;  %v5072_v47 = vld [vmem:[%s8101_s2 + $0x80] sm:$0xf] }
 0x3a8   : > { %v5101_v58 = vor.u32 %v5482_v52, %v5098_v41  ;;  %v5474_v34 = vld [vmem:[%s8101_s2 + $0x6c] sm:$0xf]  ;;  %v5066_v36 = vld [vmem:[%s8101_s2 + $0x78] sm:$0xf0]  ;;  %v5048_v26 = vld [vmem:[%s8101_s2 + $0x48] sm:$0xf] }
 0x3a9   : > { %v2936_v53 = vadd.f32 %v2935_v56, %v2934_v13  ;;  %v2922_v18 = vadd.f32 %v5594_v39, %v2921_v57  ;;  %3498 = vmatpush.bf16.msra.mxu2 %v5097_v51  ;;  %v5479_v56 = vld [vmem:[%s8101_s2 + $0x8c] sm:$0xf0]  ;;  %v5477_v57 = vld [vmem:[%s8101_s2 + $0x84] sm:$0xf]  ;;  %v5069_v37 = vor.u32 %v5474_v34, %v5066_v36  ;;  %v5024_v45 = vld [vmem:[%s8101_s2 + $0x20] sm:$0xf] }
 0x3aa   : > { %3510 = vmatpush.bf16.msra.mxu3 %v5117_v12  ;;  %v5073_v13 = vor.u32 %v5479_v56, %v5072_v47  ;;  %v5472_v12 = vld [vmem:[%s8101_s2 + $0x54] sm:$0xf0]  ;;  %v5467_v46 = vld [vmem:[%s8101_s2 + $0x2c] sm:$0xf0]  ;;  %v5465_v52 = vld [vmem:[%s8101_s2 + $0x24] sm:$0xf] }
 0x3ab   : > { %5597 = vtanh.f32 %v2936_v53  ;;  %v7840_v60 = vsel %vm2943_vm12, %v2936_v53, %v7619_v44  ;;  %v2926_v1 = vsel %vm2925_vm15, %v5594_v39, %v2922_v18  ;;  %v5120_v44 = vld [vmem:[%s8101_s2 + $0xe0] sm:$0xf]  ;;  %v5074_v53 = vld [vmem:[%s8101_s2 + $0x90] sm:$0xf0]  ;;  %v5080_v18 = vld [vmem:[%s8101_s2 + $0x88] sm:$0xf]  ;;  %v5049_v27 = vor.u32 %v5472_v12, %v5048_v26 }
 0x3ac   : > { %v2931_v0 = vsel %vm2928_vm0, %v2930_v24, %v2926_v1  ;;  %v5121_v54 = vor.u32 %v5491_v17, %v5120_v44  ;;  %v5088_v39 = vld [vmem:[%s8101_s2 + $0xa0] sm:$0xf]  ;;  %v5077_v61 = vor.u32 %v5477_v57, %v5074_v53  ;;  %v5081_v1 = vor.u32 %v5480_v48, %v5080_v18  ;;  %v5478_v24 = vld [vmem:[%s8101_s2 + $0x8c] sm:$0xf]  ;;  %v5475_v17 = vld [vmem:[%s8101_s2 + $0x6c] sm:$0xf0] }
 0x3ad   : > { %v5089_v43 = vor.u32 %v5483_v42, %v5088_v39  ;;  %v5056_v44 = vld [vmem:[%s8101_s2 + $0x60] sm:$0xf]  ;;  %v5470_v39 = vld [vmem:[%s8101_s2 + $0x4c] sm:$0xf]  ;;  %v1623_v42 = vadd.f32 %v7082_v23, %v6459_v5  ;;  %v5025_v23 = vor.u32 %v5467_v46, %v5024_v45  ;;  %v5026_v41 = vld [vmem:[%s8101_s2 + $0x30] sm:$0xf0] }
 0x3ae   : > { %3470 = vmatpush.bf16.msra.mxu0 %v5121_v54  ;;  %3511 = vmatpush.bf16.msra.mxu3 %v5101_v58  ;;  %v5032_v58 = vld [vmem:[%s8101_s2 + $0x28] sm:$0xf]  ;;  %v5468_v53 = vld [vmem:[%s8101_s2 + $0x34] sm:$0xf0]  ;;  %v5466_v18 = vld [vmem:[%s8101_s2 + $0x2c] sm:$0xf] }
 0x3af   : > { %3499 = vmatpush.bf16.msra.mxu2 %v5081_v1  ;;  %v5034_v48 = vld [vmem:[%s8101_s2 + $0x38] sm:$0xf0] }
 0x3b0   : > { %v5037_v1 = vor.u32 %v5466_v18, %v5034_v48 }
 0x3b1   : > { %v5598_v63 = vpop.eup %5597 }
 0x3b2   : > { %v2938_v2 = vmul.f32 %v5598_v63, %v2931_v0  ;;  %3471 = vmatpush.bf16.msra.mxu0 %v5105_v20  ;;  %v5082_v63 = vld [vmem:[%s8101_s2 + $0x98] sm:$0xf0] }
 0x3b3   : > { %v5085_v0 = vor.u32 %v5478_v24, %v5082_v63  ;;  %3500 = vmatpush.bf16.msra.mxu2 %v5065_v33  ;;  %v5008_v24 = vld [vmem:[%s8101_s2] sm:$0xf]  ;;  %v5463_v63 = vld [vmem:[%s8101_s2 + $0xc] sm:$0xf0] }
 0x3b4   : > { %v7844_v4 = vsel %vm2943_vm12, %v2938_v2, %v7623_v55  ;;  %v5489_v55 = vld [vmem:[%s8101_s2 + $0xe4] sm:$0xf]  ;;  %v1597_v2 = vadd.f32 %v7078_v19, %v6397_v31  ;;  %v5057_v19 = vor.u32 %v5475_v17, %v5056_v44  ;;  %v5016_v44 = vld [vmem:[%s8101_s2 + $0x8] sm:$0xf] }
 0x3b5   : > { %v2952_v9 = vpack.c.bf16 %v7844_v4, %v7844_v4  ;;  %v5125_v25 = vor.u32 %v5489_v55, %v5122_v59  ;;  %v5473_v55 = vld [vmem:[%s8101_s2 + $0x64] sm:$0xf]  ;;  %3512 = vmatpush.bf16.msra.mxu3 %v5085_v0 }
 0x3b6   : > { %3472 = vmatpush.bf16.msra.mxu0 %v5089_v43  ;;  %v5050_v43 = vld [vmem:[%s8101_s2 + $0x58] sm:$0xf0]  ;;  %v5461_v0 = vld [vmem:[%s8101_s2 + $0x4] sm:$0xf] }
 0x3b7   : > { %3153 = vmatmul.bf16.vlgmr.msrb.gmra.mxu0 %v2952_v9  ;;  %3166 = vmatmul.bf16.vlgmr.msrb.gmra.mxu1 %v2952_v9  ;;  %v5053_v51 = vor.u32 %v5470_v39, %v5050_v43 }
 0x3b8   : > { %3179 = vmatmul.bf16.vlgmr.msrb.gmra.mxu2 %v2952_v9  ;;  %3192 = vmatmul.bf16.vlgmr.msrb.gmra.mxu3 %v2952_v9  ;;  %v1610_v9 = vadd.f32 %v7080_v22, %v6400_v32  ;;  %v5058_v22 = vld [vmem:[%s8101_s2 + $0x70] sm:$0xf0] }
 0x3b9   : > { %3483 = vmatpush.bf16.msra.mxu1 %v5125_v25  ;;  %v5061_v30 = vor.u32 %v5473_v55, %v5058_v22  ;;  %3513 = vmatpush.bf16.msra.mxu3 %v5069_v37  ;;  %v5009_v55 = vor.u32 %v5463_v63, %v5008_v24  ;;  %v5018_v22 = vld [vmem:[%s8101_s2 + $0x18] sm:$0xf0]  ;;  %v1636_v37 = vadd.f32 %v7084_v28, %v6536_v16 }
 0x3ba   : > { %3473 = vmatpush.bf16.msra.mxu0 %v5073_v13  ;;  %3501 = vmatpush.bf16.msra.mxu2 %v5049_v27  ;;  %v5029_v13 = vor.u32 %v5465_v52, %v5026_v41  ;;  %v3267_v52 = vstv %s3266_s18 }
 0x3bb   : > { %vm3268_vm9 = vcmp.eq.s32.totalorder %v3267_v52, 1 }
 0x3bd   : > { %3484 = vmatpush.bf16.msra.mxu1 %v5109_v38  ;;  %v5042_v38 = vld [vmem:[%s8101_s2 + $0x50] sm:$0xf0]  ;;  %3514 = vmatpush.bf16.msra.mxu3 %v5053_v51 }
 0x3be   : > { %3474 = vmatpush.bf16.msra.mxu0 %v5057_v19  ;;  %v5045_v10 = vor.u32 %v5469_v35, %v5042_v38  ;;  %v5462_v19 = vld [vmem:[%s8101_s2 + $0xc] sm:$0xf] }
 0x3c1   : > { %3485 = vmatpush.bf16.msra.mxu1 %v5093_v50  ;;  %3515 = vmatpush.bf16.msra.mxu3 %v5037_v1 }
 0x3c2   : > { %3475 = vmatpush.bf16.msra.mxu0 %v5041_v21 }
 0x3c5   : > { %3486 = vmatpush.bf16.msra.mxu1 %v5077_v61  ;;  %v5033_v61 = vor.u32 %v5468_v53, %v5032_v58 }
 0x3c6   : > { %3476 = vmatpush.bf16.msra.mxu0 %v5025_v23 }
 0x3c7   : > { %3502 = vmatpush.bf16.msra.mxu2 %v5033_v61 }
 0x3c9   : > { %3487 = vmatpush.bf16.msra.mxu1 %v5061_v30  ;;  %v5021_v30 = vor.u32 %v5462_v19, %v5018_v22  ;;  %v2187_v19 = vadd.f32 %v7403_v6, %v6400_v32 }
 0x3ca   : > { %3477 = vmatpush.bf16.msra.mxu0 %v5009_v55 }
 0x3cb   : > { %3516 = vmatpush.bf16.msra.mxu3 %v5021_v30 }
 0x3cd   : > { %3488 = vmatpush.bf16.msra.mxu1 %v5045_v10 }
 0x3d1   : > { %3489 = vmatpush.bf16.msra.mxu1 %v5029_v13 }
 0x434   : > { %v3154_v54 = vpop.f32.mrf.mxu0  ;;  %v3167_v59 = vpop.f32.mrf.mxu1 }
 0x435   : > { %v3197_v25 = vadd.f32 %v3154_v54, %v1597_v2  ;;  %v3198_v29 = vadd.f32 %v3167_v59, %v1610_v9  ;;  %v5010_v9 = vld [vmem:[%s8101_s2 + $0x10] sm:$0xf0]  ;;  %v5464_v59 = vld [vmem:[%s8101_s2 + $0x14] sm:$0xf0] }
 0x436   : > { %v5013_v54 = vor.u32 %v5461_v0, %v5010_v9 }
 0x437   : > { %v5003_v40 = vmul.f32 -1.442695, %v3197_v25  ;;  %v5004_v20 = vmul.f32 -1.442695, %v3198_v29  ;;  %v5017_v25 = vor.u32 %v5464_v59, %v5016_v44  ;;  %v2174_v59 = vadd.f32 %v7401_v62, %v6397_v31 }
 0x438   : > { %3490 = vmatpush.bf16.msra.mxu1 %v5013_v54 }
 0x439   : > { %5599 = vpow2.f32 %v5003_v40  ;;  %3503 = vmatpush.bf16.msra.mxu2 %v5017_v25 }
 0x43a   : > { %5601 = vpow2.f32 %v5004_v20 }
 0x43b   : > { %v3180_v49 = vpop.f32.mrf.mxu2  ;;  %v3193_v50 = vpop.f32.mrf.mxu3 }
 0x43c   : > { %v3199_v47 = vadd.f32 %v3180_v49, %v1623_v42  ;;  %v3156_v56 = vpop.f32.mrf.mxu0  ;;  %v3169_v57 = vpop.f32.mrf.mxu1  ;;  %v3200_v15 = vadd.f32 %v3193_v50, %v1636_v37 }
 0x43e   : > { %v5005_v2 = vmul.f32 -1.442695, %v3199_v47 }
 0x43f   : > { %v5600_v17 = vpop.eup %5599 }
 0x440   : > { %v5602_v11 = vpop.eup %5601  ;;  %v3210_v8 = vadd.f32 1.0, %v5600_v17  ;;  %5603 = vpow2.f32 %v5005_v2 }
 0x441   : > { %v3211_v29 = vadd.f32 1.0, %v5602_v11 }
 0x442   : > { %5605 = vrcp.f32 %v3210_v8  ;;  %v3224_v26 = vand.u32 2147483648, %v3210_v8  ;;  %v3222_v28 = vand.u32 2147483647, %v3210_v8  ;;  %vm3218_vm3 = vweird.f32 %v3210_v8 }
 0x443   : > { %5607 = vrcp.f32 %v3211_v29  ;;  %v3182_v33 = vpop.f32.mrf.mxu2  ;;  %v3195_v34 = vpop.f32.mrf.mxu3  ;;  %v3239_v12 = vand.u32 2147483648, %v3211_v29  ;;  %v3237_v27 = vand.u32 2147483647, %v3211_v29  ;;  %vm3233_vm4 = vweird.f32 %v3211_v29 }
 0x444   : > { %v3225_v49 = vor.u32 1.1754944e-38, %v3224_v26  ;;  %vm3223_vm7 = vcmp.eq.f32.partialorder %v3222_v28, 8.507059e+37 }
 0x445   : > { %v3240_v51 = vor.u32 1.1754944e-38, %v3239_v12  ;;  %vm3238_vm8 = vcmp.eq.f32.partialorder %v3237_v27, 8.507059e+37 }
 0x446   : > { %v5604_v36 = vpop.eup %5603 }
 0x447   : > { %v3212_v40 = vadd.f32 1.0, %v5604_v36 }
 0x448   : > { %v5606_v20 = vpop.eup %5605 }
 0x449   : > { %v5608_v7 = vpop.eup %5607  ;;  %v3214_v35 = vmul.f32 %v5606_v20, %v3210_v8  ;;  %5609 = vrcp.f32 %v3212_v40  ;;  %vm3219_vm1 = vweird.f32 %v5606_v20  ;;  %v3254_v1 = vand.u32 2147483648, %v3212_v40 }
 0x44a   : > { %v3229_v38 = vmul.f32 %v5608_v7, %v3211_v29  ;;  %5611 = vtanh.f32 %v3200_v15  ;;  %vm3234_vm2 = vweird.f32 %v5608_v7  ;;  %vm3220_vm5 = vmor %vm3218_vm3, %vm3219_vm1  ;;  %vm3248_vm11 = vweird.f32 %v3212_v40 }
 0x44b   : > { %v3215_v21 = vsub.f32 1.0, %v3214_v35  ;;  %vm3235_vm6 = vmor %vm3233_vm4, %vm3234_vm2  ;;  %v3252_v63 = vand.u32 2147483647, %v3212_v40  ;;  %v3255_v2 = vor.u32 1.1754944e-38, %v3254_v1 }
 0x44c   : > { %v3230_v10 = vsub.f32 1.0, %v3229_v38 }
 0x44d   : > { %v3216_v39 = vmul.f32 %v5606_v20, %v3215_v21  ;;  %vm3253_vm13 = vcmp.eq.f32.partialorder %v3252_v63, 8.507059e+37 }
 0x44e   : > { %v3231_v42 = vmul.f32 %v5608_v7, %v3230_v10 }
 0x44f   : > { %v5610_v43 = vpop.eup %5609  ;;  %v3217_v45 = vadd.f32 %v5606_v20, %v3216_v39 }
 0x450   : > { %v3244_v46 = vmul.f32 %v5610_v43, %v3212_v40  ;;  %v3232_v50 = vadd.f32 %v5608_v7, %v3231_v42  ;;  %v5612_v41 = vpop.eup %5611  ;;  %vm3249_vm10 = vweird.f32 %v5610_v43 }
 0x451   : > { %v3221_v23 = vsel %vm3220_vm5, %v5606_v20, %v3217_v45  ;;  %vm3250_vm12 = vmor %vm3248_vm11, %vm3249_vm10 }
 0x452   : > { %v3245_v58 = vsub.f32 1.0, %v3244_v46  ;;  %v3226_v47 = vsel %vm3223_vm7, %v3225_v49, %v3221_v23  ;;  %v3236_v56 = vsel %vm3235_vm6, %v5608_v7, %v3232_v50 }
 0x453   : > { %v3241_v57 = vsel %vm3238_vm8, %v3240_v51, %v3236_v56  ;;  %v3260_v13 = vmul.f32 %v5612_v41, %v3226_v47 }
 0x454   : > { %v3246_v53 = vmul.f32 %v5610_v43, %v3245_v58  ;;  %v3259_v18 = vmul.f32 %v3241_v57, %v7840_v60  ;;  %v3592_v58 = vstv %s3591_s23 }
 0x455   : > { %vm3593_vm6 = vcmp.eq.s32.totalorder %v3592_v58, 1 }
 0x456   : > { %v3261_v48 = vadd.f32 %v3260_v13, %v3259_v18  ;;  %v3247_v61 = vadd.f32 %v5610_v43, %v3246_v53 }
 0x458   : > { %5613 = vtanh.f32 %v3261_v48  ;;  %v8058_v24 = vsel %vm3268_vm9, %v3261_v48, %v7840_v60  ;;  %v3251_v0 = vsel %vm3250_vm12, %v5610_v43, %v3247_v61 }
 0x459   : > { %v3256_v44 = vsel %vm3253_vm13, %v3255_v2, %v3251_v0 }
 0x45e   : > { %v5614_v9 = vpop.eup %5613 }
 0x45f   : > { %v3263_v17 = vmul.f32 %v5614_v9, %v3256_v44 }
 0x461   : > { %v8062_v55 = vsel %vm3268_vm9, %v3263_v17, %v7844_v4 }
 0x462   : > { %v3277_v54 = vpack.c.bf16 %v8062_v55, %v8062_v55  ;;  %v5506_v60 = vpack.c.bf16 %v8062_v55, %v7844_v4  ;;  %v2200_v4 = vadd.f32 %v7405_v3, %v6459_v5  ;;  %v2213_v5 = vadd.f32 %v7407_v14, %v6536_v16 }
 0x464   : > { %3478 = vmatmul.bf16.vlgmr.msra.gmra.mxu0 %v3277_v54  ;;  %5509 = vst [vmem:[%s5697_s7 + $0x10] sm:$0xff] %v5506_v60   ;;  %3491 = vmatmul.bf16.vlgmr.msra.gmra.mxu1 %v3277_v54 }
 0x465   : > { %3504 = vmatmul.bf16.vlgmr.msra.gmra.mxu2 %v3277_v54  ;;  %3517 = vmatmul.bf16.vlgmr.msra.gmra.mxu3 %v3277_v54 }
 0x4e1   : > { %v3479_v22 = vpop.f32.mrf.mxu0  ;;  %v3492_v11 = vpop.f32.mrf.mxu1 }
 0x4e2   : > { %v3522_v8 = vadd.f32 %v3479_v22, %v2174_v59  ;;  %v3523_v25 = vadd.f32 %v3492_v11, %v2187_v19 }
 0x4e4   : > { %v5134_v29 = vmul.f32 -1.442695, %v3522_v8  ;;  %v5135_v30 = vmul.f32 -1.442695, %v3523_v25 }
 0x4e6   : > { %5615 = vpow2.f32 %v5134_v29 }
 0x4e7   : > { %5617 = vpow2.f32 %v5135_v30 }
 0x4e8   : > { %v3505_v33 = vpop.f32.mrf.mxu2  ;;  %v3518_v34 = vpop.f32.mrf.mxu3 }
 0x4e9   : > { %v3524_v36 = vadd.f32 %v3505_v33, %v2200_v4  ;;  %v3481_v37 = vpop.f32.mrf.mxu0  ;;  %v3494_v31 = vpop.f32.mrf.mxu1  ;;  %v3525_v21 = vadd.f32 %v3518_v34, %v2213_v5 }
 0x4eb   : > { %v5136_v62 = vmul.f32 -1.442695, %v3524_v36 }
 0x4ec   : > { %v5616_v40 = vpop.eup %5615 }
 0x4ed   : > { %v5618_v32 = vpop.eup %5617  ;;  %v3535_v6 = vadd.f32 1.0, %v5616_v40  ;;  %5619 = vpow2.f32 %v5136_v62 }
 0x4ee   : > { %v3536_v20 = vadd.f32 1.0, %v5618_v32 }
 0x4ef   : > { %5621 = vrcp.f32 %v3535_v6  ;;  %v3549_v42 = vand.u32 2147483648, %v3535_v6  ;;  %v3547_v16 = vand.u32 2147483647, %v3535_v6  ;;  %vm3543_vm0 = vweird.f32 %v3535_v6 }
 0x4f0   : > { %5623 = vrcp.f32 %v3536_v20  ;;  %v3507_v15 = vpop.f32.mrf.mxu2  ;;  %v3520_v7 = vpop.f32.mrf.mxu3  ;;  %v3564_v27 = vand.u32 2147483648, %v3536_v20  ;;  %v3562_v45 = vand.u32 2147483647, %v3536_v20  ;;  %vm3558_vm1 = vweird.f32 %v3536_v20 }
 0x4f1   : > { %v3550_v51 = vor.u32 1.1754944e-38, %v3549_v42  ;;  %vm3548_vm4 = vcmp.eq.f32.partialorder %v3547_v16, 8.507059e+37 }
 0x4f2   : > { %v3565_v52 = vor.u32 1.1754944e-38, %v3564_v27  ;;  %vm3563_vm5 = vcmp.eq.f32.partialorder %v3562_v45, 8.507059e+37 }
 0x4f3   : > { %v5620_v35 = vpop.eup %5619 }
 0x4f4   : > { %v3537_v3 = vadd.f32 1.0, %v5620_v35 }
 0x4f5   : > { %v5622_v38 = vpop.eup %5621 }
 0x4f6   : > { %v5624_v10 = vpop.eup %5623  ;;  %v3539_v26 = vmul.f32 %v5622_v38, %v3535_v6  ;;  %5625 = vrcp.f32 %v3537_v3  ;;  %vm3544_vm14 = vweird.f32 %v5622_v38  ;;  %v3579_v0 = vand.u32 2147483648, %v3537_v3 }
 0x4f7   : > { %v3554_v12 = vmul.f32 %v5624_v10, %v3536_v20  ;;  %5627 = vtanh.f32 %v3525_v21  ;;  %vm3559_vm15 = vweird.f32 %v5624_v10  ;;  %vm3545_vm2 = vmor %vm3543_vm0, %vm3544_vm14  ;;  %vm3573_vm8 = vweird.f32 %v3537_v3 }
 0x4f8   : > { %v3540_v39 = vsub.f32 1.0, %v3539_v26  ;;  %vm3560_vm3 = vmor %vm3558_vm1, %vm3559_vm15  ;;  %v3577_v9 = vand.u32 2147483647, %v3537_v3  ;;  %v3580_v17 = vor.u32 1.1754944e-38, %v3579_v0 }
 0x4f9   : > { %v3555_v28 = vsub.f32 1.0, %v3554_v12 }
 0x4fa   : > { %v3541_v43 = vmul.f32 %v5622_v38, %v3540_v39  ;;  %vm3578_vm10 = vcmp.eq.f32.partialorder %v3577_v9, 8.507059e+37 }
 0x4fb   : > { %v3556_v14 = vmul.f32 %v5624_v10, %v3555_v28 }
 0x4fc   : > { %v5626_v46 = vpop.eup %5625  ;;  %v3542_v49 = vadd.f32 %v5622_v38, %v3541_v43 }
 0x4fd   : > { %v3569_v50 = vmul.f32 %v5626_v46, %v3537_v3  ;;  %v3557_v23 = vadd.f32 %v5624_v10, %v3556_v14  ;;  %v5628_v47 = vpop.eup %5627  ;;  %vm3574_vm7 = vweird.f32 %v5626_v46 }
 0x4fe   : > { %v3546_v41 = vsel %vm3545_vm2, %v5622_v38, %v3542_v49  ;;  %vm3575_vm9 = vmor %vm3573_vm8, %vm3574_vm7 }
 0x4ff   : > { %v3570_v56 = vsub.f32 1.0, %v3569_v50  ;;  %v3551_v57 = vsel %vm3548_vm4, %v3550_v51, %v3546_v41  ;;  %v3561_v13 = vsel %vm3560_vm3, %v5624_v10, %v3557_v23 }
 0x500   : > { %v3566_v53 = vsel %vm3563_vm5, %v3565_v52, %v3561_v13  ;;  %v3585_v18 = vmul.f32 %v5628_v47, %v3551_v57 }
 0x501   : > { %v3571_v48 = vmul.f32 %v5626_v46, %v3570_v56  ;;  %v3584_v61 = vmul.f32 %v3566_v53, %v8058_v24 }
 0x503   : > { %v3586_v1 = vadd.f32 %v3585_v18, %v3584_v61  ;;  %v3572_v63 = vadd.f32 %v5626_v46, %v3571_v48 }
 0x505   : > { %5629 = vtanh.f32 %v3586_v1  ;;  %v3595_v2 = vsel %vm3593_vm6, %v3586_v1, %v8058_v24  ;;  %v3576_v44 = vsel %vm3575_vm9, %v5626_v46, %v3572_v63 }
 0x506   : > { %3599 = vst [vmem:[%s8105_s6] sm:$0xff] %v3595_v2  ;;  %v3581_v60 = vsel %vm3578_vm10, %v3580_v17, %v3576_v44 }
 0x50b   : > { %v5630_v54 = vpop.eup %5629 }
 0x50c   : > { %v3588_v59 = vmul.f32 %v5630_v54, %v3581_v60 }
 0x50e   : > { %v3594_v19 = vsel %vm3593_vm6, %v3588_v59, %v8062_v55 }
 0x50f   : > { %3598 = vst [vmem:[%s8104_s5] sm:$0xff] %v3594_v19  ;;  %v3613_v24 = vpack.c.bf16 %v3594_v19, %v3594_v19 }
 0x511   : > { %3620 = vst [vmem:[%s5697_s7 + $0x18] sm:$0xf] %v3613_v24 }
 0x512 PF: > { %s17_s21 = sadd.s32 1, %s5637_s21  }
 0x513   : > { %p14_p11 = scmp.ge.s32.totalorder %s17_s21, 5  }
 0x515   :  { %16 = sbr.rel (!%p14_p11) target bundleno = 1 (0x1), region = 101 }

</bundles_post_ra>
